<compile_context>
chip_gen: v7x
topology: tpu7x:2x2x1
jax: 0.10.0
libtpu: 0.0.40
codegen_flags: <defaults>
</compile_context>

<pallas_src>
import functools

import jax
import jax.numpy as jnp
import numpy as np
from jax import lax
from jax.experimental import pallas as pl
from jax.experimental.pallas import tpu as pltpu


def _round_up(x, m):
    return (x + m - 1) // m * m


def _chip_generation():
    try:
        kind = jax.devices()[0].device_kind.lower()
    except Exception:
        return 6
    for g in (7, 6, 5, 4):
        if f"v{g}" in kind:
            return g
    return 6


def _tn_native():
    # v6e/v7x MXU is 2x256^2; v5e is 4x128^2, so tn=256 only doubles the live
    # accumulator / weight block there with no throughput gain.
    return 256 if _chip_generation() >= 6 else 128


def _vmem_limit(need_bytes):
    # v7x has 64 MiB VMEM per core -> cap the request at 48 MiB; v5e/v6e: 128 MiB.
    cap = (48 << 20) if _chip_generation() >= 7 else (96 << 20)
    return int(min(cap, max(24 << 20, need_bytes)))


# ----------------------------------------------------------------------------
# Kernel 1: enc1 = Conv2d(3->512, 3, s=2, p=1) + ReLU + MaxPool2d(2, 2)
# ----------------------------------------------------------------------------
def _conv_pool_kernel(p_ref, w_ref, b_ref, o_ref):
    # p_ref: (4, tm, K) patches — one slice per 2x2 pool member.  conv + max +
    # bias + relu fused (bias is per-channel constant, max/relu are monotone).
    s = jnp.dot(p_ref[0], w_ref[...], preferred_element_type=jnp.float32)
    for m in range(1, 4):
        s = jnp.maximum(
            s, jnp.dot(p_ref[m], w_ref[...], preferred_element_type=jnp.float32))
    o_ref[...] = jnp.maximum(s + b_ref[...], 0.0).astype(o_ref.dtype)


def conv_s2_relu_pool(x, w, b, out_dtype=jnp.bfloat16):
    """NHWC.  Cin = 3, so a tiny im2col in XLA is cheap; matmul, bias, ReLU and
    the 2x2 max-pool all run inside one Pallas kernel."""
    N, H, W, Cin = x.shape
    Cout = w.shape[0]
    kh = kw = 3
    Hout = (H + 2 - kh) // 2 + 1
    Wout = (W + 2 - kw) // 2 + 1
    assert Hout % 2 == 0 and Wout % 2 == 0
    Ho2, Wo2 = Hout // 2, Wout // 2
    xp = jnp.pad(x, ((0, 0), (1, 1), (1, 1), (0, 0)))

    # Build the patch tensor directly in (pool_member, M, K) order.
    members = []
    for a in range(2):
        for c2 in range(2):
            taps = []
            for i in range(kh):
                for j in range(kw):
                    taps.append(
                        xp[:, 2 * a + i: 2 * a + i + 4 * (Ho2 - 1) + 1: 4,
                              2 * c2 + j: 2 * c2 + j + 4 * (Wo2 - 1) + 1: 4, :])
            t = jnp.concatenate(taps, axis=-1)            # (N, Ho2, Wo2, 27)
            members.append(t.reshape(N * Ho2 * Wo2, kh * kw * Cin))
    p = jnp.stack(members, axis=0)                        # (4, M4, 27)

    K = kh * kw * Cin
    Kp = _round_up(K, 32)
    M4 = N * Ho2 * Wo2
    p = jnp.pad(p, ((0, 0), (0, 0), (0, Kp - K))).astype(jnp.bfloat16)

    tn = _tn_native()
    assert Cout % tn == 0
    tm_cap = (128 << 10) // (tn * 4)          # keep f32 acc <= 128 KiB (vregs)
    tm = min(tm_cap, _round_up(M4, 8))
    M4p = _round_up(M4, tm)
    if M4p != M4:
        p = jnp.pad(p, ((0, 0), (0, M4p - M4), (0, 0)))

    w2 = jnp.transpose(w, (2, 3, 1, 0)).reshape(K, Cout)
    w2 = jnp.pad(w2, ((0, Kp - K), (0, 0))).astype(jnp.bfloat16)
    b2 = b.reshape(1, Cout).astype(jnp.float32)

    grid = (Cout // tn, M4p // tm)  # cb outermost -> weight tile fetched once/cb
    need = 2 * (4 * tm * Kp * 2 + Kp * tn * 2 + tn * 4
                + tm * tn * jnp.dtype(out_dtype).itemsize) + (2 << 20)

    out = pl.pallas_call(
        _conv_pool_kernel,
        out_shape=jax.ShapeDtypeStruct((M4p, Cout), out_dtype),
        grid_spec=pltpu.PrefetchScalarGridSpec(
            num_scalar_prefetch=0,
            grid=grid,
            in_specs=[
                pl.BlockSpec((4, tm, Kp), lambda cb, mb: (0, mb, 0)),
                pl.BlockSpec((Kp, tn), lambda cb, mb: (0, cb)),
                pl.BlockSpec((1, tn), lambda cb, mb: (0, cb)),
            ],
            out_specs=pl.BlockSpec((tm, tn), lambda cb, mb: (mb, cb)),
        ),
        compiler_params=pltpu.CompilerParams(
            dimension_semantics=("parallel", "parallel"),
            vmem_limit_bytes=_vmem_limit(need),
        ),
    )(p, w2, b2)
    return out[:M4].reshape(N, Ho2, Wo2, Cout)


# ----------------------------------------------------------------------------
# Kernel 2: enc2 + enc3 + dec1 + dec2 + (Upsample x2 + dec3 + Sigmoid), fused
# ----------------------------------------------------------------------------
def _fused_stack_kernel(x_ref, w_e2, b_e2, w_e3, b_e3, w_d1, b_d1, w_d2, b_d2,
                        w_d3, b_d3, o_ref, slab_a, slab_b, *, S, Ws, M):
    """One image per grid step.  Activations live in two (R, 512) bf16 VMEM
    slabs holding the zero-padded image row-flattened (row = hp*Ws + wp); each
    kh*kw conv is kh*kw shifted-row matmuls accumulated in f32."""
    f32 = jnp.float32
    # Hoisted: marks the Wout valid columns of every flattened output row.
    col = lax.broadcasted_iota(jnp.int32, (M, 1), 0) % Ws
    valid = col < S

    def clear(dst):
        dst[...] = jnp.zeros_like(dst)

    # enc1 output -> padded slab for enc2 (data rows placed at 2*Ws + ho*Ws).
    clear(slab_a)
    for ho in range(S):
        slab_a[pl.ds((ho + 2) * Ws, S), :] = x_ref[pl.ds(ho * S, S), :]

    def conv3x3_relu(src, src_base, cin, w_ref, b_ref, cout, dst, dst_off):
        acc = jnp.zeros((M, cout), f32)
        for i in range(3):
            for j in range(3):
                xs = src[pl.ds(src_base + i * Ws + j, M), :cin]
                acc = acc + jnp.dot(xs, w_ref[i * 3 + j],
                                    preferred_element_type=f32)
        acc = jnp.maximum(acc + b_ref[...], 0.0)
        # Junk columns (wo >= S) must store zeros: they become the next layer's
        # zero-padding cells in the flattened slab.
        val = jnp.where(valid, acc, 0.0).astype(dst.dtype)
        clear(dst)
        dst[pl.ds(dst_off, M), :cout] = val

    rd = Ws - 1  # tap-read base when data sits at offset 2*Ws with pad = 1
    conv3x3_relu(slab_a, rd, 512, w_e2, b_e2, 256, slab_b, 2 * Ws)  # enc2
    conv3x3_relu(slab_b, rd, 256, w_e3, b_e3, 128, slab_a, 2 * Ws)  # enc3
    conv3x3_relu(slab_a, rd, 128, w_d1, b_d1, 256, slab_b, 2 * Ws)  # dec1 (convT s1 p1)
    conv3x3_relu(slab_b, rd, 256, w_d2, b_d2, 512, slab_a, 0)       # dec2 -> dec3 slab
    # (dec3's folded conv pads only bottom/right, so its data sits at offset 0.)

    # dec3: Upsample(x2) + ConvTranspose(512->3, s2, p1, op1) + Sigmoid folded
    # into a 2x2 stride-1 conv over 16*3 sub-pixel channels (padded to 128).
    cpad = o_ref.shape[-1]
    acc = jnp.zeros((M, cpad), f32)
    for i in range(2):
        for j in range(2):
            xs = slab_a[pl.ds(i * Ws + j, M), :]
            acc = acc + jnp.dot(xs, w_d3[i * 2 + j], preferred_element_type=f32)
    acc = jax.nn.sigmoid(acc + b_d3[...])
    for ho in range(S):                      # compact away the junk columns
        o_ref[pl.ds(ho * S, S), :] = acc[ho * Ws:ho * Ws + S, :].astype(o_ref.dtype)


# Row/col tap selection for Upsample(x2) + ConvTranspose(s=2, p=1, op=1):
# SEL[r, delta, u] = 1 iff output phase r (p mod 4) picks kernel row u from
# input row m + delta, m = p // 4.
_SUBPIX_SEL = np.zeros((4, 2, 3), np.float32)
_SUBPIX_SEL[0, 0, 1] = 1.0
_SUBPIX_SEL[1, 0, 0] = 1.0
_SUBPIX_SEL[1, 0, 2] = 1.0
_SUBPIX_SEL[2, 0, 1] = 1.0
_SUBPIX_SEL[3, 0, 0] = 1.0
_SUBPIX_SEL[3, 1, 2] = 1.0


def dec3_subpixel_weights(w, b):
    """Fold Upsample(x2, nearest) + ConvTranspose2d(Cin->Co, 3, s=2, p=1, op=1)
    into one stride-1 conv with a 2x2 kernel and 16*Co sub-pixel channels."""
    Cin, Co = w.shape[0], w.shape[1]
    w_eq = jnp.flip(w, (2, 3)).transpose(1, 0, 2, 3)     # direct-conv weights
    A = jnp.asarray(_SUBPIX_SEL)
    w2 = jnp.einsum("adu,bev,ocuv->decabo", A, A, w_eq)  # (2,2,Cin,4,4,Co)
    w2 = w2.reshape(2, 2, Cin, 16 * Co)                  # chan = (rp*4+rq)*Co + o
    b2 = jnp.tile(b, 16)
    return w2, b2


def fused_stack(h, params):
    """h: (N, S, S, 512) bf16 front-end output.  Returns (N, S, S, 48) f32
    sub-pixel channels of the final sigmoid output (channel = (rp*4+rq)*3+o)."""
    N, S, S2, Cin = h.shape
    assert S == S2 and Cin == 512
    assert (S * S) % 8 == 0, "per-image block must be sublane aligned"
    Ws = _round_up(S + 2, 8)        # slab width (>= padded width, 8-aligned)
    M = S * Ws                      # flattened rows computed per conv layer
    R = _round_up(M + 3 * Ws + 2, 8)
    # TODO(synk): for large in_size (M > 64) the (M, 512) f32 accumulator and
    # the per-image slab stop fitting; that case needs M-tiling with halo rows.
    assert M <= 64

    x2 = h.reshape(N * S * S, Cin).astype(jnp.bfloat16)

    def conv_w(w):   # Conv2d (Cout, Cin, 3, 3) -> (9, Cin, Cout) tap-major
        return jnp.transpose(w, (2, 3, 1, 0)).reshape(9, w.shape[1], w.shape[0])

    def convT_w(w):  # ConvTranspose2d (Cin, Cout, 3, 3), s1 p1 -> direct conv
        wf = jnp.transpose(jnp.flip(w, (2, 3)), (2, 3, 0, 1))
        return wf.reshape(9, w.shape[0], w.shape[1])

    Co = params["dec3_w"].shape[1]
    w_d3, b_d3 = dec3_subpixel_weights(params["dec3_w"], params["dec3_b"])
    Csub, Cpad = 16 * Co, 128                            # lane-dense output
    w_d3 = jnp.pad(w_d3.reshape(4, Cin, Csub), ((0, 0), (0, 0), (0, Cpad - Csub)))
    b_d3 = jnp.pad(b_d3, (0, Cpad - Csub))

    def bf(a):
        return a.astype(jnp.bfloat16)

    def fb(a):
        return a.reshape(1, -1).astype(jnp.float32)

    wargs = [bf(conv_w(params["enc2_w"])), fb(params["enc2_b"]),
             bf(conv_w(params["enc3_w"])), fb(params["enc3_b"]),
             bf(convT_w(params["dec1_w"])), fb(params["dec1_b"]),
             bf(convT_w(params["dec2_w"])), fb(params["dec2_b"]),
             bf(w_d3), fb(b_d3)]

    def full_spec(a):
        if a.ndim == 3:
            return pl.BlockSpec(a.shape, lambda n: (0, 0, 0))
        return pl.BlockSpec(a.shape, lambda n: (0, 0))

    w_bytes = sum(int(np.prod(a.shape)) * a.dtype.itemsize for a in wargs)
    need = (2 * (S * S * Cin * 2 + w_bytes + S * S * Cpad * 4)
            + 2 * R * 512 * 2 + (4 << 20))

    kernel = functools.partial(_fused_stack_kernel, S=S, Ws=Ws, M=M)
    out = pl.pallas_call(
        kernel,
        out_shape=jax.ShapeDtypeStruct((N * S * S, Cpad), jnp.float32),
        grid_spec=pltpu.PrefetchScalarGridSpec(
            num_scalar_prefetch=0,
            grid=(N,),                 # N = 2 keeps both v7x TensorCores busy
            in_specs=[pl.BlockSpec((S * S, Cin), lambda n: (n, 0))]
                     + [full_spec(a) for a in wargs],
            out_specs=pl.BlockSpec((S * S, Cpad), lambda n: (n, 0)),
            scratch_shapes=[pltpu.VMEM((R, 512), jnp.bfloat16),
                            pltpu.VMEM((R, 512), jnp.bfloat16)],
        ),
        compiler_params=pltpu.CompilerParams(
            dimension_semantics=("parallel",),
            vmem_limit_bytes=_vmem_limit(need),
        ),
    )(x2, *wargs)
    return out.reshape(N, S, S, Cpad)[..., :Csub]


# ----------------------------------------------------------------------------
# ConvAE forward
# ----------------------------------------------------------------------------
@jax.jit
def convae_forward(x, params):
    xh = jnp.transpose(x, (0, 2, 3, 1))                 # NCHW -> NHWC (boundary)
    h = conv_s2_relu_pool(xh, params["enc1_w"], params["enc1_b"])   # (N,S,S,512)
    N, S = h.shape[0], h.shape[1]
    z = fused_stack(h, params)                          # (N, S, S, 48)
    Co = params["dec3_w"].shape[1]
    y = z.reshape(N, S, S, 4, 4, Co).transpose(0, 1, 3, 2, 4, 5)
    y = y.reshape(N, 4 * S, 4 * S, Co)                  # depth-to-space
    return jnp.transpose(y, (0, 3, 1, 2))               # NHWC -> NCHW (boundary)


def init_params(key):
    ks = jax.random.split(key, 12)
    f32 = jnp.float32

    def w_conv(k, cout, cin):       # Conv2d weight (Cout, Cin, 3, 3)
        return jax.random.normal(k, (cout, cin, 3, 3), f32) / np.sqrt(cin * 9)

    def w_convT(k, cin, cout):      # ConvTranspose2d weight (Cin, Cout, 3, 3)
        return jax.random.normal(k, (cin, cout, 3, 3), f32) / np.sqrt(cin * 9)

    def bias(k, c):
        return jax.random.normal(k, (c,), f32) * 0.01

    return {
        "enc1_w": w_conv(ks[0], 512, 3),    "enc1_b": bias(ks[1], 512),
        "enc2_w": w_conv(ks[2], 256, 512),  "enc2_b": bias(ks[3], 256),
        "enc3_w": w_conv(ks[4], 128, 256),  "enc3_b": bias(ks[5], 128),
        "dec1_w": w_convT(ks[6], 128, 256), "dec1_b": bias(ks[7], 256),
        "dec2_w": w_convT(ks[8], 256, 512), "dec2_b": bias(ks[9], 512),
        "dec3_w": w_convT(ks[10], 512, 3),  "dec3_b": bias(ks[11], 3),
    }


# ----------------------------------------------------------------------------
# Pure-JAX (lax.conv, f32) reference for the correctness cross-check
# ----------------------------------------------------------------------------
def ref_forward(x, p):
    dn = ("NCHW", "OIHW", "NCHW")

    def conv(x, w, b, stride, pad):
        y = lax.conv_general_dilated(
            x, w, (stride, stride), [(pad, pad), (pad, pad)], dimension_numbers=dn)
        return y + b[None, :, None, None]

    def convT(x, w, b, stride, pad, op):
        k = w.shape[2]
        w_eq = jnp.flip(w, axis=(2, 3)).transpose(1, 0, 2, 3)
        y = lax.conv_general_dilated(
            x, w_eq, (1, 1), [(k - 1 - pad, k - 1 - pad + op)] * 2,
            lhs_dilation=(stride, stride), dimension_numbers=dn)
        return y + b[None, :, None, None]

    h = jax.nn.relu(conv(x, p["enc1_w"], p["enc1_b"], 2, 1))
    h = lax.reduce_window(h, -jnp.inf, lax.max, (1, 1, 2, 2), (1, 1, 2, 2), "VALID")
    h = jax.nn.relu(conv(h, p["enc2_w"], p["enc2_b"], 1, 1))
    h = jax.nn.relu(conv(h, p["enc3_w"], p["enc3_b"], 1, 1))
    h = jax.nn.relu(convT(h, p["dec1_w"], p["dec1_b"], 1, 1, 0))
    h = jax.nn.relu(convT(h, p["dec2_w"], p["dec2_b"], 1, 1, 0))
    h = jnp.repeat(jnp.repeat(h, 2, axis=2), 2, axis=3)
    h = jax.nn.sigmoid(convT(h, p["dec3_w"], p["dec3_b"], 2, 1, 1))
    return h


if __name__ == "__main__":
    key = jax.random.PRNGKey(0)
    pkey, xkey = jax.random.split(key)
    params = init_params(pkey)
    # Small RGB image consistent with the module's 3-channel input.
    x = jax.random.uniform(xkey, (2, 3, 16, 16), jnp.float32)

    out = jax.block_until_ready(convae_forward(x, params))
    assert out.shape == (2, 3, 16, 16), out.shape
    assert bool(jnp.all(jnp.isfinite(out)))

    ref = jax.block_until_ready(ref_forward(x, params))
    max_err = float(jnp.max(jnp.abs(out - ref)))
    # bf16 MXU inputs (f32 accumulation) vs. the pure-f32 lax reference.
    assert max_err < 3e-2, f"mismatch vs lax reference: {max_err}"

    print("KERNEL_OK")
</pallas_src>

<mosaic_0001>
module attributes {stable_mosaic.version = 11 : i64} {
  func.func @_conv_pool_kernel(%arg0: i32, %arg1: i32, %arg2: memref<4x32x32xbf16, #tpu.memory_space<vmem>>, %arg3: memref<32x256xbf16, #tpu.memory_space<vmem>>, %arg4: memref<1x256xf32, #tpu.memory_space<vmem>>, %arg5: memref<32x256xbf16, #tpu.memory_space<vmem>>) attributes {dimension_semantics = [#tpu.dimension_semantics<parallel>, #tpu.dimension_semantics<parallel>], iteration_bounds = array<i64: 2, 1>, scalar_prefetch = 0 : i64, scratch_operands = 0 : i64, tpu.core_type = #tpu.core_type<tc>, window_params = [{transform_indices = @transform_0, window_bounds = array<i64: 4, 32, 32>}, {transform_indices = @transform_1, window_bounds = array<i64: 32, 256>}, {transform_indices = @transform_2, window_bounds = array<i64: 1, 256>}, {transform_indices = @transform_3, window_bounds = array<i64: 32, 256>}]} {
    %c0 = arith.constant 0 : index
    %c0_0 = arith.constant 0 : index
    %c0_1 = arith.constant 0 : index
    %0 = vector.load %arg2[%c0, %c0_0, %c0_1] : memref<4x32x32xbf16, #tpu.memory_space<vmem>>, vector<1x32x32xbf16>
    %1 = vector.shape_cast %0 : vector<1x32x32xbf16> to vector<32x32xbf16>
    %c0_2 = arith.constant 0 : index
    %c0_3 = arith.constant 0 : index
    %2 = vector.load %arg3[%c0_2, %c0_3] : memref<32x256xbf16, #tpu.memory_space<vmem>>, vector<32x256xbf16>
    %cst = arith.constant dense<0.000000e+00> : vector<32x256xf32>
    %3 = tpu.matmul %1, %2, %cst {dimension_numbers = #tpu.dot_dimension_numbers<[1], [0], [0], [1], [0, 0, 1, 1], [], []>} : vector<32x32xbf16>, vector<32x256xbf16>, vector<32x256xf32> -> vector<32x256xf32>
    %c1 = arith.constant 1 : index
    %c0_4 = arith.constant 0 : index
    %c0_5 = arith.constant 0 : index
    %4 = vector.load %arg2[%c1, %c0_4, %c0_5] : memref<4x32x32xbf16, #tpu.memory_space<vmem>>, vector<1x32x32xbf16>
    %5 = vector.shape_cast %4 : vector<1x32x32xbf16> to vector<32x32xbf16>
    %c0_6 = arith.constant 0 : index
    %c0_7 = arith.constant 0 : index
    %6 = vector.load %arg3[%c0_6, %c0_7] : memref<32x256xbf16, #tpu.memory_space<vmem>>, vector<32x256xbf16>
    %cst_8 = arith.constant dense<0.000000e+00> : vector<32x256xf32>
    %7 = tpu.matmul %5, %6, %cst_8 {dimension_numbers = #tpu.dot_dimension_numbers<[1], [0], [0], [1], [0, 0, 1, 1], [], []>} : vector<32x32xbf16>, vector<32x256xbf16>, vector<32x256xf32> -> vector<32x256xf32>
    %8 = arith.maximumf %3, %7 : vector<32x256xf32>
    %c2 = arith.constant 2 : index
    %c0_9 = arith.constant 0 : index
    %c0_10 = arith.constant 0 : index
    %9 = vector.load %arg2[%c2, %c0_9, %c0_10] : memref<4x32x32xbf16, #tpu.memory_space<vmem>>, vector<1x32x32xbf16>
    %10 = vector.shape_cast %9 : vector<1x32x32xbf16> to vector<32x32xbf16>
    %c0_11 = arith.constant 0 : index
    %c0_12 = arith.constant 0 : index
    %11 = vector.load %arg3[%c0_11, %c0_12] : memref<32x256xbf16, #tpu.memory_space<vmem>>, vector<32x256xbf16>
    %cst_13 = arith.constant dense<0.000000e+00> : vector<32x256xf32>
    %12 = tpu.matmul %10, %11, %cst_13 {dimension_numbers = #tpu.dot_dimension_numbers<[1], [0], [0], [1], [0, 0, 1, 1], [], []>} : vector<32x32xbf16>, vector<32x256xbf16>, vector<32x256xf32> -> vector<32x256xf32>
    %13 = arith.maximumf %8, %12 : vector<32x256xf32>
    %c3 = arith.constant 3 : index
    %c0_14 = arith.constant 0 : index
    %c0_15 = arith.constant 0 : index
    %14 = vector.load %arg2[%c3, %c0_14, %c0_15] : memref<4x32x32xbf16, #tpu.memory_space<vmem>>, vector<1x32x32xbf16>
    %15 = vector.shape_cast %14 : vector<1x32x32xbf16> to vector<32x32xbf16>
    %c0_16 = arith.constant 0 : index
    %c0_17 = arith.constant 0 : index
    %16 = vector.load %arg3[%c0_16, %c0_17] : memref<32x256xbf16, #tpu.memory_space<vmem>>, vector<32x256xbf16>
    %cst_18 = arith.constant dense<0.000000e+00> : vector<32x256xf32>
    %17 = tpu.matmul %15, %16, %cst_18 {dimension_numbers = #tpu.dot_dimension_numbers<[1], [0], [0], [1], [0, 0, 1, 1], [], []>} : vector<32x32xbf16>, vector<32x256xbf16>, vector<32x256xf32> -> vector<32x256xf32>
    %18 = arith.maximumf %13, %17 : vector<32x256xf32>
    %c0_19 = arith.constant 0 : index
    %c0_20 = arith.constant 0 : index
    %19 = vector.load %arg4[%c0_19, %c0_20] : memref<1x256xf32, #tpu.memory_space<vmem>>, vector<1x256xf32>
    %20 = vector.broadcast %19 : vector<1x256xf32> to vector<32x256xf32>
    %21 = arith.addf %18, %20 : vector<32x256xf32>
    %cst_21 = arith.constant 0.000000e+00 : f32
    %22 = vector.broadcast %cst_21 : f32 to vector<32x256xf32>
    %23 = arith.maximumf %21, %22 : vector<32x256xf32>
    %24 = arith.truncf %23 : vector<32x256xf32> to vector<32x256xbf16>
    %c0_22 = arith.constant 0 : index
    %c0_23 = arith.constant 0 : index
    %25 = vector.load %arg5[%c0_22, %c0_23] : memref<32x256xbf16, #tpu.memory_space<vmem>>, vector<32x256xbf16>
    tpu.vector_store %arg5[%c0_22, %c0_23], %24 {strides = array<i32>} : memref<32x256xbf16, #tpu.memory_space<vmem>>, vector<32x256xbf16>,
    return
  }
  func.func @transform_0(%arg0: i32, %arg1: i32) -> (i32, i32, i32) {
    %c0_i32 = arith.constant 0 : i32
    %c0_i32_0 = arith.constant 0 : i32
    %c0_i32_1 = arith.constant 0 : i32
    return %c0_i32, %arg1, %c0_i32_0 : i32, i32, i32
  }
  func.func @transform_1(%arg0: i32, %arg1: i32) -> (i32, i32) {
    %c0_i32 = arith.constant 0 : i32
    %c0_i32_0 = arith.constant 0 : i32
    return %c0_i32, %arg0 : i32, i32
  }
  func.func @transform_2(%arg0: i32, %arg1: i32) -> (i32, i32) {
    %c0_i32 = arith.constant 0 : i32
    %c0_i32_0 = arith.constant 0 : i32
    return %c0_i32, %arg0 : i32, i32
  }
  func.func @transform_3(%arg0: i32, %arg1: i32) -> (i32, i32) {
    %c0_i32 = arith.constant 0 : i32
    return %arg1, %arg0 : i32, i32
  }
}

module attributes {stable_mosaic.version = 11 : i64} {
  func.func @_fused_stack_kernel(%arg0: i32, %arg1: memref<16x512xbf16, #tpu.memory_space<vmem>>, %arg2: memref<9x512x256xbf16, #tpu.memory_space<vmem>>, %arg3: memref<1x256xf32, #tpu.memory_space<vmem>>, %arg4: memref<9x256x128xbf16, #tpu.memory_space<vmem>>, %arg5: memref<1x128xf32, #tpu.memory_space<vmem>>, %arg6: memref<9x128x256xbf16, #tpu.memory_space<vmem>>, %arg7: memref<1x256xf32, #tpu.memory_space<vmem>>, %arg8: memref<9x256x512xbf16, #tpu.memory_space<vmem>>, %arg9: memref<1x512xf32, #tpu.memory_space<vmem>>, %arg10: memref<4x512x128xbf16, #tpu.memory_space<vmem>>, %arg11: memref<1x128xf32, #tpu.memory_space<vmem>>, %arg12: memref<16x128xf32, #tpu.memory_space<vmem>>, %arg13: memref<64x512xbf16, #tpu.memory_space<vmem>>, %arg14: memref<64x512xbf16, #tpu.memory_space<vmem>>) attributes {dimension_semantics = [#tpu.dimension_semantics<parallel>], iteration_bounds = array<i64: 2>, scalar_prefetch = 0 : i64, scratch_operands = 2 : i64, tpu.core_type = #tpu.core_type<tc>, window_params = [{transform_indices = @transform_0, window_bounds = array<i64: 16, 512>}, {pipeline_mode = #tpu.pipeline_mode<synchronous>, transform_indices = @transform_1, window_bounds = array<i64: 9, 512, 256>}, {pipeline_mode = #tpu.pipeline_mode<synchronous>, transform_indices = @transform_2, window_bounds = array<i64: 1, 256>}, {pipeline_mode = #tpu.pipeline_mode<synchronous>, transform_indices = @transform_3, window_bounds = array<i64: 9, 256, 128>}, {pipeline_mode = #tpu.pipeline_mode<synchronous>, transform_indices = @transform_4, window_bounds = array<i64: 1, 128>}, {pipeline_mode = #tpu.pipeline_mode<synchronous>, transform_indices = @transform_5, window_bounds = array<i64: 9, 128, 256>}, {pipeline_mode = #tpu.pipeline_mode<synchronous>, transform_indices = @transform_6, window_bounds = array<i64: 1, 256>}, {pipeline_mode = #tpu.pipeline_mode<synchronous>, transform_indices = @transform_7, window_bounds = array<i64: 9, 256, 512>}, {pipeline_mode = #tpu.pipeline_mode<synchronous>, transform_indices = @transform_8, window_bounds = array<i64: 1, 512>}, {pipeline_mode = #tpu.pipeline_mode<synchronous>, transform_indices = @transform_9, window_bounds = array<i64: 4, 512, 128>}, {pipeline_mode = #tpu.pipeline_mode<synchronous>, transform_indices = @transform_10, window_bounds = array<i64: 1, 128>}, {transform_indices = @transform_11, window_bounds = array<i64: 16, 128>}]} {
    %0 = tpu.iota {dimensions = array<i32: 0>} : vector<32x1xi32>
    %c8_i32 = arith.constant 8 : i32
    %c0_i32 = arith.constant 0 : i32
    %1 = arith.cmpi eq, %c8_i32, %c0_i32 : i32
    %c1_i32 = arith.constant 1 : i32
    %2 = arith.select %1, %c1_i32, %c8_i32 : i32
    %3 = vector.broadcast %2 : i32 to vector<32x1xi32>
    %4 = arith.remsi %0, %3 : vector<32x1xi32>
    %c0_i32_0 = arith.constant 0 : i32
    %5 = vector.broadcast %c0_i32_0 : i32 to vector<32x1xi32>
    %6 = arith.cmpi ne, %4, %5 : vector<32x1xi32>
    %c0_i32_1 = arith.constant 0 : i32
    %7 = vector.broadcast %c0_i32_1 : i32 to vector<32x1xi32>
    %8 = arith.cmpi slt, %4, %7 : vector<32x1xi32>
    %c0_i32_2 = arith.constant 0 : i32
    %9 = arith.cmpi slt, %2, %c0_i32_2 : i32
    %10 = vector.broadcast %9 : i1 to vector<32x1xi1>
    %11 = vector.broadcast %10 : vector<32x1xi1> to vector<32x1xi1>
    %12 = arith.xori %8, %11 : vector<32x1xi1>
    %13 = arith.andi %12, %6 : vector<32x1xi1>
    %14 = vector.broadcast %2 : i32 to vector<32x1xi32>
    %15 = arith.addi %4, %14 : vector<32x1xi32>
    %16 = arith.select %13, %15, %4 : vector<32x1xi1>, vector<32x1xi32>
    %c4_i32 = arith.constant 4 : i32
    %17 = vector.broadcast %c4_i32 : i32 to vector<32x1xi32>
    %18 = arith.cmpi slt, %16, %17 : vector<32x1xi32>
    %cst = arith.constant 0.000000e+00 : bf16
    %19 = vector.broadcast %cst : bf16 to vector<64x512xbf16>
    %c0 = arith.constant 0 : index
    %c0_3 = arith.constant 0 : index
    %20 = vector.load %arg13[%c0, %c0_3] : memref<64x512xbf16, #tpu.memory_space<vmem>>, vector<64x512xbf16>
    tpu.vector_store %arg13[%c0, %c0_3], %19 {strides = array<i32>} : memref<64x512xbf16, #tpu.memory_space<vmem>>, vector<64x512xbf16>,
    %c0_4 = arith.constant 0 : index
    %c0_5 = arith.constant 0 : index
    %21 = vector.load %arg1[%c0_4, %c0_5] : memref<16x512xbf16, #tpu.memory_space<vmem>>, vector<4x512xbf16>
    %c16 = arith.constant 16 : index
    %c0_6 = arith.constant 0 : index
    %22 = vector.load %arg13[%c16, %c0_6] : memref<64x512xbf16, #tpu.memory_space<vmem>>, vector<4x512xbf16>
    tpu.vector_store %arg13[%c16, %c0_6], %21 {strides = array<i32>} : memref<64x512xbf16, #tpu.memory_space<vmem>>, vector<4x512xbf16>,
    %c4 = arith.constant 4 : index
    %c0_7 = arith.constant 0 : index
    %23 = vector.load %arg1[%c4, %c0_7] : memref<16x512xbf16, #tpu.memory_space<vmem>>, vector<4x512xbf16>
    %c24 = arith.constant 24 : index
    %c0_8 = arith.constant 0 : index
    %24 = vector.load %arg13[%c24, %c0_8] : memref<64x512xbf16, #tpu.memory_space<vmem>>, vector<4x512xbf16>
    tpu.vector_store %arg13[%c24, %c0_8], %23 {strides = array<i32>} : memref<64x512xbf16, #tpu.memory_space<vmem>>, vector<4x512xbf16>,
    %c8 = arith.constant 8 : index
    %c0_9 = arith.constant 0 : index
    %25 = vector.load %arg1[%c8, %c0_9] : memref<16x512xbf16, #tpu.memory_space<vmem>>, vector<4x512xbf16>
    %c32 = arith.constant 32 : index
    %c0_10 = arith.constant 0 : index
    %26 = vector.load %arg13[%c32, %c0_10] : memref<64x512xbf16, #tpu.memory_space<vmem>>, vector<4x512xbf16>
    tpu.vector_store %arg13[%c32, %c0_10], %25 {strides = array<i32>} : memref<64x512xbf16, #tpu.memory_space<vmem>>, vector<4x512xbf16>,
    %c12 = arith.constant 12 : index
    %c0_11 = arith.constant 0 : index
    %27 = vector.load %arg1[%c12, %c0_11] : memref<16x512xbf16, #tpu.memory_space<vmem>>, vector<4x512xbf16>
    %c40 = arith.constant 40 : index
    %c0_12 = arith.constant 0 : index
    %28 = vector.load %arg13[%c40, %c0_12] : memref<64x512xbf16, #tpu.memory_space<vmem>>, vector<4x512xbf16>
    tpu.vector_store %arg13[%c40, %c0_12], %27 {strides = array<i32>} : memref<64x512xbf16, #tpu.memory_space<vmem>>, vector<4x512xbf16>,
    %cst_13 = arith.constant 0.000000e+00 : f32
    %29 = vector.broadcast %cst_13 : f32 to vector<32x256xf32>
    %c7 = arith.constant 7 : index
    %c0_14 = arith.constant 0 : index
    %30 = vector.load %arg13[%c7, %c0_14] : memref<64x512xbf16, #tpu.memory_space<vmem>>, vector<32x512xbf16>
    %c0_15 = arith.constant 0 : index
    %c0_16 = arith.constant 0 : index
    %c0_17 = arith.constant 0 : index
    %31 = vector.load %arg2[%c0_15, %c0_16, %c0_17] : memref<9x512x256xbf16, #tpu.memory_space<vmem>>, vector<1x512x256xbf16>
    %32 = vector.shape_cast %31 : vector<1x512x256xbf16> to vector<512x256xbf16>
    %cst_18 = arith.constant dense<0.000000e+00> : vector<32x256xf32>
    %33 = tpu.matmul %30, %32, %cst_18 {dimension_numbers = #tpu.dot_dimension_numbers<[1], [0], [0], [1], [0, 0, 1, 1], [], []>} : vector<32x512xbf16>, vector<512x256xbf16>, vector<32x256xf32> -> vector<32x256xf32>
    %34 = arith.addf %29, %33 : vector<32x256xf32>
    %c8_19 = arith.constant 8 : index
    %c0_20 = arith.constant 0 : index
    %35 = vector.load %arg13[%c8_19, %c0_20] : memref<64x512xbf16, #tpu.memory_space<vmem>>, vector<32x512xbf16>
    %c1 = arith.constant 1 : index
    %c0_21 = arith.constant 0 : index
    %c0_22 = arith.constant 0 : index
    %36 = vector.load %arg2[%c1, %c0_21, %c0_22] : memref<9x512x256xbf16, #tpu.memory_space<vmem>>, vector<1x512x256xbf16>
    %37 = vector.shape_cast %36 : vector<1x512x256xbf16> to vector<512x256xbf16>
    %cst_23 = arith.constant dense<0.000000e+00> : vector<32x256xf32>
    %38 = tpu.matmul %35, %37, %cst_23 {dimension_numbers = #tpu.dot_dimension_numbers<[1], [0], [0], [1], [0, 0, 1, 1], [], []>} : vector<32x512xbf16>, vector<512x256xbf16>, vector<32x256xf32> -> vector<32x256xf32>
    %39 = arith.addf %34, %38 : vector<32x256xf32>
    %c9 = arith.constant 9 : index
    %c0_24 = arith.constant 0 : index
    %40 = vector.load %arg13[%c9, %c0_24] : memref<64x512xbf16, #tpu.memory_space<vmem>>, vector<32x512xbf16>
    %c2 = arith.constant 2 : index
    %c0_25 = arith.constant 0 : index
    %c0_26 = arith.constant 0 : index
    %41 = vector.load %arg2[%c2, %c0_25, %c0_26] : memref<9x512x256xbf16, #tpu.memory_space<vmem>>, vector<1x512x256xbf16>
    %42 = vector.shape_cast %41 : vector<1x512x256xbf16> to vector<512x256xbf16>
    %cst_27 = arith.constant dense<0.000000e+00> : vector<32x256xf32>
    %43 = tpu.matmul %40, %42, %cst_27 {dimension_numbers = #tpu.dot_dimension_numbers<[1], [0], [0], [1], [0, 0, 1, 1], [], []>} : vector<32x512xbf16>, vector<512x256xbf16>, vector<32x256xf32> -> vector<32x256xf32>
    %44 = arith.addf %39, %43 : vector<32x256xf32>
    %c15 = arith.constant 15 : index
    %c0_28 = arith.constant 0 : index
    %45 = vector.load %arg13[%c15, %c0_28] : memref<64x512xbf16, #tpu.memory_space<vmem>>, vector<32x512xbf16>
    %c3 = arith.constant 3 : index
    %c0_29 = arith.constant 0 : index
    %c0_30 = arith.constant 0 : index
    %46 = vector.load %arg2[%c3, %c0_29, %c0_30] : memref<9x512x256xbf16, #tpu.memory_space<vmem>>, vector<1x512x256xbf16>
    %47 = vector.shape_cast %46 : vector<1x512x256xbf16> to vector<512x256xbf16>
    %cst_31 = arith.constant dense<0.000000e+00> : vector<32x256xf32>
    %48 = tpu.matmul %45, %47, %cst_31 {dimension_numbers = #tpu.dot_dimension_numbers<[1], [0], [0], [1], [0, 0, 1, 1], [], []>} : vector<32x512xbf16>, vector<512x256xbf16>, vector<32x256xf32> -> vector<32x256xf32>
    %49 = arith.addf %44, %48 : vector<32x256xf32>
    %c16_32 = arith.constant 16 : index
    %c0_33 = arith.constant 0 : index
    %50 = vector.load %arg13[%c16_32, %c0_33] : memref<64x512xbf16, #tpu.memory_space<vmem>>, vector<32x512xbf16>
    %c4_34 = arith.constant 4 : index
    %c0_35 = arith.constant 0 : index
    %c0_36 = arith.constant 0 : index
    %51 = vector.load %arg2[%c4_34, %c0_35, %c0_36] : memref<9x512x256xbf16, #tpu.memory_space<vmem>>, vector<1x512x256xbf16>
    %52 = vector.shape_cast %51 : vector<1x512x256xbf16> to vector<512x256xbf16>
    %cst_37 = arith.constant dense<0.000000e+00> : vector<32x256xf32>
    %53 = tpu.matmul %50, %52, %cst_37 {dimension_numbers = #tpu.dot_dimension_numbers<[1], [0], [0], [1], [0, 0, 1, 1], [], []>} : vector<32x512xbf16>, vector<512x256xbf16>, vector<32x256xf32> -> vector<32x256xf32>
    %54 = arith.addf %49, %53 : vector<32x256xf32>
    %c17 = arith.constant 17 : index
    %c0_38 = arith.constant 0 : index
    %55 = vector.load %arg13[%c17, %c0_38] : memref<64x512xbf16, #tpu.memory_space<vmem>>, vector<32x512xbf16>
    %c5 = arith.constant 5 : index
    %c0_39 = arith.constant 0 : index
    %c0_40 = arith.constant 0 : index
    %56 = vector.load %arg2[%c5, %c0_39, %c0_40] : memref<9x512x256xbf16, #tpu.memory_space<vmem>>, vector<1x512x256xbf16>
    %57 = vector.shape_cast %56 : vector<1x512x256xbf16> to vector<512x256xbf16>
    %cst_41 = arith.constant dense<0.000000e+00> : vector<32x256xf32>
    %58 = tpu.matmul %55, %57, %cst_41 {dimension_numbers = #tpu.dot_dimension_numbers<[1], [0], [0], [1], [0, 0, 1, 1], [], []>} : vector<32x512xbf16>, vector<512x256xbf16>, vector<32x256xf32> -> vector<32x256xf32>
    %59 = arith.addf %54, %58 : vector<32x256xf32>
    %c23 = arith.constant 23 : index
    %c0_42 = arith.constant 0 : index
    %60 = vector.load %arg13[%c23, %c0_42] : memref<64x512xbf16, #tpu.memory_space<vmem>>, vector<32x512xbf16>
    %c6 = arith.constant 6 : index
    %c0_43 = arith.constant 0 : index
    %c0_44 = arith.constant 0 : index
    %61 = vector.load %arg2[%c6, %c0_43, %c0_44] : memref<9x512x256xbf16, #tpu.memory_space<vmem>>, vector<1x512x256xbf16>
    %62 = vector.shape_cast %61 : vector<1x512x256xbf16> to vector<512x256xbf16>
    %cst_45 = arith.constant dense<0.000000e+00> : vector<32x256xf32>
    %63 = tpu.matmul %60, %62, %cst_45 {dimension_numbers = #tpu.dot_dimension_numbers<[1], [0], [0], [1], [0, 0, 1, 1], [], []>} : vector<32x512xbf16>, vector<512x256xbf16>, vector<32x256xf32> -> vector<32x256xf32>
    %64 = arith.addf %59, %63 : vector<32x256xf32>
    %c24_46 = arith.constant 24 : index
    %c0_47 = arith.constant 0 : index
    %65 = vector.load %arg13[%c24_46, %c0_47] : memref<64x512xbf16, #tpu.memory_space<vmem>>, vector<32x512xbf16>
    %c7_48 = arith.constant 7 : index
    %c0_49 = arith.constant 0 : index
    %c0_50 = arith.constant 0 : index
    %66 = vector.load %arg2[%c7_48, %c0_49, %c0_50] : memref<9x512x256xbf16, #tpu.memory_space<vmem>>, vector<1x512x256xbf16>
    %67 = vector.shape_cast %66 : vector<1x512x256xbf16> to vector<512x256xbf16>
    %cst_51 = arith.constant dense<0.000000e+00> : vector<32x256xf32>
    %68 = tpu.matmul %65, %67, %cst_51 {dimension_numbers = #tpu.dot_dimension_numbers<[1], [0], [0], [1], [0, 0, 1, 1], [], []>} : vector<32x512xbf16>, vector<512x256xbf16>, vector<32x256xf32> -> vector<32x256xf32>
    %69 = arith.addf %64, %68 : vector<32x256xf32>
    %c25 = arith.constant 25 : index
    %c0_52 = arith.constant 0 : index
    %70 = vector.load %arg13[%c25, %c0_52] : memref<64x512xbf16, #tpu.memory_space<vmem>>, vector<32x512xbf16>
    %c8_53 = arith.constant 8 : index
    %c0_54 = arith.constant 0 : index
    %c0_55 = arith.constant 0 : index
    %71 = vector.load %arg2[%c8_53, %c0_54, %c0_55] : memref<9x512x256xbf16, #tpu.memory_space<vmem>>, vector<1x512x256xbf16>
    %72 = vector.shape_cast %71 : vector<1x512x256xbf16> to vector<512x256xbf16>
    %cst_56 = arith.constant dense<0.000000e+00> : vector<32x256xf32>
    %73 = tpu.matmul %70, %72, %cst_56 {dimension_numbers = #tpu.dot_dimension_numbers<[1], [0], [0], [1], [0, 0, 1, 1], [], []>} : vector<32x512xbf16>, vector<512x256xbf16>, vector<32x256xf32> -> vector<32x256xf32>
    %74 = arith.addf %69, %73 : vector<32x256xf32>
    %c0_57 = arith.constant 0 : index
    %c0_58 = arith.constant 0 : index
    %75 = vector.load %arg3[%c0_57, %c0_58] : memref<1x256xf32, #tpu.memory_space<vmem>>, vector<1x256xf32>
    %76 = vector.broadcast %75 : vector<1x256xf32> to vector<32x256xf32>
    %77 = arith.addf %74, %76 : vector<32x256xf32>
    %cst_59 = arith.constant 0.000000e+00 : f32
    %78 = vector.broadcast %cst_59 : f32 to vector<32x256xf32>
    %79 = arith.maximumf %77, %78 : vector<32x256xf32>
    %cst_60 = arith.constant 0.000000e+00 : f32
    %80 = vector.shape_cast %18 : vector<32x1xi1> to vector<32x1xi1>
    %81 = vector.broadcast %80 : vector<32x1xi1> to vector<32x256xi1>
    %82 = vector.broadcast %cst_60 : f32 to vector<32x256xf32>
    %83 = arith.select %81, %79, %82 : vector<32x256xi1>, vector<32x256xf32>
    %84 = arith.truncf %83 : vector<32x256xf32> to vector<32x256xbf16>
    %cst_61 = arith.constant 0.000000e+00 : bf16
    %85 = vector.broadcast %cst_61 : bf16 to vector<64x512xbf16>
    %c0_62 = arith.constant 0 : index
    %c0_63 = arith.constant 0 : index
    %86 = vector.load %arg14[%c0_62, %c0_63] : memref<64x512xbf16, #tpu.memory_space<vmem>>, vector<64x512xbf16>
    tpu.vector_store %arg14[%c0_62, %c0_63], %85 {strides = array<i32>} : memref<64x512xbf16, #tpu.memory_space<vmem>>, vector<64x512xbf16>,
    %c16_64 = arith.constant 16 : index
    %c0_65 = arith.constant 0 : index
    %87 = vector.load %arg14[%c16_64, %c0_65] : memref<64x512xbf16, #tpu.memory_space<vmem>>, vector<32x256xbf16>
    tpu.vector_store %arg14[%c16_64, %c0_65], %84 {strides = array<i32>} : memref<64x512xbf16, #tpu.memory_space<vmem>>, vector<32x256xbf16>,
    %cst_66 = arith.constant 0.000000e+00 : f32
    %88 = vector.broadcast %cst_66 : f32 to vector<32x128xf32>
    %c7_67 = arith.constant 7 : index
    %c0_68 = arith.constant 0 : index
    %89 = vector.load %arg14[%c7_67, %c0_68] : memref<64x512xbf16, #tpu.memory_space<vmem>>, vector<32x256xbf16>
    %c0_69 = arith.constant 0 : index
    %c0_70 = arith.constant 0 : index
    %c0_71 = arith.constant 0 : index
    %90 = vector.load %arg4[%c0_69, %c0_70, %c0_71] : memref<9x256x128xbf16, #tpu.memory_space<vmem>>, vector<1x256x128xbf16>
    %91 = vector.shape_cast %90 : vector<1x256x128xbf16> to vector<256x128xbf16>
    %cst_72 = arith.constant dense<0.000000e+00> : vector<32x128xf32>
    %92 = tpu.matmul %89, %91, %cst_72 {dimension_numbers = #tpu.dot_dimension_numbers<[1], [0], [0], [1], [0, 0, 1, 1], [], []>} : vector<32x256xbf16>, vector<256x128xbf16>, vector<32x128xf32> -> vector<32x128xf32>
    %93 = arith.addf %88, %92 : vector<32x128xf32>
    %c8_73 = arith.constant 8 : index
    %c0_74 = arith.constant 0 : index
    %94 = vector.load %arg14[%c8_73, %c0_74] : memref<64x512xbf16, #tpu.memory_space<vmem>>, vector<32x256xbf16>
    %c1_75 = arith.constant 1 : index
    %c0_76 = arith.constant 0 : index
    %c0_77 = arith.constant 0 : index
    %95 = vector.load %arg4[%c1_75, %c0_76, %c0_77] : memref<9x256x128xbf16, #tpu.memory_space<vmem>>, vector<1x256x128xbf16>
    %96 = vector.shape_cast %95 : vector<1x256x128xbf16> to vector<256x128xbf16>
    %cst_78 = arith.constant dense<0.000000e+00> : vector<32x128xf32>
    %97 = tpu.matmul %94, %96, %cst_78 {dimension_numbers = #tpu.dot_dimension_numbers<[1], [0], [0], [1], [0, 0, 1, 1], [], []>} : vector<32x256xbf16>, vector<256x128xbf16>, vector<32x128xf32> -> vector<32x128xf32>
    %98 = arith.addf %93, %97 : vector<32x128xf32>
    %c9_79 = arith.constant 9 : index
    %c0_80 = arith.constant 0 : index
    %99 = vector.load %arg14[%c9_79, %c0_80] : memref<64x512xbf16, #tpu.memory_space<vmem>>, vector<32x256xbf16>
    %c2_81 = arith.constant 2 : index
    %c0_82 = arith.constant 0 : index
    %c0_83 = arith.constant 0 : index
    %100 = vector.load %arg4[%c2_81, %c0_82, %c0_83] : memref<9x256x128xbf16, #tpu.memory_space<vmem>>, vector<1x256x128xbf16>
    %101 = vector.shape_cast %100 : vector<1x256x128xbf16> to vector<256x128xbf16>
    %cst_84 = arith.constant dense<0.000000e+00> : vector<32x128xf32>
    %102 = tpu.matmul %99, %101, %cst_84 {dimension_numbers = #tpu.dot_dimension_numbers<[1], [0], [0], [1], [0, 0, 1, 1], [], []>} : vector<32x256xbf16>, vector<256x128xbf16>, vector<32x128xf32> -> vector<32x128xf32>
    %103 = arith.addf %98, %102 : vector<32x128xf32>
    %c15_85 = arith.constant 15 : index
    %c0_86 = arith.constant 0 : index
    %104 = vector.load %arg14[%c15_85, %c0_86] : memref<64x512xbf16, #tpu.memory_space<vmem>>, vector<32x256xbf16>
    %c3_87 = arith.constant 3 : index
    %c0_88 = arith.constant 0 : index
    %c0_89 = arith.constant 0 : index
    %105 = vector.load %arg4[%c3_87, %c0_88, %c0_89] : memref<9x256x128xbf16, #tpu.memory_space<vmem>>, vector<1x256x128xbf16>
    %106 = vector.shape_cast %105 : vector<1x256x128xbf16> to vector<256x128xbf16>
    %cst_90 = arith.constant dense<0.000000e+00> : vector<32x128xf32>
    %107 = tpu.matmul %104, %106, %cst_90 {dimension_numbers = #tpu.dot_dimension_numbers<[1], [0], [0], [1], [0, 0, 1, 1], [], []>} : vector<32x256xbf16>, vector<256x128xbf16>, vector<32x128xf32> -> vector<32x128xf32>
    %108 = arith.addf %103, %107 : vector<32x128xf32>
    %c16_91 = arith.constant 16 : index
    %c0_92 = arith.constant 0 : index
    %109 = vector.load %arg14[%c16_91, %c0_92] : memref<64x512xbf16, #tpu.memory_space<vmem>>, vector<32x256xbf16>
    %c4_93 = arith.constant 4 : index
    %c0_94 = arith.constant 0 : index
    %c0_95 = arith.constant 0 : index
    %110 = vector.load %arg4[%c4_93, %c0_94, %c0_95] : memref<9x256x128xbf16, #tpu.memory_space<vmem>>, vector<1x256x128xbf16>
    %111 = vector.shape_cast %110 : vector<1x256x128xbf16> to vector<256x128xbf16>
    %cst_96 = arith.constant dense<0.000000e+00> : vector<32x128xf32>
    %112 = tpu.matmul %109, %111, %cst_96 {dimension_numbers = #tpu.dot_dimension_numbers<[1], [0], [0], [1], [0, 0, 1, 1], [], []>} : vector<32x256xbf16>, vector<256x128xbf16>, vector<32x128xf32> -> vector<32x128xf32>
    %113 = arith.addf %108, %112 : vector<32x128xf32>
    %c17_97 = arith.constant 17 : index
    %c0_98 = arith.constant 0 : index
    %114 = vector.load %arg14[%c17_97, %c0_98] : memref<64x512xbf16, #tpu.memory_space<vmem>>, vector<32x256xbf16>
    %c5_99 = arith.constant 5 : index
    %c0_100 = arith.constant 0 : index
    %c0_101 = arith.constant 0 : index
    %115 = vector.load %arg4[%c5_99, %c0_100, %c0_101] : memref<9x256x128xbf16, #tpu.memory_space<vmem>>, vector<1x256x128xbf16>
    %116 = vector.shape_cast %115 : vector<1x256x128xbf16> to vector<256x128xbf16>
    %cst_102 = arith.constant dense<0.000000e+00> : vector<32x128xf32>
    %117 = tpu.matmul %114, %116, %cst_102 {dimension_numbers = #tpu.dot_dimension_numbers<[1], [0], [0], [1], [0, 0, 1, 1], [], []>} : vector<32x256xbf16>, vector<256x128xbf16>, vector<32x128xf32> -> vector<32x128xf32>
    %118 = arith.addf %113, %117 : vector<32x128xf32>
    %c23_103 = arith.constant 23 : index
    %c0_104 = arith.constant 0 : index
    %119 = vector.load %arg14[%c23_103, %c0_104] : memref<64x512xbf16, #tpu.memory_space<vmem>>, vector<32x256xbf16>
    %c6_105 = arith.constant 6 : index
    %c0_106 = arith.constant 0 : index
    %c0_107 = arith.constant 0 : index
    %120 = vector.load %arg4[%c6_105, %c0_106, %c0_107] : memref<9x256x128xbf16, #tpu.memory_space<vmem>>, vector<1x256x128xbf16>
    %121 = vector.shape_cast %120 : vector<1x256x128xbf16> to vector<256x128xbf16>
    %cst_108 = arith.constant dense<0.000000e+00> : vector<32x128xf32>
    %122 = tpu.matmul %119, %121, %cst_108 {dimension_numbers = #tpu.dot_dimension_numbers<[1], [0], [0], [1], [0, 0, 1, 1], [], []>} : vector<32x256xbf16>, vector<256x128xbf16>, vector<32x128xf32> -> vector<32x128xf32>
    %123 = arith.addf %118, %122 : vector<32x128xf32>
    %c24_109 = arith.constant 24 : index
    %c0_110 = arith.constant 0 : index
    %124 = vector.load %arg14[%c24_109, %c0_110] : memref<64x512xbf16, #tpu.memory_space<vmem>>, vector<32x256xbf16>
    %c7_111 = arith.constant 7 : index
    %c0_112 = arith.constant 0 : index
    %c0_113 = arith.constant 0 : index
    %125 = vector.load %arg4[%c7_111, %c0_112, %c0_113] : memref<9x256x128xbf16, #tpu.memory_space<vmem>>, vector<1x256x128xbf16>
    %126 = vector.shape_cast %125 : vector<1x256x128xbf16> to vector<256x128xbf16>
    %cst_114 = arith.constant dense<0.000000e+00> : vector<32x128xf32>
    %127 = tpu.matmul %124, %126, %cst_114 {dimension_numbers = #tpu.dot_dimension_numbers<[1], [0], [0], [1], [0, 0, 1, 1], [], []>} : vector<32x256xbf16>, vector<256x128xbf16>, vector<32x128xf32> -> vector<32x128xf32>
    %128 = arith.addf %123, %127 : vector<32x128xf32>
    %c25_115 = arith.constant 25 : index
    %c0_116 = arith.constant 0 : index
    %129 = vector.load %arg14[%c25_115, %c0_116] : memref<64x512xbf16, #tpu.memory_space<vmem>>, vector<32x256xbf16>
    %c8_117 = arith.constant 8 : index
    %c0_118 = arith.constant 0 : index
    %c0_119 = arith.constant 0 : index
    %130 = vector.load %arg4[%c8_117, %c0_118, %c0_119] : memref<9x256x128xbf16, #tpu.memory_space<vmem>>, vector<1x256x128xbf16>
    %131 = vector.shape_cast %130 : vector<1x256x128xbf16> to vector<256x128xbf16>
    %cst_120 = arith.constant dense<0.000000e+00> : vector<32x128xf32>
    %132 = tpu.matmul %129, %131, %cst_120 {dimension_numbers = #tpu.dot_dimension_numbers<[1], [0], [0], [1], [0, 0, 1, 1], [], []>} : vector<32x256xbf16>, vector<256x128xbf16>, vector<32x128xf32> -> vector<32x128xf32>
    %133 = arith.addf %128, %132 : vector<32x128xf32>
    %c0_121 = arith.constant 0 : index
    %c0_122 = arith.constant 0 : index
    %134 = vector.load %arg5[%c0_121, %c0_122] : memref<1x128xf32, #tpu.memory_space<vmem>>, vector<1x128xf32>
    %135 = vector.broadcast %134 : vector<1x128xf32> to vector<32x128xf32>
    %136 = arith.addf %133, %135 : vector<32x128xf32>
    %cst_123 = arith.constant 0.000000e+00 : f32
    %137 = vector.broadcast %cst_123 : f32 to vector<32x128xf32>
    %138 = arith.maximumf %136, %137 : vector<32x128xf32>
    %cst_124 = arith.constant 0.000000e+00 : f32
    %139 = vector.shape_cast %18 : vector<32x1xi1> to vector<32x1xi1>
    %140 = vector.broadcast %139 : vector<32x1xi1> to vector<32x128xi1>
    %141 = vector.broadcast %cst_124 : f32 to vector<32x128xf32>
    %142 = arith.select %140, %138, %141 : vector<32x128xi1>, vector<32x128xf32>
    %143 = arith.truncf %142 : vector<32x128xf32> to vector<32x128xbf16>
    %cst_125 = arith.constant 0.000000e+00 : bf16
    %144 = vector.broadcast %cst_125 : bf16 to vector<64x512xbf16>
    %c0_126 = arith.constant 0 : index
    %c0_127 = arith.constant 0 : index
    %145 = vector.load %arg13[%c0_126, %c0_127] : memref<64x512xbf16, #tpu.memory_space<vmem>>, vector<64x512xbf16>
    tpu.vector_store %arg13[%c0_126, %c0_127], %144 {strides = array<i32>} : memref<64x512xbf16, #tpu.memory_space<vmem>>, vector<64x512xbf16>,
    %c16_128 = arith.constant 16 : index
    %c0_129 = arith.constant 0 : index
    %146 = vector.load %arg13[%c16_128, %c0_129] : memref<64x512xbf16, #tpu.memory_space<vmem>>, vector<32x128xbf16>
    tpu.vector_store %arg13[%c16_128, %c0_129], %143 {strides = array<i32>} : memref<64x512xbf16, #tpu.memory_space<vmem>>, vector<32x128xbf16>,
    %cst_130 = arith.constant 0.000000e+00 : f32
    %147 = vector.broadcast %cst_130 : f32 to vector<32x256xf32>
    %c7_131 = arith.constant 7 : index
    %c0_132 = arith.constant 0 : index
    %148 = vector.load %arg13[%c7_131, %c0_132] : memref<64x512xbf16, #tpu.memory_space<vmem>>, vector<32x128xbf16>
    %c0_133 = arith.constant 0 : index
    %c0_134 = arith.constant 0 : index
    %c0_135 = arith.constant 0 : index
    %149 = vector.load %arg6[%c0_133, %c0_134, %c0_135] : memref<9x128x256xbf16, #tpu.memory_space<vmem>>, vector<1x128x256xbf16>
    %150 = vector.shape_cast %149 : vector<1x128x256xbf16> to vector<128x256xbf16>
    %cst_136 = arith.constant dense<0.000000e+00> : vector<32x256xf32>
    %151 = tpu.matmul %148, %150, %cst_136 {dimension_numbers = #tpu.dot_dimension_numbers<[1], [0], [0], [1], [0, 0, 1, 1], [], []>} : vector<32x128xbf16>, vector<128x256xbf16>, vector<32x256xf32> -> vector<32x256xf32>
    %152 = arith.addf %147, %151 : vector<32x256xf32>
    %c8_137 = arith.constant 8 : index
    %c0_138 = arith.constant 0 : index
    %153 = vector.load %arg13[%c8_137, %c0_138] : memref<64x512xbf16, #tpu.memory_space<vmem>>, vector<32x128xbf16>
    %c1_139 = arith.constant 1 : index
    %c0_140 = arith.constant 0 : index
    %c0_141 = arith.constant 0 : index
    %154 = vector.load %arg6[%c1_139, %c0_140, %c0_141] : memref<9x128x256xbf16, #tpu.memory_space<vmem>>, vector<1x128x256xbf16>
    %155 = vector.shape_cast %154 : vector<1x128x256xbf16> to vector<128x256xbf16>
    %cst_142 = arith.constant dense<0.000000e+00> : vector<32x256xf32>
    %156 = tpu.matmul %153, %155, %cst_142 {dimension_numbers = #tpu.dot_dimension_numbers<[1], [0], [0], [1], [0, 0, 1, 1], [], []>} : vector<32x128xbf16>, vector<128x256xbf16>, vector<32x256xf32> -> vector<32x256xf32>
    %157 = arith.addf %152, %156 : vector<32x256xf32>
    %c9_143 = arith.constant 9 : index
    %c0_144 = arith.constant 0 : index
    %158 = vector.load %arg13[%c9_143, %c0_144] : memref<64x512xbf16, #tpu.memory_space<vmem>>, vector<32x128xbf16>
    %c2_145 = arith.constant 2 : index
    %c0_146 = arith.constant 0 : index
    %c0_147 = arith.constant 0 : index
    %159 = vector.load %arg6[%c2_145, %c0_146, %c0_147] : memref<9x128x256xbf16, #tpu.memory_space<vmem>>, vector<1x128x256xbf16>
    %160 = vector.shape_cast %159 : vector<1x128x256xbf16> to vector<128x256xbf16>
    %cst_148 = arith.constant dense<0.000000e+00> : vector<32x256xf32>
    %161 = tpu.matmul %158, %160, %cst_148 {dimension_numbers = #tpu.dot_dimension_numbers<[1], [0], [0], [1], [0, 0, 1, 1], [], []>} : vector<32x128xbf16>, vector<128x256xbf16>, vector<32x256xf32> -> vector<32x256xf32>
    %162 = arith.addf %157, %161 : vector<32x256xf32>
    %c15_149 = arith.constant 15 : index
    %c0_150 = arith.constant 0 : index
    %163 = vector.load %arg13[%c15_149, %c0_150] : memref<64x512xbf16, #tpu.memory_space<vmem>>, vector<32x128xbf16>
    %c3_151 = arith.constant 3 : index
    %c0_152 = arith.constant 0 : index
    %c0_153 = arith.constant 0 : index
    %164 = vector.load %arg6[%c3_151, %c0_152, %c0_153] : memref<9x128x256xbf16, #tpu.memory_space<vmem>>, vector<1x128x256xbf16>
    %165 = vector.shape_cast %164 : vector<1x128x256xbf16> to vector<128x256xbf16>
    %cst_154 = arith.constant dense<0.000000e+00> : vector<32x256xf32>
    %166 = tpu.matmul %163, %165, %cst_154 {dimension_numbers = #tpu.dot_dimension_numbers<[1], [0], [0], [1], [0, 0, 1, 1], [], []>} : vector<32x128xbf16>, vector<128x256xbf16>, vector<32x256xf32> -> vector<32x256xf32>
    %167 = arith.addf %162, %166 : vector<32x256xf32>
    %c16_155 = arith.constant 16 : index
    %c0_156 = arith.constant 0 : index
    %168 = vector.load %arg13[%c16_155, %c0_156] : memref<64x512xbf16, #tpu.memory_space<vmem>>, vector<32x128xbf16>
    %c4_157 = arith.constant 4 : index
    %c0_158 = arith.constant 0 : index
    %c0_159 = arith.constant 0 : index
    %169 = vector.load %arg6[%c4_157, %c0_158, %c0_159] : memref<9x128x256xbf16, #tpu.memory_space<vmem>>, vector<1x128x256xbf16>
    %170 = vector.shape_cast %169 : vector<1x128x256xbf16> to vector<128x256xbf16>
    %cst_160 = arith.constant dense<0.000000e+00> : vector<32x256xf32>
    %171 = tpu.matmul %168, %170, %cst_160 {dimension_numbers = #tpu.dot_dimension_numbers<[1], [0], [0], [1], [0, 0, 1, 1], [], []>} : vector<32x128xbf16>, vector<128x256xbf16>, vector<32x256xf32> -> vector<32x256xf32>
    %172 = arith.addf %167, %171 : vector<32x256xf32>
    %c17_161 = arith.constant 17 : index
    %c0_162 = arith.constant 0 : index
    %173 = vector.load %arg13[%c17_161, %c0_162] : memref<64x512xbf16, #tpu.memory_space<vmem>>, vector<32x128xbf16>
    %c5_163 = arith.constant 5 : index
    %c0_164 = arith.constant 0 : index
    %c0_165 = arith.constant 0 : index
    %174 = vector.load %arg6[%c5_163, %c0_164, %c0_165] : memref<9x128x256xbf16, #tpu.memory_space<vmem>>, vector<1x128x256xbf16>
    %175 = vector.shape_cast %174 : vector<1x128x256xbf16> to vector<128x256xbf16>
    %cst_166 = arith.constant dense<0.000000e+00> : vector<32x256xf32>
    %176 = tpu.matmul %173, %175, %cst_166 {dimension_numbers = #tpu.dot_dimension_numbers<[1], [0], [0], [1], [0, 0, 1, 1], [], []>} : vector<32x128xbf16>, vector<128x256xbf16>, vector<32x256xf32> -> vector<32x256xf32>
    %177 = arith.addf %172, %176 : vector<32x256xf32>
    %c23_167 = arith.constant 23 : index
    %c0_168 = arith.constant 0 : index
    %178 = vector.load %arg13[%c23_167, %c0_168] : memref<64x512xbf16, #tpu.memory_space<vmem>>, vector<32x128xbf16>
    %c6_169 = arith.constant 6 : index
    %c0_170 = arith.constant 0 : index
    %c0_171 = arith.constant 0 : index
    %179 = vector.load %arg6[%c6_169, %c0_170, %c0_171] : memref<9x128x256xbf16, #tpu.memory_space<vmem>>, vector<1x128x256xbf16>
    %180 = vector.shape_cast %179 : vector<1x128x256xbf16> to vector<128x256xbf16>
    %cst_172 = arith.constant dense<0.000000e+00> : vector<32x256xf32>
    %181 = tpu.matmul %178, %180, %cst_172 {dimension_numbers = #tpu.dot_dimension_numbers<[1], [0], [0], [1], [0, 0, 1, 1], [], []>} : vector<32x128xbf16>, vector<128x256xbf16>, vector<32x256xf32> -> vector<32x256xf32>
    %182 = arith.addf %177, %181 : vector<32x256xf32>
    %c24_173 = arith.constant 24 : index
    %c0_174 = arith.constant 0 : index
    %183 = vector.load %arg13[%c24_173, %c0_174] : memref<64x512xbf16, #tpu.memory_space<vmem>>, vector<32x128xbf16>
    %c7_175 = arith.constant 7 : index
    %c0_176 = arith.constant 0 : index
    %c0_177 = arith.constant 0 : index
    %184 = vector.load %arg6[%c7_175, %c0_176, %c0_177] : memref<9x128x256xbf16, #tpu.memory_space<vmem>>, vector<1x128x256xbf16>
    %185 = vector.shape_cast %184 : vector<1x128x256xbf16> to vector<128x256xbf16>
    %cst_178 = arith.constant dense<0.000000e+00> : vector<32x256xf32>
    %186 = tpu.matmul %183, %185, %cst_178 {dimension_numbers = #tpu.dot_dimension_numbers<[1], [0], [0], [1], [0, 0, 1, 1], [], []>} : vector<32x128xbf16>, vector<128x256xbf16>, vector<32x256xf32> -> vector<32x256xf32>
    %187 = arith.addf %182, %186 : vector<32x256xf32>
    %c25_179 = arith.constant 25 : index
    %c0_180 = arith.constant 0 : index
    %188 = vector.load %arg13[%c25_179, %c0_180] : memref<64x512xbf16, #tpu.memory_space<vmem>>, vector<32x128xbf16>
    %c8_181 = arith.constant 8 : index
    %c0_182 = arith.constant 0 : index
    %c0_183 = arith.constant 0 : index
    %189 = vector.load %arg6[%c8_181, %c0_182, %c0_183] : memref<9x128x256xbf16, #tpu.memory_space<vmem>>, vector<1x128x256xbf16>
    %190 = vector.shape_cast %189 : vector<1x128x256xbf16> to vector<128x256xbf16>
    %cst_184 = arith.constant dense<0.000000e+00> : vector<32x256xf32>
    %191 = tpu.matmul %188, %190, %cst_184 {dimension_numbers = #tpu.dot_dimension_numbers<[1], [0], [0], [1], [0, 0, 1, 1], [], []>} : vector<32x128xbf16>, vector<128x256xbf16>, vector<32x256xf32> -> vector<32x256xf32>
    %192 = arith.addf %187, %191 : vector<32x256xf32>
    %c0_185 = arith.constant 0 : index
    %c0_186 = arith.constant 0 : index
    %193 = vector.load %arg7[%c0_185, %c0_186] : memref<1x256xf32, #tpu.memory_space<vmem>>, vector<1x256xf32>
    %194 = vector.broadcast %193 : vector<1x256xf32> to vector<32x256xf32>
    %195 = arith.addf %192, %194 : vector<32x256xf32>
    %cst_187 = arith.constant 0.000000e+00 : f32
    %196 = vector.broadcast %cst_187 : f32 to vector<32x256xf32>
    %197 = arith.maximumf %195, %196 : vector<32x256xf32>
    %cst_188 = arith.constant 0.000000e+00 : f32
    %198 = vector.shape_cast %18 : vector<32x1xi1> to vector<32x1xi1>
    %199 = vector.broadcast %198 : vector<32x1xi1> to vector<32x256xi1>
    %200 = vector.broadcast %cst_188 : f32 to vector<32x256xf32>
    %201 = arith.select %199, %197, %200 : vector<32x256xi1>, vector<32x256xf32>
    %202 = arith.truncf %201 : vector<32x256xf32> to vector<32x256xbf16>
    %cst_189 = arith.constant 0.000000e+00 : bf16
    %203 = vector.broadcast %cst_189 : bf16 to vector<64x512xbf16>
    %c0_190 = arith.constant 0 : index
    %c0_191 = arith.constant 0 : index
    %204 = vector.load %arg14[%c0_190, %c0_191] : memref<64x512xbf16, #tpu.memory_space<vmem>>, vector<64x512xbf16>
    tpu.vector_store %arg14[%c0_190, %c0_191], %203 {strides = array<i32>} : memref<64x512xbf16, #tpu.memory_space<vmem>>, vector<64x512xbf16>,
    %c16_192 = arith.constant 16 : index
    %c0_193 = arith.constant 0 : index
    %205 = vector.load %arg14[%c16_192, %c0_193] : memref<64x512xbf16, #tpu.memory_space<vmem>>, vector<32x256xbf16>
    tpu.vector_store %arg14[%c16_192, %c0_193], %202 {strides = array<i32>} : memref<64x512xbf16, #tpu.memory_space<vmem>>, vector<32x256xbf16>,
    %cst_194 = arith.constant 0.000000e+00 : f32
    %206 = vector.broadcast %cst_194 : f32 to vector<32x512xf32>
    %c7_195 = arith.constant 7 : index
    %c0_196 = arith.constant 0 : index
    %207 = vector.load %arg14[%c7_195, %c0_196] : memref<64x512xbf16, #tpu.memory_space<vmem>>, vector<32x256xbf16>
    %c0_197 = arith.constant 0 : index
    %c0_198 = arith.constant 0 : index
    %c0_199 = arith.constant 0 : index
    %208 = vector.load %arg8[%c0_197, %c0_198, %c0_199] : memref<9x256x512xbf16, #tpu.memory_space<vmem>>, vector<1x256x512xbf16>
    %209 = vector.shape_cast %208 : vector<1x256x512xbf16> to vector<256x512xbf16>
    %cst_200 = arith.constant dense<0.000000e+00> : vector<32x512xf32>
    %210 = tpu.matmul %207, %209, %cst_200 {dimension_numbers = #tpu.dot_dimension_numbers<[1], [0], [0], [1], [0, 0, 1, 1], [], []>} : vector<32x256xbf16>, vector<256x512xbf16>, vector<32x512xf32> -> vector<32x512xf32>
    %211 = arith.addf %206, %210 : vector<32x512xf32>
    %c8_201 = arith.constant 8 : index
    %c0_202 = arith.constant 0 : index
    %212 = vector.load %arg14[%c8_201, %c0_202] : memref<64x512xbf16, #tpu.memory_space<vmem>>, vector<32x256xbf16>
    %c1_203 = arith.constant 1 : index
    %c0_204 = arith.constant 0 : index
    %c0_205 = arith.constant 0 : index
    %213 = vector.load %arg8[%c1_203, %c0_204, %c0_205] : memref<9x256x512xbf16, #tpu.memory_space<vmem>>, vector<1x256x512xbf16>
    %214 = vector.shape_cast %213 : vector<1x256x512xbf16> to vector<256x512xbf16>
    %cst_206 = arith.constant dense<0.000000e+00> : vector<32x512xf32>
    %215 = tpu.matmul %212, %214, %cst_206 {dimension_numbers = #tpu.dot_dimension_numbers<[1], [0], [0], [1], [0, 0, 1, 1], [], []>} : vector<32x256xbf16>, vector<256x512xbf16>, vector<32x512xf32> -> vector<32x512xf32>
    %216 = arith.addf %211, %215 : vector<32x512xf32>
    %c9_207 = arith.constant 9 : index
    %c0_208 = arith.constant 0 : index
    %217 = vector.load %arg14[%c9_207, %c0_208] : memref<64x512xbf16, #tpu.memory_space<vmem>>, vector<32x256xbf16>
    %c2_209 = arith.constant 2 : index
    %c0_210 = arith.constant 0 : index
    %c0_211 = arith.constant 0 : index
    %218 = vector.load %arg8[%c2_209, %c0_210, %c0_211] : memref<9x256x512xbf16, #tpu.memory_space<vmem>>, vector<1x256x512xbf16>
    %219 = vector.shape_cast %218 : vector<1x256x512xbf16> to vector<256x512xbf16>
    %cst_212 = arith.constant dense<0.000000e+00> : vector<32x512xf32>
    %220 = tpu.matmul %217, %219, %cst_212 {dimension_numbers = #tpu.dot_dimension_numbers<[1], [0], [0], [1], [0, 0, 1, 1], [], []>} : vector<32x256xbf16>, vector<256x512xbf16>, vector<32x512xf32> -> vector<32x512xf32>
    %221 = arith.addf %216, %220 : vector<32x512xf32>
    %c15_213 = arith.constant 15 : index
    %c0_214 = arith.constant 0 : index
    %222 = vector.load %arg14[%c15_213, %c0_214] : memref<64x512xbf16, #tpu.memory_space<vmem>>, vector<32x256xbf16>
    %c3_215 = arith.constant 3 : index
    %c0_216 = arith.constant 0 : index
    %c0_217 = arith.constant 0 : index
    %223 = vector.load %arg8[%c3_215, %c0_216, %c0_217] : memref<9x256x512xbf16, #tpu.memory_space<vmem>>, vector<1x256x512xbf16>
    %224 = vector.shape_cast %223 : vector<1x256x512xbf16> to vector<256x512xbf16>
    %cst_218 = arith.constant dense<0.000000e+00> : vector<32x512xf32>
    %225 = tpu.matmul %222, %224, %cst_218 {dimension_numbers = #tpu.dot_dimension_numbers<[1], [0], [0], [1], [0, 0, 1, 1], [], []>} : vector<32x256xbf16>, vector<256x512xbf16>, vector<32x512xf32> -> vector<32x512xf32>
    %226 = arith.addf %221, %225 : vector<32x512xf32>
    %c16_219 = arith.constant 16 : index
    %c0_220 = arith.constant 0 : index
    %227 = vector.load %arg14[%c16_219, %c0_220] : memref<64x512xbf16, #tpu.memory_space<vmem>>, vector<32x256xbf16>
    %c4_221 = arith.constant 4 : index
    %c0_222 = arith.constant 0 : index
    %c0_223 = arith.constant 0 : index
    %228 = vector.load %arg8[%c4_221, %c0_222, %c0_223] : memref<9x256x512xbf16, #tpu.memory_space<vmem>>, vector<1x256x512xbf16>
    %229 = vector.shape_cast %228 : vector<1x256x512xbf16> to vector<256x512xbf16>
    %cst_224 = arith.constant dense<0.000000e+00> : vector<32x512xf32>
    %230 = tpu.matmul %227, %229, %cst_224 {dimension_numbers = #tpu.dot_dimension_numbers<[1], [0], [0], [1], [0, 0, 1, 1], [], []>} : vector<32x256xbf16>, vector<256x512xbf16>, vector<32x512xf32> -> vector<32x512xf32>
    %231 = arith.addf %226, %230 : vector<32x512xf32>
    %c17_225 = arith.constant 17 : index
    %c0_226 = arith.constant 0 : index
    %232 = vector.load %arg14[%c17_225, %c0_226] : memref<64x512xbf16, #tpu.memory_space<vmem>>, vector<32x256xbf16>
    %c5_227 = arith.constant 5 : index
    %c0_228 = arith.constant 0 : index
    %c0_229 = arith.constant 0 : index
    %233 = vector.load %arg8[%c5_227, %c0_228, %c0_229] : memref<9x256x512xbf16, #tpu.memory_space<vmem>>, vector<1x256x512xbf16>
    %234 = vector.shape_cast %233 : vector<1x256x512xbf16> to vector<256x512xbf16>
    %cst_230 = arith.constant dense<0.000000e+00> : vector<32x512xf32>
    %235 = tpu.matmul %232, %234, %cst_230 {dimension_numbers = #tpu.dot_dimension_numbers<[1], [0], [0], [1], [0, 0, 1, 1], [], []>} : vector<32x256xbf16>, vector<256x512xbf16>, vector<32x512xf32> -> vector<32x512xf32>
    %236 = arith.addf %231, %235 : vector<32x512xf32>
    %c23_231 = arith.constant 23 : index
    %c0_232 = arith.constant 0 : index
    %237 = vector.load %arg14[%c23_231, %c0_232] : memref<64x512xbf16, #tpu.memory_space<vmem>>, vector<32x256xbf16>
    %c6_233 = arith.constant 6 : index
    %c0_234 = arith.constant 0 : index
    %c0_235 = arith.constant 0 : index
    %238 = vector.load %arg8[%c6_233, %c0_234, %c0_235] : memref<9x256x512xbf16, #tpu.memory_space<vmem>>, vector<1x256x512xbf16>
    %239 = vector.shape_cast %238 : vector<1x256x512xbf16> to vector<256x512xbf16>
    %cst_236 = arith.constant dense<0.000000e+00> : vector<32x512xf32>
    %240 = tpu.matmul %237, %239, %cst_236 {dimension_numbers = #tpu.dot_dimension_numbers<[1], [0], [0], [1], [0, 0, 1, 1], [], []>} : vector<32x256xbf16>, vector<256x512xbf16>, vector<32x512xf32> -> vector<32x512xf32>
    %241 = arith.addf %236, %240 : vector<32x512xf32>
    %c24_237 = arith.constant 24 : index
    %c0_238 = arith.constant 0 : index
    %242 = vector.load %arg14[%c24_237, %c0_238] : memref<64x512xbf16, #tpu.memory_space<vmem>>, vector<32x256xbf16>
    %c7_239 = arith.constant 7 : index
    %c0_240 = arith.constant 0 : index
    %c0_241 = arith.constant 0 : index
    %243 = vector.load %arg8[%c7_239, %c0_240, %c0_241] : memref<9x256x512xbf16, #tpu.memory_space<vmem>>, vector<1x256x512xbf16>
    %244 = vector.shape_cast %243 : vector<1x256x512xbf16> to vector<256x512xbf16>
    %cst_242 = arith.constant dense<0.000000e+00> : vector<32x512xf32>
    %245 = tpu.matmul %242, %244, %cst_242 {dimension_numbers = #tpu.dot_dimension_numbers<[1], [0], [0], [1], [0, 0, 1, 1], [], []>} : vector<32x256xbf16>, vector<256x512xbf16>, vector<32x512xf32> -> vector<32x512xf32>
    %246 = arith.addf %241, %245 : vector<32x512xf32>
    %c25_243 = arith.constant 25 : index
    %c0_244 = arith.constant 0 : index
    %247 = vector.load %arg14[%c25_243, %c0_244] : memref<64x512xbf16, #tpu.memory_space<vmem>>, vector<32x256xbf16>
    %c8_245 = arith.constant 8 : index
    %c0_246 = arith.constant 0 : index
    %c0_247 = arith.constant 0 : index
    %248 = vector.load %arg8[%c8_245, %c0_246, %c0_247] : memref<9x256x512xbf16, #tpu.memory_space<vmem>>, vector<1x256x512xbf16>
    %249 = vector.shape_cast %248 : vector<1x256x512xbf16> to vector<256x512xbf16>
    %cst_248 = arith.constant dense<0.000000e+00> : vector<32x512xf32>
    %250 = tpu.matmul %247, %249, %cst_248 {dimension_numbers = #tpu.dot_dimension_numbers<[1], [0], [0], [1], [0, 0, 1, 1], [], []>} : vector<32x256xbf16>, vector<256x512xbf16>, vector<32x512xf32> -> vector<32x512xf32>
    %251 = arith.addf %246, %250 : vector<32x512xf32>
    %c0_249 = arith.constant 0 : index
    %c0_250 = arith.constant 0 : index
    %252 = vector.load %arg9[%c0_249, %c0_250] : memref<1x512xf32, #tpu.memory_space<vmem>>, vector<1x512xf32>
    %253 = vector.broadcast %252 : vector<1x512xf32> to vector<32x512xf32>
    %254 = arith.addf %251, %253 : vector<32x512xf32>
    %cst_251 = arith.constant 0.000000e+00 : f32
    %255 = vector.broadcast %cst_251 : f32 to vector<32x512xf32>
    %256 = arith.maximumf %254, %255 : vector<32x512xf32>
    %cst_252 = arith.constant 0.000000e+00 : f32
    %257 = vector.shape_cast %18 : vector<32x1xi1> to vector<32x1xi1>
    %258 = vector.broadcast %257 : vector<32x1xi1> to vector<32x512xi1>
    %259 = vector.broadcast %cst_252 : f32 to vector<32x512xf32>
    %260 = arith.select %258, %256, %259 : vector<32x512xi1>, vector<32x512xf32>
    %261 = arith.truncf %260 : vector<32x512xf32> to vector<32x512xbf16>
    %cst_253 = arith.constant 0.000000e+00 : bf16
    %262 = vector.broadcast %cst_253 : bf16 to vector<64x512xbf16>
    %c0_254 = arith.constant 0 : index
    %c0_255 = arith.constant 0 : index
    %263 = vector.load %arg13[%c0_254, %c0_255] : memref<64x512xbf16, #tpu.memory_space<vmem>>, vector<64x512xbf16>
    tpu.vector_store %arg13[%c0_254, %c0_255], %262 {strides = array<i32>} : memref<64x512xbf16, #tpu.memory_space<vmem>>, vector<64x512xbf16>,
    %c0_256 = arith.constant 0 : index
    %c0_257 = arith.constant 0 : index
    %264 = vector.load %arg13[%c0_256, %c0_257] : memref<64x512xbf16, #tpu.memory_space<vmem>>, vector<32x512xbf16>
    tpu.vector_store %arg13[%c0_256, %c0_257], %261 {strides = array<i32>} : memref<64x512xbf16, #tpu.memory_space<vmem>>, vector<32x512xbf16>,
    %cst_258 = arith.constant 0.000000e+00 : f32
    %265 = vector.broadcast %cst_258 : f32 to vector<32x128xf32>
    %c0_259 = arith.constant 0 : index
    %c0_260 = arith.constant 0 : index
    %266 = vector.load %arg13[%c0_259, %c0_260] : memref<64x512xbf16, #tpu.memory_space<vmem>>, vector<32x512xbf16>
    %c0_261 = arith.constant 0 : index
    %c0_262 = arith.constant 0 : index
    %c0_263 = arith.constant 0 : index
    %267 = vector.load %arg10[%c0_261, %c0_262, %c0_263] : memref<4x512x128xbf16, #tpu.memory_space<vmem>>, vector<1x512x128xbf16>
    %268 = vector.shape_cast %267 : vector<1x512x128xbf16> to vector<512x128xbf16>
    %cst_264 = arith.constant dense<0.000000e+00> : vector<32x128xf32>
    %269 = tpu.matmul %266, %268, %cst_264 {dimension_numbers = #tpu.dot_dimension_numbers<[1], [0], [0], [1], [0, 0, 1, 1], [], []>} : vector<32x512xbf16>, vector<512x128xbf16>, vector<32x128xf32> -> vector<32x128xf32>
    %270 = arith.addf %265, %269 : vector<32x128xf32>
    %c1_265 = arith.constant 1 : index
    %c0_266 = arith.constant 0 : index
    %271 = vector.load %arg13[%c1_265, %c0_266] : memref<64x512xbf16, #tpu.memory_space<vmem>>, vector<32x512xbf16>
    %c1_267 = arith.constant 1 : index
    %c0_268 = arith.constant 0 : index
    %c0_269 = arith.constant 0 : index
    %272 = vector.load %arg10[%c1_267, %c0_268, %c0_269] : memref<4x512x128xbf16, #tpu.memory_space<vmem>>, vector<1x512x128xbf16>
    %273 = vector.shape_cast %272 : vector<1x512x128xbf16> to vector<512x128xbf16>
    %cst_270 = arith.constant dense<0.000000e+00> : vector<32x128xf32>
    %274 = tpu.matmul %271, %273, %cst_270 {dimension_numbers = #tpu.dot_dimension_numbers<[1], [0], [0], [1], [0, 0, 1, 1], [], []>} : vector<32x512xbf16>, vector<512x128xbf16>, vector<32x128xf32> -> vector<32x128xf32>
    %275 = arith.addf %270, %274 : vector<32x128xf32>
    %c8_271 = arith.constant 8 : index
    %c0_272 = arith.constant 0 : index
    %276 = vector.load %arg13[%c8_271, %c0_272] : memref<64x512xbf16, #tpu.memory_space<vmem>>, vector<32x512xbf16>
    %c2_273 = arith.constant 2 : index
    %c0_274 = arith.constant 0 : index
    %c0_275 = arith.constant 0 : index
    %277 = vector.load %arg10[%c2_273, %c0_274, %c0_275] : memref<4x512x128xbf16, #tpu.memory_space<vmem>>, vector<1x512x128xbf16>
    %278 = vector.shape_cast %277 : vector<1x512x128xbf16> to vector<512x128xbf16>
    %cst_276 = arith.constant dense<0.000000e+00> : vector<32x128xf32>
    %279 = tpu.matmul %276, %278, %cst_276 {dimension_numbers = #tpu.dot_dimension_numbers<[1], [0], [0], [1], [0, 0, 1, 1], [], []>} : vector<32x512xbf16>, vector<512x128xbf16>, vector<32x128xf32> -> vector<32x128xf32>
    %280 = arith.addf %275, %279 : vector<32x128xf32>
    %c9_277 = arith.constant 9 : index
    %c0_278 = arith.constant 0 : index
    %281 = vector.load %arg13[%c9_277, %c0_278] : memref<64x512xbf16, #tpu.memory_space<vmem>>, vector<32x512xbf16>
    %c3_279 = arith.constant 3 : index
    %c0_280 = arith.constant 0 : index
    %c0_281 = arith.constant 0 : index
    %282 = vector.load %arg10[%c3_279, %c0_280, %c0_281] : memref<4x512x128xbf16, #tpu.memory_space<vmem>>, vector<1x512x128xbf16>
    %283 = vector.shape_cast %282 : vector<1x512x128xbf16> to vector<512x128xbf16>
    %cst_282 = arith.constant dense<0.000000e+00> : vector<32x128xf32>
    %284 = tpu.matmul %281, %283, %cst_282 {dimension_numbers = #tpu.dot_dimension_numbers<[1], [0], [0], [1], [0, 0, 1, 1], [], []>} : vector<32x512xbf16>, vector<512x128xbf16>, vector<32x128xf32> -> vector<32x128xf32>
    %285 = arith.addf %280, %284 : vector<32x128xf32>
    %c0_283 = arith.constant 0 : index
    %c0_284 = arith.constant 0 : index
    %286 = vector.load %arg11[%c0_283, %c0_284] : memref<1x128xf32, #tpu.memory_space<vmem>>, vector<1x128xf32>
    %287 = vector.broadcast %286 : vector<1x128xf32> to vector<32x128xf32>
    %288 = arith.addf %285, %287 : vector<32x128xf32>
    %289 = arith.negf %288 : vector<32x128xf32>
    %290 = math.exp %289 : vector<32x128xf32>
    %cst_285 = arith.constant 1.000000e+00 : f32
    %291 = vector.broadcast %cst_285 : f32 to vector<32x128xf32>
    %292 = arith.addf %291, %290 : vector<32x128xf32>
    %293 = arith.divf %291, %292 : vector<32x128xf32>
    %294 = vector.extract_strided_slice %293 {offsets = [0, 0], sizes = [4, 128], strides = [1, 1]} : vector<32x128xf32> to vector<4x128xf32>
    %c0_286 = arith.constant 0 : index
    %c0_287 = arith.constant 0 : index
    %295 = vector.load %arg12[%c0_286, %c0_287] : memref<16x128xf32, #tpu.memory_space<vmem>>, vector<4x128xf32>
    tpu.vector_store %arg12[%c0_286, %c0_287], %294 {strides = array<i32>} : memref<16x128xf32, #tpu.memory_space<vmem>>, vector<4x128xf32>,
    %296 = vector.extract_strided_slice %293 {offsets = [8, 0], sizes = [4, 128], strides = [1, 1]} : vector<32x128xf32> to vector<4x128xf32>
    %c4_288 = arith.constant 4 : index
    %c0_289 = arith.constant 0 : index
    %297 = vector.load %arg12[%c4_288, %c0_289] : memref<16x128xf32, #tpu.memory_space<vmem>>, vector<4x128xf32>
    tpu.vector_store %arg12[%c4_288, %c0_289], %296 {strides = array<i32>} : memref<16x128xf32, #tpu.memory_space<vmem>>, vector<4x128xf32>,
    %298 = vector.extract_strided_slice %293 {offsets = [16, 0], sizes = [4, 128], strides = [1, 1]} : vector<32x128xf32> to vector<4x128xf32>
    %c8_290 = arith.constant 8 : index
    %c0_291 = arith.constant 0 : index
    %299 = vector.load %arg12[%c8_290, %c0_291] : memref<16x128xf32, #tpu.memory_space<vmem>>, vector<4x128xf32>
    tpu.vector_store %arg12[%c8_290, %c0_291], %298 {strides = array<i32>} : memref<16x128xf32, #tpu.memory_space<vmem>>, vector<4x128xf32>,
    %300 = vector.extract_strided_slice %293 {offsets = [24, 0], sizes = [4, 128], strides = [1, 1]} : vector<32x128xf32> to vector<4x128xf32>
    %c12_292 = arith.constant 12 : index
    %c0_293 = arith.constant 0 : index
    %301 = vector.load %arg12[%c12_292, %c0_293] : memref<16x128xf32, #tpu.memory_space<vmem>>, vector<4x128xf32>
    tpu.vector_store %arg12[%c12_292, %c0_293], %300 {strides = array<i32>} : memref<16x128xf32, #tpu.memory_space<vmem>>, vector<4x128xf32>,
    return
  }
  func.func @transform_0(%arg0: i32) -> (i32, i32) {
    %c0_i32 = arith.constant 0 : i32
    %c0_i32_0 = arith.constant 0 : i32
    return %arg0, %c0_i32 : i32, i32
  }
  func.func @transform_1(%arg0: i32) -> (i32, i32, i32) {
    %c0_i32 = arith.constant 0 : i32
    %c0_i32_0 = arith.constant 0 : i32
    %c0_i32_1 = arith.constant 0 : i32
    %c0_i32_2 = arith.constant 0 : i32
    return %c0_i32, %c0_i32_0, %c0_i32_1 : i32, i32, i32
  }
  func.func @transform_2(%arg0: i32) -> (i32, i32) {
    %c0_i32 = arith.constant 0 : i32
    %c0_i32_0 = arith.constant 0 : i32
    %c0_i32_1 = arith.constant 0 : i32
    return %c0_i32, %c0_i32_0 : i32, i32
  }
  func.func @transform_3(%arg0: i32) -> (i32, i32, i32) {
    %c0_i32 = arith.constant 0 : i32
    %c0_i32_0 = arith.constant 0 : i32
    %c0_i32_1 = arith.constant 0 : i32
    %c0_i32_2 = arith.constant 0 : i32
    return %c0_i32, %c0_i32_0, %c0_i32_1 : i32, i32, i32
  }
  func.func @transform_4(%arg0: i32) -> (i32, i32) {
    %c0_i32 = arith.constant 0 : i32
    %c0_i32_0 = arith.constant 0 : i32
    %c0_i32_1 = arith.constant 0 : i32
    return %c0_i32, %c0_i32_0 : i32, i32
  }
  func.func @transform_5(%arg0: i32) -> (i32, i32, i32) {
    %c0_i32 = arith.constant 0 : i32
    %c0_i32_0 = arith.constant 0 : i32
    %c0_i32_1 = arith.constant 0 : i32
    %c0_i32_2 = arith.constant 0 : i32
    return %c0_i32, %c0_i32_0, %c0_i32_1 : i32, i32, i32
  }
  func.func @transform_6(%arg0: i32) -> (i32, i32) {
    %c0_i32 = arith.constant 0 : i32
    %c0_i32_0 = arith.constant 0 : i32
    %c0_i32_1 = arith.constant 0 : i32
    return %c0_i32, %c0_i32_0 : i32, i32
  }
  func.func @transform_7(%arg0: i32) -> (i32, i32, i32) {
    %c0_i32 = arith.constant 0 : i32
    %c0_i32_0 = arith.constant 0 : i32
    %c0_i32_1 = arith.constant 0 : i32
    %c0_i32_2 = arith.constant 0 : i32
    return %c0_i32, %c0_i32_0, %c0_i32_1 : i32, i32, i32
  }
  func.func @transform_8(%arg0: i32) -> (i32, i32) {
    %c0_i32 = arith.constant 0 : i32
    %c0_i32_0 = arith.constant 0 : i32
    %c0_i32_1 = arith.constant 0 : i32
    return %c0_i32, %c0_i32_0 : i32, i32
  }
  func.func @transform_9(%arg0: i32) -> (i32, i32, i32) {
    %c0_i32 = arith.constant 0 : i32
    %c0_i32_0 = arith.constant 0 : i32
    %c0_i32_1 = arith.constant 0 : i32
    %c0_i32_2 = arith.constant 0 : i32
    return %c0_i32, %c0_i32_0, %c0_i32_1 : i32, i32, i32
  }
  func.func @transform_10(%arg0: i32) -> (i32, i32) {
    %c0_i32 = arith.constant 0 : i32
    %c0_i32_0 = arith.constant 0 : i32
    %c0_i32_1 = arith.constant 0 : i32
    return %c0_i32, %c0_i32_0 : i32, i32
  }
  func.func @transform_11(%arg0: i32) -> (i32, i32) {
    %c0_i32 = arith.constant 0 : i32
    %c0_i32_0 = arith.constant 0 : i32
    return %arg0, %c0_i32 : i32, i32
  }
}

</mosaic_0001>

<bundles_post_ra>
// kernel: convae_forward.2
= control target key start
LH: loop header
LB: loop body
LE: loop exit
PB: predicated region body
PF: predicated region fallthrough
CT: control target
= control target key end

     0   :  { %8 = vsyncpa [#allocation4], 0  ;;  %s1245_s0 = inlined_call_operand.vmem [shape: bf16[4,32,32], index: 0, kind: input, shape index: {}]   ;;  %s1246_s1 = inlined_call_operand.vmem [shape: bf16[32,512], index: 1, kind: input, shape index: {}]   ;;  %s1247_s2 = inlined_call_operand.hbm [shape: f32[1,512], index: 2, kind: input, shape index: {}]   ;;  %s1248_s3 = inlined_call_operand.vmem [shape: bf16[32,512], index: 3, kind: output, shape index: {}]  }
   0x1   :  { %10 = vsyncpa [#allocation4 + $0x1], 0  ;;  %s1084_s12 = smov 0   ;;  %s1086_s13 = smov 0  }
   0x2   :  { %s1088_s14 = smov 0   ;;  %s1090_s15 = smov 0  }
   0x3   :  { %s1092_s16 = smov 0   ;;  %s1094_s17 = smov 0  }
   0x4 LB: > { %s854_s18 = sadd.s32 4294967295, %s1060_s17   ;;  %s28_s19 = sadd.s32 1, %s1056_s16  ;;  %s1060_s17 = sphi %s1094_s17, %s16_s17   ;;  %s1056_s16 = sphi %s1092_s16, %s1259_s16   ;;  %s1052_s15 = sphi %s1090_s15, %s1258_s15   ;;  %s1048_s14 = sphi %s1088_s14, %s1257_s14   ;;  %s1044_s13 = sphi %s1086_s13, %s1256_s13   ;;  %s1040_s12 = sphi %s1084_s12, %s1255_s12  }
   0x5   : > { %p30_p0 = scmp.ge.s32.totalorder %s28_s19, 2  ;;  %s61_s20 = sadd.s32 1, %s1048_s14 }
   0x6   : > { %p68_p1 = scmp.ne.s32.totalorder %s1048_s14, %s1044_s13  ;;  %p69_p2 = scmp.eq.s32.totalorder %s1060_s17, 0 }
   0x7   : > { %s1261_s19 = smov (%p30_p0, %s28_s19), 0  ;;  %p100_p4 = scmp.ne.s32.totalorder %s1044_s13, %s1040_s12 }
   0x8   : > { %p1120_p3 = por %p69_p2, %p68_p1  ;;  %s58_s22 = ssub.s32 %s1056_s16, %s1261_s19 }
   0x9   : > { %p101_p5 = scmp.eq.s32.totalorder %s854_s18, 0  ;;  %p59_p6 = scmp.eq.s32.totalorder %s58_s22, 0 }
   0xa   : > { %p126_p7 = scmp.eq.s32.totalorder %s854_s18, 1  ;;  %p858_p10 = scmp.ge.s32.totalorder %s1060_s17, 2 }
   0xb   : > { %p1127_p8 = por %p101_p5, %p100_p4 }
   0xc   : > { %s1132_s24 = scalar_select %p59_p6, %s1048_s14, %s61_s20  }
   0xd   : > { %s1251_s23 = scalar_select %p1127_p8, 1, 0 }
   0xe   : > { %p1134_p9 = por %p126_p7, %p68_p1  ;;  %157 = sbr.rel (%p858_p10) target bundleno = 53 (0x35), region = 20 }
  0x10   : > { %s1252_s25 = scalar_select %p1134_p9, 1, 0 }
  0x15   : > { %160 = sbr.rel (!%p1120_p3) target bundleno = 28 (0x1c), region = 24  ;;  %s162_s26 = sand.u32 (%p1120_p3), 1, %s1048_s14  }
  0x16   : > { %s910_s27 = sshll.u32 (%p1120_p3), %s1056_s16, 3  ;;  %s859_s28 = sshll.u32 (%p1120_p3), %s162_s26, 5 }
  0x17   : > { %s167_s4 = scalar_lea.vmem (%p1120_p3), %s1246_s1, %s910_s27  ;;  %s164_s5 = scalar_lea.vmem (%p1120_p3), [#allocation2], %s859_s28 }
  0x18   : > { %v201_v0 = vld [vmem:[%s167_s4] sm:$0xff] (%p1120_p3)  ;;  %v203_v1 = vld [vmem:[%s167_s4 + $0x10] sm:$0xff] (%p1120_p3) }
  0x19   : > { %v205_v2 = vld [vmem:[%s167_s4 + $0x20] sm:$0xff] (%p1120_p3)  ;;  %202 = vst [vmem:[%s164_s5] sm:$0xff] (%p1120_p3), %v201_v0  ;;  %204 = vst [vmem:[%s164_s5 + $0x8] sm:$0xff] (%p1120_p3), %v203_v1  ;;  %v207_v3 = vld [vmem:[%s167_s4 + $0x30] sm:$0xff] (%p1120_p3) }
  0x1a   : > { %206 = vst [vmem:[%s164_s5 + $0x10] sm:$0xff] (%p1120_p3), %v205_v2  ;;  %208 = vst [vmem:[%s164_s5 + $0x18] sm:$0xff] (%p1120_p3), %v207_v3 }
  0x1c PF: > { %s215_s6 = sand.u32 1, %s1048_s14   ;;  %s911_s7 = sshll.u32 %s1056_s16, 5 }
  0x1d   : > { %s862_s8 = sshll.u32 %s215_s6, 1  ;;  %s1151_s11 = scalar_lea.hbm %s1247_s2, %s911_s7 }
  0x1e   : > { %s219_s12 = scalar_lea.vmem [#allocation3], %s862_s8  ;;  %s216_s20 = scalar_lea.sflag [#allocation4], %s215_s6 }
  0x1f   : > { %s227_s18 = sshll.u32 %s219_s12, 4  ;;  %s982_s22 = scalar_lea.hbm %s1151_s11, 32  ;;  %s228_s18 = int_to_ptr.vmem [resolvable:$true] %s227_s18 }
  0x20   : > { %p983_p11 = scmp.ne.s32.totalorder %s1151_s11, %s982_s22  ;;  %s986_s28 = scalar_lea.hbm %s1247_s2, 64 }
  0x21   : > { %p987_p0 = scmp.lt.u32.totalorder %s1151_s11, %s1247_s2  ;;  %p988_p1 = scmp.lt.u32.totalorder %s986_s28, %s982_s22 }
  0x22   : > { %p984_p12 = pnand %p983_p11, %p1120_p3  ;;  %p990_p4 = scmp.lt.u32.totalorder %s982_s22, %s1151_s11 }
  0x23   : > { %p989_p2 = por %p988_p1, %p987_p0 }
  0x24   : > { %p985_p13 = pneg %p984_p12 }
  0x25   : > { %p991_p5 = por %p990_p4, %p989_p2 }
  0x27   : > { %p992_p6 = pnand %p991_p5, %p985_p13 }
  0x29   : > { %995 = shalt.err (!%p992_p6)
}
  0x2a   : > { %s996_s4 = scalar_lea.vmem %s228_s18, 32  ;;  %s1062_s5 = smov [#allocation3]  }
  0x2b   : > { %p997_p7 = scmp.ne.s32.totalorder %s228_s18, %s996_s4  ;;  %s1000_s6 = sshll.u32 %s1062_s5, 4  ;;  %s1001_s6 = int_to_ptr.vmem [resolvable:$false] %s1000_s6 }
  0x2c   : > { %s1002_s7 = scalar_lea.vmem %s1001_s6, 64  ;;  %p1003_p12 = scmp.lt.s32.totalorder %s228_s18, %s1001_s6 }
  0x2d   : > { %p998_p10 = pnand %p997_p7, %p1120_p3  ;;  %p1004_p9 = scmp.lt.s32.totalorder %s1002_s7, %s996_s4 }
  0x2f   : > { %p999_p11 = pneg %p998_p10  ;;  %p1005_p8 = por %p1004_p9, %p1003_p12 }
  0x31   : > { %p1006_p0 = pnand %p1005_p8, %p999_p11 }
  0x33   : > { %1009 = shalt.err (!%p1006_p0)
}
  0x34   : > { %917 = dma.hbm_to_vmem [thread:$0]  (%p1120_p3), %s1151_s11, 32, %s228_s18, %s216_s20  }
  0x35 PF: > { %p865_p13 = scmp.ge.s32.totalorder %s1060_s17, 1  ;;  %p232_p1 = scmp.lt.s32.totalorder %s1060_s17, 3 }
  0x37   : > { %p233_p2 = pnand %p865_p13, %p232_p1 }
  0x38   : > { %s1173_s8 = sand.u32 (!%p233_p2), 1, %s1044_s13   ;;  %p1253_p3 = scmp.ne.s32.totalorder (!%p233_p2), %s1251_s23, 0 }
  0x39   : > { %236 = sbr.rel (%p233_p2) target bundleno = 333 (0x14d), region = 66  ;;  %s866_s9 = sshll.u32 (!%p233_p2), %s1173_s8, 5 }
  0x3a   : > { %s867_s10 = sshll.u32 (!%p233_p2), %s1173_s8, 1  ;;  %s241_s21 = scalar_lea.vmem (!%p233_p2), [#allocation2], %s866_s9 }
  0x3b   : > { %s246_s11 = scalar_lea.sflag (!%p233_p2), [#allocation4], %s1173_s8  ;;  %s1180_s12 = scalar_lea.vmem (!%p233_p2), [#allocation3], %s867_s10 }
  0x40   : > { %1035 = dma.done.wait (%p1253_p3), %s246_s11, 32  }
  0x41   : > { %1037 = vsyncadd (%p1253_p3), %s246_s11, 4294967264  ;;  %v1063_v4 = vmov 0   ;;  %v968_v5 = vld [vmem:[%s241_s21 + $0x4] ss:$8 sps:$4 sm:$0xff]   ;;  %v970_v6 = vld [vmem:[%s241_s21] ss:$8 sps:$4 sm:$0xff]   ;;  %v637_v29 = vlaneseq }
  0x42   : > { %368 = vmatprep.mubr.bf16.mxu0 %v1063_v4  ;;  %442 = vmatprep.mubr.bf16.mxu1 %v1063_v4  ;;  %v971_v7 = vld [vmem:[%s241_s21 + $0x14] ss:$8 sps:$4 sm:$0xff]   ;;  %v973_v8 = vld [vmem:[%s241_s21 + $0x10] ss:$8 sps:$4 sm:$0xff]   ;;  %v974_v9 = vld [vmem:[%s1245_s0] sm:$0xff]   ;;  %vm329_vm0 = vcmask 261120  }
  0x43   : > { %336 = vmatprep.subr.bf16.mxu0 %v968_v5  ;;  %410 = vmatprep.subr.bf16.mxu1 %v968_v5  ;;  %v975_v10 = vld [vmem:[%s1245_s0 + $0x10] sm:$0xff]   ;;  %v976_v11 = vld [vmem:[%s1245_s0 + $0x8] sm:$0xff]   ;;  %v977_v12 = vld [vmem:[%s1245_s0 + $0x18] sm:$0xff]   ;;  %v638_v35 = vshrl.u32 %v637_v29, 7  ;;  %p1254_p8 = scmp.ne.s32.totalorder %s1252_s25, 0 }
  0x44   : > { %337 = vmatpush1.bf16.msra.mxu0 %v970_v6  ;;  %411 = vmatpush1.bf16.msra.mxu1 %v970_v6  ;;  %v978_v13 = vld [vmem:[%s1245_s0 + $0x20] sm:$0xff]   ;;  %v979_v14 = vld [vmem:[%s1245_s0 + $0x30] sm:$0xff]   ;;  %v980_v15 = vld [vmem:[%s1245_s0 + $0x28] sm:$0xff]   ;;  %s916_s8 = sshll.u32 (%p1254_p8), %s1052_s15, 3 }
  0x45   : > { %338 = vmatprep.subr.bf16.mxu0 %v971_v7  ;;  %412 = vmatprep.subr.bf16.mxu1 %v971_v7  ;;  %v981_v16 = vld [vmem:[%s1245_s0 + $0x38] sm:$0xff]   ;;  %v639_v43 = vsub.s32 0, %v638_v35  ;;  %v635_v44 = vld [vmem:[%s1180_s12] sm:$0x3]  ;;  %v643_v45 = vsub.s32 1, %v638_v35  ;;  %s279_s12 = scalar_lea.vmem [#allocation5], %s866_s9  ;;  %s703_s20 = scalar_lea.vmem (%p1254_p8), %s1248_s3, %s916_s8 }
  0x47   : > { %v640_v49 = vrot.slane %v635_v44, %v639_v43  ;;  %v644_v53 = vrot.slane %v635_v44, %v643_v45 }
  0x48   : > { %339 = vmatpush1.bf16.msra.mxu0 %v973_v8  ;;  %413 = vmatpush1.bf16.msra.mxu1 %v973_v8 }
  0x49   : > { %492 = vmatprep.subr.bf16.mxu0 %v968_v5  ;;  %574 = vmatprep.subr.bf16.mxu1 %v968_v5 }
  0x4b   : > { %875 = vmatmul.mubr.msk.bf16.vlgmr.msra.gmra.mrb[0].mxu0 %vm329_vm0, %v974_v9  ;;  %883 = vmatmul.mubr.msk.bf16.vlgmr.msra.gmra.mrb[0].mxu1 %vm329_vm0, %v975_v10 }
  0x4c   : > { %493 = vmatpush1.bf16.msra.mxu0 %v970_v6  ;;  %575 = vmatpush1.bf16.msra.mxu1 %v970_v6 }
  0x4d   : > { %378 = vmatprep.mubr.bf16.mxu0 %v1063_v4  ;;  %452 = vmatprep.mubr.bf16.mxu1 %v1063_v4 }
  0x4e   : > { %494 = vmatprep.subr.bf16.mxu0 %v971_v7  ;;  %576 = vmatprep.subr.bf16.mxu1 %v971_v7 }
  0x50   : > { %495 = vmatpush1.bf16.msra.mxu0 %v973_v8  ;;  %577 = vmatpush1.bf16.msra.mxu1 %v973_v8 }
  0x53   : > { %876 = vmatmul.mubr.msk.bf16.gmra.mrb[4].mxu0 %vm329_vm0, %v976_v11  ;;  %884 = vmatmul.mubr.msk.bf16.gmra.mrb[4].mxu1 %vm329_vm0, %v977_v12 }
  0x54   : > { %524 = vmatprep.mubr.bf16.mxu0 %v1063_v4  ;;  %606 = vmatprep.mubr.bf16.mxu1 %v1063_v4 }
  0x5b   : > { %891 = vmatmul.mubr.msk.bf16.vlgmr.msra.gmra.mrb[8].mxu0 %vm329_vm0, %v978_v13  ;;  %899 = vmatmul.mubr.msk.bf16.vlgmr.msra.gmra.mrb[8].mxu1 %vm329_vm0, %v979_v14 }
  0x5c   : > { %534 = vmatprep.mubr.bf16.mxu0 %v1063_v4  ;;  %616 = vmatprep.mubr.bf16.mxu1 %v1063_v4 }
  0x63   : > { %892 = vmatmul.mubr.msk.bf16.gmra.mrb[12].mxu0 %vm329_vm0, %v980_v15  ;;  %900 = vmatmul.mubr.msk.bf16.gmra.mrb[12].mxu1 %vm329_vm0, %v981_v16 }
 0x11e   : > { %v370_v17 = vpop.f32.mrb[0].mxu0  ;;  %v444_v18 = vpop.f32.mrb[0].mxu1 }
 0x11f   : > { %v463_v19 = vmax.f32 %v370_v17, %v444_v18  ;;  %v372_v20 = vpop.f32.mrb[1].mxu0  ;;  %v446_v21 = vpop.f32.mrb[1].mxu1 }
 0x120   : > { %v464_v22 = vmax.f32 %v372_v20, %v446_v21  ;;  %v374_v23 = vpop.f32.mrb[2].mxu0  ;;  %v448_v24 = vpop.f32.mrb[2].mxu1 }
 0x121   : > { %v465_v25 = vmax.f32 %v374_v23, %v448_v24  ;;  %v376_v26 = vpop.f32.mrb[3].mxu0  ;;  %v450_v27 = vpop.f32.mrb[3].mxu1 }
 0x122   : > { %v466_v28 = vmax.f32 %v376_v26, %v450_v27 }
 0x126   : > { %v380_v30 = vpop.f32.mrb[4].mxu0  ;;  %v454_v31 = vpop.f32.mrb[4].mxu1 }
 0x127   : > { %v467_v32 = vmax.f32 %v380_v30, %v454_v31  ;;  %v382_v33 = vpop.f32.mrb[5].mxu0  ;;  %v456_v34 = vpop.f32.mrb[5].mxu1 }
 0x128   : > { %v468_v36 = vmax.f32 %v382_v33, %v456_v34  ;;  %v384_v37 = vpop.f32.mrb[6].mxu0  ;;  %v458_v38 = vpop.f32.mrb[6].mxu1 }
 0x129   : > { %v469_v39 = vmax.f32 %v384_v37, %v458_v38  ;;  %v386_v40 = vpop.f32.mrb[7].mxu0  ;;  %v460_v41 = vpop.f32.mrb[7].mxu1 }
 0x12a   : > { %v470_v42 = vmax.f32 %v386_v40, %v460_v41 }
 0x12e   : > { %v526_v46 = vpop.f32.mrb[8].mxu0  ;;  %v608_v47 = vpop.f32.mrb[8].mxu1 }
 0x12f   : > { %v545_v48 = vmax.f32 %v463_v19, %v526_v46  ;;  %v528_v50 = vpop.f32.mrb[9].mxu0  ;;  %v610_v51 = vpop.f32.mrb[9].mxu1 }
 0x130   : > { %v546_v52 = vmax.f32 %v464_v22, %v528_v50  ;;  %v530_v54 = vpop.f32.mrb[10].mxu0  ;;  %v612_v55 = vpop.f32.mrb[10].mxu1 }
 0x131   : > { %v627_v56 = vmax.f32 %v545_v48, %v608_v47  ;;  %v547_v57 = vmax.f32 %v465_v25, %v530_v54  ;;  %v532_v58 = vpop.f32.mrb[11].mxu0  ;;  %v614_v59 = vpop.f32.mrb[11].mxu1 }
 0x132   : > { %v628_v60 = vmax.f32 %v546_v52, %v610_v51  ;;  %v548_v61 = vmax.f32 %v466_v28, %v532_v58 }
 0x133   : > { %v647_v62 = vadd.f32 %v640_v49, %v627_v56  ;;  %v629_v63 = vmax.f32 %v547_v57, %v612_v55 }
 0x134   : > { %v648_v0 = vadd.f32 %v644_v53, %v628_v60  ;;  %v630_v1 = vmax.f32 %v548_v61, %v614_v59 }
 0x135   : > { %v655_v2 = vmax.f32 %v647_v62, 0.0  ;;  %v649_v3 = vadd.f32 %v640_v49, %v629_v63 }
 0x136   : > { %v656_v4 = vmax.f32 %v648_v0, 0.0  ;;  %v650_v5 = vadd.f32 %v644_v53, %v630_v1  ;;  %v536_v6 = vpop.f32.mrb[12].mxu0  ;;  %v618_v7 = vpop.f32.mrb[12].mxu1 }
 0x137   : > { %v657_v8 = vmax.f32 %v649_v3, 0.0  ;;  %v549_v9 = vmax.f32 %v467_v32, %v536_v6  ;;  %v538_v10 = vpop.f32.mrb[13].mxu0  ;;  %v620_v11 = vpop.f32.mrb[13].mxu1 }
 0x138   : > { %v912_v12 = vpack.c.bf16 %v656_v4, %v655_v2  ;;  %v658_v13 = vmax.f32 %v650_v5, 0.0  ;;  %v550_v14 = vmax.f32 %v468_v36, %v538_v10  ;;  %v540_v15 = vpop.f32.mrb[14].mxu0  ;;  %v622_v16 = vpop.f32.mrb[14].mxu1 }
 0x139   : > { %v631_v17 = vmax.f32 %v549_v9, %v618_v7  ;;  %v551_v18 = vmax.f32 %v469_v39, %v540_v15  ;;  %v542_v19 = vpop.f32.mrb[15].mxu0  ;;  %v624_v20 = vpop.f32.mrb[15].mxu1 }
 0x13a   : > { %687 = vst [vmem:[%s279_s12] sm:$0xff] %v912_v12  ;;  %v913_v21 = vpack.c.bf16 %v658_v13, %v657_v8  ;;  %v632_v22 = vmax.f32 %v550_v14, %v620_v11  ;;  %v552_v23 = vmax.f32 %v470_v42, %v542_v19 }
 0x13b   : > { %v651_v24 = vadd.f32 %v640_v49, %v631_v17  ;;  %v633_v25 = vmax.f32 %v551_v18, %v622_v16 }
 0x13c   : > { %688 = vst [vmem:[%s279_s12 + $0x8] sm:$0xff] %v913_v21  ;;  %v652_v26 = vadd.f32 %v644_v53, %v632_v22  ;;  %v634_v27 = vmax.f32 %v552_v23, %v624_v20 }
 0x13d   : > { %v659_v28 = vmax.f32 %v651_v24, 0.0  ;;  %v653_v29 = vadd.f32 %v640_v49, %v633_v25 }
 0x13e   : > { %v660_v30 = vmax.f32 %v652_v26, 0.0  ;;  %v654_v31 = vadd.f32 %v644_v53, %v634_v27  ;;  %697 = sbr.rel (!%p1254_p8) target bundleno = 333 (0x14d), region = 78 }
 0x13f   : > { %v661_v32 = vmax.f32 %v653_v29, 0.0 }
 0x140   : > { %v914_v33 = vpack.c.bf16 %v660_v30, %v659_v28  ;;  %v662_v34 = vmax.f32 %v654_v31, 0.0 }
 0x141   : > { %v737_v36 = vld [vmem:[%s279_s12] sm:$0xff] (%p1254_p8) }
 0x142   : > { %689 = vst [vmem:[%s279_s12 + $0x10] sm:$0xff] %v914_v33  ;;  %v915_v35 = vpack.c.bf16 %v662_v34, %v661_v32  ;;  %738 = vst [vmem:[%s703_s20] sm:$0xff] (%p1254_p8), %v737_v36 }
 0x143   : > { %v739_v37 = vld [vmem:[%s279_s12 + $0x8] sm:$0xff] (%p1254_p8) }
 0x144   : > { %690 = vst [vmem:[%s279_s12 + $0x18] sm:$0xff] %v915_v35  ;;  %740 = vst [vmem:[%s703_s20 + $0x10] sm:$0xff] (%p1254_p8), %v739_v37 }
 0x149   : > { %v741_v38 = vld [vmem:[%s279_s12 + $0x10] sm:$0xff] }
 0x14a   : > { %742 = vst [vmem:[%s703_s20 + $0x20] sm:$0xff] %v741_v38 }
 0x14b   : > { %v743_v39 = vld [vmem:[%s279_s12 + $0x18] sm:$0xff] }
 0x14c   : > { %744 = vst [vmem:[%s703_s20 + $0x30] sm:$0xff] %v743_v39 }
 0x14d PF: > { %s16_s17 = sadd.s32 1, %s1060_s17   ;;  %s1255_s12 = smov %s1044_s13 }
 0x14e   : > { %p13_p9 = scmp.ge.s32.totalorder %s16_s17, 4   ;;  %s1256_s13 = smov %s1048_s14 }
 0x14f   : > { %s1257_s14 = smov %s1132_s24  ;;  %s1258_s15 = smov %s1056_s16 }
 0x150   : > { %s1259_s16 = smov %s1261_s19  ;;  %15 = sbr.rel (!%p13_p9) target bundleno = 4 (0x4), region = 162 }
 0x157   :  { %760 = vsyncpa [#allocation4], 1 }
 0x158   :  { %762 = vsyncpa [#allocation4 + $0x1], 1 }

// kernel: tile.8
= control target key start
LH: loop header
LB: loop body
LE: loop exit
PB: predicated region body
PF: predicated region fallthrough
CT: control target
= control target key end

     0   :  { %s28_s0 = inlined_call_operand.vmem [shape: f32[3], index: 0, kind: input, shape index: {}]   ;;  %s29_s1 = inlined_call_operand.vmem [shape: f32[16,3], index: 1, kind: output, shape index: {}]  }
   0x1   :  { %v4_v0 = vld [vmem:[%s28_s0] ss:$0 sm:$0xff] }
   0x2   :  { %5 = vst [vmem:[%s29_s1] sm:$0xff] %v4_v0  ;;  %8 = vst [vmem:[%s29_s1 + $0x8] sm:$0xff] %v4_v0 }

// kernel: tile.9
= control target key start
LH: loop header
LB: loop body
LE: loop exit
PB: predicated region body
PF: predicated region fallthrough
CT: control target
= control target key end

     0   :  { %s131_s10 = smov 45   ;;  %s132_s11 = smov 39   ;;  %vm3_vm0 = vcmask 23552   ;;  %vm9_vm1 = vcmask 392552   ;;  %vm15_vm2 = vcmask 367952   ;;  %vm21_vm3 = vcmask 343352   ;;  %s207_s0 = inlined_call_operand.vmem [shape: f32[16,3], index: 0, kind: input, shape index: {}]   ;;  %s208_s1 = inlined_call_operand.vmem [shape: f32[48], index: 1, kind: output, shape index: {}]  }
   0x1   :  { %v101_v0 = vld [vmem:[%s207_s0 + $0xf] sm:$0x1]   ;;  %v103_v1 = vld [vmem:[%s207_s0 + $0xd] sm:$0x1]   ;;  %v102_v2 = vld [vmem:[%s207_s0 + $0xe] sm:$0x1]  }
   0x2   :  { %7 = vrot.lane.b32.xlu0 %v101_v0, %s131_s10  ;;  %19 = vrot.lane.b32.xlu1 %v103_v1, %s132_s11  ;;  %v104_v3 = vld [vmem:[%s207_s0 + $0xc] sm:$0x1]   ;;  %s133_s16 = smov 42   ;;  %s134_s17 = smov 36   ;;  %v105_v4 = vld [vmem:[%s207_s0 + $0xb] sm:$0x1]  }
   0x3   :  { %v106_v5 = vld [vmem:[%s207_s0 + $0xa] sm:$0x1]   ;;  %v2_v6 = vld [vmem:[%s207_s0] sm:$0x1]   ;;  %s135_s24 = smov 33   ;;  %s136_s25 = smov 30  }
   0x4   :  { %4 = vst.msk [vmem:[#allocation0] sm:$0x1] %vm3_vm0, %v2_v6   ;;  %v107_v7 = vld [vmem:[%s207_s0 + $0x9] sm:$0x1]   ;;  %v108_v8 = vld [vmem:[%s207_s0 + $0x8] sm:$0x1]  }
   0x5   :  { %s137_s30 = smov 27   ;;  %s138_s2 = smov 24   ;;  %v109_v9 = vld [vmem:[%s207_s0 + $0x7] sm:$0x1]   ;;  %v110_v10 = vld [vmem:[%s207_s0 + $0x6] sm:$0x1]  }
   0x6   :  { %13 = vrot.lane.b32.xlu0 %v102_v2, %s133_s16  ;;  %25 = vrot.lane.b32.xlu1 %v104_v3, %s134_s17  ;;  %s139_s7 = smov 21   ;;  %s140_s8 = smov 18   ;;  %v111_v11 = vld [vmem:[%s207_s0 + $0x5] sm:$0x1]   ;;  %v112_v12 = vld [vmem:[%s207_s0 + $0x4] sm:$0x1]  }
   0x7   :  { %s141_s13 = smov 15   ;;  %s142_s14 = smov 12   ;;  %v113_v13 = vld [vmem:[%s207_s0 + $0x3] sm:$0x1]   ;;  %v114_v14 = vld [vmem:[%s207_s0 + $0x2] sm:$0x1]  }
   0x8   :  { %s143_s19 = smov 9   ;;  %s144_s20 = smov 6   ;;  %v115_v15 = vld [vmem:[%s207_s0 + $0x1] sm:$0x1]   ;;  %vm27_vm4 = vcmask 318752   ;;  %vm33_vm5 = vcmask 294152  }
   0x9   :  { %s145_s0 = smov 3   ;;  %vm39_vm6 = vcmask 269552   ;;  %vm45_vm7 = vcmask 244952   ;;  %vm51_vm8 = vcmask 220352   ;;  %vm57_vm9 = vcmask 195752  }
   0xa   :  { %31 = vrot.lane.b32.xlu0 %v105_v4, %s135_s24  ;;  %37 = vrot.lane.b32.xlu1 %v106_v5, %s136_s25  ;;  %vm63_vm10 = vcmask 171152   ;;  %vm69_vm11 = vcmask 146552   ;;  %vm75_vm12 = vcmask 121952   ;;  %vm81_vm13 = vcmask 97352  }
   0xb   :  { %vm87_vm14 = vcmask 72752   ;;  %vm93_vm15 = vcmask 48152  }
   0xe   :  { %43 = vrot.lane.b32.xlu0 %v107_v7, %s137_s30  ;;  %49 = vrot.lane.b32.xlu1 %v108_v8, %s138_s2 }
  0x12   :  { %55 = vrot.lane.b32.xlu0 %v109_v9, %s139_s7  ;;  %61 = vrot.lane.b32.xlu1 %v110_v10, %s140_s8 }
  0x16   :  { %67 = vrot.lane.b32.xlu0 %v111_v11, %s141_s13  ;;  %73 = vrot.lane.b32.xlu1 %v112_v12, %s142_s14 }
  0x1a   :  { %79 = vrot.lane.b32.xlu0 %v113_v13, %s143_s19  ;;  %85 = vrot.lane.b32.xlu1 %v114_v14, %s144_s20 }
  0x1e   :  { %91 = vrot.lane.b32.xlu0 %v115_v15, %s145_s0 }
  0x74   :  { %v8_v16 = vpop.permute.xlu0 %7   ;;  %v20_v17 = vpop.permute.xlu1 %19  }
  0x75   :  { %10 = vst.msk [vmem:[#allocation0] sm:$0x1] %vm9_vm1, %v8_v16  }
  0x78   :  { %v14_v18 = vpop.permute.xlu0 %13   ;;  %v26_v19 = vpop.permute.xlu1 %25  }
  0x79   :  { %16 = vst.msk [vmem:[#allocation0] sm:$0x1] %vm15_vm2, %v14_v18  }
  0x7a   :  { %22 = vst.msk [vmem:[#allocation0] sm:$0x1] %vm21_vm3, %v20_v17  }
  0x7b   :  { %28 = vst.msk [vmem:[#allocation0] sm:$0x1] %vm27_vm4, %v26_v19  }
  0x7c   :  { %v32_v20 = vpop.permute.xlu0 %31   ;;  %v38_v21 = vpop.permute.xlu1 %37  }
  0x7d   :  { %34 = vst.msk [vmem:[#allocation0] sm:$0x1] %vm33_vm5, %v32_v20  }
  0x7e   :  { %40 = vst.msk [vmem:[#allocation0] sm:$0x1] %vm39_vm6, %v38_v21  }
  0x80   :  { %v44_v22 = vpop.permute.xlu0 %43   ;;  %v50_v23 = vpop.permute.xlu1 %49  }
  0x81   :  { %46 = vst.msk [vmem:[#allocation0] sm:$0x1] %vm45_vm7, %v44_v22  }
  0x82   :  { %52 = vst.msk [vmem:[#allocation0] sm:$0x1] %vm51_vm8, %v50_v23  }
  0x84   :  { %v56_v24 = vpop.permute.xlu0 %55   ;;  %v62_v25 = vpop.permute.xlu1 %61  }
  0x85   :  { %58 = vst.msk [vmem:[#allocation0] sm:$0x1] %vm57_vm9, %v56_v24  }
  0x86   :  { %64 = vst.msk [vmem:[#allocation0] sm:$0x1] %vm63_vm10, %v62_v25  }
  0x88   :  { %v68_v26 = vpop.permute.xlu0 %67   ;;  %v74_v27 = vpop.permute.xlu1 %73  }
  0x89   :  { %70 = vst.msk [vmem:[#allocation0] sm:$0x1] %vm69_vm11, %v68_v26  }
  0x8a   :  { %76 = vst.msk [vmem:[#allocation0] sm:$0x1] %vm75_vm12, %v74_v27  }
  0x8c   :  { %v80_v28 = vpop.permute.xlu0 %79   ;;  %v86_v29 = vpop.permute.xlu1 %85  }
  0x8d   :  { %82 = vst.msk [vmem:[#allocation0] sm:$0x1] %vm81_vm13, %v80_v28  }
  0x8e   :  { %88 = vst.msk [vmem:[#allocation0] sm:$0x1] %vm87_vm14, %v86_v29  }
  0x90   :  { %v92_v30 = vpop.permute.xlu0 %91  }
  0x91   :  { %94 = vst.msk [vmem:[#allocation0] sm:$0x1] %vm93_vm15, %v92_v30  }
  0x98   :  { %v98_v31 = vld [vmem:[#allocation0] sm:$0x1] }
  0x99   :  { %100 = vst [vmem:[%s208_s1] sm:$0x1] %v98_v31 }

// kernel: convae_forward.3
= control target key start
LH: loop header
LB: loop body
LE: loop exit
PB: predicated region body
PF: predicated region fallthrough
CT: control target
= control target key end

     0   :  { %s22558_s17 = smov 0   ;;  %s28856_s0 = inlined_call_operand.vmem [shape: bf16[32,512], index: 0, kind: input, shape index: {}]   ;;  %s28857_s1 = inlined_call_operand.vmem [shape: bf16[9,512,256], index: 1, kind: input, shape index: {}]   ;;  %s28858_s2 = inlined_call_operand.vmem [shape: f32[1,256], index: 2, kind: input, shape index: {}]   ;;  %s28859_s3 = inlined_call_operand.vmem [shape: bf16[9,256,128], index: 3, kind: input, shape index: {}]   ;;  %s28860_s4 = inlined_call_operand.vmem [shape: f32[1,128], index: 4, kind: input, shape index: {}]   ;;  %s28861_s5 = inlined_call_operand.vmem [shape: bf16[9,128,256], index: 5, kind: input, shape index: {}]   ;;  %s28862_s6 = inlined_call_operand.vmem [shape: f32[1,256], index: 6, kind: input, shape index: {}]   ;;  %s28863_s7 = inlined_call_operand.vmem [shape: bf16[9,256,512], index: 7, kind: input, shape index: {}]   ;;  %s28864_s8 = inlined_call_operand.vmem [shape: f32[1,512], index: 8, kind: input, shape index: {}]   ;;  %s28865_s9 = inlined_call_operand.vmem [shape: bf16[4,512,128], index: 9, kind: input, shape index: {}]   ;;  %s28866_s10 = inlined_call_operand.vmem [shape: f32[1,128], index: 10, kind: input, shape index: {}]   ;;  %s28867_s11 = inlined_call_operand.vmem [shape: f32[32,128], index: 11, kind: output, shape index: {}]  }
   0x1 LB: > { %s16163_s18 = sadd.s32 4294967295, %s22495_s17   ;;  %p16167_p0 = scmp.ge.s32.totalorder %s22495_s17, 1  ;;  %s22495_s17 = sphi %s22558_s17, %s21_s17  }
   0x2   : > { %p339_p1 = scmp.lt.s32.totalorder %s22495_s17, 3 }
   0x4   : > { %p340_p2 = pnand %p16167_p0, %p339_p1 }
   0x6   : > { %343 = sbr.rel (%p340_p2) target bundleno = 3985 (0xf91), region = 64 }
   0xd   : > { %v20179_v0 = vld [vmem:[%s28857_s1 + $0x204] ss:$8 sps:$4 sm:$0xff]   ;;  %v20181_v1 = vld [vmem:[%s28857_s1 + $0x200] ss:$8 sps:$4 sm:$0xff]   ;;  %v22497_v2 = vmov 0   ;;  %s16168_s29 = sshll.u32 %s16163_s18, 1 }
   0xe   : > { %452 = vst [vmem:[#allocation2 + $0x8] sm:$0xff] %v22497_v2  ;;  %456 = vst [vmem:[#allocation2 + $0x28] sm:$0xff] %v22497_v2  ;;  %1061 = vmatprep.subr.bf16.mxu0 %v20179_v0  ;;  %v20182_v3 = vld [vmem:[%s28857_s1 + $0x214] ss:$8 sps:$4 sm:$0xff]   ;;  %v20184_v4 = vld [vmem:[%s28857_s1 + $0x210] ss:$8 sps:$4 sm:$0xff]  }
   0xf   : > { %451 = vst [vmem:[#allocation2] sm:$0xff] %v22497_v2  ;;  %453 = vst [vmem:[#allocation2 + $0x10] sm:$0xff] %v22497_v2  ;;  %1062 = vmatpush1.bf16.msra.mxu0 %v20181_v1  ;;  %v20185_v5 = vld [vmem:[%s28857_s1 + $0x224] ss:$8 sps:$4 sm:$0xff]   ;;  %v20187_v6 = vld [vmem:[%s28857_s1 + $0x220] ss:$8 sps:$4 sm:$0xff]  }
  0x10   : > { %454 = vst [vmem:[#allocation2 + $0x18] sm:$0xff] %v22497_v2  ;;  %455 = vst [vmem:[#allocation2 + $0x20] sm:$0xff] %v22497_v2  ;;  %1063 = vmatprep.subr.bf16.mxu0 %v20182_v3  ;;  %p381_p3 = scmp.lt.s32.totalorder %s16168_s29, 3  ;;  %v20188_v7 = vld [vmem:[%s28857_s1 + $0x234] ss:$8 sps:$4 sm:$0xff]   ;;  %vm712_vm0 = vcmask 1043456  }
  0x11   : > { %457 = vst [vmem:[#allocation2 + $0x30] sm:$0xff] %v22497_v2  ;;  %458 = vst [vmem:[#allocation2 + $0x38] sm:$0xff] %v22497_v2  ;;  %v20190_v8 = vld [vmem:[%s28857_s1 + $0x230] ss:$8 sps:$4 sm:$0xff]   ;;  %v20191_v9 = vld [vmem:[%s28857_s1 + $0x244] ss:$8 sps:$4 sm:$0xff]  }
  0x12   : > { %459 = vst [vmem:[#allocation2 + $0x40] sm:$0xff] %v22497_v2  ;;  %460 = vst [vmem:[#allocation2 + $0x48] sm:$0xff] %v22497_v2  ;;  %s28909_s29 = smov (!%p381_p3, %s16168_s29), 3  ;;  %v20193_v10 = vld [vmem:[%s28857_s1 + $0x240] ss:$8 sps:$4 sm:$0xff]  }
  0x13   : > { %461 = vst [vmem:[#allocation2 + $0x50] sm:$0xff] %v22497_v2  ;;  %462 = vst [vmem:[#allocation2 + $0x58] sm:$0xff] %v22497_v2  ;;  %1064 = vmatpush1.bf16.msra.mxu0 %v20184_v4  ;;  %s19365_s22 = sshll.u32 %s28909_s29, 4  ;;  %v20194_v11 = vld [vmem:[%s28857_s1 + $0x254] ss:$8 sps:$4 sm:$0xff]   ;;  %s16172_s23 = sshll.u32 %s28909_s29, 3 }
  0x14   : > { %463 = vst [vmem:[#allocation2 + $0x60] sm:$0xff] %v22497_v2  ;;  %464 = vst [vmem:[#allocation2 + $0x68] sm:$0xff] %v22497_v2  ;;  %1065 = vmatprep.subr.bf16.mxu0 %v20185_v5  ;;  %s22607_s27 = scalar_lea.vmem %s28856_s0, %s19365_s22  ;;  %v20196_v12 = vld [vmem:[%s28857_s1 + $0x250] ss:$8 sps:$4 sm:$0xff]   ;;  %v20197_v13 = vld [vmem:[%s28857_s1 + $0x264] ss:$8 sps:$4 sm:$0xff]   ;;  %s391_s26 = scalar_lea.vmem %s28867_s11, %s16172_s23 }
  0x15   : > { %465 = vst [vmem:[#allocation2 + $0x70] sm:$0xff] %v22497_v2  ;;  %466 = vst [vmem:[#allocation2 + $0x78] sm:$0xff] %v22497_v2  ;;  %v467_v14 = vld [vmem:[%s22607_s27] sm:$0x33]  ;;  %v487_v15 = vld [vmem:[%s22607_s27] sm:$0xcc] }
  0x16   : > { %5762 = vst [vmem:[#allocation3] sm:$0xff] %v22497_v2  ;;  %5763 = vst [vmem:[#allocation3 + $0x8] sm:$0xff] %v22497_v2  ;;  %v16174_v16 = vcombine.high %v467_v14, %v467_v14  ;;  %v16178_v17 = vcombine.high %v487_v15, %v487_v15  ;;  %v16173_v18 = vcombine.low %v467_v14, %v467_v14  ;;  %v20199_v20 = vld [vmem:[%s28857_s1 + $0x260] ss:$8 sps:$4 sm:$0xff]   ;;  %v20200_v21 = vld [vmem:[%s28857_s1 + $0x274] ss:$8 sps:$4 sm:$0xff]  }
  0x17   : > { %5774 = vst [vmem:[#allocation3 + $0x60] sm:$0xff] %v22497_v2  ;;  %5775 = vst [vmem:[#allocation3 + $0x68] sm:$0xff] %v22497_v2  ;;  %1066 = vmatpush1.bf16.msra.mxu0 %v20187_v6  ;;  %v16177_v19 = vcombine.low %v487_v15, %v487_v15  ;;  %v20202_v24 = vld [vmem:[%s28857_s1 + $0x270] ss:$8 sps:$4 sm:$0xff]   ;;  %v20203_v25 = vld [vmem:[%s28857_s1 + $0x284] ss:$8 sps:$4 sm:$0xff]  }
  0x18   : > { %1067 = vmatprep.subr.bf16.mxu0 %v20188_v7  ;;  %484 = vst [vmem:[#allocation2 + $0x28] sm:$0x3] %v16174_v16  ;;  %v500_v22 = vrot.slane %v16178_v17, 6  ;;  %483 = vst [vmem:[#allocation2 + $0x20] sm:$0x3] %v16173_v18 }
  0x19   : > { %v499_v23 = vrot.slane %v16177_v19, 6  ;;  %v632_v26 = vld [vmem:[#allocation2 + $0x8] sm:$0xf0]  ;;  %v20205_v27 = vld [vmem:[%s28857_s1 + $0x280] ss:$8 sps:$4 sm:$0xff]  }
  0x1a   : > { %508 = vst [vmem:[#allocation2 + $0x28] sm:$0x30] %v500_v22  ;;  %v20206_v28 = vld [vmem:[%s28857_s1 + $0x294] ss:$8 sps:$4 sm:$0xff]   ;;  %v716_v29 = vrot.slane %v632_v26, 4 }
  0x1b   : > { %1068 = vmatpush1.bf16.msra.mxu0 %v20190_v8  ;;  %507 = vst [vmem:[#allocation2 + $0x20] sm:$0x30] %v499_v23  ;;  %v20208_v32 = vld [vmem:[%s28857_s1 + $0x290] ss:$8 sps:$4 sm:$0xff]   ;;  %v20209_v33 = vld [vmem:[%s28857_s1 + $0x2a4] ss:$8 sps:$4 sm:$0xff]  }
  0x1c   : > { %1069 = vmatprep.subr.bf16.mxu0 %v20191_v9  ;;  %v20211_v35 = vld [vmem:[%s28857_s1 + $0x2a0] ss:$8 sps:$4 sm:$0xff]   ;;  %v20212_v36 = vld [vmem:[%s28857_s1 + $0x2b4] ss:$8 sps:$4 sm:$0xff]   ;;  %v20214_v38 = vld [vmem:[%s28857_s1 + $0x2b0] ss:$8 sps:$4 sm:$0xff]  }
  0x1d   : > { %v511_v37 = vld [vmem:[%s22607_s27 + $0x10] sm:$0x33]  ;;  %v20215_v41 = vld [vmem:[%s28857_s1 + $0x2c4] ss:$8 sps:$4 sm:$0xff]   ;;  %v20217_v48 = vld [vmem:[%s28857_s1 + $0x2c0] ss:$8 sps:$4 sm:$0xff]  }
  0x1e   : > { %v16182_v39 = vcombine.high %v511_v37, %v511_v37  ;;  %v16181_v40 = vcombine.low %v511_v37, %v511_v37  ;;  %v468_v42 = vld [vmem:[%s22607_s27 + $0x8] sm:$0x33]  ;;  %v488_v43 = vld [vmem:[%s22607_s27 + $0x8] sm:$0xcc]  ;;  %v20218_v49 = vld [vmem:[%s28857_s1 + $0x2d4] ss:$8 sps:$4 sm:$0xff]  }
  0x1f   : > { %1070 = vmatpush1.bf16.msra.mxu0 %v20193_v10  ;;  %v16175_v44 = vcombine.low %v468_v42, %v468_v42  ;;  %v16176_v45 = vcombine.high %v468_v42, %v468_v42  ;;  %v16179_v46 = vcombine.low %v488_v43, %v488_v43  ;;  %v16180_v47 = vcombine.high %v488_v43, %v488_v43  ;;  %v20220_v52 = vld [vmem:[%s28857_s1 + $0x2d0] ss:$8 sps:$4 sm:$0xff]   ;;  %v20221_v53 = vld [vmem:[%s28857_s1 + $0x2e4] ss:$8 sps:$4 sm:$0xff]   ;;  %v20223_v54 = vld [vmem:[%s28857_s1 + $0x2e0] ss:$8 sps:$4 sm:$0xff]  }
  0x20   : > { %1071 = vmatprep.subr.bf16.mxu0 %v20194_v11  ;;  %528 = vst [vmem:[#allocation2 + $0x48] sm:$0x3] %v16182_v39  ;;  %527 = vst [vmem:[#allocation2 + $0x40] sm:$0x3] %v16181_v40  ;;  %v20224_v55 = vld [vmem:[%s28857_s1 + $0x2f4] ss:$8 sps:$4 sm:$0xff]  }
  0x21   : > { %v22635_v30 = vld [vmem:[#allocation2 + $0x28] sm:$0xff]  ;;  %486 = vst [vmem:[#allocation2 + $0x38] sm:$0x3] %v16176_v45  ;;  %v501_v50 = vrot.slane %v16179_v46, 6  ;;  %v502_v51 = vrot.slane %v16180_v47, 6 }
  0x22   : > { %v717_v31 = vrot.slane %v22635_v30, 4  ;;  %485 = vst [vmem:[#allocation2 + $0x30] sm:$0x3] %v16175_v44  ;;  %v22678_v56 = vld [vmem:[#allocation2 + $0x20] sm:$0xff]  ;;  %v20226_v59 = vld [vmem:[%s28857_s1 + $0x2f0] ss:$8 sps:$4 sm:$0xff]  }
  0x23   : > { %1072 = vmatpush1.bf16.msra.mxu0 %v20196_v12  ;;  %510 = vst [vmem:[#allocation2 + $0x38] sm:$0x30] %v502_v51  ;;  %509 = vst [vmem:[#allocation2 + $0x30] sm:$0x30] %v501_v50  ;;  %v631_v57 = vld [vmem:[#allocation2] sm:$0xf0] }
  0x24   : > { %1073 = vmatprep.subr.bf16.mxu0 %v20197_v13  ;;  %v718_v34 = vsel %vm712_vm0, %v716_v29, %v717_v31  ;;  %v713_v60 = vrot.slane %v631_v57, 4  ;;  %v714_v61 = vrot.slane %v22678_v56, 4  ;;  %v20231_v62 = vld [vmem:[%s28857_s1 + $0x304] ss:$8 sps:$4 sm:$0xff]   ;;  %v20229_v0 = vld [vmem:[%s28857_s1 + $0x300] ss:$8 sps:$4 sm:$0xff]  }
  0x25   : > { %1093 = vmatprep.mubr.bf16.mxu0 %v718_v34  ;;  %v20236_v2 = vld [vmem:[%s28857_s1 + $0x314] ss:$8 sps:$4 sm:$0xff]   ;;  %v20234_v7 = vld [vmem:[%s28857_s1 + $0x310] ss:$8 sps:$4 sm:$0xff]   ;;  %v20239_v10 = vld [vmem:[%s28857_s1 + $0x324] ss:$8 sps:$4 sm:$0xff]  }
  0x26   : > { %v715_v1 = vsel %vm712_vm0, %v713_v60, %v714_v61  ;;  %v634_v6 = vld [vmem:[#allocation2 + $0x18] sm:$0xf0]  ;;  %v20237_v15 = vld [vmem:[%s28857_s1 + $0x320] ss:$8 sps:$4 sm:$0xff]   ;;  %v20240_v19 = vld [vmem:[%s28857_s1 + $0x330] ss:$8 sps:$4 sm:$0xff]  }
  0x27   : > { %1074 = vmatpush1.bf16.msra.mxu0 %v20199_v20  ;;  %v22680_v58 = vld [vmem:[#allocation2 + $0x48] sm:$0xf]  ;;  %v22698_v4 = vld [vmem:[#allocation2 + $0x40] sm:$0xf]  ;;  %v512_v9 = vld [vmem:[%s22607_s27 + $0x18] sm:$0x33] }
  0x28   : > { %1075 = vmatprep.subr.bf16.mxu0 %v20200_v21  ;;  %v727_v63 = vrot.slane %v22680_v58, 4  ;;  %v725_v8 = vrot.slane %v22698_v4, 4  ;;  %v722_v11 = vrot.slane %v634_v6, 4  ;;  %v16184_v13 = vcombine.high %v512_v9, %v512_v9  ;;  %v20242_v17 = vld [vmem:[%s28857_s1 + $0x334] ss:$8 sps:$4 sm:$0xff]  }
  0x29   : > { %v16183_v14 = vcombine.low %v512_v9, %v512_v9  ;;  %v20245_v20 = vld [vmem:[%s28857_s1 + $0x344] ss:$8 sps:$4 sm:$0xff]   ;;  %v20243_v21 = vld [vmem:[%s28857_s1 + $0x340] ss:$8 sps:$4 sm:$0xff]   ;;  %v20248_v22 = vld [vmem:[%s28857_s1 + $0x354] ss:$8 sps:$4 sm:$0xff]  }
  0x2a   : > { %v728_v3 = vsel %vm712_vm0, %v717_v31, %v727_v63  ;;  %v22700_v5 = vld [vmem:[#allocation2 + $0x38] sm:$0xff]  ;;  %530 = vst [vmem:[#allocation2 + $0x58] sm:$0x3] %v16184_v13  ;;  %v726_v16 = vsel %vm712_vm0, %v714_v61, %v725_v8  ;;  %v20255_v29 = vld [vmem:[%s28857_s1 + $0x380] ss:$8 sps:$4 sm:$0xff]   ;;  %v22793_v44 = vld [vmem:[#allocation2 + $0x30] sm:$0xff] }
  0x2b   : > { %1076 = vmatpush1.bf16.msra.mxu0 %v20202_v24  ;;  %v723_v12 = vrot.slane %v22700_v5, 4  ;;  %529 = vst [vmem:[#allocation2 + $0x50] sm:$0x3] %v16183_v14  ;;  %v20246_v23 = vld [vmem:[%s28857_s1 + $0x350] ss:$8 sps:$4 sm:$0xff]   ;;  %v720_v50 = vrot.slane %v22793_v44, 4 }
  0x2c   : > { %1077 = vmatprep.subr.bf16.mxu0 %v20203_v25  ;;  %v20251_v24 = vld [vmem:[%s28857_s1 + $0x364] ss:$8 sps:$4 sm:$0xff]   ;;  %v20249_v25 = vld [vmem:[%s28857_s1 + $0x360] ss:$8 sps:$4 sm:$0xff]   ;;  %v20254_v26 = vld [vmem:[%s28857_s1 + $0x374] ss:$8 sps:$4 sm:$0xff]  }
  0x2d   : > { %v724_v18 = vsel %vm712_vm0, %v722_v11, %v723_v12  ;;  %v20260_v31 = vld [vmem:[%s28857_s1 + $0x394] ss:$8 sps:$4 sm:$0xff]   ;;  %v20261_v34 = vld [vmem:[%s28857_s1 + $0x3a0] ss:$8 sps:$4 sm:$0xff]   ;;  %v20269_v37 = vld [vmem:[%s28857_s1 + $0x3c4] ss:$8 sps:$4 sm:$0xff]  }
  0x2e   : > { %v20272_v39 = vld [vmem:[%s28857_s1 + $0x3d4] ss:$8 sps:$4 sm:$0xff]   ;;  %v20270_v40 = vld [vmem:[%s28857_s1 + $0x3d0] ss:$8 sps:$4 sm:$0xff]   ;;  %v20274_v42 = vld [vmem:[%s28857_s1 + $0x3e0] ss:$8 sps:$4 sm:$0xff]  }
  0x2f   : > { %1078 = vmatpush1.bf16.msra.mxu0 %v20205_v27  ;;  %v20252_v27 = vld [vmem:[%s28857_s1 + $0x370] ss:$8 sps:$4 sm:$0xff]   ;;  %v20280_v43 = vld [vmem:[%s28857_s1 + $0x3f4] ss:$8 sps:$4 sm:$0xff]   ;;  %v556_v47 = vld [vmem:[#allocation2 + $0x8] sm:$0xf8] }
  0x30   : > { %1079 = vmatprep.subr.bf16.mxu0 %v20206_v28  ;;  %v20257_v28 = vld [vmem:[%s28857_s1 + $0x384] ss:$8 sps:$4 sm:$0xff]   ;;  %v633_v45 = vld [vmem:[#allocation2 + $0x10] sm:$0xf0]  ;;  %v22802_v51 = vshrl.u32 %v22635_v30, 16  ;;  %v22809_v57 = vshll.u32 %v22635_v30, 16 }
  0x31   : > { %v22795_v46 = vld [vmem:[#allocation2 + $0x58] sm:$0xf]  ;;  %v20290_v61 = vld [vmem:[%s28857_s1 + $0x14] ss:$8 sps:$4 sm:$0xff]   ;;  %v20293_v6 = vld [vmem:[%s28857_s1 + $0x24] ss:$8 sps:$4 sm:$0xff]  }
  0x32   : > { %v1196_v63 = vrot.slane %v22802_v51, 3  ;;  %vm1167_vm1 = vsmask.f32 4352  ;;  %v20296_v11 = vld [vmem:[%s28857_s1 + $0x34] ss:$8 sps:$4 sm:$0xff]  }
  0x33   : > { %1080 = vmatpush1.bf16.msra.mxu0 %v20208_v32  ;;  %v20258_v32 = vld [vmem:[%s28857_s1 + $0x390] ss:$8 sps:$4 sm:$0xff]   ;;  %vm1775_vm2 = vsmask.f32 3328  ;;  %vm2375_vm3 = vsmask.f32 256 }
  0x34   : > { %1081 = vmatprep.subr.bf16.mxu0 %v20209_v33  ;;  %v20263_v33 = vld [vmem:[%s28857_s1 + $0x3a4] ss:$8 sps:$4 sm:$0xff]   ;;  %v20294_v14 = vld [vmem:[%s28857_s1 + $0x30] ss:$8 sps:$4 sm:$0xff]   ;;  %vm3454_vm4 = vsmask.f32 7424 }
  0x37   : > { %1082 = vmatpush1.bf16.msra.mxu0 %v20211_v35  ;;  %v20266_v35 = vld [vmem:[%s28857_s1 + $0x3b4] ss:$8 sps:$4 sm:$0xff]  }
  0x38   : > { %1083 = vmatprep.subr.bf16.mxu0 %v20212_v36  ;;  %v20264_v36 = vld [vmem:[%s28857_s1 + $0x3b0] ss:$8 sps:$4 sm:$0xff]  }
  0x3b   : > { %1084 = vmatpush1.bf16.msra.mxu0 %v20214_v38  ;;  %v20267_v38 = vld [vmem:[%s28857_s1 + $0x3c0] ss:$8 sps:$4 sm:$0xff]  }
  0x3c   : > { %1085 = vmatprep.subr.bf16.mxu0 %v20215_v41  ;;  %v20276_v41 = vld [vmem:[%s28857_s1 + $0x3e4] ss:$8 sps:$4 sm:$0xff]  }
  0x3f   : > { %1086 = vmatpush1.bf16.msra.mxu0 %v20217_v48  ;;  %v20278_v48 = vld [vmem:[%s28857_s1 + $0x3f0] ss:$8 sps:$4 sm:$0xff]  }
  0x40   : > { %1087 = vmatprep.subr.bf16.mxu0 %v20218_v49  ;;  %v719_v49 = vrot.slane %v633_v45, 4  ;;  %v20334_v45 = vld [vmem:[%s28857_s1 + $0xf4] ss:$8 sps:$4 sm:$0xff]  }
  0x42   : > { %v721_v60 = vsel %vm712_vm0, %v719_v49, %v720_v50 }
  0x43   : > { %1088 = vmatpush1.bf16.msra.mxu0 %v20220_v52  ;;  %v20287_v52 = vld [vmem:[%s28857_s1 + $0x4] ss:$8 sps:$4 sm:$0xff]  }
  0x44   : > { %1089 = vmatprep.subr.bf16.mxu0 %v20221_v53  ;;  %v731_v53 = vrot.slane %v22795_v46, 4 }
  0x46   : > { %v732_v30 = vsel %vm712_vm0, %v723_v12, %v731_v53 }
  0x47   : > { %1090 = vmatpush1.bf16.msra.mxu0 %v20223_v54  ;;  %v1186_v54 = vshrl.u32 %v556_v47, 16 }
  0x48   : > { %1091 = vmatprep.subr.bf16.mxu0 %v20224_v55  ;;  %v1189_v55 = vshll.u32 %v556_v47, 16 }
  0x4b   : > { %1092 = vmatpush1.bf16.msra.mxu0 %v20226_v59  ;;  %v20285_v59 = vld [vmem:[%s28857_s1] ss:$8 sps:$4 sm:$0xff]  }
  0x4c   : > { %1114 = vmatprep.subr.bf16.mxu0 %v20231_v62  ;;  %v22818_v62 = vld [vmem:[#allocation2 + $0x50] sm:$0xf] }
  0x4e   : > { %1094 = vmatmul.mubr.bf16.vlgmr.msra.gmra.mrb[0].mxu0 %v715_v1  ;;  %v1191_v1 = vrot.slane %v1189_v55, 4 }
  0x4f   : > { %1115 = vmatpush1.bf16.msra.mxu0 %v20229_v0  ;;  %1103 = vmatprep.mubr.bf16.mxu0 %v728_v3  ;;  %v1188_v0 = vrot.slane %v1186_v54, 3  ;;  %v20288_v3 = vld [vmem:[%s28857_s1 + $0x10] ss:$8 sps:$4 sm:$0xff]  }
  0x50   : > { %1116 = vmatprep.subr.bf16.mxu0 %v20236_v2  ;;  %v1199_v2 = vrot.slane %v22809_v57, 4 }
  0x51   : > { %v1192_v8 = vor.u32 %v1191_v1, %v1188_v0 }
  0x52   : > { %v22832_v9 = vor.u32 %v1199_v2, %v1196_v63  ;;  %v1240_v63 = vshll.u32 %v22698_v4, 16  ;;  %v22934_v2 = vshrl.u32 %v22700_v5, 16 }
  0x53   : > { %1117 = vmatpush1.bf16.msra.mxu0 %v20234_v7  ;;  %v729_v7 = vrot.slane %v22818_v62, 4 }
  0x54   : > { %1118 = vmatprep.subr.bf16.mxu0 %v20239_v10  ;;  %v20291_v10 = vld [vmem:[%s28857_s1 + $0x20] ss:$8 sps:$4 sm:$0xff]   ;;  %v1201_v13 = vsel %vm1167_vm1, %v1192_v8, %v22832_v9 }
  0x55   : > { %v730_v12 = vsel %vm712_vm0, %v720_v50, %v729_v7 }
  0x56   : > { %1104 = vmatmul.mubr.bf16.gmra.mrb[4].mxu0 %v726_v16  ;;  %v20297_v16 = vld [vmem:[%s28857_s1 + $0x40] ss:$8 sps:$4 sm:$0xff]  }
  0x57   : > { %1119 = vmatpush1.bf16.msra.mxu0 %v20237_v15  ;;  %1146 = vmatprep.mubr.bf16.mxu0 %v724_v18  ;;  %v20299_v15 = vld [vmem:[%s28857_s1 + $0x44] ss:$8 sps:$4 sm:$0xff]   ;;  %v20300_v18 = vld [vmem:[%s28857_s1 + $0x50] ss:$8 sps:$4 sm:$0xff]  }
  0x58   : > { %1120 = vmatprep.subr.bf16.mxu0 %v20242_v17  ;;  %v20302_v17 = vld [vmem:[%s28857_s1 + $0x54] ss:$8 sps:$4 sm:$0xff]  }
  0x5b   : > { %1121 = vmatpush1.bf16.msra.mxu0 %v20240_v19  ;;  %v20305_v19 = vld [vmem:[%s28857_s1 + $0x64] ss:$8 sps:$4 sm:$0xff]  }
  0x5c   : > { %1122 = vmatprep.subr.bf16.mxu0 %v20245_v20  ;;  %v20303_v20 = vld [vmem:[%s28857_s1 + $0x60] ss:$8 sps:$4 sm:$0xff]  }
  0x5f   : > { %1123 = vmatpush1.bf16.msra.mxu0 %v20243_v21  ;;  %v20308_v21 = vld [vmem:[%s28857_s1 + $0x74] ss:$8 sps:$4 sm:$0xff]  }
  0x60   : > { %1124 = vmatprep.subr.bf16.mxu0 %v20248_v22  ;;  %v20306_v22 = vld [vmem:[%s28857_s1 + $0x70] ss:$8 sps:$4 sm:$0xff]  }
  0x63   : > { %1125 = vmatpush1.bf16.msra.mxu0 %v20246_v23  ;;  %v20311_v23 = vld [vmem:[%s28857_s1 + $0x84] ss:$8 sps:$4 sm:$0xff]  }
  0x64   : > { %1126 = vmatprep.subr.bf16.mxu0 %v20251_v24  ;;  %v20309_v24 = vld [vmem:[%s28857_s1 + $0x80] ss:$8 sps:$4 sm:$0xff]  }
  0x67   : > { %1127 = vmatpush1.bf16.msra.mxu0 %v20249_v25  ;;  %v20314_v25 = vld [vmem:[%s28857_s1 + $0x94] ss:$8 sps:$4 sm:$0xff]  }
  0x68   : > { %1128 = vmatprep.subr.bf16.mxu0 %v20254_v26  ;;  %v20312_v26 = vld [vmem:[%s28857_s1 + $0x90] ss:$8 sps:$4 sm:$0xff]  }
  0x6b   : > { %1129 = vmatpush1.bf16.msra.mxu0 %v20252_v27  ;;  %v20317_v27 = vld [vmem:[%s28857_s1 + $0xa4] ss:$8 sps:$4 sm:$0xff]  }
  0x6c   : > { %1130 = vmatprep.subr.bf16.mxu0 %v20257_v28  ;;  %v20315_v28 = vld [vmem:[%s28857_s1 + $0xa0] ss:$8 sps:$4 sm:$0xff]  }
  0x6f   : > { %1131 = vmatpush1.bf16.msra.mxu0 %v20255_v29  ;;  %v20320_v29 = vld [vmem:[%s28857_s1 + $0xb4] ss:$8 sps:$4 sm:$0xff]  }
  0x70   : > { %1132 = vmatprep.subr.bf16.mxu0 %v20260_v31  ;;  %v20318_v31 = vld [vmem:[%s28857_s1 + $0xb0] ss:$8 sps:$4 sm:$0xff]  }
  0x73   : > { %1133 = vmatpush1.bf16.msra.mxu0 %v20258_v32  ;;  %v20323_v32 = vld [vmem:[%s28857_s1 + $0xc4] ss:$8 sps:$4 sm:$0xff]  }
  0x74   : > { %1134 = vmatprep.subr.bf16.mxu0 %v20263_v33  ;;  %v20321_v33 = vld [vmem:[%s28857_s1 + $0xc0] ss:$8 sps:$4 sm:$0xff]  }
  0x77   : > { %1135 = vmatpush1.bf16.msra.mxu0 %v20261_v34  ;;  %v20326_v34 = vld [vmem:[%s28857_s1 + $0xd4] ss:$8 sps:$4 sm:$0xff]  }
  0x78   : > { %1136 = vmatprep.subr.bf16.mxu0 %v20266_v35  ;;  %v555_v35 = vld [vmem:[#allocation2] sm:$0xf8] }
  0x7b   : > { %1137 = vmatpush1.bf16.msra.mxu0 %v20264_v36  ;;  %v22904_v36 = vshrl.u32 %v22678_v56, 16 }
  0x7c   : > { %1138 = vmatprep.subr.bf16.mxu0 %v20269_v37  ;;  %v22907_v37 = vshll.u32 %v22678_v56, 16  ;;  %v20328_v56 = vld [vmem:[%s28857_s1 + $0xe0] ss:$8 sps:$4 sm:$0xff]  }
  0x7d   : > { %v1179_v47 = vrot.slane %v22904_v36, 3 }
  0x7f   : > { %1139 = vmatpush1.bf16.msra.mxu0 %v20267_v38  ;;  %v20324_v38 = vld [vmem:[%s28857_s1 + $0xd0] ss:$8 sps:$4 sm:$0xff]  }
  0x80   : > { %1140 = vmatprep.subr.bf16.mxu0 %v20272_v39  ;;  %v20330_v39 = vld [vmem:[%s28857_s1 + $0xe4] ss:$8 sps:$4 sm:$0xff]  }
  0x83   : > { %1141 = vmatpush1.bf16.msra.mxu0 %v20270_v40  ;;  %v1169_v40 = vshrl.u32 %v555_v35, 16 }
  0x84   : > { %1142 = vmatprep.subr.bf16.mxu0 %v20276_v41  ;;  %v1172_v41 = vshll.u32 %v555_v35, 16  ;;  %v20364_v35 = vld [vmem:[%s28857_s1 + $0x194] ss:$8 sps:$4 sm:$0xff]  }
  0x85   : > { %v1171_v49 = vrot.slane %v1169_v40, 3  ;;  %v531_v40 = vld [vmem:[%s22607_s27 + $0x10] sm:$0xcc] }
  0x86   : > { %v1174_v50 = vrot.slane %v1172_v41, 4  ;;  %v20365_v41 = vld [vmem:[%s28857_s1 + $0x1a0] ss:$8 sps:$4 sm:$0xff]  }
  0x87   : > { %1143 = vmatpush1.bf16.msra.mxu0 %v20274_v42  ;;  %v1246_v42 = vshrl.u32 %v22680_v58, 16 }
  0x88   : > { %1144 = vmatprep.subr.bf16.mxu0 %v20280_v43  ;;  %v1249_v43 = vshll.u32 %v22680_v58, 16  ;;  %v20332_v58 = vld [vmem:[%s28857_s1 + $0xf0] ss:$8 sps:$4 sm:$0xff]  }
  0x89   : > { %v1248_v53 = vrot.slane %v1246_v42, 3  ;;  %v20370_v42 = vld [vmem:[%s28857_s1 + $0x1b4] ss:$8 sps:$4 sm:$0xff]  }
  0x8a   : > { %v1251_v54 = vrot.slane %v1249_v43, 4  ;;  %v16186_v43 = vcombine.high %v531_v40, %v531_v40 }
  0x8b   : > { %1145 = vmatpush1.bf16.msra.mxu0 %v20278_v48  ;;  %v1182_v48 = vrot.slane %v22907_v37, 4 }
  0x8c   : > { %1600 = vmatprep.subr.bf16.mxu0 %v20287_v52  ;;  %v558_v52 = vld [vmem:[#allocation2 + $0x18] sm:$0xf8]  ;;  %v1252_v0 = vor.u32 %v1251_v54, %v1248_v53  ;;  %v557_v53 = vld [vmem:[#allocation2 + $0x10] sm:$0xf8]  ;;  %v23029_v54 = vshrl.u32 %v22793_v44, 16 }
  0x8d   : > { %v1183_v55 = vor.u32 %v1182_v48, %v1179_v47  ;;  %v1223_v1 = vshll.u32 %v558_v52, 16  ;;  %v20368_v48 = vld [vmem:[%s28857_s1 + $0x1b0] ss:$8 sps:$4 sm:$0xff]  }
  0x8e   : > { %1147 = vmatmul.mubr.bf16.vlgmr.msra.gmra.mrb[0].mxu0 %v721_v60  ;;  %v1175_v60 = vor.u32 %v1174_v50, %v1171_v49  ;;  %v20373_v49 = vld [vmem:[%s28857_s1 + $0x1c4] ss:$8 sps:$4 sm:$0xff]   ;;  %v20371_v50 = vld [vmem:[%s28857_s1 + $0x1c0] ss:$8 sps:$4 sm:$0xff]  }
  0x8f   : > { %1601 = vmatpush1.bf16.msra.mxu0 %v20285_v59  ;;  %1156 = vmatprep.mubr.bf16.mxu0 %v732_v30  ;;  %v20337_v59 = vld [vmem:[%s28857_s1 + $0x104] ss:$8 sps:$4 sm:$0xff]   ;;  %v1220_v30 = vshrl.u32 %v558_v52, 16  ;;  %v20376_v52 = vld [vmem:[%s28857_s1 + $0x1d4] ss:$8 sps:$4 sm:$0xff]  }
  0x90   : > { %1602 = vmatprep.subr.bf16.mxu0 %v20290_v61  ;;  %v1237_v61 = vshrl.u32 %v22698_v4, 16  ;;  %v1184_v7 = vsel %vm1167_vm1, %v1175_v60, %v1183_v55  ;;  %v20340_v4 = vld [vmem:[%s28857_s1 + $0x114] ss:$8 sps:$4 sm:$0xff]   ;;  %v1206_v60 = vshll.u32 %v557_v53, 16 }
  0x92   : > { %v1239_v8 = vrot.slane %v1237_v61, 3  ;;  %v20379_v61 = vld [vmem:[%s28857_s1 + $0x1e4] ss:$8 sps:$4 sm:$0xff]  }
  0x93   : > { %1603 = vmatpush1.bf16.msra.mxu0 %v20288_v3  ;;  %v22937_v3 = vshll.u32 %v22700_v5, 16  ;;  %v1225_v5 = vrot.slane %v1223_v1, 4  ;;  %v20377_v1 = vld [vmem:[%s28857_s1 + $0x1e0] ss:$8 sps:$4 sm:$0xff]  }
  0x94   : > { %1604 = vmatprep.subr.bf16.mxu0 %v20293_v6  ;;  %v20335_v6 = vld [vmem:[%s28857_s1 + $0x100] ss:$8 sps:$4 sm:$0xff]  }
  0x96   : > { %1157 = vmatmul.mubr.bf16.gmra.mrb[4].mxu0 %v730_v12  ;;  %v1253_v12 = vsel %vm1167_vm1, %v22832_v9, %v1252_v0  ;;  %v1213_v0 = vrot.slane %v23029_v54, 3 }
  0x97   : > { %1605 = vmatpush1.bf16.msra.mxu0 %v20291_v10  ;;  %1632 = vmatprep.mubr.bf16.mxu0 %v1201_v13  ;;  %v1242_v10 = vrot.slane %v1240_v63, 4  ;;  %v1230_v13 = vrot.slane %v22934_v2, 3  ;;  %v1264_v63 = vshrl.u32 %v22795_v46, 16 }
  0x98   : > { %1606 = vmatprep.subr.bf16.mxu0 %v20296_v11  ;;  %v1222_v11 = vrot.slane %v1220_v30, 3  ;;  %v1267_v30 = vshll.u32 %v22795_v46, 16  ;;  %v20380_v46 = vld [vmem:[%s28857_s1 + $0x1f0] ss:$8 sps:$4 sm:$0xff]  }
  0x9b   : > { %1607 = vmatpush1.bf16.msra.mxu0 %v20294_v14  ;;  %v1233_v14 = vrot.slane %v22937_v3, 4 }
  0x9c   : > { %1608 = vmatprep.subr.bf16.mxu0 %v20299_v15  ;;  %v20338_v15 = vld [vmem:[%s28857_s1 + $0x110] ss:$8 sps:$4 sm:$0xff]  }
  0x9d   : > { %v22956_v9 = vor.u32 %v1233_v14, %v1230_v13  ;;  %v1255_v13 = vshrl.u32 %v22818_v62, 16  ;;  %v1258_v14 = vshll.u32 %v22818_v62, 16 }
  0x9f   : > { %1609 = vmatpush1.bf16.msra.mxu0 %v20297_v16  ;;  %v20343_v16 = vld [vmem:[%s28857_s1 + $0x124] ss:$8 sps:$4 sm:$0xff]  }
  0xa0   : > { %1610 = vmatprep.subr.bf16.mxu0 %v20302_v17  ;;  %v1243_v17 = vor.u32 %v1242_v10, %v1239_v8  ;;  %v1266_v8 = vrot.slane %v1264_v63, 3  ;;  %v1269_v10 = vrot.slane %v1267_v30, 4 }
  0xa3   : > { %1611 = vmatpush1.bf16.msra.mxu0 %v20300_v18  ;;  %v1226_v18 = vor.u32 %v1225_v5, %v1222_v11 }
  0xa4   : > { %1612 = vmatprep.subr.bf16.mxu0 %v20305_v19  ;;  %v20341_v19 = vld [vmem:[%s28857_s1 + $0x120] ss:$8 sps:$4 sm:$0xff]  }
  0xa7   : > { %1613 = vmatpush1.bf16.msra.mxu0 %v20303_v20  ;;  %v20346_v20 = vld [vmem:[%s28857_s1 + $0x134] ss:$8 sps:$4 sm:$0xff]  }
  0xa8   : > { %1614 = vmatprep.subr.bf16.mxu0 %v20308_v21  ;;  %v1244_v21 = vsel %vm1167_vm1, %v1183_v55, %v1243_v17  ;;  %v20374_v55 = vld [vmem:[%s28857_s1 + $0x1d0] ss:$8 sps:$4 sm:$0xff]   ;;  %v1270_v17 = vor.u32 %v1269_v10, %v1266_v8  ;;  %v22428_v8 = vld [vmem:[#allocation2] sm:$0xf0] }
  0xa9   : > { %v1777_v10 = vshrl.u32 %v22428_v8, 16 }
  0xaa   : > { %v1271_v62 = vsel %vm1167_vm1, %v22956_v9, %v1270_v17 }
  0xab   : > { %1615 = vmatpush1.bf16.msra.mxu0 %v20306_v22  ;;  %v1235_v22 = vsel %vm1167_vm1, %v1226_v18, %v22956_v9 }
  0xac   : > { %1616 = vmatprep.subr.bf16.mxu0 %v20311_v23  ;;  %v20344_v23 = vld [vmem:[%s28857_s1 + $0x130] ss:$8 sps:$4 sm:$0xff]  }
  0xaf   : > { %1617 = vmatpush1.bf16.msra.mxu0 %v20309_v24  ;;  %v20349_v24 = vld [vmem:[%s28857_s1 + $0x144] ss:$8 sps:$4 sm:$0xff]  }
  0xb0   : > { %1618 = vmatprep.subr.bf16.mxu0 %v20314_v25  ;;  %v20347_v25 = vld [vmem:[%s28857_s1 + $0x140] ss:$8 sps:$4 sm:$0xff]  }
  0xb3   : > { %1619 = vmatpush1.bf16.msra.mxu0 %v20312_v26  ;;  %v20352_v26 = vld [vmem:[%s28857_s1 + $0x154] ss:$8 sps:$4 sm:$0xff]  }
  0xb4   : > { %1620 = vmatprep.subr.bf16.mxu0 %v20317_v27  ;;  %v20350_v27 = vld [vmem:[%s28857_s1 + $0x150] ss:$8 sps:$4 sm:$0xff]  }
  0xb7   : > { %1621 = vmatpush1.bf16.msra.mxu0 %v20315_v28  ;;  %v20355_v28 = vld [vmem:[%s28857_s1 + $0x164] ss:$8 sps:$4 sm:$0xff]  }
  0xb8   : > { %1622 = vmatprep.subr.bf16.mxu0 %v20320_v29  ;;  %v20353_v29 = vld [vmem:[%s28857_s1 + $0x160] ss:$8 sps:$4 sm:$0xff]  }
  0xbb   : > { %1623 = vmatpush1.bf16.msra.mxu0 %v20318_v31  ;;  %v20358_v31 = vld [vmem:[%s28857_s1 + $0x174] ss:$8 sps:$4 sm:$0xff]  }
  0xbc   : > { %1624 = vmatprep.subr.bf16.mxu0 %v20323_v32  ;;  %v20356_v32 = vld [vmem:[%s28857_s1 + $0x170] ss:$8 sps:$4 sm:$0xff]  }
  0xbf   : > { %1625 = vmatpush1.bf16.msra.mxu0 %v20321_v33  ;;  %v20361_v33 = vld [vmem:[%s28857_s1 + $0x184] ss:$8 sps:$4 sm:$0xff]  }
  0xc0   : > { %1626 = vmatprep.subr.bf16.mxu0 %v20326_v34  ;;  %v20359_v34 = vld [vmem:[%s28857_s1 + $0x180] ss:$8 sps:$4 sm:$0xff]  }
  0xc3   : > { %1627 = vmatpush1.bf16.msra.mxu0 %v20324_v38  ;;  %v20362_v38 = vld [vmem:[%s28857_s1 + $0x190] ss:$8 sps:$4 sm:$0xff]  }
  0xc4   : > { %1628 = vmatprep.subr.bf16.mxu0 %v20330_v39  ;;  %v20367_v39 = vld [vmem:[%s28857_s1 + $0x1a4] ss:$8 sps:$4 sm:$0xff]  }
  0xc7   : > { %1629 = vmatpush1.bf16.msra.mxu0 %v20328_v56  ;;  %v16185_v56 = vcombine.low %v531_v40, %v531_v40  ;;  %v20397_v40 = vld [vmem:[%s28857_s1 + $0x444] ss:$8 sps:$4 sm:$0xff]  }
  0xc8   : > { %1630 = vmatprep.subr.bf16.mxu0 %v20334_v45  ;;  %v544_v45 = vrot.slane %v16186_v43, 6  ;;  %v20398_v43 = vld [vmem:[%s28857_s1 + $0x450] ss:$8 sps:$4 sm:$0xff]  }
  0xc9   : > { %v543_v47 = vrot.slane %v16185_v56, 6  ;;  %v20403_v56 = vld [vmem:[%s28857_s1 + $0x464] ss:$8 sps:$4 sm:$0xff]  }
  0xca   : > { %552 = vst [vmem:[#allocation2 + $0x48] sm:$0x30] %v544_v45  ;;  %v20401_v45 = vld [vmem:[%s28857_s1 + $0x460] ss:$8 sps:$4 sm:$0xff]  }
  0xcb   : > { %1631 = vmatpush1.bf16.msra.mxu0 %v20332_v58  ;;  %551 = vst [vmem:[#allocation2 + $0x40] sm:$0x30] %v543_v47  ;;  %v23032_v58 = vshll.u32 %v22793_v44, 16  ;;  %v20406_v47 = vld [vmem:[%s28857_s1 + $0x474] ss:$8 sps:$4 sm:$0xff]  }
  0xcc   : > { %1653 = vmatprep.subr.bf16.mxu0 %v20337_v59  ;;  %v1203_v59 = vshrl.u32 %v557_v53, 16  ;;  %v20410_v53 = vld [vmem:[%s28857_s1 + $0x490] ss:$8 sps:$4 sm:$0xff]  }
  0xcd   : > { %v1216_v44 = vrot.slane %v23032_v58, 4 }
  0xce   : > { %1633 = vmatmul.mubr.bf16.vlgmr.msra.gmra.mrb[0].mxu0 %v1184_v7  ;;  %v1205_v7 = vrot.slane %v1203_v59, 3  ;;  %v532_v59 = vld [vmem:[%s22607_s27 + $0x18] sm:$0xcc] }
  0xcf   : > { %1654 = vmatpush1.bf16.msra.mxu0 %v20335_v6  ;;  %1642 = vmatprep.mubr.bf16.mxu0 %v1253_v12  ;;  %v20382_v6 = vld [vmem:[%s28857_s1 + $0x1f4] ss:$8 sps:$4 sm:$0xff]   ;;  %v1217_v11 = vor.u32 %v1216_v44, %v1213_v0  ;;  %v20385_v12 = vld [vmem:[%s28857_s1 + $0x404] ss:$8 sps:$4 sm:$0xff]   ;;  %v16188_v63 = vcombine.high %v532_v59, %v532_v59  ;;  %v16187_v30 = vcombine.low %v532_v59, %v532_v59 }
  0xd0   : > { %1655 = vmatprep.subr.bf16.mxu0 %v20340_v4  ;;  %v1208_v4 = vrot.slane %v1206_v60, 4  ;;  %v20413_v60 = vld [vmem:[%s28857_s1 + $0x4a0] ss:$8 sps:$4 sm:$0xff]   ;;  %v20442_v59 = vld [vmem:[%s28857_s1 + $0x534] ss:$8 sps:$4 sm:$0xff]  }
  0xd1   : > { %v546_v0 = vrot.slane %v16188_v63, 6  ;;  %v545_v44 = vrot.slane %v16187_v30, 6  ;;  %v20440_v63 = vld [vmem:[%s28857_s1 + $0x530] ss:$8 sps:$4 sm:$0xff]   ;;  %v20445_v30 = vld [vmem:[%s28857_s1 + $0x544] ss:$8 sps:$4 sm:$0xff]  }
  0xd2   : > { %v1209_v5 = vor.u32 %v1208_v4, %v1205_v7  ;;  %v20419_v7 = vld [vmem:[%s28857_s1 + $0x4c0] ss:$8 sps:$4 sm:$0xff]   ;;  %v20424_v4 = vld [vmem:[%s28857_s1 + $0x4d4] ss:$8 sps:$4 sm:$0xff]  }
  0xd3   : > { %1656 = vmatpush1.bf16.msra.mxu0 %v20338_v15  ;;  %v22427_v15 = vld [vmem:[#allocation2 + $0x8] sm:$0xf0]  ;;  %554 = vst [vmem:[#allocation2 + $0x58] sm:$0x30] %v546_v0  ;;  %553 = vst [vmem:[#allocation2 + $0x50] sm:$0x30] %v545_v44 }
  0xd4   : > { %1657 = vmatprep.subr.bf16.mxu0 %v20343_v16  ;;  %v1789_v16 = vshrl.u32 %v22427_v15, 16  ;;  %v1792_v18 = vshll.u32 %v22427_v15, 16  ;;  %v20425_v15 = vld [vmem:[%s28857_s1 + $0x4e0] ss:$8 sps:$4 sm:$0xff]   ;;  %v20448_v44 = vld [vmem:[%s28857_s1 + $0x554] ss:$8 sps:$4 sm:$0xff]  }
  0xd5   : > { %v20443_v0 = vld [vmem:[%s28857_s1 + $0x540] ss:$8 sps:$4 sm:$0xff]  }
  0xd6   : > { %1643 = vmatmul.mubr.bf16.gmra.mrb[4].mxu0 %v1244_v21  ;;  %v20388_v21 = vld [vmem:[%s28857_s1 + $0x414] ss:$8 sps:$4 sm:$0xff]  }
  0xd7   : > { %1658 = vmatpush1.bf16.msra.mxu0 %v20341_v19  ;;  %1685 = vmatprep.mubr.bf16.mxu0 %v1235_v22  ;;  %v20383_v19 = vld [vmem:[%s28857_s1 + $0x400] ss:$8 sps:$4 sm:$0xff]   ;;  %v1257_v22 = vrot.slane %v1255_v13, 3 }
  0xd8   : > { %1659 = vmatprep.subr.bf16.mxu0 %v20346_v20  ;;  %v1218_v20 = vsel %vm1167_vm1, %v1209_v5, %v1217_v11 }
  0xdb   : > { %1660 = vmatpush1.bf16.msra.mxu0 %v20344_v23  ;;  %v1260_v23 = vrot.slane %v1258_v14, 4  ;;  %v20427_v14 = vld [vmem:[%s28857_s1 + $0x4e4] ss:$8 sps:$4 sm:$0xff]  }
  0xdc   : > { %1661 = vmatprep.subr.bf16.mxu0 %v20349_v24  ;;  %v1791_v24 = vrot.slane %v1789_v16, 4  ;;  %v1779_v16 = vrot.slane %v1777_v10, 4  ;;  %v20457_v10 = vld [vmem:[%s28857_s1 + $0x584] ss:$8 sps:$4 sm:$0xff]  }
  0xdf   : > { %1662 = vmatpush1.bf16.msra.mxu0 %v20347_v25  ;;  %v1794_v25 = vrot.slane %v1792_v18, 5  ;;  %v20430_v18 = vld [vmem:[%s28857_s1 + $0x4f4] ss:$8 sps:$4 sm:$0xff]  }
  0xe0   : > { %1663 = vmatprep.subr.bf16.mxu0 %v20352_v26  ;;  %v1796_v26 = vrot.slane %v22802_v51, 4 }
  0xe3   : > { %1664 = vmatpush1.bf16.msra.mxu0 %v20350_v27  ;;  %v1797_v27 = vrot.slane %v22809_v57, 5 }
  0xe4   : > { %1665 = vmatprep.subr.bf16.mxu0 %v20355_v28  ;;  %v20386_v28 = vld [vmem:[%s28857_s1 + $0x410] ss:$8 sps:$4 sm:$0xff]  }
  0xe5   : > { %v23075_v9 = vor.u32 %v1797_v27, %v1796_v26 }
  0xe7   : > { %1666 = vmatpush1.bf16.msra.mxu0 %v20353_v29  ;;  %v20391_v29 = vld [vmem:[%s28857_s1 + $0x424] ss:$8 sps:$4 sm:$0xff]  }
  0xe8   : > { %1667 = vmatprep.subr.bf16.mxu0 %v20358_v31  ;;  %v1261_v31 = vor.u32 %v1260_v23, %v1257_v22  ;;  %v1706_v23 = vld [vmem:[#allocation2 + $0x40] sm:$0x1f] }
  0xe9   : > { %v1825_v27 = vshrl.u32 %v1706_v23, 16 }
  0xeb   : > { %1668 = vmatpush1.bf16.msra.mxu0 %v20356_v32  ;;  %v1795_v32 = vor.u32 %v1794_v25, %v1791_v24  ;;  %v20428_v24 = vld [vmem:[%s28857_s1 + $0x4f0] ss:$8 sps:$4 sm:$0xff]  }
  0xec   : > { %1669 = vmatprep.subr.bf16.mxu0 %v20361_v33  ;;  %v20389_v33 = vld [vmem:[%s28857_s1 + $0x420] ss:$8 sps:$4 sm:$0xff]  }
  0xef   : > { %1670 = vmatpush1.bf16.msra.mxu0 %v20359_v34  ;;  %v20394_v34 = vld [vmem:[%s28857_s1 + $0x434] ss:$8 sps:$4 sm:$0xff]  }
  0xf0   : > { %1671 = vmatprep.subr.bf16.mxu0 %v20364_v35  ;;  %v1262_v35 = vsel %vm1167_vm1, %v1217_v11, %v1261_v31  ;;  %v1707_v11 = vld [vmem:[#allocation2 + $0x48] sm:$0x1f] }
  0xf1   : > { %v1834_v5 = vshrl.u32 %v1707_v11, 16  ;;  %v1837_v13 = vshll.u32 %v1707_v11, 16  ;;  %v20460_v11 = vld [vmem:[%s28857_s1 + $0x594] ss:$8 sps:$4 sm:$0xff]  }
  0xf3   : > { %1672 = vmatpush1.bf16.msra.mxu0 %v20362_v38  ;;  %v1799_v38 = vsel %vm1775_vm2, %v1795_v32, %v23075_v9  ;;  %v1839_v22 = vrot.slane %v1837_v13, 5  ;;  %v20461_v13 = vld [vmem:[%s28857_s1 + $0x5a0] ss:$8 sps:$4 sm:$0xff]  }
  0xf4   : > { %1673 = vmatprep.subr.bf16.mxu0 %v20367_v39  ;;  %v20392_v39 = vld [vmem:[%s28857_s1 + $0x430] ss:$8 sps:$4 sm:$0xff]  }
  0xf7   : > { %1674 = vmatpush1.bf16.msra.mxu0 %v20365_v41  ;;  %v20395_v41 = vld [vmem:[%s28857_s1 + $0x440] ss:$8 sps:$4 sm:$0xff]  }
  0xf8   : > { %1675 = vmatprep.subr.bf16.mxu0 %v20370_v42  ;;  %v20400_v42 = vld [vmem:[%s28857_s1 + $0x454] ss:$8 sps:$4 sm:$0xff]  }
  0xfb   : > { %1676 = vmatpush1.bf16.msra.mxu0 %v20368_v48  ;;  %v20404_v48 = vld [vmem:[%s28857_s1 + $0x470] ss:$8 sps:$4 sm:$0xff]  }
  0xfc   : > { %1677 = vmatprep.subr.bf16.mxu0 %v20373_v49  ;;  %v20409_v49 = vld [vmem:[%s28857_s1 + $0x484] ss:$8 sps:$4 sm:$0xff]  }
  0xff   : > { %1678 = vmatpush1.bf16.msra.mxu0 %v20371_v50  ;;  %v20407_v50 = vld [vmem:[%s28857_s1 + $0x480] ss:$8 sps:$4 sm:$0xff]  }
 0x100   : > { %1679 = vmatprep.subr.bf16.mxu0 %v20376_v52  ;;  %v20412_v52 = vld [vmem:[%s28857_s1 + $0x494] ss:$8 sps:$4 sm:$0xff]  }
 0x103   : > { %1680 = vmatpush1.bf16.msra.mxu0 %v20374_v55  ;;  %v20415_v55 = vld [vmem:[%s28857_s1 + $0x4a4] ss:$8 sps:$4 sm:$0xff]  }
 0x104   : > { %1681 = vmatprep.subr.bf16.mxu0 %v20379_v61  ;;  %v20418_v61 = vld [vmem:[%s28857_s1 + $0x4b4] ss:$8 sps:$4 sm:$0xff]  }
 0x107   : > { %1682 = vmatpush1.bf16.msra.mxu0 %v20377_v1  ;;  %v20416_v1 = vld [vmem:[%s28857_s1 + $0x4b0] ss:$8 sps:$4 sm:$0xff]  }
 0x108   : > { %1683 = vmatprep.subr.bf16.mxu0 %v20382_v6  ;;  %v20421_v6 = vld [vmem:[%s28857_s1 + $0x4c4] ss:$8 sps:$4 sm:$0xff]  }
 0x10b   : > { %1684 = vmatpush1.bf16.msra.mxu0 %v20380_v46  ;;  %v1780_v46 = vshll.u32 %v22428_v8, 16  ;;  %v20452_v8 = vld [vmem:[%s28857_s1 + $0x570] ss:$8 sps:$4 sm:$0xff]  }
 0x10c   : > { %2188 = vmatprep.subr.bf16.mxu0 %v20385_v12  ;;  %v20422_v12 = vld [vmem:[%s28857_s1 + $0x4d0] ss:$8 sps:$4 sm:$0xff]  }
 0x10d   : > { %v1782_v17 = vrot.slane %v1780_v46, 5  ;;  %v20455_v46 = vld [vmem:[%s28857_s1 + $0x580] ss:$8 sps:$4 sm:$0xff]  }
 0x10e   : > { %1686 = vmatmul.mubr.bf16.vlgmr.msra.gmra.mrb[0].mxu0 %v1218_v20  ;;  %v1785_v20 = vrot.slane %v22907_v37, 5 }
 0x10f   : > { %2189 = vmatpush1.bf16.msra.mxu0 %v20383_v19  ;;  %1695 = vmatprep.mubr.bf16.mxu0 %v1271_v62  ;;  %v1784_v19 = vrot.slane %v22904_v36, 4  ;;  %v20433_v62 = vld [vmem:[%s28857_s1 + $0x504] ss:$8 sps:$4 sm:$0xff]   ;;  %v1783_v25 = vor.u32 %v1782_v17, %v1779_v16  ;;  %v20467_v17 = vld [vmem:[%s28857_s1 + $0x5c0] ss:$8 sps:$4 sm:$0xff]  }
 0x110   : > { %2190 = vmatprep.subr.bf16.mxu0 %v20388_v21  ;;  %v1836_v21 = vrot.slane %v1834_v5, 4  ;;  %v20463_v5 = vld [vmem:[%s28857_s1 + $0x5a4] ss:$8 sps:$4 sm:$0xff]  }
 0x111   : > { %v1786_v26 = vor.u32 %v1785_v20, %v1784_v19  ;;  %v20469_v16 = vld [vmem:[%s28857_s1 + $0x5c4] ss:$8 sps:$4 sm:$0xff]   ;;  %v22431_v19 = vld [vmem:[#allocation2 + $0x10] sm:$0xf0] }
 0x112   : > { %v1840_v32 = vor.u32 %v1839_v22, %v1836_v21  ;;  %v1801_v20 = vshrl.u32 %v22431_v19, 16  ;;  %v1804_v21 = vshll.u32 %v22431_v19, 16  ;;  %v1709_v22 = vld [vmem:[#allocation2 + $0x58] sm:$0x1f] }
 0x113   : > { %2191 = vmatpush1.bf16.msra.mxu0 %v20386_v28  ;;  %v1828_v28 = vshll.u32 %v1706_v23, 16  ;;  %v23260_v23 = vld [vmem:[#allocation2 + $0x48] sm:$0xff]  ;;  %v20508_v19 = vld [vmem:[%s28857_s1 + $0x690] ss:$8 sps:$4 sm:$0xff]  }
 0x114   : > { %2192 = vmatprep.subr.bf16.mxu0 %v20391_v29  ;;  %v22429_v29 = vld [vmem:[#allocation2 + $0x18] sm:$0xf0] }
 0x115   : > { %v1813_v31 = vshrl.u32 %v22429_v29, 16 }
 0x116   : > { %1696 = vmatmul.mubr.bf16.gmra.mrb[4].mxu0 %v1262_v35  ;;  %v20431_v35 = vld [vmem:[%s28857_s1 + $0x500] ss:$8 sps:$4 sm:$0xff]  }
 0x117   : > { %2193 = vmatpush1.bf16.msra.mxu0 %v20389_v33  ;;  %2220 = vmatprep.mubr.bf16.mxu0 %v1799_v38  ;;  %v1816_v33 = vshll.u32 %v22429_v29, 16  ;;  %v23172_v38 = vld [vmem:[#allocation2 + $0x8] sm:$0xff]  ;;  %v1806_v29 = vrot.slane %v1804_v21, 5 }
 0x118   : > { %2194 = vmatprep.subr.bf16.mxu0 %v20394_v34  ;;  %v23167_v34 = vld [vmem:[#allocation2] sm:$0x80]  ;;  %14382 = vst [vmem:[#allocation2 + $0x48] sm:$0xff] %v23172_v38  ;;  %v20511_v21 = vld [vmem:[%s28857_s1 + $0x6a0] ss:$8 sps:$4 sm:$0xff]  }
 0x119   : > { %7772 = vst [vmem:[#allocation2] sm:$0xff] %v23172_v38 }
 0x11b   : > { %2195 = vmatpush1.bf16.msra.mxu0 %v20392_v39  ;;  %v1787_v39 = vsel %vm1775_vm2, %v1783_v25, %v1786_v26  ;;  %v1852_v25 = vshrl.u32 %v1709_v22, 16 }
 0x11c   : > { %2196 = vmatprep.subr.bf16.mxu0 %v20397_v40  ;;  %v20436_v40 = vld [vmem:[%s28857_s1 + $0x514] ss:$8 sps:$4 sm:$0xff]  }
 0x11f   : > { %2197 = vmatpush1.bf16.msra.mxu0 %v20395_v41  ;;  %v1827_v41 = vrot.slane %v1825_v27, 4  ;;  %v20474_v27 = vld [vmem:[%s28857_s1 + $0x5e0] ss:$8 sps:$4 sm:$0xff]  }
 0x120   : > { %2198 = vmatprep.subr.bf16.mxu0 %v20400_v42  ;;  %v1830_v42 = vrot.slane %v1828_v28, 5  ;;  %v1803_v28 = vrot.slane %v1801_v20, 4  ;;  %v20513_v20 = vld [vmem:[%s28857_s1 + $0x6a4] ss:$8 sps:$4 sm:$0xff]  }
 0x123   : > { %2199 = vmatpush1.bf16.msra.mxu0 %v20398_v43  ;;  %v1815_v43 = vrot.slane %v1813_v31, 4  ;;  %v20480_v31 = vld [vmem:[%s28857_s1 + $0x5f4] ss:$8 sps:$4 sm:$0xff]  }
 0x124   : > { %2200 = vmatprep.subr.bf16.mxu0 %v20403_v56  ;;  %v1841_v56 = vsel %vm1775_vm2, %v23075_v9, %v1840_v32  ;;  %v1808_v32 = vrot.slane %v23029_v54, 4 }
 0x127   : > { %2201 = vmatpush1.bf16.msra.mxu0 %v20401_v45  ;;  %v1818_v45 = vrot.slane %v1816_v33, 5  ;;  %v1809_v33 = vrot.slane %v23032_v58, 5 }
 0x128   : > { %2202 = vmatprep.subr.bf16.mxu0 %v20406_v47  ;;  %v1820_v47 = vrot.slane %v22934_v2, 4 }
 0x12b   : > { %2203 = vmatpush1.bf16.msra.mxu0 %v20404_v48  ;;  %v1821_v48 = vrot.slane %v22937_v3, 5 }
 0x12c   : > { %2204 = vmatprep.subr.bf16.mxu0 %v20409_v49  ;;  %v20434_v49 = vld [vmem:[%s28857_s1 + $0x510] ss:$8 sps:$4 sm:$0xff]  }
 0x12d   : > { %v23189_v9 = vor.u32 %v1821_v48, %v1820_v47 }
 0x12f   : > { %2205 = vmatpush1.bf16.msra.mxu0 %v20407_v50  ;;  %v20439_v50 = vld [vmem:[%s28857_s1 + $0x524] ss:$8 sps:$4 sm:$0xff]  }
 0x130   : > { %2206 = vmatprep.subr.bf16.mxu0 %v20412_v52  ;;  %v1831_v52 = vor.u32 %v1830_v42, %v1827_v41  ;;  %v20478_v41 = vld [vmem:[%s28857_s1 + $0x5f0] ss:$8 sps:$4 sm:$0xff]   ;;  %v20483_v42 = vld [vmem:[%s28857_s1 + $0x604] ss:$8 sps:$4 sm:$0xff]  }
 0x133   : > { %2207 = vmatpush1.bf16.msra.mxu0 %v20410_v53  ;;  %v1819_v53 = vor.u32 %v1818_v45, %v1815_v43  ;;  %v1807_v43 = vor.u32 %v1806_v29, %v1803_v28  ;;  %v20520_v28 = vld [vmem:[%s28857_s1 + $0x6d0] ss:$8 sps:$4 sm:$0xff]   ;;  %v20526_v29 = vld [vmem:[%s28857_s1 + $0x6e4] ss:$8 sps:$4 sm:$0xff]  }
 0x134   : > { %2208 = vmatprep.subr.bf16.mxu0 %v20415_v55  ;;  %v20437_v55 = vld [vmem:[%s28857_s1 + $0x520] ss:$8 sps:$4 sm:$0xff]  }
 0x137   : > { %2209 = vmatpush1.bf16.msra.mxu0 %v20413_v60  ;;  %v1832_v60 = vsel %vm1775_vm2, %v1786_v26, %v1831_v52  ;;  %v1855_v26 = vshll.u32 %v1709_v22, 16  ;;  %v20516_v22 = vld [vmem:[%s28857_s1 + $0x6b4] ss:$8 sps:$4 sm:$0xff]  }
 0x138   : > { %2210 = vmatprep.subr.bf16.mxu0 %v20418_v61  ;;  %v1823_v61 = vsel %vm1775_vm2, %v1819_v53, %v23189_v9  ;;  %v20486_v53 = vld [vmem:[%s28857_s1 + $0x614] ss:$8 sps:$4 sm:$0xff]  }
 0x13b   : > { %2211 = vmatpush1.bf16.msra.mxu0 %v20416_v1  ;;  %v20446_v1 = vld [vmem:[%s28857_s1 + $0x550] ss:$8 sps:$4 sm:$0xff]  }
 0x13c   : > { %2212 = vmatprep.subr.bf16.mxu0 %v20421_v6  ;;  %v20451_v6 = vld [vmem:[%s28857_s1 + $0x564] ss:$8 sps:$4 sm:$0xff]  }
 0x13f   : > { %2213 = vmatpush1.bf16.msra.mxu0 %v20419_v7  ;;  %v20449_v7 = vld [vmem:[%s28857_s1 + $0x560] ss:$8 sps:$4 sm:$0xff]  }
 0x140   : > { %2214 = vmatprep.subr.bf16.mxu0 %v20424_v4  ;;  %v20454_v4 = vld [vmem:[%s28857_s1 + $0x574] ss:$8 sps:$4 sm:$0xff]  }
 0x143   : > { %2215 = vmatpush1.bf16.msra.mxu0 %v20422_v12  ;;  %v20458_v12 = vld [vmem:[%s28857_s1 + $0x590] ss:$8 sps:$4 sm:$0xff]  }
 0x144   : > { %2216 = vmatprep.subr.bf16.mxu0 %v20427_v14  ;;  %v20466_v14 = vld [vmem:[%s28857_s1 + $0x5b4] ss:$8 sps:$4 sm:$0xff]  }
 0x147   : > { %2217 = vmatpush1.bf16.msra.mxu0 %v20425_v15  ;;  %v20464_v15 = vld [vmem:[%s28857_s1 + $0x5b0] ss:$8 sps:$4 sm:$0xff]  }
 0x148   : > { %2218 = vmatprep.subr.bf16.mxu0 %v20430_v18  ;;  %v20472_v18 = vld [vmem:[%s28857_s1 + $0x5d4] ss:$8 sps:$4 sm:$0xff]  }
 0x14b   : > { %2219 = vmatpush1.bf16.msra.mxu0 %v20428_v24  ;;  %v20470_v24 = vld [vmem:[%s28857_s1 + $0x5d0] ss:$8 sps:$4 sm:$0xff]  }
 0x14c   : > { %2241 = vmatprep.subr.bf16.mxu0 %v20433_v62  ;;  %v20476_v62 = vld [vmem:[%s28857_s1 + $0x5e4] ss:$8 sps:$4 sm:$0xff]  }
 0x14e   : > { %2221 = vmatmul.mubr.bf16.vlgmr.msra.gmra.mrb[0].mxu0 %v1787_v39  ;;  %v1857_v39 = vrot.slane %v1855_v26, 5  ;;  %v20522_v26 = vld [vmem:[%s28857_s1 + $0x6d4] ss:$8 sps:$4 sm:$0xff]  }
 0x14f   : > { %2242 = vmatpush1.bf16.msra.mxu0 %v20431_v35  ;;  %2230 = vmatprep.mubr.bf16.mxu0 %v1841_v56  ;;  %v1854_v35 = vrot.slane %v1852_v25, 4  ;;  %v1810_v56 = vor.u32 %v1809_v33, %v1808_v32  ;;  %v20517_v25 = vld [vmem:[%s28857_s1 + $0x6c0] ss:$8 sps:$4 sm:$0xff]   ;;  %v23382_v32 = vshrl.u32 %v23260_v23, 16 }
 0x150   : > { %2243 = vmatprep.subr.bf16.mxu0 %v20436_v40  ;;  %v1708_v40 = vld [vmem:[#allocation2 + $0x50] sm:$0x1f]  ;;  %v20524_v33 = vld [vmem:[%s28857_s1 + $0x6e0] ss:$8 sps:$4 sm:$0xff]  }
 0x151   : > { %v1843_v45 = vshrl.u32 %v1708_v40, 16  ;;  %v1846_v47 = vshll.u32 %v1708_v40, 16  ;;  %v1858_v48 = vor.u32 %v1857_v39, %v1854_v35  ;;  %v1811_v52 = vsel %vm1775_vm2, %v1807_v43, %v1810_v56  ;;  %v20530_v35 = vld [vmem:[%s28857_s1 + $0x6f4] ss:$8 sps:$4 sm:$0xff]  }
 0x152   : > { %v2377_v39 = vshrl.u32 %v23167_v34, 16  ;;  %v2380_v40 = vrot.slane %v22904_v36, 7  ;;  %v23395_v43 = vshll.u32 %v23260_v23, 16 }
 0x153   : > { %2244 = vmatpush1.bf16.msra.mxu0 %v20434_v49  ;;  %v2303_v49 = vld [vmem:[#allocation2 + $0x8] sm:$0x80] }
 0x154   : > { %2245 = vmatprep.subr.bf16.mxu0 %v20439_v50  ;;  %v20481_v50 = vld [vmem:[%s28857_s1 + $0x600] ss:$8 sps:$4 sm:$0xff]   ;;  %v2381_v34 = vor.u32 %v2380_v40, %v22907_v37 }
 0x156   : > { %2231 = vmatmul.mubr.bf16.gmra.mrb[4].mxu0 %v1832_v60  ;;  %v2384_v60 = vshrl.u32 %v2303_v49, 16  ;;  %v20531_v49 = vld [vmem:[%s28857_s1 + $0x700] ss:$8 sps:$4 sm:$0xff]  }
 0x157   : > { %2246 = vmatpush1.bf16.msra.mxu0 %v20437_v55  ;;  %2273 = vmatprep.mubr.bf16.mxu0 %v1823_v61  ;;  %v1845_v55 = vrot.slane %v1843_v45, 4  ;;  %v1859_v61 = vsel %vm1775_vm2, %v23189_v9, %v1858_v48  ;;  %v2379_v45 = vrot.slane %v2377_v39, 7 }
 0x158   : > { %2247 = vmatprep.subr.bf16.mxu0 %v20442_v59  ;;  %v1848_v59 = vrot.slane %v1846_v47, 5  ;;  %v2305_v47 = vld [vmem:[#allocation2 + $0x18] sm:$0x80] }
 0x15b   : > { %2248 = vmatpush1.bf16.msra.mxu0 %v20440_v63  ;;  %v2387_v63 = vrot.slane %v22802_v51, 7 }
 0x15c   : > { %2249 = vmatprep.subr.bf16.mxu0 %v20445_v30  ;;  %v20484_v30 = vld [vmem:[%s28857_s1 + $0x610] ss:$8 sps:$4 sm:$0xff]  }
 0x15d   : > { %v2388_v9 = vor.u32 %v2387_v63, %v22809_v57  ;;  %v20490_v57 = vld [vmem:[%s28857_s1 + $0x630] ss:$8 sps:$4 sm:$0xff]  }
 0x15f   : > { %2250 = vmatpush1.bf16.msra.mxu0 %v20443_v0  ;;  %v20489_v0 = vld [vmem:[%s28857_s1 + $0x624] ss:$8 sps:$4 sm:$0xff]  }
 0x160   : > { %2251 = vmatprep.subr.bf16.mxu0 %v20448_v44  ;;  %v1849_v44 = vor.u32 %v1848_v59, %v1845_v55  ;;  %v2398_v59 = vshrl.u32 %v2305_v47, 16 }
 0x162   : > { %v2400_v51 = vrot.slane %v2398_v59, 7  ;;  %v20590_v59 = vld [vmem:[%s28857_s1 + $0x834] ss:$8 sps:$4 sm:$0xff]  }
 0x163   : > { %2252 = vmatpush1.bf16.msra.mxu0 %v20446_v1  ;;  %v2386_v1 = vrot.slane %v2384_v60, 7  ;;  %v2401_v60 = vrot.slane %v22934_v2, 7  ;;  %v20585_v2 = vld [vmem:[%s28857_s1 + $0x820] ss:$8 sps:$4 sm:$0xff]  }
 0x164   : > { %2253 = vmatprep.subr.bf16.mxu0 %v20451_v6  ;;  %v20487_v6 = vld [vmem:[%s28857_s1 + $0x620] ss:$8 sps:$4 sm:$0xff]  }
 0x167   : > { %2254 = vmatpush1.bf16.msra.mxu0 %v20449_v7  ;;  %v20492_v7 = vld [vmem:[%s28857_s1 + $0x634] ss:$8 sps:$4 sm:$0xff]  }
 0x168   : > { %2255 = vmatprep.subr.bf16.mxu0 %v20454_v4  ;;  %v1850_v4 = vsel %vm1775_vm2, %v1810_v56, %v1849_v44  ;;  %v20533_v56 = vld [vmem:[%s28857_s1 + $0x704] ss:$8 sps:$4 sm:$0xff]   ;;  %v20537_v44 = vld [vmem:[%s28857_s1 + $0x720] ss:$8 sps:$4 sm:$0xff]  }
 0x16b   : > { %2256 = vmatpush1.bf16.msra.mxu0 %v20452_v8  ;;  %v2389_v8 = vsel %vm2375_vm3, %v2386_v1, %v2388_v9  ;;  %v20542_v1 = vld [vmem:[%s28857_s1 + $0x734] ss:$8 sps:$4 sm:$0xff]  }
 0x16c   : > { %2257 = vmatprep.subr.bf16.mxu0 %v20457_v10  ;;  %v20495_v10 = vld [vmem:[%s28857_s1 + $0x644] ss:$8 sps:$4 sm:$0xff]  }
 0x16f   : > { %2258 = vmatpush1.bf16.msra.mxu0 %v20455_v46  ;;  %v20493_v46 = vld [vmem:[%s28857_s1 + $0x640] ss:$8 sps:$4 sm:$0xff]  }
 0x170   : > { %2259 = vmatprep.subr.bf16.mxu0 %v20460_v11  ;;  %v20498_v11 = vld [vmem:[%s28857_s1 + $0x654] ss:$8 sps:$4 sm:$0xff]  }
 0x173   : > { %2260 = vmatpush1.bf16.msra.mxu0 %v20458_v12  ;;  %v20496_v12 = vld [vmem:[%s28857_s1 + $0x650] ss:$8 sps:$4 sm:$0xff]  }
 0x174   : > { %2261 = vmatprep.subr.bf16.mxu0 %v20463_v5  ;;  %v20501_v5 = vld [vmem:[%s28857_s1 + $0x664] ss:$8 sps:$4 sm:$0xff]  }
 0x177   : > { %2262 = vmatpush1.bf16.msra.mxu0 %v20461_v13  ;;  %v20499_v13 = vld [vmem:[%s28857_s1 + $0x660] ss:$8 sps:$4 sm:$0xff]  }
 0x178   : > { %2263 = vmatprep.subr.bf16.mxu0 %v20466_v14  ;;  %v20504_v14 = vld [vmem:[%s28857_s1 + $0x674] ss:$8 sps:$4 sm:$0xff]  }
 0x17b   : > { %2264 = vmatpush1.bf16.msra.mxu0 %v20464_v15  ;;  %v20502_v15 = vld [vmem:[%s28857_s1 + $0x670] ss:$8 sps:$4 sm:$0xff]  }
 0x17c   : > { %2265 = vmatprep.subr.bf16.mxu0 %v20469_v16  ;;  %v20507_v16 = vld [vmem:[%s28857_s1 + $0x684] ss:$8 sps:$4 sm:$0xff]  }
 0x17f   : > { %2266 = vmatpush1.bf16.msra.mxu0 %v20467_v17  ;;  %v20505_v17 = vld [vmem:[%s28857_s1 + $0x680] ss:$8 sps:$4 sm:$0xff]  }
 0x180   : > { %2267 = vmatprep.subr.bf16.mxu0 %v20472_v18  ;;  %v20510_v18 = vld [vmem:[%s28857_s1 + $0x694] ss:$8 sps:$4 sm:$0xff]  }
 0x183   : > { %2268 = vmatpush1.bf16.msra.mxu0 %v20470_v24  ;;  %v20514_v24 = vld [vmem:[%s28857_s1 + $0x6b0] ss:$8 sps:$4 sm:$0xff]  }
 0x184   : > { %2269 = vmatprep.subr.bf16.mxu0 %v20476_v62  ;;  %v20519_v62 = vld [vmem:[%s28857_s1 + $0x6c4] ss:$8 sps:$4 sm:$0xff]  }
 0x187   : > { %2270 = vmatpush1.bf16.msra.mxu0 %v20474_v27  ;;  %v23370_v27 = vld [vmem:[#allocation2 + $0x58] sm:$0xff] }
 0x188   : > { %2271 = vmatprep.subr.bf16.mxu0 %v20480_v31  ;;  %v23378_v31 = vld [vmem:[#allocation2 + $0x50] sm:$0xff]  ;;  %14384 = vst [vmem:[#allocation2 + $0x58] sm:$0xff] %v23172_v38 }
 0x189   : > { %14383 = vst [vmem:[#allocation2 + $0x50] sm:$0xff] %v23172_v38  ;;  %v20528_v38 = vld [vmem:[%s28857_s1 + $0x6f0] ss:$8 sps:$4 sm:$0xff]  }
 0x18b   : > { %2272 = vmatpush1.bf16.msra.mxu0 %v20478_v41  ;;  %v2306_v41 = vld [vmem:[#allocation2 + $0x40] sm:$0xff] }
 0x18c   : > { %2764 = vmatprep.subr.bf16.mxu0 %v20483_v42  ;;  %v2415_v42 = vrot.slane %v23382_v32, 7  ;;  %v23404_v36 = vshrl.u32 %v2306_v41, 16  ;;  %v23415_v37 = vshll.u32 %v2306_v41, 16  ;;  %v20576_v41 = vld [vmem:[%s28857_s1 + $0x7f0] ss:$8 sps:$4 sm:$0xff]  }
 0x18e   : > { %2274 = vmatmul.mubr.bf16.vlgmr.msra.gmra.mrb[0].mxu0 %v1811_v52  ;;  %v2418_v48 = vor.u32 %v23395_v43, %v2415_v42  ;;  %v20536_v52 = vld [vmem:[%s28857_s1 + $0x714] ss:$8 sps:$4 sm:$0xff]   ;;  %v20581_v42 = vld [vmem:[%s28857_s1 + $0x804] ss:$8 sps:$4 sm:$0xff]  }
 0x18f   : > { %2765 = vmatpush1.bf16.msra.mxu0 %v20481_v50  ;;  %2283 = vmatprep.mubr.bf16.mxu0 %v1859_v61  ;;  %v2382_v50 = vsel %vm2375_vm3, %v2379_v45, %v2381_v34  ;;  %v20534_v61 = vld [vmem:[%s28857_s1 + $0x710] ss:$8 sps:$4 sm:$0xff]   ;;  %v20579_v34 = vld [vmem:[%s28857_s1 + $0x800] ss:$8 sps:$4 sm:$0xff]  }
 0x190   : > { %2766 = vmatprep.subr.bf16.mxu0 %v20486_v53  ;;  %v2407_v53 = vrot.slane %v23404_v36, 7  ;;  %v2419_v55 = vsel %vm2375_vm3, %v2387_v63, %v2418_v48  ;;  %v2402_v63 = vor.u32 %v2401_v60, %v22937_v3  ;;  %v20540_v3 = vld [vmem:[%s28857_s1 + $0x730] ss:$8 sps:$4 sm:$0xff]   ;;  %v20584_v48 = vld [vmem:[%s28857_s1 + $0x814] ss:$8 sps:$4 sm:$0xff]  }
 0x193   : > { %2767 = vmatpush1.bf16.msra.mxu0 %v20484_v30  ;;  %v20539_v30 = vld [vmem:[%s28857_s1 + $0x724] ss:$8 sps:$4 sm:$0xff]  }
 0x194   : > { %2768 = vmatprep.subr.bf16.mxu0 %v20489_v0  ;;  %v2410_v0 = vor.u32 %v23415_v37, %v2407_v53  ;;  %v20587_v53 = vld [vmem:[%s28857_s1 + $0x824] ss:$8 sps:$4 sm:$0xff]  }
 0x196   : > { %2284 = vmatmul.mubr.bf16.gmra.mrb[4].mxu0 %v1850_v4  ;;  %v2411_v9 = vsel %vm2375_vm3, %v2380_v40, %v2410_v0  ;;  %v20543_v4 = vld [vmem:[%s28857_s1 + $0x740] ss:$8 sps:$4 sm:$0xff]   ;;  %v23517_v40 = vshll.u32 %v23370_v27, 16 }
 0x197   : > { %2769 = vmatpush1.bf16.msra.mxu0 %v20487_v6  ;;  %2796 = vmatprep.mubr.bf16.mxu0 %v2389_v8  ;;  %v2403_v6 = vsel %vm2375_vm3, %v2400_v51, %v2402_v63  ;;  %v20548_v8 = vld [vmem:[%s28857_s1 + $0x754] ss:$8 sps:$4 sm:$0xff]   ;;  %v22432_v0 = vld [vmem:[#allocation2 + $0x28] sm:$0xff] }
 0x198   : > { %2770 = vmatprep.subr.bf16.mxu0 %v20492_v7  ;;  %v20545_v7 = vld [vmem:[%s28857_s1 + $0x744] ss:$8 sps:$4 sm:$0xff]   ;;  %v20591_v51 = vld [vmem:[%s28857_s1 + $0x840] ss:$8 sps:$4 sm:$0xff]   ;;  %v20596_v63 = vld [vmem:[%s28857_s1 + $0x854] ss:$8 sps:$4 sm:$0xff]  }
 0x19b   : > { %2771 = vmatpush1.bf16.msra.mxu0 %v20490_v57  ;;  %v20546_v57 = vld [vmem:[%s28857_s1 + $0x750] ss:$8 sps:$4 sm:$0xff]  }
 0x19c   : > { %2772 = vmatprep.subr.bf16.mxu0 %v20495_v10  ;;  %v20551_v10 = vld [vmem:[%s28857_s1 + $0x764] ss:$8 sps:$4 sm:$0xff]  }
 0x19f   : > { %2773 = vmatpush1.bf16.msra.mxu0 %v20493_v46  ;;  %v20549_v46 = vld [vmem:[%s28857_s1 + $0x760] ss:$8 sps:$4 sm:$0xff]  }
 0x1a0   : > { %2774 = vmatprep.subr.bf16.mxu0 %v20498_v11  ;;  %v20554_v11 = vld [vmem:[%s28857_s1 + $0x774] ss:$8 sps:$4 sm:$0xff]  }
 0x1a3   : > { %2775 = vmatpush1.bf16.msra.mxu0 %v20496_v12  ;;  %v20552_v12 = vld [vmem:[%s28857_s1 + $0x770] ss:$8 sps:$4 sm:$0xff]  }
 0x1a4   : > { %2776 = vmatprep.subr.bf16.mxu0 %v20501_v5  ;;  %v20557_v5 = vld [vmem:[%s28857_s1 + $0x784] ss:$8 sps:$4 sm:$0xff]  }
 0x1a7   : > { %2777 = vmatpush1.bf16.msra.mxu0 %v20499_v13  ;;  %v20555_v13 = vld [vmem:[%s28857_s1 + $0x780] ss:$8 sps:$4 sm:$0xff]  }
 0x1a8   : > { %2778 = vmatprep.subr.bf16.mxu0 %v20504_v14  ;;  %v20560_v14 = vld [vmem:[%s28857_s1 + $0x794] ss:$8 sps:$4 sm:$0xff]  }
 0x1ab   : > { %2779 = vmatpush1.bf16.msra.mxu0 %v20502_v15  ;;  %v20558_v15 = vld [vmem:[%s28857_s1 + $0x790] ss:$8 sps:$4 sm:$0xff]  }
 0x1ac   : > { %2780 = vmatprep.subr.bf16.mxu0 %v20507_v16  ;;  %v20563_v16 = vld [vmem:[%s28857_s1 + $0x7a4] ss:$8 sps:$4 sm:$0xff]  }
 0x1af   : > { %2781 = vmatpush1.bf16.msra.mxu0 %v20505_v17  ;;  %v20561_v17 = vld [vmem:[%s28857_s1 + $0x7a0] ss:$8 sps:$4 sm:$0xff]  }
 0x1b0   : > { %2782 = vmatprep.subr.bf16.mxu0 %v20510_v18  ;;  %v20566_v18 = vld [vmem:[%s28857_s1 + $0x7b4] ss:$8 sps:$4 sm:$0xff]  }
 0x1b3   : > { %2783 = vmatpush1.bf16.msra.mxu0 %v20508_v19  ;;  %v20564_v19 = vld [vmem:[%s28857_s1 + $0x7b0] ss:$8 sps:$4 sm:$0xff]  }
 0x1b4   : > { %2784 = vmatprep.subr.bf16.mxu0 %v20513_v20  ;;  %v20569_v20 = vld [vmem:[%s28857_s1 + $0x7c4] ss:$8 sps:$4 sm:$0xff]  }
 0x1b7   : > { %2785 = vmatpush1.bf16.msra.mxu0 %v20511_v21  ;;  %v20567_v21 = vld [vmem:[%s28857_s1 + $0x7c0] ss:$8 sps:$4 sm:$0xff]  }
 0x1b8   : > { %2786 = vmatprep.subr.bf16.mxu0 %v20516_v22  ;;  %v20572_v22 = vld [vmem:[%s28857_s1 + $0x7d4] ss:$8 sps:$4 sm:$0xff]  }
 0x1bb   : > { %2787 = vmatpush1.bf16.msra.mxu0 %v20514_v24  ;;  %v20570_v24 = vld [vmem:[%s28857_s1 + $0x7d0] ss:$8 sps:$4 sm:$0xff]  }
 0x1bc   : > { %2788 = vmatprep.subr.bf16.mxu0 %v20519_v62  ;;  %v20575_v62 = vld [vmem:[%s28857_s1 + $0x7e4] ss:$8 sps:$4 sm:$0xff]  }
 0x1bf   : > { %2789 = vmatpush1.bf16.msra.mxu0 %v20517_v25  ;;  %v2304_v25 = vld [vmem:[#allocation2 + $0x10] sm:$0x80] }
 0x1c0   : > { %2790 = vmatprep.subr.bf16.mxu0 %v20522_v26  ;;  %v23506_v26 = vshrl.u32 %v23370_v27, 16 }
 0x1c2   : > { %v2431_v39 = vrot.slane %v23506_v26, 7 }
 0x1c3   : > { %2791 = vmatpush1.bf16.msra.mxu0 %v20520_v28  ;;  %v20573_v28 = vld [vmem:[%s28857_s1 + $0x7e0] ss:$8 sps:$4 sm:$0xff]  }
 0x1c4   : > { %2792 = vmatprep.subr.bf16.mxu0 %v20526_v29  ;;  %v20578_v29 = vld [vmem:[%s28857_s1 + $0x7f4] ss:$8 sps:$4 sm:$0xff]   ;;  %v2434_v45 = vor.u32 %v23517_v40, %v2431_v39  ;;  %v20641_v39 = vld [vmem:[%s28857_s1 + $0x944] ss:$8 sps:$4 sm:$0xff]  }
 0x1c7   : > { %2793 = vmatpush1.bf16.msra.mxu0 %v20524_v33  ;;  %v2391_v33 = vshrl.u32 %v2304_v25, 16  ;;  %v20635_v25 = vld [vmem:[%s28857_s1 + $0x924] ss:$8 sps:$4 sm:$0xff]  }
 0x1c8   : > { %2794 = vmatprep.subr.bf16.mxu0 %v20530_v35  ;;  %v2394_v35 = vrot.slane %v23029_v54, 7  ;;  %v23527_v54 = vshrl.u32 %v23378_v31, 16 }
 0x1cb   : > { %2795 = vmatpush1.bf16.msra.mxu0 %v20528_v38  ;;  %v2393_v38 = vrot.slane %v2391_v33, 7  ;;  %v22434_v33 = vld [vmem:[#allocation2 + $0x40] sm:$0xff] }
 0x1cc   : > { %2817 = vmatprep.subr.bf16.mxu0 %v20533_v56  ;;  %v2395_v56 = vor.u32 %v2394_v35, %v23032_v58  ;;  %v23539_v58 = vshll.u32 %v23378_v31, 16 }
 0x1ce   : > { %2797 = vmatmul.mubr.bf16.vlgmr.msra.gmra.mrb[0].mxu0 %v2382_v50  ;;  %v2396_v47 = vsel %vm2375_vm3, %v2393_v38, %v2395_v56  ;;  %v2435_v50 = vsel %vm2375_vm3, %v2401_v60, %v2434_v45  ;;  %v20644_v38 = vld [vmem:[%s28857_s1 + $0x954] ss:$8 sps:$4 sm:$0xff]   ;;  %v20642_v56 = vld [vmem:[%s28857_s1 + $0x950] ss:$8 sps:$4 sm:$0xff]   ;;  %v20647_v45 = vld [vmem:[%s28857_s1 + $0x964] ss:$8 sps:$4 sm:$0xff]  }
 0x1cf   : > { %2818 = vmatpush1.bf16.msra.mxu0 %v20531_v49  ;;  %2806 = vmatprep.mubr.bf16.mxu0 %v2419_v55  ;;  %v2423_v49 = vrot.slane %v23527_v54, 7 }
 0x1d0   : > { %2819 = vmatprep.subr.bf16.mxu0 %v20536_v52  ;;  %v20582_v52 = vld [vmem:[%s28857_s1 + $0x810] ss:$8 sps:$4 sm:$0xff]  }
 0x1d1   : > { %v2426_v55 = vor.u32 %v23539_v58, %v2423_v49  ;;  %v20653_v49 = vld [vmem:[%s28857_s1 + $0x984] ss:$8 sps:$4 sm:$0xff]  }
 0x1d3   : > { %2820 = vmatpush1.bf16.msra.mxu0 %v20534_v61  ;;  %v2427_v60 = vsel %vm2375_vm3, %v2394_v35, %v2426_v55  ;;  %v20588_v61 = vld [vmem:[%s28857_s1 + $0x830] ss:$8 sps:$4 sm:$0xff]   ;;  %v20659_v55 = vld [vmem:[%s28857_s1 + $0x9a4] ss:$8 sps:$4 sm:$0xff]  }
 0x1d4   : > { %2821 = vmatprep.subr.bf16.mxu0 %v20539_v30  ;;  %v20593_v30 = vld [vmem:[%s28857_s1 + $0x844] ss:$8 sps:$4 sm:$0xff]   ;;  %v20636_v35 = vld [vmem:[%s28857_s1 + $0x930] ss:$8 sps:$4 sm:$0xff]  }
 0x1d6   : > { %2807 = vmatmul.mubr.bf16.gmra.mrb[4].mxu0 %v2411_v9  ;;  %v20597_v9 = vld [vmem:[%s28857_s1 + $0x860] ss:$8 sps:$4 sm:$0xff]  }
 0x1d7   : > { %2822 = vmatpush1.bf16.msra.mxu0 %v20537_v44  ;;  %2849 = vmatprep.mubr.bf16.mxu0 %v2403_v6  ;;  %v20594_v44 = vld [vmem:[%s28857_s1 + $0x850] ss:$8 sps:$4 sm:$0xff]   ;;  %v20602_v6 = vld [vmem:[%s28857_s1 + $0x874] ss:$8 sps:$4 sm:$0xff]  }
 0x1d8   : > { %2823 = vmatprep.subr.bf16.mxu0 %v20542_v1  ;;  %v20599_v1 = vld [vmem:[%s28857_s1 + $0x864] ss:$8 sps:$4 sm:$0xff]  }
 0x1db   : > { %2824 = vmatpush1.bf16.msra.mxu0 %v20540_v3  ;;  %v20600_v3 = vld [vmem:[%s28857_s1 + $0x870] ss:$8 sps:$4 sm:$0xff]  }
 0x1dc   : > { %2825 = vmatprep.subr.bf16.mxu0 %v20545_v7  ;;  %v20605_v7 = vld [vmem:[%s28857_s1 + $0x884] ss:$8 sps:$4 sm:$0xff]  }
 0x1df   : > { %2826 = vmatpush1.bf16.msra.mxu0 %v20543_v4  ;;  %v20603_v4 = vld [vmem:[%s28857_s1 + $0x880] ss:$8 sps:$4 sm:$0xff]  }
 0x1e0   : > { %2827 = vmatprep.subr.bf16.mxu0 %v20548_v8  ;;  %v20608_v8 = vld [vmem:[%s28857_s1 + $0x894] ss:$8 sps:$4 sm:$0xff]  }
 0x1e3   : > { %2828 = vmatpush1.bf16.msra.mxu0 %v20546_v57  ;;  %v20606_v57 = vld [vmem:[%s28857_s1 + $0x890] ss:$8 sps:$4 sm:$0xff]  }
 0x1e4   : > { %2829 = vmatprep.subr.bf16.mxu0 %v20551_v10  ;;  %v20611_v10 = vld [vmem:[%s28857_s1 + $0x8a4] ss:$8 sps:$4 sm:$0xff]  }
 0x1e7   : > { %2830 = vmatpush1.bf16.msra.mxu0 %v20549_v46  ;;  %v20609_v46 = vld [vmem:[%s28857_s1 + $0x8a0] ss:$8 sps:$4 sm:$0xff]  }
 0x1e8   : > { %2831 = vmatprep.subr.bf16.mxu0 %v20554_v11  ;;  %v20614_v11 = vld [vmem:[%s28857_s1 + $0x8b4] ss:$8 sps:$4 sm:$0xff]  }
 0x1eb   : > { %2832 = vmatpush1.bf16.msra.mxu0 %v20552_v12  ;;  %v20612_v12 = vld [vmem:[%s28857_s1 + $0x8b0] ss:$8 sps:$4 sm:$0xff]  }
 0x1ec   : > { %2833 = vmatprep.subr.bf16.mxu0 %v20557_v5  ;;  %v20617_v5 = vld [vmem:[%s28857_s1 + $0x8c4] ss:$8 sps:$4 sm:$0xff]  }
 0x1ef   : > { %2834 = vmatpush1.bf16.msra.mxu0 %v20555_v13  ;;  %v20615_v13 = vld [vmem:[%s28857_s1 + $0x8c0] ss:$8 sps:$4 sm:$0xff]  }
 0x1f0   : > { %2835 = vmatprep.subr.bf16.mxu0 %v20560_v14  ;;  %v20620_v14 = vld [vmem:[%s28857_s1 + $0x8d4] ss:$8 sps:$4 sm:$0xff]  }
 0x1f3   : > { %2836 = vmatpush1.bf16.msra.mxu0 %v20558_v15  ;;  %v20618_v15 = vld [vmem:[%s28857_s1 + $0x8d0] ss:$8 sps:$4 sm:$0xff]  }
 0x1f4   : > { %2837 = vmatprep.subr.bf16.mxu0 %v20563_v16  ;;  %v20623_v16 = vld [vmem:[%s28857_s1 + $0x8e4] ss:$8 sps:$4 sm:$0xff]  }
 0x1f7   : > { %2838 = vmatpush1.bf16.msra.mxu0 %v20561_v17  ;;  %v20621_v17 = vld [vmem:[%s28857_s1 + $0x8e0] ss:$8 sps:$4 sm:$0xff]  }
 0x1f8   : > { %2839 = vmatprep.subr.bf16.mxu0 %v20566_v18  ;;  %v20626_v18 = vld [vmem:[%s28857_s1 + $0x8f4] ss:$8 sps:$4 sm:$0xff]  }
 0x1fb   : > { %2840 = vmatpush1.bf16.msra.mxu0 %v20564_v19  ;;  %v20624_v19 = vld [vmem:[%s28857_s1 + $0x8f0] ss:$8 sps:$4 sm:$0xff]  }
 0x1fc   : > { %2841 = vmatprep.subr.bf16.mxu0 %v20569_v20  ;;  %v20629_v20 = vld [vmem:[%s28857_s1 + $0x904] ss:$8 sps:$4 sm:$0xff]  }
 0x1ff   : > { %2842 = vmatpush1.bf16.msra.mxu0 %v20567_v21  ;;  %v20627_v21 = vld [vmem:[%s28857_s1 + $0x900] ss:$8 sps:$4 sm:$0xff]  }
 0x200   : > { %2843 = vmatprep.subr.bf16.mxu0 %v20572_v22  ;;  %v20632_v22 = vld [vmem:[%s28857_s1 + $0x914] ss:$8 sps:$4 sm:$0xff]  }
 0x203   : > { %2844 = vmatpush1.bf16.msra.mxu0 %v20570_v24  ;;  %v22433_v24 = vld [vmem:[#allocation2 + $0x20] sm:$0xff] }
 0x204   : > { %2845 = vmatprep.subr.bf16.mxu0 %v20575_v62  ;;  %v20630_v62 = vld [vmem:[%s28857_s1 + $0x910] ss:$8 sps:$4 sm:$0xff]  }
 0x207   : > { %2846 = vmatpush1.bf16.msra.mxu0 %v20573_v28  ;;  %v20633_v28 = vld [vmem:[%s28857_s1 + $0x920] ss:$8 sps:$4 sm:$0xff]  }
 0x208   : > { %2847 = vmatprep.subr.bf16.mxu0 %v20578_v29  ;;  %v20638_v29 = vld [vmem:[%s28857_s1 + $0x934] ss:$8 sps:$4 sm:$0xff]  }
 0x20b   : > { %2848 = vmatpush1.bf16.msra.mxu0 %v20576_v41  ;;  %v22435_v41 = vld [vmem:[#allocation2 + $0x38] sm:$0xff] }
 0x20c   : > { %3263 = vmatprep.subr.bf16.mxu0 %v20581_v42  ;;  %v20639_v42 = vld [vmem:[%s28857_s1 + $0x940] ss:$8 sps:$4 sm:$0xff]  }
 0x20e   : > { %2850 = vmatmul.mubr.bf16.vlgmr.msra.gmra.mrb[0].mxu0 %v2396_v47  ;;  %v20650_v47 = vld [vmem:[%s28857_s1 + $0x974] ss:$8 sps:$4 sm:$0xff]  }
 0x20f   : > { %3264 = vmatpush1.bf16.msra.mxu0 %v20579_v34  ;;  %2859 = vmatprep.mubr.bf16.mxu0 %v2435_v50  ;;  %v20645_v34 = vld [vmem:[%s28857_s1 + $0x960] ss:$8 sps:$4 sm:$0xff]  }
 0x210   : > { %3265 = vmatprep.subr.bf16.mxu0 %v20584_v48  ;;  %v20648_v48 = vld [vmem:[%s28857_s1 + $0x970] ss:$8 sps:$4 sm:$0xff]   ;;  %v20651_v50 = vld [vmem:[%s28857_s1 + $0x980] ss:$8 sps:$4 sm:$0xff]  }
 0x213   : > { %3266 = vmatpush1.bf16.msra.mxu0 %v20582_v52  ;;  %v20656_v52 = vld [vmem:[%s28857_s1 + $0x994] ss:$8 sps:$4 sm:$0xff]  }
 0x214   : > { %3267 = vmatprep.subr.bf16.mxu0 %v20587_v53  ;;  %v20654_v53 = vld [vmem:[%s28857_s1 + $0x990] ss:$8 sps:$4 sm:$0xff]  }
 0x216   : > { %2860 = vmatmul.mubr.bf16.gmra.mrb[4].mxu0 %v2427_v60  ;;  %v20660_v60 = vld [vmem:[%s28857_s1 + $0x9b0] ss:$8 sps:$4 sm:$0xff]  }
 0x217   : > { %3268 = vmatpush1.bf16.msra.mxu0 %v20585_v2  ;;  %3295 = vmatprep.mubr.bf16.mxu0 %v22432_v0  ;;  %v20657_v2 = vld [vmem:[%s28857_s1 + $0x9a0] ss:$8 sps:$4 sm:$0xff]   ;;  %v20668_v0 = vld [vmem:[%s28857_s1 + $0x9d4] ss:$8 sps:$4 sm:$0xff]  }
 0x218   : > { %3269 = vmatprep.subr.bf16.mxu0 %v20590_v59  ;;  %v20662_v59 = vld [vmem:[%s28857_s1 + $0x9b4] ss:$8 sps:$4 sm:$0xff]  }
 0x21b   : > { %3270 = vmatpush1.bf16.msra.mxu0 %v20588_v61  ;;  %v20665_v61 = vld [vmem:[%s28857_s1 + $0x9c4] ss:$8 sps:$4 sm:$0xff]  }
 0x21c   : > { %3271 = vmatprep.subr.bf16.mxu0 %v20593_v30  ;;  %v20663_v30 = vld [vmem:[%s28857_s1 + $0x9c0] ss:$8 sps:$4 sm:$0xff]  }
 0x21f   : > { %3272 = vmatpush1.bf16.msra.mxu0 %v20591_v51  ;;  %v20666_v51 = vld [vmem:[%s28857_s1 + $0x9d0] ss:$8 sps:$4 sm:$0xff]  }
 0x220   : > { %3273 = vmatprep.subr.bf16.mxu0 %v20596_v63  ;;  %v20671_v63 = vld [vmem:[%s28857_s1 + $0x9e4] ss:$8 sps:$4 sm:$0xff]  }
 0x223   : > { %3274 = vmatpush1.bf16.msra.mxu0 %v20594_v44  ;;  %v20669_v44 = vld [vmem:[%s28857_s1 + $0x9e0] ss:$8 sps:$4 sm:$0xff]  }
 0x224   : > { %3275 = vmatprep.subr.bf16.mxu0 %v20599_v1  ;;  %v20674_v1 = vld [vmem:[%s28857_s1 + $0x9f4] ss:$8 sps:$4 sm:$0xff]  }
 0x227   : > { %3276 = vmatpush1.bf16.msra.mxu0 %v20597_v9  ;;  %v3378_v9 = vld [vmem:[#allocation2 + $0x28] sm:$0xff] }
 0x228   : > { %3277 = vmatprep.subr.bf16.mxu0 %v20602_v6  ;;  %v20672_v6 = vld [vmem:[%s28857_s1 + $0x9f0] ss:$8 sps:$4 sm:$0xff]  }
 0x22b   : > { %3278 = vmatpush1.bf16.msra.mxu0 %v20600_v3  ;;  %v20677_v3 = vld [vmem:[%s28857_s1 + $0xa04] ss:$8 sps:$4 sm:$0xff]  }
 0x22c   : > { %3279 = vmatprep.subr.bf16.mxu0 %v20605_v7  ;;  %v3470_v7 = vshll.u32 %v3378_v9, 16 }
 0x22f   : > { %3280 = vmatpush1.bf16.msra.mxu0 %v20603_v4  ;;  %v20675_v4 = vld [vmem:[%s28857_s1 + $0xa00] ss:$8 sps:$4 sm:$0xff]  }
 0x230   : > { %3281 = vmatprep.subr.bf16.mxu0 %v20608_v8  ;;  %v20680_v8 = vld [vmem:[%s28857_s1 + $0xa14] ss:$8 sps:$4 sm:$0xff]  }
 0x233   : > { %3282 = vmatpush1.bf16.msra.mxu0 %v20606_v57  ;;  %v3468_v57 = vshrl.u32 %v3378_v9, 16 }
 0x234   : > { %3283 = vmatprep.subr.bf16.mxu0 %v20611_v10  ;;  %v3472_v10 = vrot.slane %v3470_v7, 1 }
 0x237   : > { %3284 = vmatpush1.bf16.msra.mxu0 %v20609_v46  ;;  %v22436_v46 = vld [vmem:[#allocation2 + $0x30] sm:$0xff] }
 0x238   : > { %3285 = vmatprep.subr.bf16.mxu0 %v20614_v11  ;;  %v20678_v11 = vld [vmem:[%s28857_s1 + $0xa10] ss:$8 sps:$4 sm:$0xff]  }
 0x23b   : > { %3286 = vmatpush1.bf16.msra.mxu0 %v20612_v12  ;;  %v20683_v12 = vld [vmem:[%s28857_s1 + $0xa24] ss:$8 sps:$4 sm:$0xff]  }
 0x23c   : > { %3287 = vmatprep.subr.bf16.mxu0 %v20617_v5  ;;  %v3473_v5 = vor.u32 %v3472_v10, %v3468_v57 }
 0x23f   : > { %3288 = vmatpush1.bf16.msra.mxu0 %v20615_v13  ;;  %v3477_v13 = vrot.slane %v23395_v43, 1 }
 0x240   : > { %3289 = vmatprep.subr.bf16.mxu0 %v20620_v14  ;;  %v20681_v14 = vld [vmem:[%s28857_s1 + $0xa20] ss:$8 sps:$4 sm:$0xff]  }
 0x243   : > { %3290 = vmatpush1.bf16.msra.mxu0 %v20618_v15  ;;  %v20686_v15 = vld [vmem:[%s28857_s1 + $0xa34] ss:$8 sps:$4 sm:$0xff]  }
 0x244   : > { %3291 = vmatprep.subr.bf16.mxu0 %v20623_v16  ;;  %v3478_v16 = vsel %vm3454_vm4, %v3473_v5, %v3477_v13 }
 0x247   : > { %3292 = vmatpush1.bf16.msra.mxu0 %v20621_v17  ;;  %v20684_v17 = vld [vmem:[%s28857_s1 + $0xa30] ss:$8 sps:$4 sm:$0xff]  }
 0x248   : > { %3293 = vmatprep.subr.bf16.mxu0 %v20626_v18  ;;  %v20689_v18 = vld [vmem:[%s28857_s1 + $0xa44] ss:$8 sps:$4 sm:$0xff]  }
 0x24b   : > { %3294 = vmatpush1.bf16.msra.mxu0 %v20624_v19  ;;  %v20687_v19 = vld [vmem:[%s28857_s1 + $0xa40] ss:$8 sps:$4 sm:$0xff]  }
 0x24c   : > { %3316 = vmatprep.subr.bf16.mxu0 %v20629_v20  ;;  %v20692_v20 = vld [vmem:[%s28857_s1 + $0xa54] ss:$8 sps:$4 sm:$0xff]  }
 0x24e   : > { %3296 = vmatmul.mubr.bf16.vlgmr.msra.gmra.mrb[0].mxu0 %v22433_v24  ;;  %v20693_v24 = vld [vmem:[%s28857_s1 + $0xa60] ss:$8 sps:$4 sm:$0xff]  }
 0x24f   : > { %3317 = vmatpush1.bf16.msra.mxu0 %v20627_v21  ;;  %3305 = vmatprep.mubr.bf16.mxu0 %v23260_v23  ;;  %v20690_v21 = vld [vmem:[%s28857_s1 + $0xa50] ss:$8 sps:$4 sm:$0xff]  }
 0x250   : > { %3318 = vmatprep.subr.bf16.mxu0 %v20632_v22  ;;  %v20695_v22 = vld [vmem:[%s28857_s1 + $0xa64] ss:$8 sps:$4 sm:$0xff]  }
 0x253   : > { %3319 = vmatpush1.bf16.msra.mxu0 %v20630_v62  ;;  %v20698_v62 = vld [vmem:[%s28857_s1 + $0xa74] ss:$8 sps:$4 sm:$0xff]  }
 0x254   : > { %3320 = vmatprep.subr.bf16.mxu0 %v20635_v25  ;;  %v20696_v25 = vld [vmem:[%s28857_s1 + $0xa70] ss:$8 sps:$4 sm:$0xff]  }
 0x256   : > { %3306 = vmatmul.mubr.bf16.gmra.mrb[4].mxu0 %v22434_v33  ;;  %v20704_v33 = vld [vmem:[%s28857_s1 + $0xa94] ss:$8 sps:$4 sm:$0xff]  }
 0x257   : > { %3321 = vmatpush1.bf16.msra.mxu0 %v20633_v28  ;;  %3348 = vmatprep.mubr.bf16.mxu0 %v22435_v41  ;;  %v20701_v28 = vld [vmem:[%s28857_s1 + $0xa84] ss:$8 sps:$4 sm:$0xff]   ;;  %v20705_v41 = vld [vmem:[%s28857_s1 + $0xaa0] ss:$8 sps:$4 sm:$0xff]  }
 0x258   : > { %3322 = vmatprep.subr.bf16.mxu0 %v20638_v29  ;;  %v20699_v29 = vld [vmem:[%s28857_s1 + $0xa80] ss:$8 sps:$4 sm:$0xff]  }
 0x25b   : > { %3323 = vmatpush1.bf16.msra.mxu0 %v20636_v35  ;;  %v20702_v35 = vld [vmem:[%s28857_s1 + $0xa90] ss:$8 sps:$4 sm:$0xff]  }
 0x25c   : > { %3324 = vmatprep.subr.bf16.mxu0 %v20641_v39  ;;  %v20707_v39 = vld [vmem:[%s28857_s1 + $0xaa4] ss:$8 sps:$4 sm:$0xff]  }
 0x25f   : > { %3325 = vmatpush1.bf16.msra.mxu0 %v20639_v42  ;;  %v20710_v42 = vld [vmem:[%s28857_s1 + $0xab4] ss:$8 sps:$4 sm:$0xff]  }
 0x260   : > { %3326 = vmatprep.subr.bf16.mxu0 %v20644_v38  ;;  %v20708_v38 = vld [vmem:[%s28857_s1 + $0xab0] ss:$8 sps:$4 sm:$0xff]  }
 0x263   : > { %3327 = vmatpush1.bf16.msra.mxu0 %v20642_v56  ;;  %v20713_v56 = vld [vmem:[%s28857_s1 + $0xac4] ss:$8 sps:$4 sm:$0xff]  }
 0x264   : > { %3328 = vmatprep.subr.bf16.mxu0 %v20647_v45  ;;  %v20711_v45 = vld [vmem:[%s28857_s1 + $0xac0] ss:$8 sps:$4 sm:$0xff]  }
 0x267   : > { %3329 = vmatpush1.bf16.msra.mxu0 %v20645_v34  ;;  %v20716_v34 = vld [vmem:[%s28857_s1 + $0xad4] ss:$8 sps:$4 sm:$0xff]  }
 0x268   : > { %3330 = vmatprep.subr.bf16.mxu0 %v20650_v47  ;;  %v3377_v47 = vld [vmem:[#allocation2 + $0x20] sm:$0xff] }
 0x26b   : > { %3331 = vmatpush1.bf16.msra.mxu0 %v20648_v48  ;;  %v20714_v48 = vld [vmem:[%s28857_s1 + $0xad0] ss:$8 sps:$4 sm:$0xff]  }
 0x26c   : > { %3332 = vmatprep.subr.bf16.mxu0 %v20653_v49  ;;  %v3458_v49 = vshll.u32 %v3377_v47, 16 }
 0x26f   : > { %3333 = vmatpush1.bf16.msra.mxu0 %v20651_v50  ;;  %v20719_v50 = vld [vmem:[%s28857_s1 + $0xae4] ss:$8 sps:$4 sm:$0xff]  }
 0x270   : > { %3334 = vmatprep.subr.bf16.mxu0 %v20656_v52  ;;  %v3386_v52 = vld [vmem:[#allocation2 + $0x68] sm:$0x1] }
 0x273   : > { %3335 = vmatpush1.bf16.msra.mxu0 %v20654_v53  ;;  %v20717_v53 = vld [vmem:[%s28857_s1 + $0xae0] ss:$8 sps:$4 sm:$0xff]  }
 0x274   : > { %3336 = vmatprep.subr.bf16.mxu0 %v20659_v55  ;;  %v20722_v55 = vld [vmem:[%s28857_s1 + $0xaf4] ss:$8 sps:$4 sm:$0xff]  }
 0x277   : > { %3337 = vmatpush1.bf16.msra.mxu0 %v20657_v2  ;;  %v3456_v2 = vshrl.u32 %v3377_v47, 16  ;;  %v20761_v47 = vld [vmem:[%s28857_s1 + $0xbc4] ss:$8 sps:$4 sm:$0xff]  }
 0x278   : > { %3338 = vmatprep.subr.bf16.mxu0 %v20662_v59  ;;  %v3460_v59 = vrot.slane %v3458_v49, 1  ;;  %v20764_v49 = vld [vmem:[%s28857_s1 + $0xbd4] ss:$8 sps:$4 sm:$0xff]  }
 0x27b   : > { %3339 = vmatpush1.bf16.msra.mxu0 %v20660_v60  ;;  %v3515_v60 = vshll.u32 %v3386_v52, 16  ;;  %v20762_v52 = vld [vmem:[%s28857_s1 + $0xbd0] ss:$8 sps:$4 sm:$0xff]  }
 0x27c   : > { %3340 = vmatprep.subr.bf16.mxu0 %v20665_v61  ;;  %v3380_v61 = vld [vmem:[#allocation2 + $0x38] sm:$0xff] }
 0x27d   : > { %v3517_v9 = vrot.slane %v3515_v60, 1  ;;  %v3492_v10 = vshrl.u32 %v3380_v61, 16  ;;  %v20770_v60 = vld [vmem:[%s28857_s1 + $0xbf4] ss:$8 sps:$4 sm:$0xff]  }
 0x27f   : > { %3341 = vmatpush1.bf16.msra.mxu0 %v20663_v30  ;;  %v20720_v30 = vld [vmem:[%s28857_s1 + $0xaf0] ss:$8 sps:$4 sm:$0xff]  }
 0x280   : > { %3342 = vmatprep.subr.bf16.mxu0 %v20668_v0  ;;  %v20725_v0 = vld [vmem:[%s28857_s1 + $0xb04] ss:$8 sps:$4 sm:$0xff]  }
 0x283   : > { %3343 = vmatpush1.bf16.msra.mxu0 %v20666_v51  ;;  %v3461_v51 = vor.u32 %v3460_v59, %v3456_v2  ;;  %v3388_v2 = vld [vmem:[#allocation2 + $0x78] sm:$0x1]  ;;  %v20765_v59 = vld [vmem:[%s28857_s1 + $0xbe0] ss:$8 sps:$4 sm:$0xff]  }
 0x284   : > { %3344 = vmatprep.subr.bf16.mxu0 %v20671_v63  ;;  %v3465_v63 = vrot.slane %v23415_v37, 1 }
 0x286   : > { %v3466_v7 = vsel %vm3454_vm4, %v3461_v51, %v3465_v63  ;;  %v3505_v5 = vor.u32 %v3465_v63, %v23404_v36  ;;  %v3978_v51 = vld [vmem:[#allocation2 + $0x28] sm:$0xf8]  ;;  %v20768_v63 = vld [vmem:[%s28857_s1 + $0xbf0] ss:$8 sps:$4 sm:$0xff]  }
 0x287   : > { %3345 = vmatpush1.bf16.msra.mxu0 %v20669_v44  ;;  %v3385_v44 = vld [vmem:[#allocation2 + $0x60] sm:$0x1] }
 0x288   : > { %3346 = vmatprep.subr.bf16.mxu0 %v20674_v1  ;;  %v3513_v1 = vor.u32 %v3477_v13, %v23382_v32 }
 0x28a   : > { %v3518_v57 = vsel %vm3454_vm4, %v3513_v1, %v3517_v9  ;;  %v3489_v9 = vrot.slane %v23539_v58, 1 }
 0x28b   : > { %3347 = vmatpush1.bf16.msra.mxu0 %v20672_v6  ;;  %v3494_v6 = vshll.u32 %v3380_v61, 16 }
 0x28c   : > { %3863 = vmatprep.subr.bf16.mxu0 %v20677_v3  ;;  %v20723_v3 = vld [vmem:[%s28857_s1 + $0xb00] ss:$8 sps:$4 sm:$0xff]  }
 0x28e   : > { %3349 = vmatmul.mubr.bf16.vlgmr.msra.gmra.mrb[0].mxu0 %v22436_v46  ;;  %v3496_v46 = vrot.slane %v3494_v6, 1  ;;  %v3387_v6 = vld [vmem:[#allocation2 + $0x70] sm:$0x1] }
 0x28f   : > { %3864 = vmatpush1.bf16.msra.mxu0 %v20675_v4  ;;  %3358 = vmatprep.mubr.bf16.mxu0 %v23370_v27  ;;  %v20728_v4 = vld [vmem:[%s28857_s1 + $0xb14] ss:$8 sps:$4 sm:$0xff]  }
 0x290   : > { %3865 = vmatprep.subr.bf16.mxu0 %v20680_v8  ;;  %v3507_v8 = vshll.u32 %v3385_v44, 16  ;;  %v20773_v44 = vld [vmem:[%s28857_s1 + $0xc04] ss:$8 sps:$4 sm:$0xff]  }
 0x292   : > { %v3509_v13 = vrot.slane %v3507_v8, 1 }
 0x293   : > { %3866 = vmatpush1.bf16.msra.mxu0 %v20678_v11  ;;  %v20726_v11 = vld [vmem:[%s28857_s1 + $0xb10] ss:$8 sps:$4 sm:$0xff]  }
 0x294   : > { %3867 = vmatprep.subr.bf16.mxu0 %v20683_v12  ;;  %v20731_v12 = vld [vmem:[%s28857_s1 + $0xb24] ss:$8 sps:$4 sm:$0xff]  }
 0x296   : > { %3359 = vmatmul.mubr.bf16.gmra.mrb[4].mxu0 %v23378_v31 }
 0x297   : > { %3868 = vmatpush1.bf16.msra.mxu0 %v20681_v14  ;;  %3895 = vmatprep.mubr.bf16.mxu0 %v3478_v16  ;;  %v3501_v14 = vrot.slane %v23517_v40, 1  ;;  %v20729_v16 = vld [vmem:[%s28857_s1 + $0xb20] ss:$8 sps:$4 sm:$0xff]  }
 0x298   : > { %3869 = vmatprep.subr.bf16.mxu0 %v20686_v15  ;;  %v3497_v15 = vor.u32 %v3496_v46, %v3492_v10  ;;  %v20776_v10 = vld [vmem:[%s28857_s1 + $0xc14] ss:$8 sps:$4 sm:$0xff]  }
 0x29b   : > { %3870 = vmatpush1.bf16.msra.mxu0 %v20684_v17  ;;  %v20734_v17 = vld [vmem:[%s28857_s1 + $0xb34] ss:$8 sps:$4 sm:$0xff]  }
 0x29c   : > { %3871 = vmatprep.subr.bf16.mxu0 %v20689_v18  ;;  %v3510_v18 = vsel %vm3454_vm4, %v3505_v5, %v3509_v13 }
 0x29f   : > { %3872 = vmatpush1.bf16.msra.mxu0 %v20687_v19  ;;  %v3502_v19 = vsel %vm3454_vm4, %v3497_v15, %v3501_v14  ;;  %v4071_v15 = vrot.slane %v23395_v43, 4 }
 0x2a0   : > { %3873 = vmatprep.subr.bf16.mxu0 %v20692_v20  ;;  %v20732_v20 = vld [vmem:[%s28857_s1 + $0xb30] ss:$8 sps:$4 sm:$0xff]  }
 0x2a3   : > { %3874 = vmatpush1.bf16.msra.mxu0 %v20690_v21  ;;  %v20737_v21 = vld [vmem:[%s28857_s1 + $0xb44] ss:$8 sps:$4 sm:$0xff]  }
 0x2a4   : > { %3875 = vmatprep.subr.bf16.mxu0 %v20695_v22  ;;  %v20735_v22 = vld [vmem:[%s28857_s1 + $0xb40] ss:$8 sps:$4 sm:$0xff]  }
 0x2a7   : > { %3876 = vmatpush1.bf16.msra.mxu0 %v20693_v24  ;;  %v20740_v24 = vld [vmem:[%s28857_s1 + $0xb54] ss:$8 sps:$4 sm:$0xff]  }
 0x2a8   : > { %3877 = vmatprep.subr.bf16.mxu0 %v20698_v62  ;;  %v20738_v62 = vld [vmem:[%s28857_s1 + $0xb50] ss:$8 sps:$4 sm:$0xff]  }
 0x2ab   : > { %3878 = vmatpush1.bf16.msra.mxu0 %v20696_v25  ;;  %v20743_v25 = vld [vmem:[%s28857_s1 + $0xb64] ss:$8 sps:$4 sm:$0xff]  }
 0x2ac   : > { %3879 = vmatprep.subr.bf16.mxu0 %v20701_v28  ;;  %v20741_v28 = vld [vmem:[%s28857_s1 + $0xb60] ss:$8 sps:$4 sm:$0xff]  }
 0x2af   : > { %3880 = vmatpush1.bf16.msra.mxu0 %v20699_v29  ;;  %v20746_v29 = vld [vmem:[%s28857_s1 + $0xb74] ss:$8 sps:$4 sm:$0xff]  }
 0x2b0   : > { %3881 = vmatprep.subr.bf16.mxu0 %v20704_v33  ;;  %v20744_v33 = vld [vmem:[%s28857_s1 + $0xb70] ss:$8 sps:$4 sm:$0xff]  }
 0x2b3   : > { %3882 = vmatpush1.bf16.msra.mxu0 %v20702_v35  ;;  %v20749_v35 = vld [vmem:[%s28857_s1 + $0xb84] ss:$8 sps:$4 sm:$0xff]  }
 0x2b4   : > { %3883 = vmatprep.subr.bf16.mxu0 %v20707_v39  ;;  %v20747_v39 = vld [vmem:[%s28857_s1 + $0xb80] ss:$8 sps:$4 sm:$0xff]  }
 0x2b7   : > { %3884 = vmatpush1.bf16.msra.mxu0 %v20705_v41  ;;  %v20752_v41 = vld [vmem:[%s28857_s1 + $0xb94] ss:$8 sps:$4 sm:$0xff]  }
 0x2b8   : > { %3885 = vmatprep.subr.bf16.mxu0 %v20710_v42  ;;  %v20750_v42 = vld [vmem:[%s28857_s1 + $0xb90] ss:$8 sps:$4 sm:$0xff]  }
 0x2bb   : > { %3886 = vmatpush1.bf16.msra.mxu0 %v20708_v38  ;;  %v20755_v38 = vld [vmem:[%s28857_s1 + $0xba4] ss:$8 sps:$4 sm:$0xff]  }
 0x2bc   : > { %3887 = vmatprep.subr.bf16.mxu0 %v20713_v56  ;;  %v20753_v56 = vld [vmem:[%s28857_s1 + $0xba0] ss:$8 sps:$4 sm:$0xff]  }
 0x2bf   : > { %3888 = vmatpush1.bf16.msra.mxu0 %v20711_v45  ;;  %v20758_v45 = vld [vmem:[%s28857_s1 + $0xbb4] ss:$8 sps:$4 sm:$0xff]  }
 0x2c0   : > { %3889 = vmatprep.subr.bf16.mxu0 %v20716_v34  ;;  %v20756_v34 = vld [vmem:[%s28857_s1 + $0xbb0] ss:$8 sps:$4 sm:$0xff]  }
 0x2c3   : > { %3890 = vmatpush1.bf16.msra.mxu0 %v20714_v48  ;;  %v20759_v48 = vld [vmem:[%s28857_s1 + $0xbc0] ss:$8 sps:$4 sm:$0xff]  }
 0x2c4   : > { %3891 = vmatprep.subr.bf16.mxu0 %v20719_v50  ;;  %v3379_v50 = vld [vmem:[#allocation2 + $0x30] sm:$0xff] }
 0x2c5   : > { %v3480_v61 = vshrl.u32 %v3379_v50, 16 }
 0x2c7   : > { %3892 = vmatpush1.bf16.msra.mxu0 %v20717_v53  ;;  %v20767_v53 = vld [vmem:[%s28857_s1 + $0xbe4] ss:$8 sps:$4 sm:$0xff]  }
 0x2c8   : > { %3893 = vmatprep.subr.bf16.mxu0 %v20722_v55  ;;  %v3482_v55 = vshll.u32 %v3379_v50, 16  ;;  %v20801_v50 = vld [vmem:[%s28857_s1 + $0xca0] ss:$8 sps:$4 sm:$0xff]  }
 0x2cb   : > { %3894 = vmatpush1.bf16.msra.mxu0 %v20720_v30  ;;  %v3484_v30 = vrot.slane %v3482_v55, 1  ;;  %v20809_v55 = vld [vmem:[%s28857_s1 + $0xcc4] ss:$8 sps:$4 sm:$0xff]  }
 0x2cc   : > { %3916 = vmatprep.subr.bf16.mxu0 %v20725_v0  ;;  %v3531_v0 = vshll.u32 %v3388_v2, 16  ;;  %v20807_v2 = vld [vmem:[%s28857_s1 + $0xcc0] ss:$8 sps:$4 sm:$0xff]  }
 0x2cd   : > { %v3485_v1 = vor.u32 %v3484_v30, %v3480_v61  ;;  %v24035_v61 = vld [vmem:[#allocation2 + $0x68] sm:$0xf]  ;;  %v20810_v30 = vld [vmem:[%s28857_s1 + $0xcd0] ss:$8 sps:$4 sm:$0xff]  }
 0x2ce   : > { %3896 = vmatmul.mubr.bf16.vlgmr.msra.gmra.mrb[0].mxu0 %v3466_v7  ;;  %v4066_v7 = vshll.u32 %v3978_v51, 16  ;;  %v3533_v8 = vrot.slane %v3531_v0, 1 }
 0x2cf   : > { %3917 = vmatpush1.bf16.msra.mxu0 %v20723_v3  ;;  %3905 = vmatprep.mubr.bf16.mxu0 %v3518_v57  ;;  %v4063_v3 = vshrl.u32 %v3978_v51, 16  ;;  %v20771_v57 = vld [vmem:[%s28857_s1 + $0xc00] ss:$8 sps:$4 sm:$0xff]   ;;  %v3490_v46 = vsel %vm3454_vm4, %v3485_v1, %v3489_v9  ;;  %v20815_v1 = vld [vmem:[%s28857_s1 + $0xce4] ss:$8 sps:$4 sm:$0xff]  }
 0x2d0   : > { %3918 = vmatprep.subr.bf16.mxu0 %v20728_v4  ;;  %v3529_v4 = vor.u32 %v3501_v14, %v23506_v26  ;;  %v4068_v5 = vrot.slane %v4066_v7, 4  ;;  %v4070_v14 = vrot.slane %v23382_v32, 3 }
 0x2d2   : > { %v3534_v13 = vsel %vm3454_vm4, %v3529_v4, %v3533_v8 }
 0x2d3   : > { %3919 = vmatpush1.bf16.msra.mxu0 %v20726_v11  ;;  %v3523_v11 = vshll.u32 %v3387_v6, 16  ;;  %v4059_v6 = vrot.slane %v23415_v37, 4 }
 0x2d4   : > { %3920 = vmatprep.subr.bf16.mxu0 %v20731_v12  ;;  %v4065_v12 = vrot.slane %v4063_v3, 3  ;;  %v20813_v3 = vld [vmem:[%s28857_s1 + $0xce0] ss:$8 sps:$4 sm:$0xff]  }
 0x2d6   : > { %3906 = vmatmul.mubr.bf16.gmra.mrb[4].mxu0 %v3510_v18  ;;  %v3521_v18 = vor.u32 %v3489_v9, %v23527_v54  ;;  %v4058_v9 = vrot.slane %v23404_v36, 3 }
 0x2d7   : > { %3921 = vmatpush1.bf16.msra.mxu0 %v20729_v16  ;;  %3948 = vmatprep.mubr.bf16.mxu0 %v3502_v19  ;;  %v20774_v16 = vld [vmem:[%s28857_s1 + $0xc10] ss:$8 sps:$4 sm:$0xff]   ;;  %v3525_v19 = vrot.slane %v3523_v11, 1 }
 0x2d8   : > { %3922 = vmatprep.subr.bf16.mxu0 %v20734_v17  ;;  %v20779_v17 = vld [vmem:[%s28857_s1 + $0xc24] ss:$8 sps:$4 sm:$0xff]   ;;  %v3980_v11 = vld [vmem:[#allocation2 + $0x38] sm:$0xf8] }
 0x2db   : > { %3923 = vmatpush1.bf16.msra.mxu0 %v20732_v20  ;;  %v4069_v20 = vor.u32 %v4068_v5, %v4065_v12  ;;  %v4060_v12 = vor.u32 %v4059_v6, %v4058_v9  ;;  %v20816_v5 = vld [vmem:[%s28857_s1 + $0xcf0] ss:$8 sps:$4 sm:$0xff]   ;;  %v20849_v9 = vld [vmem:[%s28857_s1 + $0xda0] ss:$8 sps:$4 sm:$0xff]   ;;  %v20854_v6 = vld [vmem:[%s28857_s1 + $0xdb4] ss:$8 sps:$4 sm:$0xff]  }
 0x2dc   : > { %3924 = vmatprep.subr.bf16.mxu0 %v20737_v21  ;;  %v23964_v21 = vor.u32 %v4071_v15, %v4070_v14 }
 0x2df   : > { %3925 = vmatpush1.bf16.msra.mxu0 %v20735_v22  ;;  %v20777_v22 = vld [vmem:[%s28857_s1 + $0xc20] ss:$8 sps:$4 sm:$0xff]  }
 0x2e0   : > { %3926 = vmatprep.subr.bf16.mxu0 %v20740_v24  ;;  %v20782_v24 = vld [vmem:[%s28857_s1 + $0xc34] ss:$8 sps:$4 sm:$0xff]  }
 0x2e3   : > { %3927 = vmatpush1.bf16.msra.mxu0 %v20738_v62  ;;  %v3526_v62 = vsel %vm3454_vm4, %v3521_v18, %v3525_v19  ;;  %v4087_v18 = vshrl.u32 %v3980_v11, 16  ;;  %v4090_v19 = vshll.u32 %v3980_v11, 16  ;;  %v20858_v11 = vld [vmem:[%s28857_s1 + $0xdd0] ss:$8 sps:$4 sm:$0xff]  }
 0x2e4   : > { %3928 = vmatprep.subr.bf16.mxu0 %v20743_v25  ;;  %v4073_v25 = vsel %vm1167_vm1, %v4069_v20, %v23964_v21  ;;  %v20819_v20 = vld [vmem:[%s28857_s1 + $0xd00] ss:$8 sps:$4 sm:$0xff]  }
 0x2e7   : > { %3929 = vmatpush1.bf16.msra.mxu0 %v20741_v28  ;;  %v20780_v28 = vld [vmem:[%s28857_s1 + $0xc30] ss:$8 sps:$4 sm:$0xff]  }
 0x2e8   : > { %3930 = vmatprep.subr.bf16.mxu0 %v20746_v29  ;;  %v20785_v29 = vld [vmem:[%s28857_s1 + $0xc44] ss:$8 sps:$4 sm:$0xff]  }
 0x2eb   : > { %3931 = vmatpush1.bf16.msra.mxu0 %v20744_v33  ;;  %v20783_v33 = vld [vmem:[%s28857_s1 + $0xc40] ss:$8 sps:$4 sm:$0xff]  }
 0x2ec   : > { %3932 = vmatprep.subr.bf16.mxu0 %v20749_v35  ;;  %v20788_v35 = vld [vmem:[%s28857_s1 + $0xc54] ss:$8 sps:$4 sm:$0xff]  }
 0x2ef   : > { %3933 = vmatpush1.bf16.msra.mxu0 %v20747_v39  ;;  %v20786_v39 = vld [vmem:[%s28857_s1 + $0xc50] ss:$8 sps:$4 sm:$0xff]  }
 0x2f0   : > { %3934 = vmatprep.subr.bf16.mxu0 %v20752_v41  ;;  %v20791_v41 = vld [vmem:[%s28857_s1 + $0xc64] ss:$8 sps:$4 sm:$0xff]  }
 0x2f3   : > { %3935 = vmatpush1.bf16.msra.mxu0 %v20750_v42  ;;  %v20789_v42 = vld [vmem:[%s28857_s1 + $0xc60] ss:$8 sps:$4 sm:$0xff]  }
 0x2f4   : > { %3936 = vmatprep.subr.bf16.mxu0 %v20755_v38  ;;  %v20794_v38 = vld [vmem:[%s28857_s1 + $0xc74] ss:$8 sps:$4 sm:$0xff]  }
 0x2f7   : > { %3937 = vmatpush1.bf16.msra.mxu0 %v20753_v56  ;;  %v20792_v56 = vld [vmem:[%s28857_s1 + $0xc70] ss:$8 sps:$4 sm:$0xff]  }
 0x2f8   : > { %3938 = vmatprep.subr.bf16.mxu0 %v20758_v45  ;;  %v20797_v45 = vld [vmem:[%s28857_s1 + $0xc84] ss:$8 sps:$4 sm:$0xff]  }
 0x2fb   : > { %3939 = vmatpush1.bf16.msra.mxu0 %v20756_v34  ;;  %v20795_v34 = vld [vmem:[%s28857_s1 + $0xc80] ss:$8 sps:$4 sm:$0xff]  }
 0x2fc   : > { %3940 = vmatprep.subr.bf16.mxu0 %v20761_v47  ;;  %v20800_v47 = vld [vmem:[%s28857_s1 + $0xc94] ss:$8 sps:$4 sm:$0xff]  }
 0x2ff   : > { %3941 = vmatpush1.bf16.msra.mxu0 %v20759_v48  ;;  %v20798_v48 = vld [vmem:[%s28857_s1 + $0xc90] ss:$8 sps:$4 sm:$0xff]  }
 0x300   : > { %3942 = vmatprep.subr.bf16.mxu0 %v20764_v49  ;;  %v20803_v49 = vld [vmem:[%s28857_s1 + $0xca4] ss:$8 sps:$4 sm:$0xff]  }
 0x303   : > { %3943 = vmatpush1.bf16.msra.mxu0 %v20762_v52  ;;  %v20806_v52 = vld [vmem:[%s28857_s1 + $0xcb4] ss:$8 sps:$4 sm:$0xff]  }
 0x304   : > { %3944 = vmatprep.subr.bf16.mxu0 %v20767_v53  ;;  %v20804_v53 = vld [vmem:[%s28857_s1 + $0xcb0] ss:$8 sps:$4 sm:$0xff]  }
 0x307   : > { %3945 = vmatpush1.bf16.msra.mxu0 %v20765_v59  ;;  %v20812_v59 = vld [vmem:[%s28857_s1 + $0xcd4] ss:$8 sps:$4 sm:$0xff]  }
 0x308   : > { %3946 = vmatprep.subr.bf16.mxu0 %v20770_v60  ;;  %v3977_v60 = vld [vmem:[#allocation2 + $0x20] sm:$0xf8] }
 0x309   : > { %v4051_v0 = vshrl.u32 %v3977_v60, 16  ;;  %v4054_v51 = vshll.u32 %v3977_v60, 16  ;;  %v20842_v60 = vld [vmem:[%s28857_s1 + $0xd74] ss:$8 sps:$4 sm:$0xff]  }
 0x30b   : > { %3947 = vmatpush1.bf16.msra.mxu0 %v20768_v63  ;;  %v4108_v63 = vshrl.u32 %v24035_v61, 16  ;;  %v4053_v7 = vrot.slane %v4051_v0, 3  ;;  %v4056_v4 = vrot.slane %v4054_v51, 4  ;;  %v20845_v0 = vld [vmem:[%s28857_s1 + $0xd84] ss:$8 sps:$4 sm:$0xff]  }
 0x30c   : > { %4462 = vmatprep.subr.bf16.mxu0 %v20773_v44  ;;  %v4111_v44 = vshll.u32 %v24035_v61, 16  ;;  %v20843_v51 = vld [vmem:[%s28857_s1 + $0xd80] ss:$8 sps:$4 sm:$0xff]  }
 0x30d   : > { %v4110_v8 = vrot.slane %v4108_v63, 3  ;;  %v20848_v63 = vld [vmem:[%s28857_s1 + $0xd94] ss:$8 sps:$4 sm:$0xff]  }
 0x30e   : > { %3949 = vmatmul.mubr.bf16.vlgmr.msra.gmra.mrb[0].mxu0 %v3490_v46  ;;  %v24053_v46 = vld [vmem:[#allocation2 + $0x60] sm:$0xf] }
 0x30f   : > { %4463 = vmatpush1.bf16.msra.mxu0 %v20771_v57  ;;  %3958 = vmatprep.mubr.bf16.mxu0 %v3534_v13  ;;  %v4113_v57 = vrot.slane %v4111_v44, 4  ;;  %v4057_v13 = vor.u32 %v4056_v4, %v4053_v7  ;;  %v4099_v15 = vshrl.u32 %v24053_v46, 16  ;;  %v20846_v44 = vld [vmem:[%s28857_s1 + $0xd90] ss:$8 sps:$4 sm:$0xff]   ;;  %v20857_v7 = vld [vmem:[%s28857_s1 + $0xdc4] ss:$8 sps:$4 sm:$0xff]  }
 0x310   : > { %4464 = vmatprep.subr.bf16.mxu0 %v20776_v10  ;;  %v20818_v10 = vld [vmem:[%s28857_s1 + $0xcf4] ss:$8 sps:$4 sm:$0xff]   ;;  %v20855_v4 = vld [vmem:[%s28857_s1 + $0xdc0] ss:$8 sps:$4 sm:$0xff]  }
 0x311   : > { %v4114_v14 = vor.u32 %v4113_v57, %v4110_v8  ;;  %v20860_v8 = vld [vmem:[%s28857_s1 + $0xdd4] ss:$8 sps:$4 sm:$0xff]  }
 0x312   : > { %v3979_v57 = vld [vmem:[#allocation2 + $0x30] sm:$0xf8] }
 0x313   : > { %4465 = vmatpush1.bf16.msra.mxu0 %v20774_v16  ;;  %v4102_v16 = vshll.u32 %v24053_v46, 16 }
 0x314   : > { %4466 = vmatprep.subr.bf16.mxu0 %v20779_v17  ;;  %v20821_v17 = vld [vmem:[%s28857_s1 + $0xd04] ss:$8 sps:$4 sm:$0xff]  }
 0x316   : > { %3959 = vmatmul.mubr.bf16.gmra.mrb[4].mxu0 %v3526_v62  ;;  %v4101_v62 = vrot.slane %v4099_v15, 3 }
 0x317   : > { %4467 = vmatpush1.bf16.msra.mxu0 %v20777_v22  ;;  %4494 = vmatprep.mubr.bf16.mxu0 %v4073_v25  ;;  %v4061_v22 = vsel %vm1167_vm1, %v4057_v13, %v4060_v12  ;;  %v4104_v25 = vrot.slane %v4102_v16, 4  ;;  %v20863_v13 = vld [vmem:[%s28857_s1 + $0xde4] ss:$8 sps:$4 sm:$0xff]   ;;  %v20861_v16 = vld [vmem:[%s28857_s1 + $0xde0] ss:$8 sps:$4 sm:$0xff]  }
 0x318   : > { %4468 = vmatprep.subr.bf16.mxu0 %v20782_v24  ;;  %v4115_v24 = vsel %vm1167_vm1, %v23964_v21, %v4114_v14 }
 0x319   : > { %v4105_v21 = vor.u32 %v4104_v25, %v4101_v62  ;;  %v24169_v25 = vld [vmem:[#allocation2 + $0x70] sm:$0xf] }
 0x31b   : > { %4469 = vmatpush1.bf16.msra.mxu0 %v20780_v28  ;;  %v20824_v28 = vld [vmem:[%s28857_s1 + $0xd14] ss:$8 sps:$4 sm:$0xff]  }
 0x31c   : > { %4470 = vmatprep.subr.bf16.mxu0 %v20785_v29  ;;  %v4089_v29 = vrot.slane %v4087_v18, 3 }
 0x31f   : > { %4471 = vmatpush1.bf16.msra.mxu0 %v20783_v33  ;;  %v4092_v33 = vrot.slane %v4090_v19, 4  ;;  %v4082_v19 = vrot.slane %v23527_v54, 3 }
 0x320   : > { %4472 = vmatprep.subr.bf16.mxu0 %v20788_v35  ;;  %v4094_v35 = vrot.slane %v23506_v26, 3 }
 0x323   : > { %4473 = vmatpush1.bf16.msra.mxu0 %v20786_v39  ;;  %v4095_v39 = vrot.slane %v23517_v40, 4 }
 0x324   : > { %4474 = vmatprep.subr.bf16.mxu0 %v20791_v41  ;;  %v20822_v41 = vld [vmem:[%s28857_s1 + $0xd10] ss:$8 sps:$4 sm:$0xff]  }
 0x327   : > { %4475 = vmatpush1.bf16.msra.mxu0 %v20789_v42  ;;  %v20827_v42 = vld [vmem:[%s28857_s1 + $0xd24] ss:$8 sps:$4 sm:$0xff]  }
 0x328   : > { %4476 = vmatprep.subr.bf16.mxu0 %v20794_v38  ;;  %v4093_v38 = vor.u32 %v4092_v33, %v4089_v29 }
 0x32b   : > { %4477 = vmatpush1.bf16.msra.mxu0 %v20792_v56  ;;  %v24080_v56 = vor.u32 %v4095_v39, %v4094_v35  ;;  %v4117_v35 = vshrl.u32 %v24169_v25, 16  ;;  %v4120_v39 = vshll.u32 %v24169_v25, 16 }
 0x32c   : > { %4478 = vmatprep.subr.bf16.mxu0 %v20797_v45  ;;  %v20825_v45 = vld [vmem:[%s28857_s1 + $0xd20] ss:$8 sps:$4 sm:$0xff]  }
 0x32f   : > { %4479 = vmatpush1.bf16.msra.mxu0 %v20795_v34  ;;  %v4106_v34 = vsel %vm1167_vm1, %v4060_v12, %v4105_v21  ;;  %v4075_v12 = vshrl.u32 %v3979_v57, 16 }
 0x330   : > { %4480 = vmatprep.subr.bf16.mxu0 %v20800_v47  ;;  %v20830_v47 = vld [vmem:[%s28857_s1 + $0xd34] ss:$8 sps:$4 sm:$0xff]  }
 0x333   : > { %4481 = vmatpush1.bf16.msra.mxu0 %v20798_v48  ;;  %v4097_v48 = vsel %vm1167_vm1, %v4093_v38, %v24080_v56 }
 0x334   : > { %4482 = vmatprep.subr.bf16.mxu0 %v20803_v49  ;;  %v20828_v49 = vld [vmem:[%s28857_s1 + $0xd30] ss:$8 sps:$4 sm:$0xff]  }
 0x337   : > { %4483 = vmatpush1.bf16.msra.mxu0 %v20801_v50  ;;  %v20833_v50 = vld [vmem:[%s28857_s1 + $0xd44] ss:$8 sps:$4 sm:$0xff]  }
 0x338   : > { %4484 = vmatprep.subr.bf16.mxu0 %v20806_v52  ;;  %v20831_v52 = vld [vmem:[%s28857_s1 + $0xd40] ss:$8 sps:$4 sm:$0xff]  }
 0x33b   : > { %4485 = vmatpush1.bf16.msra.mxu0 %v20804_v53  ;;  %v20836_v53 = vld [vmem:[%s28857_s1 + $0xd54] ss:$8 sps:$4 sm:$0xff]  }
 0x33c   : > { %4486 = vmatprep.subr.bf16.mxu0 %v20809_v55  ;;  %v20834_v55 = vld [vmem:[%s28857_s1 + $0xd50] ss:$8 sps:$4 sm:$0xff]  }
 0x33f   : > { %4487 = vmatpush1.bf16.msra.mxu0 %v20807_v2  ;;  %v20839_v2 = vld [vmem:[%s28857_s1 + $0xd64] ss:$8 sps:$4 sm:$0xff]  }
 0x340   : > { %4488 = vmatprep.subr.bf16.mxu0 %v20812_v59  ;;  %v20837_v59 = vld [vmem:[%s28857_s1 + $0xd60] ss:$8 sps:$4 sm:$0xff]  }
 0x343   : > { %4489 = vmatpush1.bf16.msra.mxu0 %v20810_v30  ;;  %v20840_v30 = vld [vmem:[%s28857_s1 + $0xd70] ss:$8 sps:$4 sm:$0xff]  }
 0x344   : > { %4490 = vmatprep.subr.bf16.mxu0 %v20815_v1  ;;  %v20851_v1 = vld [vmem:[%s28857_s1 + $0xda4] ss:$8 sps:$4 sm:$0xff]  }
 0x347   : > { %4491 = vmatpush1.bf16.msra.mxu0 %v20813_v3  ;;  %v20852_v3 = vld [vmem:[%s28857_s1 + $0xdb0] ss:$8 sps:$4 sm:$0xff]  }
 0x348   : > { %4492 = vmatprep.subr.bf16.mxu0 %v20818_v10  ;;  %v24151_v10 = vld [vmem:[#allocation2 + $0x78] sm:$0xf] }
 0x349   : > { %v4126_v14 = vshrl.u32 %v24151_v10, 16  ;;  %v4129_v15 = vshll.u32 %v24151_v10, 16 }
 0x34b   : > { %4493 = vmatpush1.bf16.msra.mxu0 %v20816_v5  ;;  %v4078_v5 = vshll.u32 %v3979_v57, 16  ;;  %v4131_v62 = vrot.slane %v4129_v15, 4  ;;  %v20896_v57 = vld [vmem:[%s28857_s1 + $0xe94] ss:$8 sps:$4 sm:$0xff]   ;;  %v20905_v15 = vld [vmem:[%s28857_s1 + $0xec4] ss:$8 sps:$4 sm:$0xff]  }
 0x34c   : > { %4515 = vmatprep.subr.bf16.mxu0 %v20821_v17  ;;  %v4077_v17 = vrot.slane %v4075_v12, 3  ;;  %v20899_v12 = vld [vmem:[%s28857_s1 + $0xea4] ss:$8 sps:$4 sm:$0xff]  }
 0x34d   : > { %v4080_v18 = vrot.slane %v4078_v5, 4  ;;  %v20897_v5 = vld [vmem:[%s28857_s1 + $0xea0] ss:$8 sps:$4 sm:$0xff]  }
 0x34e   : > { %4495 = vmatmul.mubr.bf16.vlgmr.msra.gmra.mrb[0].mxu0 %v4061_v22  ;;  %v20866_v22 = vld [vmem:[%s28857_s1 + $0xdf4] ss:$8 sps:$4 sm:$0xff]  }
 0x34f   : > { %4516 = vmatpush1.bf16.msra.mxu0 %v20819_v20  ;;  %4504 = vmatprep.mubr.bf16.mxu0 %v4115_v24  ;;  %v4083_v20 = vrot.slane %v23539_v58, 4  ;;  %v4128_v24 = vrot.slane %v4126_v14, 3  ;;  %v4081_v29 = vor.u32 %v4080_v18, %v4077_v17  ;;  %v20900_v14 = vld [vmem:[%s28857_s1 + $0xeb0] ss:$8 sps:$4 sm:$0xff]   ;;  %v20908_v17 = vld [vmem:[%s28857_s1 + $0xed4] ss:$8 sps:$4 sm:$0xff]  }
 0x350   : > { %4517 = vmatprep.subr.bf16.mxu0 %v20824_v28  ;;  %v20864_v28 = vld [vmem:[%s28857_s1 + $0xdf0] ss:$8 sps:$4 sm:$0xff]  }
 0x351   : > { %v4084_v33 = vor.u32 %v4083_v20, %v4082_v19  ;;  %v4132_v21 = vor.u32 %v4131_v62, %v4128_v24  ;;  %v20906_v18 = vld [vmem:[%s28857_s1 + $0xed0] ss:$8 sps:$4 sm:$0xff]   ;;  %v20911_v19 = vld [vmem:[%s28857_s1 + $0xee4] ss:$8 sps:$4 sm:$0xff]   ;;  %v20909_v20 = vld [vmem:[%s28857_s1 + $0xee0] ss:$8 sps:$4 sm:$0xff]  }
 0x352   : > { %v24280_v24 = vld [vmem:[#allocation2 + $0x20] sm:$0xf0]  ;;  %v20912_v62 = vld [vmem:[%s28857_s1 + $0xef0] ss:$8 sps:$4 sm:$0xff]  }
 0x353   : > { %4518 = vmatpush1.bf16.msra.mxu0 %v20822_v41  ;;  %v20869_v41 = vld [vmem:[%s28857_s1 + $0xe04] ss:$8 sps:$4 sm:$0xff]   ;;  %v4085_v38 = vsel %vm1167_vm1, %v4081_v29, %v4084_v33 }
 0x354   : > { %4519 = vmatprep.subr.bf16.mxu0 %v20827_v42  ;;  %v20867_v42 = vld [vmem:[%s28857_s1 + $0xe00] ss:$8 sps:$4 sm:$0xff]  }
 0x355   : > { %v22437_v29 = vld [vmem:[#allocation2 + $0x40] sm:$0xff] }
 0x356   : > { %4505 = vmatmul.mubr.bf16.gmra.mrb[4].mxu0 %v4106_v34  ;;  %v4122_v34 = vrot.slane %v4120_v39, 4  ;;  %v4671_v39 = vrot.slane %v24035_v61, 4  ;;  %v20918_v61 = vld [vmem:[%s28857_s1 + $0xf10] ss:$8 sps:$4 sm:$0xff]  }
 0x357   : > { %4520 = vmatpush1.bf16.msra.mxu0 %v20825_v45  ;;  %4547 = vmatprep.mubr.bf16.mxu0 %v4097_v48  ;;  %v4119_v45 = vrot.slane %v4117_v35, 3  ;;  %v4133_v48 = vsel %vm1167_vm1, %v24080_v56, %v4132_v21  ;;  %v20873_v56 = vld [vmem:[%s28857_s1 + $0xe20] ss:$8 sps:$4 sm:$0xff]   ;;  %v20917_v35 = vld [vmem:[%s28857_s1 + $0xf04] ss:$8 sps:$4 sm:$0xff]  }
 0x358   : > { %4521 = vmatprep.subr.bf16.mxu0 %v20830_v47  ;;  %v20872_v47 = vld [vmem:[%s28857_s1 + $0xe14] ss:$8 sps:$4 sm:$0xff]  }
 0x35b   : > { %4522 = vmatpush1.bf16.msra.mxu0 %v20828_v49  ;;  %v24188_v49 = vld [vmem:[#allocation2 + $0x28] sm:$0xf0] }
 0x35c   : > { %4523 = vmatprep.subr.bf16.mxu0 %v20833_v50  ;;  %v20870_v50 = vld [vmem:[%s28857_s1 + $0xe10] ss:$8 sps:$4 sm:$0xff]  }
 0x35f   : > { %4524 = vmatpush1.bf16.msra.mxu0 %v20831_v52  ;;  %v4123_v52 = vor.u32 %v4122_v34, %v4119_v45  ;;  %v24300_v45 = vld [vmem:[#allocation2 + $0x38] sm:$0xf0]  ;;  %v4669_v34 = vrot.slane %v24053_v46, 4 }
 0x360   : > { %4525 = vmatprep.subr.bf16.mxu0 %v20836_v53  ;;  %v20875_v53 = vld [vmem:[%s28857_s1 + $0xe24] ss:$8 sps:$4 sm:$0xff]   ;;  %v20926_v46 = vld [vmem:[%s28857_s1 + $0xf34] ss:$8 sps:$4 sm:$0xff]  }
 0x363   : > { %4526 = vmatpush1.bf16.msra.mxu0 %v20834_v55  ;;  %v4660_v55 = vrot.slane %v24188_v49, 4 }
 0x364   : > { %4527 = vmatprep.subr.bf16.mxu0 %v20839_v2  ;;  %v4661_v2 = vrot.slane %v23260_v23, 4  ;;  %v4666_v23 = vrot.slane %v24300_v45, 4 }
 0x367   : > { %4528 = vmatpush1.bf16.msra.mxu0 %v20837_v59  ;;  %v4124_v59 = vsel %vm1167_vm1, %v4084_v33, %v4123_v52  ;;  %v4658_v33 = vrot.slane %v22437_v29, 4  ;;  %v20965_v29 = vld [vmem:[%s28857_s1 + $0x1004] ss:$8 sps:$4 sm:$0xff]  }
 0x368   : > { %4529 = vmatprep.subr.bf16.mxu0 %v20842_v60  ;;  %v20878_v60 = vld [vmem:[%s28857_s1 + $0xe34] ss:$8 sps:$4 sm:$0xff]  }
 0x369   : > { %v4670_v52 = vsel %vm712_vm0, %v4658_v33, %v4669_v34  ;;  %v24429_v34 = vld [vmem:[#allocation2 + $0x70] sm:$0x1f] }
 0x36b   : > { %4530 = vmatpush1.bf16.msra.mxu0 %v20840_v30  ;;  %v4662_v30 = vsel %vm712_vm0, %v4660_v55, %v4661_v2  ;;  %v20924_v55 = vld [vmem:[%s28857_s1 + $0xf30] ss:$8 sps:$4 sm:$0xff]  }
 0x36c   : > { %4531 = vmatprep.subr.bf16.mxu0 %v20845_v0  ;;  %v20876_v0 = vld [vmem:[%s28857_s1 + $0xe30] ss:$8 sps:$4 sm:$0xff]  }
 0x36f   : > { %4532 = vmatpush1.bf16.msra.mxu0 %v20843_v51  ;;  %v20881_v51 = vld [vmem:[%s28857_s1 + $0xe44] ss:$8 sps:$4 sm:$0xff]  }
 0x370   : > { %4533 = vmatprep.subr.bf16.mxu0 %v20848_v63  ;;  %v20879_v63 = vld [vmem:[%s28857_s1 + $0xe40] ss:$8 sps:$4 sm:$0xff]  }
 0x373   : > { %4534 = vmatpush1.bf16.msra.mxu0 %v20846_v44  ;;  %v20884_v44 = vld [vmem:[%s28857_s1 + $0xe54] ss:$8 sps:$4 sm:$0xff]  }
 0x374   : > { %4535 = vmatprep.subr.bf16.mxu0 %v20851_v1  ;;  %v20882_v1 = vld [vmem:[%s28857_s1 + $0xe50] ss:$8 sps:$4 sm:$0xff]  }
 0x377   : > { %4536 = vmatpush1.bf16.msra.mxu0 %v20849_v9  ;;  %v20887_v9 = vld [vmem:[%s28857_s1 + $0xe64] ss:$8 sps:$4 sm:$0xff]  }
 0x378   : > { %4537 = vmatprep.subr.bf16.mxu0 %v20854_v6  ;;  %v20885_v6 = vld [vmem:[%s28857_s1 + $0xe60] ss:$8 sps:$4 sm:$0xff]  }
 0x37b   : > { %4538 = vmatpush1.bf16.msra.mxu0 %v20852_v3  ;;  %v20890_v3 = vld [vmem:[%s28857_s1 + $0xe74] ss:$8 sps:$4 sm:$0xff]  }
 0x37c   : > { %4539 = vmatprep.subr.bf16.mxu0 %v20857_v7  ;;  %v20888_v7 = vld [vmem:[%s28857_s1 + $0xe70] ss:$8 sps:$4 sm:$0xff]  }
 0x37f   : > { %4540 = vmatpush1.bf16.msra.mxu0 %v20855_v4  ;;  %v20893_v4 = vld [vmem:[%s28857_s1 + $0xe84] ss:$8 sps:$4 sm:$0xff]  }
 0x380   : > { %4541 = vmatprep.subr.bf16.mxu0 %v20860_v8  ;;  %v20891_v8 = vld [vmem:[%s28857_s1 + $0xe80] ss:$8 sps:$4 sm:$0xff]  }
 0x383   : > { %4542 = vmatpush1.bf16.msra.mxu0 %v20858_v11  ;;  %v20894_v11 = vld [vmem:[%s28857_s1 + $0xe90] ss:$8 sps:$4 sm:$0xff]  }
 0x384   : > { %4543 = vmatprep.subr.bf16.mxu0 %v20863_v13  ;;  %v20902_v13 = vld [vmem:[%s28857_s1 + $0xeb4] ss:$8 sps:$4 sm:$0xff]  }
 0x387   : > { %4544 = vmatpush1.bf16.msra.mxu0 %v20861_v16  ;;  %v20903_v16 = vld [vmem:[%s28857_s1 + $0xec0] ss:$8 sps:$4 sm:$0xff]  }
 0x388   : > { %4545 = vmatprep.subr.bf16.mxu0 %v20866_v22  ;;  %v20914_v22 = vld [vmem:[%s28857_s1 + $0xef4] ss:$8 sps:$4 sm:$0xff]  }
 0x38b   : > { %4546 = vmatpush1.bf16.msra.mxu0 %v20864_v28  ;;  %v4657_v28 = vrot.slane %v24280_v24, 4 }
 0x38c   : > { %5005 = vmatprep.subr.bf16.mxu0 %v20869_v41  ;;  %v20915_v41 = vld [vmem:[%s28857_s1 + $0xf00] ss:$8 sps:$4 sm:$0xff]  }
 0x38d   : > { %v4659_v21 = vsel %vm712_vm0, %v4657_v28, %v4658_v33  ;;  %v4675_v28 = vrot.slane %v24151_v10, 4  ;;  %v5201_v33 = vshrl.u32 %v24188_v49, 16  ;;  %v20968_v10 = vld [vmem:[%s28857_s1 + $0x1014] ss:$8 sps:$4 sm:$0xff]  }
 0x38e   : > { %4548 = vmatmul.mubr.bf16.vlgmr.msra.gmra.mrb[0].mxu0 %v4085_v38  ;;  %v4672_v38 = vsel %vm712_vm0, %v4661_v2, %v4671_v39  ;;  %v20929_v2 = vld [vmem:[%s28857_s1 + $0xf44] ss:$8 sps:$4 sm:$0xff]   ;;  %v20963_v39 = vld [vmem:[%s28857_s1 + $0x1000] ss:$8 sps:$4 sm:$0xff]  }
 0x38f   : > { %5006 = vmatpush1.bf16.msra.mxu0 %v20867_v42  ;;  %4557 = vmatprep.mubr.bf16.mxu0 %v4133_v48  ;;  %v20920_v42 = vld [vmem:[%s28857_s1 + $0xf14] ss:$8 sps:$4 sm:$0xff]   ;;  %v4667_v48 = vrot.slane %v23370_v27, 4  ;;  %v20966_v27 = vld [vmem:[%s28857_s1 + $0x1010] ss:$8 sps:$4 sm:$0xff]  }
 0x390   : > { %5007 = vmatprep.subr.bf16.mxu0 %v20872_v47  ;;  %v20923_v47 = vld [vmem:[%s28857_s1 + $0xf24] ss:$8 sps:$4 sm:$0xff]  }
 0x393   : > { %5008 = vmatpush1.bf16.msra.mxu0 %v20870_v50  ;;  %v20921_v50 = vld [vmem:[%s28857_s1 + $0xf20] ss:$8 sps:$4 sm:$0xff]  }
 0x394   : > { %5009 = vmatprep.subr.bf16.mxu0 %v20875_v53  ;;  %v4668_v53 = vsel %vm712_vm0, %v4666_v23, %v4667_v48 }
 0x396   : > { %4558 = vmatmul.mubr.bf16.gmra.mrb[4].mxu0 %v4124_v59  ;;  %v20932_v59 = vld [vmem:[%s28857_s1 + $0xf54] ss:$8 sps:$4 sm:$0xff]  }
 0x397   : > { %5010 = vmatpush1.bf16.msra.mxu0 %v20873_v56  ;;  %5037 = vmatprep.mubr.bf16.mxu0 %v4662_v30  ;;  %v20927_v56 = vld [vmem:[%s28857_s1 + $0xf40] ss:$8 sps:$4 sm:$0xff]   ;;  %v20935_v30 = vld [vmem:[%s28857_s1 + $0xf64] ss:$8 sps:$4 sm:$0xff]  }
 0x398   : > { %5011 = vmatprep.subr.bf16.mxu0 %v20878_v60  ;;  %v20930_v60 = vld [vmem:[%s28857_s1 + $0xf50] ss:$8 sps:$4 sm:$0xff]  }
 0x39b   : > { %5012 = vmatpush1.bf16.msra.mxu0 %v20876_v0  ;;  %v20933_v0 = vld [vmem:[%s28857_s1 + $0xf60] ss:$8 sps:$4 sm:$0xff]  }
 0x39c   : > { %5013 = vmatprep.subr.bf16.mxu0 %v20881_v51  ;;  %v20938_v51 = vld [vmem:[%s28857_s1 + $0xf74] ss:$8 sps:$4 sm:$0xff]  }
 0x39f   : > { %5014 = vmatpush1.bf16.msra.mxu0 %v20879_v63  ;;  %v20936_v63 = vld [vmem:[%s28857_s1 + $0xf70] ss:$8 sps:$4 sm:$0xff]  }
 0x3a0   : > { %5015 = vmatprep.subr.bf16.mxu0 %v20884_v44  ;;  %v20941_v44 = vld [vmem:[%s28857_s1 + $0xf84] ss:$8 sps:$4 sm:$0xff]  }
 0x3a3   : > { %5016 = vmatpush1.bf16.msra.mxu0 %v20882_v1  ;;  %v20939_v1 = vld [vmem:[%s28857_s1 + $0xf80] ss:$8 sps:$4 sm:$0xff]  }
 0x3a4   : > { %5017 = vmatprep.subr.bf16.mxu0 %v20887_v9  ;;  %v20944_v9 = vld [vmem:[%s28857_s1 + $0xf94] ss:$8 sps:$4 sm:$0xff]  }
 0x3a7   : > { %5018 = vmatpush1.bf16.msra.mxu0 %v20885_v6  ;;  %v20942_v6 = vld [vmem:[%s28857_s1 + $0xf90] ss:$8 sps:$4 sm:$0xff]  }
 0x3a8   : > { %5019 = vmatprep.subr.bf16.mxu0 %v20890_v3  ;;  %v20947_v3 = vld [vmem:[%s28857_s1 + $0xfa4] ss:$8 sps:$4 sm:$0xff]  }
 0x3ab   : > { %5020 = vmatpush1.bf16.msra.mxu0 %v20888_v7  ;;  %v20945_v7 = vld [vmem:[%s28857_s1 + $0xfa0] ss:$8 sps:$4 sm:$0xff]  }
 0x3ac   : > { %5021 = vmatprep.subr.bf16.mxu0 %v20893_v4  ;;  %v20950_v4 = vld [vmem:[%s28857_s1 + $0xfb4] ss:$8 sps:$4 sm:$0xff]  }
 0x3af   : > { %5022 = vmatpush1.bf16.msra.mxu0 %v20891_v8  ;;  %v20948_v8 = vld [vmem:[%s28857_s1 + $0xfb0] ss:$8 sps:$4 sm:$0xff]  }
 0x3b0   : > { %5023 = vmatprep.subr.bf16.mxu0 %v20896_v57  ;;  %v20953_v57 = vld [vmem:[%s28857_s1 + $0xfc4] ss:$8 sps:$4 sm:$0xff]  }
 0x3b3   : > { %5024 = vmatpush1.bf16.msra.mxu0 %v20894_v11  ;;  %v20951_v11 = vld [vmem:[%s28857_s1 + $0xfc0] ss:$8 sps:$4 sm:$0xff]  }
 0x3b4   : > { %5025 = vmatprep.subr.bf16.mxu0 %v20899_v12  ;;  %v20956_v12 = vld [vmem:[%s28857_s1 + $0xfd4] ss:$8 sps:$4 sm:$0xff]  }
 0x3b7   : > { %5026 = vmatpush1.bf16.msra.mxu0 %v20897_v5  ;;  %v24381_v5 = vld [vmem:[#allocation2 + $0x68] sm:$0x1f] }
 0x3b8   : > { %5027 = vmatprep.subr.bf16.mxu0 %v20902_v13  ;;  %v24383_v13 = vld [vmem:[#allocation2 + $0x8] sm:$0xff] }
 0x3b9   : > { %14386 = vst [vmem:[#allocation2 + $0x68] sm:$0xff] %v24383_v13  ;;  %14387 = vst [vmem:[#allocation2 + $0x70] sm:$0xff] %v24383_v13 }
 0x3bb   : > { %5028 = vmatpush1.bf16.msra.mxu0 %v20900_v14  ;;  %v24386_v14 = vld [vmem:[#allocation2 + $0x60] sm:$0x1f] }
 0x3bc   : > { %5029 = vmatprep.subr.bf16.mxu0 %v20905_v15  ;;  %v20954_v15 = vld [vmem:[%s28857_s1 + $0xfd0] ss:$8 sps:$4 sm:$0xff]   ;;  %7784 = vst [vmem:[#allocation2 + $0x60] sm:$0xff] %v24383_v13 }
 0x3bf   : > { %5030 = vmatpush1.bf16.msra.mxu0 %v20903_v16  ;;  %v20959_v16 = vld [vmem:[%s28857_s1 + $0xfe4] ss:$8 sps:$4 sm:$0xff]  }
 0x3c0   : > { %5031 = vmatprep.subr.bf16.mxu0 %v20908_v17  ;;  %v20957_v17 = vld [vmem:[%s28857_s1 + $0xfe0] ss:$8 sps:$4 sm:$0xff]  }
 0x3c3   : > { %5032 = vmatpush1.bf16.msra.mxu0 %v20906_v18  ;;  %v20962_v18 = vld [vmem:[%s28857_s1 + $0xff4] ss:$8 sps:$4 sm:$0xff]  }
 0x3c4   : > { %5033 = vmatprep.subr.bf16.mxu0 %v20911_v19  ;;  %v24401_v19 = vld [vmem:[#allocation2 + $0x30] sm:$0xf0] }
 0x3c7   : > { %5034 = vmatpush1.bf16.msra.mxu0 %v20909_v20  ;;  %v20960_v20 = vld [vmem:[%s28857_s1 + $0xff0] ss:$8 sps:$4 sm:$0xff]  }
 0x3c8   : > { %5035 = vmatprep.subr.bf16.mxu0 %v20914_v22  ;;  %v4663_v22 = vrot.slane %v24401_v19, 4 }
 0x3cb   : > { %5036 = vmatpush1.bf16.msra.mxu0 %v20912_v62  ;;  %v4664_v62 = vrot.slane %v23378_v31, 4  ;;  %v4676_v31 = vsel %vm712_vm0, %v4667_v48, %v4675_v28  ;;  %v20969_v48 = vld [vmem:[%s28857_s1 + $0x1020] ss:$8 sps:$4 sm:$0xff]   ;;  %v21007_v28 = vld [vmem:[%s28857_s1 + $0x10e4] ss:$8 sps:$4 sm:$0xff]  }
 0x3cc   : > { %5058 = vmatprep.subr.bf16.mxu0 %v20917_v35  ;;  %v5204_v35 = vshll.u32 %v24188_v49, 16  ;;  %v5208_v49 = vrot.slane %v23382_v32, 4  ;;  %v20971_v32 = vld [vmem:[%s28857_s1 + $0x1024] ss:$8 sps:$4 sm:$0xff]  }
 0x3ce   : > { %5038 = vmatmul.mubr.bf16.vlgmr.msra.gmra.mrb[0].mxu0 %v4659_v21  ;;  %v5203_v21 = vrot.slane %v5201_v33, 4 }
 0x3cf   : > { %5059 = vmatpush1.bf16.msra.mxu0 %v20915_v41  ;;  %5047 = vmatprep.mubr.bf16.mxu0 %v4672_v38  ;;  %v4665_v41 = vsel %vm712_vm0, %v4663_v22, %v4664_v62  ;;  %v5209_v38 = vrot.slane %v23395_v43, 5  ;;  %v5246_v22 = vshrl.u32 %v24381_v5, 16 }
 0x3d0   : > { %5060 = vmatprep.subr.bf16.mxu0 %v20920_v42  ;;  %v5206_v42 = vrot.slane %v5204_v35, 5  ;;  %v5196_v35 = vrot.slane %v23404_v36, 4  ;;  %v5240_v36 = vshll.u32 %v24386_v14, 16 }
 0x3d1   : > { %v24439_v23 = vor.u32 %v5209_v38, %v5208_v49  ;;  %v5237_v38 = vshrl.u32 %v24386_v14, 16 }
 0x3d2   : > { %v5207_v43 = vor.u32 %v5206_v42, %v5203_v21  ;;  %v21008_v21 = vld [vmem:[%s28857_s1 + $0x10f0] ss:$8 sps:$4 sm:$0xff]  }
 0x3d3   : > { %5061 = vmatpush1.bf16.msra.mxu0 %v20918_v61  ;;  %v24426_v61 = vld [vmem:[#allocation2 + $0x78] sm:$0x1f]  ;;  %v5239_v14 = vrot.slane %v5237_v38, 4 }
 0x3d4   : > { %5062 = vmatprep.subr.bf16.mxu0 %v20923_v47  ;;  %14388 = vst [vmem:[#allocation2 + $0x78] sm:$0xff] %v24383_v13  ;;  %v4673_v47 = vrot.slane %v24169_v25, 4  ;;  %v20974_v25 = vld [vmem:[%s28857_s1 + $0x1034] ss:$8 sps:$4 sm:$0xff]  }
 0x3d6   : > { %5048 = vmatmul.mubr.bf16.gmra.mrb[4].mxu0 %v4670_v52  ;;  %v5211_v52 = vsel %vm1775_vm2, %v5207_v43, %v24439_v23 }
 0x3d7   : > { %5063 = vmatpush1.bf16.msra.mxu0 %v20921_v50  ;;  %5090 = vmatprep.mubr.bf16.mxu0 %v4668_v53  ;;  %v4674_v50 = vsel %vm712_vm0, %v4664_v62, %v4673_v47  ;;  %v20972_v53 = vld [vmem:[%s28857_s1 + $0x1030] ss:$8 sps:$4 sm:$0xff]   ;;  %v5249_v62 = vshll.u32 %v24381_v5, 16  ;;  %v21010_v5 = vld [vmem:[%s28857_s1 + $0x10f4] ss:$8 sps:$4 sm:$0xff]   ;;  %v5228_v47 = vshll.u32 %v24300_v45, 16 }
 0x3d8   : > { %5064 = vmatprep.subr.bf16.mxu0 %v20926_v46  ;;  %v21061_v46 = vld [vmem:[%s28859_s3 + $0x40] sm:$0xff]  }
 0x3d9   : > { %19394 = vmatprep.subr.bf16.mxu1 %v21061_v46  ;;  %v5230_v46 = vrot.slane %v5228_v47, 5 }
 0x3db   : > { %5065 = vmatpush1.bf16.msra.mxu0 %v20924_v55  ;;  %v21063_v55 = vld [vmem:[%s28859_s3] sm:$0xff]  }
 0x3dc   : > { %5066 = vmatprep.subr.bf16.mxu0 %v20929_v2  ;;  %v20977_v2 = vld [vmem:[%s28857_s1 + $0x1044] ss:$8 sps:$4 sm:$0xff]   ;;  %19395 = vmatpush3.bf16.msra.mxu1 %v21063_v55  ;;  %v21014_v55 = vld [vmem:[%s28857_s1 + $0x1110] ss:$8 sps:$4 sm:$0xff]  }
 0x3df   : > { %5067 = vmatpush1.bf16.msra.mxu0 %v20927_v56  ;;  %v21065_v56 = vld [vmem:[%s28859_s3 + $0x48] sm:$0xff]  }
 0x3e0   : > { %5068 = vmatprep.subr.bf16.mxu0 %v20932_v59  ;;  %v21067_v59 = vld [vmem:[%s28859_s3 + $0x8] sm:$0xff]   ;;  %19396 = vmatprep.subr.bf16.mxu1 %v21065_v56 }
 0x3e1   : > { %19397 = vmatpush3.bf16.msra.mxu1 %v21067_v59 }
 0x3e3   : > { %5069 = vmatpush1.bf16.msra.mxu0 %v20930_v60  ;;  %v20975_v60 = vld [vmem:[%s28857_s1 + $0x1040] ss:$8 sps:$4 sm:$0xff]  }
 0x3e4   : > { %5070 = vmatprep.subr.bf16.mxu0 %v20935_v30  ;;  %v20980_v30 = vld [vmem:[%s28857_s1 + $0x1054] ss:$8 sps:$4 sm:$0xff]  }
 0x3e7   : > { %5071 = vmatpush1.bf16.msra.mxu0 %v20933_v0  ;;  %v20978_v0 = vld [vmem:[%s28857_s1 + $0x1050] ss:$8 sps:$4 sm:$0xff]  }
 0x3e8   : > { %5072 = vmatprep.subr.bf16.mxu0 %v20938_v51  ;;  %v20983_v51 = vld [vmem:[%s28857_s1 + $0x1064] ss:$8 sps:$4 sm:$0xff]  }
 0x3eb   : > { %5073 = vmatpush1.bf16.msra.mxu0 %v20936_v63  ;;  %v20981_v63 = vld [vmem:[%s28857_s1 + $0x1060] ss:$8 sps:$4 sm:$0xff]  }
 0x3ec   : > { %5074 = vmatprep.subr.bf16.mxu0 %v20941_v44  ;;  %v20986_v44 = vld [vmem:[%s28857_s1 + $0x1074] ss:$8 sps:$4 sm:$0xff]  }
 0x3ef   : > { %5075 = vmatpush1.bf16.msra.mxu0 %v20939_v1  ;;  %v20984_v1 = vld [vmem:[%s28857_s1 + $0x1070] ss:$8 sps:$4 sm:$0xff]  }
 0x3f0   : > { %5076 = vmatprep.subr.bf16.mxu0 %v20944_v9  ;;  %v20989_v9 = vld [vmem:[%s28857_s1 + $0x1084] ss:$8 sps:$4 sm:$0xff]  }
 0x3f3   : > { %5077 = vmatpush1.bf16.msra.mxu0 %v20942_v6  ;;  %v20987_v6 = vld [vmem:[%s28857_s1 + $0x1080] ss:$8 sps:$4 sm:$0xff]  }
 0x3f4   : > { %5078 = vmatprep.subr.bf16.mxu0 %v20947_v3  ;;  %v20992_v3 = vld [vmem:[%s28857_s1 + $0x1094] ss:$8 sps:$4 sm:$0xff]  }
 0x3f7   : > { %5079 = vmatpush1.bf16.msra.mxu0 %v20945_v7  ;;  %v20990_v7 = vld [vmem:[%s28857_s1 + $0x1090] ss:$8 sps:$4 sm:$0xff]  }
 0x3f8   : > { %5080 = vmatprep.subr.bf16.mxu0 %v20950_v4  ;;  %v20995_v4 = vld [vmem:[%s28857_s1 + $0x10a4] ss:$8 sps:$4 sm:$0xff]  }
 0x3fb   : > { %5081 = vmatpush1.bf16.msra.mxu0 %v20948_v8  ;;  %v20993_v8 = vld [vmem:[%s28857_s1 + $0x10a0] ss:$8 sps:$4 sm:$0xff]  }
 0x3fc   : > { %5082 = vmatprep.subr.bf16.mxu0 %v20953_v57  ;;  %v20998_v57 = vld [vmem:[%s28857_s1 + $0x10b4] ss:$8 sps:$4 sm:$0xff]  }
 0x3ff   : > { %5083 = vmatpush1.bf16.msra.mxu0 %v20951_v11  ;;  %v20996_v11 = vld [vmem:[%s28857_s1 + $0x10b0] ss:$8 sps:$4 sm:$0xff]  }
 0x400   : > { %5084 = vmatprep.subr.bf16.mxu0 %v20956_v12  ;;  %v21001_v12 = vld [vmem:[%s28857_s1 + $0x10c4] ss:$8 sps:$4 sm:$0xff]  }
 0x403   : > { %5085 = vmatpush1.bf16.msra.mxu0 %v20954_v15  ;;  %v20999_v15 = vld [vmem:[%s28857_s1 + $0x10c0] ss:$8 sps:$4 sm:$0xff]  }
 0x404   : > { %5086 = vmatprep.subr.bf16.mxu0 %v20959_v16  ;;  %v21004_v16 = vld [vmem:[%s28857_s1 + $0x10d4] ss:$8 sps:$4 sm:$0xff]  }
 0x407   : > { %5087 = vmatpush1.bf16.msra.mxu0 %v20957_v17  ;;  %v5189_v17 = vshrl.u32 %v24280_v24, 16 }
 0x408   : > { %5088 = vmatprep.subr.bf16.mxu0 %v20962_v18  ;;  %v5192_v18 = vshll.u32 %v24280_v24, 16  ;;  %v21005_v24 = vld [vmem:[%s28857_s1 + $0x10e0] ss:$8 sps:$4 sm:$0xff]  }
 0x40a   : > { %v5194_v33 = vrot.slane %v5192_v18, 5  ;;  %v21049_v18 = vld [vmem:[%s28857_s1 + $0x11c4] ss:$8 sps:$4 sm:$0xff]  }
 0x40b   : > { %5089 = vmatpush1.bf16.msra.mxu0 %v20960_v20  ;;  %v21002_v20 = vld [vmem:[%s28857_s1 + $0x10d0] ss:$8 sps:$4 sm:$0xff]  }
 0x40c   : > { %5600 = vmatprep.subr.bf16.mxu0 %v20965_v29  ;;  %v5191_v29 = vrot.slane %v5189_v17, 4  ;;  %v21044_v17 = vld [vmem:[%s28857_s1 + $0x11b0] ss:$8 sps:$4 sm:$0xff]  }
 0x40e   : > { %5091 = vmatmul.mubr.bf16.vlgmr.msra.gmra.mrb[0].mxu0 %v4665_v41  ;;  %v5248_v41 = vrot.slane %v5246_v22, 4  ;;  %v21052_v22 = vld [vmem:[%s28857_s1 + $0x11d4] ss:$8 sps:$4 sm:$0xff]  }
 0x40f   : > { %5601 = vmatpush1.bf16.msra.mxu0 %v20963_v39  ;;  %5100 = vmatprep.mubr.bf16.mxu0 %v4676_v31  ;;  %v5197_v39 = vrot.slane %v23415_v37, 5  ;;  %v5251_v31 = vrot.slane %v5249_v62, 5  ;;  %v21013_v37 = vld [vmem:[%s28857_s1 + $0x1104] ss:$8 sps:$4 sm:$0xff]   ;;  %v21050_v62 = vld [vmem:[%s28857_s1 + $0x11d0] ss:$8 sps:$4 sm:$0xff]  }
 0x410   : > { %5602 = vmatprep.subr.bf16.mxu0 %v20968_v10  ;;  %v5195_v10 = vor.u32 %v5194_v33, %v5191_v29  ;;  %v5216_v29 = vshll.u32 %v24401_v19, 16  ;;  %v21055_v33 = vld [vmem:[%s28857_s1 + $0x11e4] ss:$8 sps:$4 sm:$0xff]  }
 0x411   : > { %v5198_v42 = vor.u32 %v5197_v39, %v5196_v35  ;;  %v5252_v49 = vor.u32 %v5251_v31, %v5248_v41  ;;  %v5267_v35 = vshll.u32 %v24426_v61, 16  ;;  %v21053_v39 = vld [vmem:[%s28857_s1 + $0x11e0] ss:$8 sps:$4 sm:$0xff]  }
 0x412   : > { %v5218_v31 = vrot.slane %v5216_v29, 5  ;;  %v24772_v29 = vld [vmem:[#allocation3 + $0x68] sm:$0xf] }
 0x413   : > { %5603 = vmatpush1.bf16.msra.mxu0 %v20966_v27  ;;  %v5225_v27 = vshrl.u32 %v24300_v45, 16  ;;  %v5199_v43 = vsel %vm1775_vm2, %v5195_v10, %v5198_v42  ;;  %v5232_v45 = vrot.slane %v23506_v26, 4  ;;  %v21017_v26 = vld [vmem:[%s28857_s1 + $0x1120] ss:$8 sps:$4 sm:$0xff]   ;;  %v21058_v10 = vld [vmem:[%s28857_s1 + $0x11f4] ss:$8 sps:$4 sm:$0xff]  }
 0x414   : > { %5604 = vmatprep.subr.bf16.mxu0 %v20971_v32  ;;  %v21011_v32 = vld [vmem:[%s28857_s1 + $0x1100] ss:$8 sps:$4 sm:$0xff]  }
 0x416   : > { %5101 = vmatmul.mubr.bf16.gmra.mrb[4].mxu0 %v4674_v50  ;;  %v5242_v50 = vrot.slane %v5240_v36, 5  ;;  %v5255_v36 = vshrl.u32 %v24429_v34, 16 }
 0x417   : > { %5605 = vmatpush1.bf16.msra.mxu0 %v20969_v48  ;;  %5632 = vmatprep.mubr.bf16.mxu0 %v5211_v52  ;;  %v5253_v48 = vsel %vm1775_vm2, %v24439_v23, %v5252_v49  ;;  %v5227_v52 = vrot.slane %v5225_v27, 4 }
 0x418   : > { %5606 = vmatprep.subr.bf16.mxu0 %v20974_v25  ;;  %v21016_v25 = vld [vmem:[%s28857_s1 + $0x1114] ss:$8 sps:$4 sm:$0xff]   ;;  %v5243_v23 = vor.u32 %v5242_v50, %v5239_v14  ;;  %v5257_v47 = vrot.slane %v5255_v36, 4  ;;  %v21064_v50 = vld [vmem:[%s28859_s3 + $0x88] sm:$0xff]  }
 0x419   : > { %v5231_v56 = vor.u32 %v5230_v46, %v5227_v52  ;;  %v21068_v46 = vld [vmem:[%s28859_s3 + $0x90] sm:$0xff]  }
 0x41b   : > { %5607 = vmatpush1.bf16.msra.mxu0 %v20972_v53  ;;  %v5233_v53 = vrot.slane %v23517_v40, 5  ;;  %v5244_v40 = vsel %vm1775_vm2, %v5198_v42, %v5243_v23  ;;  %v5269_v42 = vrot.slane %v5267_v35, 5  ;;  %v21072_v23 = vld [vmem:[%s28859_s3 + $0x98] sm:$0xff]  }
 0x41c   : > { %5608 = vmatprep.subr.bf16.mxu0 %v20977_v2  ;;  %v21019_v2 = vld [vmem:[%s28857_s1 + $0x1124] ss:$8 sps:$4 sm:$0xff]  }
 0x41d   : > { %v24567_v59 = vor.u32 %v5233_v53, %v5232_v45  ;;  %v21069_v45 = vld [vmem:[%s28859_s3 + $0x50] sm:$0xff]   ;;  %v21070_v53 = vld [vmem:[%s28859_s3 + $0xd8] sm:$0xff]  }
 0x41e   : > { %19398 = vmatprep.subr.bf16.mxu1 %v21069_v45 }
 0x41f   : > { %5609 = vmatpush1.bf16.msra.mxu0 %v20975_v60  ;;  %v21022_v60 = vld [vmem:[%s28857_s1 + $0x1134] ss:$8 sps:$4 sm:$0xff]  }
 0x420   : > { %5610 = vmatprep.subr.bf16.mxu0 %v20980_v30  ;;  %v5235_v30 = vsel %vm1775_vm2, %v5231_v56, %v24567_v59  ;;  %v21074_v56 = vld [vmem:[%s28859_s3 + $0xe0] sm:$0xff]  }
 0x423   : > { %5611 = vmatpush1.bf16.msra.mxu0 %v20978_v0  ;;  %v21020_v0 = vld [vmem:[%s28857_s1 + $0x1130] ss:$8 sps:$4 sm:$0xff]  }
 0x424   : > { %5612 = vmatprep.subr.bf16.mxu0 %v20983_v51  ;;  %v21025_v51 = vld [vmem:[%s28857_s1 + $0x1144] ss:$8 sps:$4 sm:$0xff]  }
 0x427   : > { %5613 = vmatpush1.bf16.msra.mxu0 %v20981_v63  ;;  %v21023_v63 = vld [vmem:[%s28857_s1 + $0x1140] ss:$8 sps:$4 sm:$0xff]  }
 0x428   : > { %5614 = vmatprep.subr.bf16.mxu0 %v20986_v44  ;;  %v21028_v44 = vld [vmem:[%s28857_s1 + $0x1154] ss:$8 sps:$4 sm:$0xff]  }
 0x42b   : > { %5615 = vmatpush1.bf16.msra.mxu0 %v20984_v1  ;;  %v21026_v1 = vld [vmem:[%s28857_s1 + $0x1150] ss:$8 sps:$4 sm:$0xff]  }
 0x42c   : > { %5616 = vmatprep.subr.bf16.mxu0 %v20989_v9  ;;  %v21031_v9 = vld [vmem:[%s28857_s1 + $0x1164] ss:$8 sps:$4 sm:$0xff]  }
 0x42f   : > { %5617 = vmatpush1.bf16.msra.mxu0 %v20987_v6  ;;  %v21029_v6 = vld [vmem:[%s28857_s1 + $0x1160] ss:$8 sps:$4 sm:$0xff]  }
 0x430   : > { %5618 = vmatprep.subr.bf16.mxu0 %v20992_v3  ;;  %v21034_v3 = vld [vmem:[%s28857_s1 + $0x1174] ss:$8 sps:$4 sm:$0xff]  }
 0x433   : > { %5619 = vmatpush1.bf16.msra.mxu0 %v20990_v7  ;;  %v21032_v7 = vld [vmem:[%s28857_s1 + $0x1170] ss:$8 sps:$4 sm:$0xff]  }
 0x434   : > { %5620 = vmatprep.subr.bf16.mxu0 %v20995_v4  ;;  %v21037_v4 = vld [vmem:[%s28857_s1 + $0x1184] ss:$8 sps:$4 sm:$0xff]  }
 0x437   : > { %5621 = vmatpush1.bf16.msra.mxu0 %v20993_v8  ;;  %v21035_v8 = vld [vmem:[%s28857_s1 + $0x1180] ss:$8 sps:$4 sm:$0xff]  }
 0x438   : > { %5622 = vmatprep.subr.bf16.mxu0 %v20998_v57  ;;  %v21040_v57 = vld [vmem:[%s28857_s1 + $0x1194] ss:$8 sps:$4 sm:$0xff]  }
 0x43b   : > { %5623 = vmatpush1.bf16.msra.mxu0 %v20996_v11  ;;  %v21038_v11 = vld [vmem:[%s28857_s1 + $0x1190] ss:$8 sps:$4 sm:$0xff]  }
 0x43c   : > { %5624 = vmatprep.subr.bf16.mxu0 %v21001_v12  ;;  %v21043_v12 = vld [vmem:[%s28857_s1 + $0x11a4] ss:$8 sps:$4 sm:$0xff]  }
 0x43f   : > { %5625 = vmatpush1.bf16.msra.mxu0 %v20999_v15  ;;  %v21041_v15 = vld [vmem:[%s28857_s1 + $0x11a0] ss:$8 sps:$4 sm:$0xff]  }
 0x440   : > { %5626 = vmatprep.subr.bf16.mxu0 %v21004_v16  ;;  %v21046_v16 = vld [vmem:[%s28857_s1 + $0x11b4] ss:$8 sps:$4 sm:$0xff]  }
 0x443   : > { %5627 = vmatpush1.bf16.msra.mxu0 %v21002_v20  ;;  %v21047_v20 = vld [vmem:[%s28857_s1 + $0x11c0] ss:$8 sps:$4 sm:$0xff]  }
 0x444   : > { %5628 = vmatprep.subr.bf16.mxu0 %v21007_v28  ;;  %v5213_v28 = vshrl.u32 %v24401_v19, 16  ;;  %v5221_v19 = vrot.slane %v23539_v58, 5 }
 0x446   : > { %v5215_v41 = vrot.slane %v5213_v28, 4  ;;  %v24770_v28 = vld [vmem:[#allocation3 + $0x68] sm:$0x1] }
 0x447   : > { %5629 = vmatpush1.bf16.msra.mxu0 %v21005_v24  ;;  %v5264_v24 = vshrl.u32 %v24426_v61, 16  ;;  %v21056_v61 = vld [vmem:[%s28857_s1 + $0x11f0] ss:$8 sps:$4 sm:$0xff]  }
 0x448   : > { %5630 = vmatprep.subr.bf16.mxu0 %v21010_v5  ;;  %v5220_v5 = vrot.slane %v23527_v54, 4  ;;  %v5219_v49 = vor.u32 %v5218_v31, %v5215_v41  ;;  %v5258_v54 = vshll.u32 %v24429_v34, 16  ;;  %v21062_v34 = vld [vmem:[%s28859_s3 + $0xc8] sm:$0xff]   ;;  %v5714_v41 = vld [vmem:[%s28858_s2] sm:$0x3] }
 0x44a   : > { %v5222_v38 = vor.u32 %v5221_v19, %v5220_v5 }
 0x44b   : > { %5631 = vmatpush1.bf16.msra.mxu0 %v21008_v21  ;;  %v5266_v21 = vrot.slane %v5264_v24, 4  ;;  %v394_v24 = vlaneseq }
 0x44c   : > { %5653 = vmatprep.subr.bf16.mxu0 %v21013_v37  ;;  %v21059_v37 = vld [vmem:[%s28859_s3 + $0xc0] sm:$0xff]   ;;  %v5223_v27 = vsel %vm1775_vm2, %v5219_v49, %v5222_v38 }
 0x44d   : > { %v5270_v58 = vor.u32 %v5269_v42, %v5266_v21  ;;  %v24778_v35 = vshrl.u32 %v394_v24, 7 }
 0x44e   : > { %5633 = vmatmul.mubr.bf16.vlgmr.msra.gmra.mrb[0].mxu0 %v5199_v43  ;;  %v21060_v43 = vld [vmem:[%s28859_s3 + $0x80] sm:$0xff]  }
 0x44f   : > { %5654 = vmatpush1.bf16.msra.mxu0 %v21011_v32  ;;  %5642 = vmatprep.mubr.bf16.mxu0 %v5253_v48  ;;  %v5260_v32 = vrot.slane %v5258_v54, 5  ;;  %v5271_v48 = vsel %vm1775_vm2, %v24567_v59, %v5270_v58  ;;  %v21075_v59 = vld [vmem:[%s28859_s3 + $0x18] sm:$0xff]   ;;  %28882 = vst [vmem:[#allocation4_spill] sm:$0xff] %v24778_v35  ;;  %v24787_v31 = vsub.s32 1, %v24778_v35  ;;  %v396_v5 = vadd.s32 8, %v24778_v35 }
 0x450   : > { %5655 = vmatprep.subr.bf16.mxu0 %v21016_v25  ;;  %v21066_v25 = vld [vmem:[%s28859_s3 + $0xd0] sm:$0xff]   ;;  %v397_v21 = vadd.s32 16, %v24778_v35  ;;  %v398_v42 = vadd.s32 24, %v24778_v35 }
 0x451   : > { %v5261_v14 = vor.u32 %v5260_v32, %v5257_v47  ;;  %28883 = vst [vmem:[#allocation5_spill] sm:$0xff] %v24787_v31  ;;  %v410_v49 = vand.u32 7, %v396_v5 }
 0x453   : > { %5656 = vmatpush1.bf16.msra.mxu0 %v21014_v55  ;;  %v5262_v52 = vsel %vm1775_vm2, %v5222_v38, %v5261_v14  ;;  %v21071_v55 = vld [vmem:[%s28859_s3 + $0x10] sm:$0xff]   ;;  %vm24807_vm6 = vcmp.lt.s32.totalorder %v410_v49, 4 }
 0x454   : > { %5657 = vmatprep.subr.bf16.mxu0 %v21019_v2  ;;  %19399 = vmatpush3.bf16.msra.mxu1 %v21071_v55  ;;  %v21073_v2 = vld [vmem:[%s28859_s3 + $0x58] sm:$0xff]  }
 0x455   : > { %19400 = vmatprep.subr.bf16.mxu1 %v21073_v2 }
 0x456   : > { %5643 = vmatmul.mubr.bf16.gmra.mrb[4].mxu0 %v5244_v40  ;;  %v21077_v40 = vld [vmem:[%s28859_s3 + $0x60] sm:$0xff]  }
 0x457   : > { %5658 = vmatpush1.bf16.msra.mxu0 %v21017_v26  ;;  %5685 = vmatprep.mubr.bf16.mxu0 %v5235_v30  ;;  %v21076_v26 = vld [vmem:[%s28859_s3 + $0xa0] sm:$0xff]  }
 0x458   : > { %5659 = vmatprep.subr.bf16.mxu0 %v21022_v60  ;;  %19401 = vmatpush3.bf16.msra.mxu1 %v21075_v59  ;;  %v21078_v60 = vld [vmem:[%s28859_s3 + $0xe8] sm:$0xff]   ;;  %v21079_v30 = vld [vmem:[%s28859_s3 + $0x20] sm:$0xff]  }
 0x459   : > { %19402 = vmatprep.subr.bf16.mxu1 %v21077_v40 }
 0x45b   : > { %5660 = vmatpush1.bf16.msra.mxu0 %v21020_v0  ;;  %v21080_v0 = vld [vmem:[%s28859_s3 + $0xa8] sm:$0xff]  }
 0x45c   : > { %5661 = vmatprep.subr.bf16.mxu0 %v21025_v51  ;;  %19403 = vmatpush3.bf16.msra.mxu1 %v21079_v30  ;;  %v21081_v51 = vld [vmem:[%s28859_s3 + $0x68] sm:$0xff]  }
 0x45d   : > { %19404 = vmatprep.subr.bf16.mxu1 %v21081_v51 }
 0x45f   : > { %5662 = vmatpush1.bf16.msra.mxu0 %v21023_v63  ;;  %v21082_v63 = vld [vmem:[%s28859_s3 + $0xf0] sm:$0xff]  }
 0x460   : > { %5663 = vmatprep.subr.bf16.mxu0 %v21028_v44  ;;  %v21083_v44 = vld [vmem:[%s28859_s3 + $0x28] sm:$0xff]  }
 0x461   : > { %19405 = vmatpush3.bf16.msra.mxu1 %v21083_v44 }
 0x463   : > { %5664 = vmatpush1.bf16.msra.mxu0 %v21026_v1  ;;  %v21084_v1 = vld [vmem:[%s28859_s3 + $0xb0] sm:$0xff]  }
 0x464   : > { %5665 = vmatprep.subr.bf16.mxu0 %v21031_v9  ;;  %v21085_v9 = vld [vmem:[%s28859_s3 + $0x70] sm:$0xff]  }
 0x465   : > { %19406 = vmatprep.subr.bf16.mxu1 %v21085_v9 }
 0x467   : > { %5666 = vmatpush1.bf16.msra.mxu0 %v21029_v6  ;;  %v21086_v6 = vld [vmem:[%s28859_s3 + $0xf8] sm:$0xff]  }
 0x468   : > { %5667 = vmatprep.subr.bf16.mxu0 %v21034_v3  ;;  %v21087_v3 = vld [vmem:[%s28859_s3 + $0x30] sm:$0xff]  }
 0x469   : > { %19407 = vmatpush3.bf16.msra.mxu1 %v21087_v3 }
 0x46b   : > { %5668 = vmatpush1.bf16.msra.mxu0 %v21032_v7  ;;  %v21088_v7 = vld [vmem:[%s28859_s3 + $0xb8] sm:$0xff]  }
 0x46c   : > { %5669 = vmatprep.subr.bf16.mxu0 %v21037_v4  ;;  %v21089_v4 = vld [vmem:[%s28859_s3 + $0x78] sm:$0xff]  }
 0x46d   : > { %19408 = vmatprep.subr.bf16.mxu1 %v21089_v4 }
 0x46f   : > { %5670 = vmatpush1.bf16.msra.mxu0 %v21035_v8  ;;  %v21090_v8 = vld [vmem:[%s28859_s3 + $0x38] sm:$0xff]  }
 0x470   : > { %5671 = vmatprep.subr.bf16.mxu0 %v21040_v57  ;;  %v24749_v57 = vld [vmem:[#allocation3] sm:$0xf0]  ;;  %19409 = vmatpush3.bf16.msra.mxu1 %v21090_v8 }
 0x473   : > { %5672 = vmatpush1.bf16.msra.mxu0 %v21038_v11  ;;  %v24751_v11 = vld [vmem:[#allocation3 + $0x8] sm:$0xf0] }
 0x474   : > { %5673 = vmatprep.subr.bf16.mxu0 %v21043_v12  ;;  %v24753_v12 = vld [vmem:[#allocation3] sm:$0xf8]  ;;  %v5864_v2 = vrot.slane %v24751_v11, 4 }
 0x475   : > { %v6021_v45 = vshrl.u32 %v24753_v12, 16 }
 0x477   : > { %5674 = vmatpush1.bf16.msra.mxu0 %v21041_v15  ;;  %v24755_v15 = vld [vmem:[#allocation3] sm:$0x80]  ;;  %v6023_v3 = vrot.slane %v6021_v45, 3 }
 0x478   : > { %5675 = vmatprep.subr.bf16.mxu0 %v21046_v16  ;;  %v5783_v16 = vld [vmem:[#allocation3 + $0x8] sm:$0xf8]  ;;  %9405 = vst [vmem:[#allocation3] sm:$0xff] %v24383_v13 }
 0x47b   : > { %5676 = vmatpush1.bf16.msra.mxu0 %v21044_v17  ;;  %v21091_v17 = vld [vmem:[%s28859_s3 + $0x140] sm:$0xff]  }
 0x47c   : > { %5677 = vmatprep.subr.bf16.mxu0 %v21049_v18  ;;  %v24760_v18 = vld [vmem:[#allocation3 + $0x8] sm:$0x80]  ;;  %19422 = vmatprep.subr.bf16.mxu1 %v21091_v17 }
 0x47d   : > { %9406 = vst [vmem:[#allocation3 + $0x8] sm:$0xff] %v24383_v13 }
 0x47f   : > { %5678 = vmatpush1.bf16.msra.mxu0 %v21047_v20  ;;  %v24764_v20 = vld [vmem:[#allocation3 + $0x60] sm:$0x1] }
 0x480   : > { %5679 = vmatprep.subr.bf16.mxu0 %v21052_v22  ;;  %v24766_v22 = vld [vmem:[#allocation3 + $0x60] sm:$0xf] }
 0x483   : > { %5680 = vmatpush1.bf16.msra.mxu0 %v21050_v62  ;;  %v24768_v62 = vld [vmem:[#allocation3 + $0x60] sm:$0x1f] }
 0x484   : > { %5681 = vmatprep.subr.bf16.mxu0 %v21055_v33  ;;  %v24774_v33 = vld [vmem:[#allocation3 + $0x68] sm:$0x1f]  ;;  %9417 = vst [vmem:[#allocation3 + $0x60] sm:$0xff] %v24383_v13 }
 0x485   : > { %9418 = vst [vmem:[#allocation3 + $0x68] sm:$0xff] %v24383_v13  ;;  %v5723_v13 = vrot.slane %v5714_v41, %v24787_v31 }
 0x487   : > { %5682 = vmatpush1.bf16.msra.mxu0 %v21053_v39  ;;  %v24781_v39 = vsub.s32 0, %v24778_v35 }
 0x488   : > { %5683 = vmatprep.subr.bf16.mxu0 %v21058_v10  ;;  %v403_v10 = vand.u32 7, %v24778_v35 }
 0x489   : > { %v5719_v19 = vrot.slane %v5714_v41, %v24781_v39 }
 0x48a   : > { %vm24797_vm5 = vcmp.lt.s32.totalorder %v403_v10, 4 }
 0x48b   : > { %5684 = vmatpush1.bf16.msra.mxu0 %v21056_v61  ;;  %vm25161_vm9 = vmpackc.low %vm24807_vm6, %vm24797_vm5 }
 0x48c   : > { %19366 = vmatprep.subr.bf16.mxu0 %v21059_v37 }
 0x48e   : > { %5686 = vmatmul.mubr.bf16.vlgmr.msra.gmra.mrb[0].mxu0 %v5223_v27  ;;  %v417_v27 = vand.u32 7, %v397_v21 }
 0x48f   : > { %5695 = vmatprep.mubr.bf16.mxu0 %v5271_v48  ;;  %19367 = vmatpush3.bf16.msra.mxu0 %v21060_v43  ;;  %v424_v48 = vand.u32 7, %v398_v42 }
 0x490   : > { %19368 = vmatprep.subr.bf16.mxu0 %v21062_v34  ;;  %v6038_v34 = vshrl.u32 %v5783_v16, 16  ;;  %vm24817_vm7 = vcmp.lt.s32.totalorder %v417_v27, 4 }
 0x491   : > { %vm24831_vm8 = vcmp.lt.s32.totalorder %v424_v48, 4 }
 0x492   : > { %vm25217_vm10 = vmpackc.low %vm24831_vm8, %vm24817_vm7 }
 0x493   : > { %19369 = vmatpush3.bf16.msra.mxu0 %v21064_v50 }
 0x494   : > { %19370 = vmatprep.subr.bf16.mxu0 %v21066_v25 }
 0x496   : > { %5696 = vmatmul.mubr.bf16.gmra.mrb[4].mxu0 %v5262_v52  ;;  %v6041_v52 = vshll.u32 %v5783_v16, 16 }
 0x497   : > { %19371 = vmatpush3.bf16.msra.mxu0 %v21068_v46 }
 0x498   : > { %19372 = vmatprep.subr.bf16.mxu0 %v21070_v53  ;;  %v6024_v53 = vshll.u32 %v24753_v12, 16  ;;  %v6043_v44 = vrot.slane %v6041_v52, 4 }
 0x49b   : > { %19373 = vmatpush3.bf16.msra.mxu0 %v21072_v23 }
 0x49c   : > { %19374 = vmatprep.subr.bf16.mxu0 %v21074_v56  ;;  %v5861_v56 = vrot.slane %v24749_v57, 4 }
 0x49f   : > { %19375 = vmatpush3.bf16.msra.mxu0 %v21076_v26 }
 0x4a0   : > { %19376 = vmatprep.subr.bf16.mxu0 %v21078_v60  ;;  %v6040_v60 = vrot.slane %v6038_v34, 3 }
 0x4a2   : > { %v6044_v49 = vor.u32 %v6043_v44, %v6040_v60 }
 0x4a3   : > { %19377 = vmatpush3.bf16.msra.mxu0 %v21080_v0 }
 0x4a4   : > { %19378 = vmatprep.subr.bf16.mxu0 %v21082_v63 }
 0x4a7   : > { %19379 = vmatpush3.bf16.msra.mxu0 %v21084_v1 }
 0x4a8   : > { %19380 = vmatprep.subr.bf16.mxu0 %v21086_v6 }
 0x4ab   : > { %19381 = vmatpush3.bf16.msra.mxu0 %v21088_v7  ;;  %v6026_v7 = vrot.slane %v6024_v53, 4 }
 0x4ad   : > { %v6027_v53 = vor.u32 %v6026_v7, %v6023_v3  ;;  %v6269_v3 = vshrl.u32 %v24751_v11, 16 }
 0x561   : > { %v5687_v61 = vpop.f32.mrb[0].mxu0 }
 0x562   : > { %v24795_v38 = vadd.f32 %v5719_v19, %v5687_v61  ;;  %v5689_v36 = vpop.f32.mrb[1].mxu0 }
 0x563   : > { %v24801_v58 = vadd.f32 %v5723_v13, %v5689_v36  ;;  %v5691_v37 = vpop.f32.mrb[2].mxu0 }
 0x564   : > { %v28873_v47 = vmax.f32 %v24795_v38, 0.0  ;;  %v24804_v32 = vadd.f32 %v5719_v19, %v5691_v37  ;;  %v5693_v43 = vpop.f32.mrb[3].mxu0 }
 0x565   : > { %v28875_v14 = vmax.f32 %v24801_v58, 0.0  ;;  %v24811_v25 = vadd.f32 %v5723_v13, %v5693_v43  ;;  %v6489_v43 = vshrl.u32 %v24755_v15, 16 }
 0x566   : > { %v28872_v46 = vmax.f32 %v24804_v32, 0.0  ;;  %v5750_v59 = vsel %vm24797_vm5, %v28873_v47, 0.0 }
 0x567   : > { %v28874_v55 = vmax.f32 %v24811_v25, 0.0  ;;  %v5751_v30 = vsel %vm24797_vm5, %v28875_v14, 0.0  ;;  %v6491_v7 = vrot.slane %v6489_v43, 7  ;;  %v6928_v43 = vshll.u32 %v24770_v28, 16 }
 0x568   : > { %v5752_v26 = vsel %vm24807_vm6, %v28872_v46, 0.0 }
 0x569   : > { %v24839_v0 = vpack.c.bf16 %v5752_v26, %v5750_v59  ;;  %v5753_v51 = vsel %vm24807_vm6, %v28874_v55, 0.0  ;;  %v5697_v63 = vpop.f32.mrb[4].mxu0 }
 0x56a   : > { %v24845_v1 = vpack.c.bf16 %v5753_v51, %v5751_v30  ;;  %v24847_v9 = vadd.f32 %v5719_v19, %v5697_v63  ;;  %v5699_v6 = vpop.f32.mrb[5].mxu0  ;;  %v21092_v63 = vld [vmem:[%s28859_s3 + $0x100] sm:$0xff]  }
 0x56b   : > { %5778 = vst [vmem:[#allocation3 + $0x20] sm:$0xff] %v24839_v0  ;;  %v24850_v4 = vadd.f32 %v5723_v13, %v5699_v6  ;;  %v5701_v8 = vpop.f32.mrb[6].mxu0  ;;  %v28877_v12 = vrot.slane %v24839_v0, 4  ;;  %v24854_v16 = vshrl.u32 %v24839_v0, 16  ;;  %v24857_v17 = vshll.u32 %v24839_v0, 16  ;;  %v21093_v6 = vld [vmem:[%s28859_s3 + $0x148] sm:$0xff]  }
 0x56c   : > { %5779 = vst [vmem:[#allocation3 + $0x28] sm:$0xff] %v24845_v1  ;;  %v28869_v24 = vmax.f32 %v24847_v9, 0.0  ;;  %v24861_v41 = vadd.f32 %v5719_v19, %v5701_v8  ;;  %v5703_v5 = vpop.f32.mrb[7].mxu0  ;;  %v5865_v10 = vrot.slane %v24845_v1, 4  ;;  %v24865_v21 = vshrl.u32 %v24845_v1, 16 }
 0x56d   : > { %v28871_v42 = vmax.f32 %v24850_v4, 0.0  ;;  %v24868_v61 = vadd.f32 %v5723_v13, %v5703_v5  ;;  %v24871_v36 = vshll.u32 %v24845_v1, 16  ;;  %v5863_v13 = vsel %vm712_vm0, %v5861_v56, %v28877_v12 }
 0x56e   : > { %v28868_v37 = vmax.f32 %v24861_v41, 0.0  ;;  %v5866_v19 = vsel %vm712_vm0, %v5864_v2, %v5865_v10  ;;  %v6048_v27 = vrot.slane %v24865_v21, 3  ;;  %v6031_v52 = vrot.slane %v24854_v16, 3 }
 0x56f   : > { %v28870_v48 = vmax.f32 %v24868_v61, 0.0  ;;  %6003 = vmatprep.mubr.bf16.mxu0 %v5866_v19  ;;  %v6051_v34 = vrot.slane %v24871_v36, 4  ;;  %v5754_v45 = vsel %vm24817_vm7, %v28869_v24, 0.0  ;;  %v6034_v2 = vrot.slane %v24857_v17, 4 }
 0x570   : > { %v5756_v15 = vsel %vm24831_vm8, %v28868_v37, 0.0  ;;  %6004 = vmatmul.mubr.bf16.vlgmr.msra.gmra.mrb[8].mxu0 %v5863_v13  ;;  %v5755_v56 = vsel %vm24817_vm7, %v28871_v42, 0.0  ;;  %v28876_v8 = vrot.slane %v24854_v16, 7  ;;  %v6272_v19 = vshll.u32 %v24751_v11, 16  ;;  %v21094_v13 = vld [vmem:[%s28859_s3 + $0x108] sm:$0xff]   ;;  %v21095_v11 = vld [vmem:[%s28859_s3 + $0x150] sm:$0xff]  }
 0x571   : > { %v24898_v59 = vpack.c.bf16 %v5756_v15, %v5754_v45  ;;  %v5757_v26 = vsel %vm24831_vm8, %v28870_v48, 0.0  ;;  %v24904_v60 = vor.u32 %v6051_v34, %v6048_v27  ;;  %v24908_v51 = vor.u32 %v6034_v2, %v6031_v52 }
 0x572   : > { %v24906_v30 = vpack.c.bf16 %v5757_v26, %v5755_v56  ;;  %v6909_v34 = vrot.slane %v24871_v36, 1  ;;  %v7156_v52 = vshrl.u32 %v24772_v29, 16  ;;  %v24940_v45 = vrot.slane %v6269_v3, 4  ;;  %v21096_v26 = vld [vmem:[%s28859_s3 + $0x110] sm:$0xff]  }
 0x573   : > { %5780 = vst [vmem:[#allocation3 + $0x40] sm:$0xff] %v24898_v59  ;;  %v6053_v44 = vsel %vm1167_vm1, %v6044_v49, %v24904_v60  ;;  %v6036_v5 = vsel %vm1167_vm1, %v6027_v53, %v24908_v51  ;;  %v6493_v49 = vor.u32 %v28876_v8, %v24857_v17  ;;  %v24945_v28 = vrot.slane %v6272_v19, 5 }
 0x574   : > { %5781 = vst [vmem:[#allocation3 + $0x48] sm:$0xff] %v24906_v30  ;;  %6204 = vmatprep.mubr.bf16.mxu1 %v6053_v44  ;;  %v24929_v27 = vshll.u32 %v24906_v30, 16  ;;  %v24948_v53 = vor.u32 %v6909_v34, %v24865_v21  ;;  %v6920_v56 = vshll.u32 %v24764_v20, 16  ;;  %v24959_v44 = vshll.u32 %v24898_v59, 16 }
 0x575   : > { %6205 = vmatmul.mubr.bf16.vlgmr.msra.gmra.mrb[0].mxu1 %v6036_v5  ;;  %v24943_v15 = vsel %vm2375_vm3, %v6491_v7, %v6493_v49  ;;  %v7159_v3 = vshll.u32 %v24772_v29, 16  ;;  %v7147_v7 = vshrl.u32 %v24766_v22, 16  ;;  %v6276_v20 = vrot.slane %v24865_v21, 4 }
 0x576   : > { %19423 = vmatpush3.bf16.msra.mxu1 %v21092_v63  ;;  %v6914_v2 = vrot.slane %v24929_v27, 1  ;;  %v21097_v63 = vld [vmem:[%s28859_s3 + $0x158] sm:$0xff]   ;;  %v24965_v19 = vshrl.u32 %v24906_v30, 16  ;;  %v24967_v49 = vrot.slane %v7156_v52, 3  ;;  %v7150_v34 = vshll.u32 %v24766_v22, 16 }
 0x577   : > { %19424 = vmatprep.subr.bf16.mxu1 %v21093_v6  ;;  %v6930_v6 = vrot.slane %v6928_v43, 1  ;;  %v6277_v42 = vrot.slane %v24871_v36, 5  ;;  %v6902_v52 = vrot.slane %v24959_v44, 1  ;;  %v7161_v12 = vrot.slane %v7159_v3, 4 }
 0x578   : > { %v6275_v31 = vor.u32 %v24945_v28, %v24940_v45  ;;  %v7581_v28 = vshrl.u32 %v24768_v62, 16 }
 0x57a   : > { %v5786_v5 = vld [vmem:[#allocation3 + $0x40] sm:$0xf]  ;;  %19425 = vmatpush3.bf16.msra.mxu1 %v21094_v13  ;;  %v6926_v13 = vor.u32 %v6914_v2, %v24965_v19 }
 0x57b   : > { %v5787_v37 = vld [vmem:[#allocation3 + $0x48] sm:$0xf]  ;;  %v5867_v24 = vrot.slane %v5786_v5, 4  ;;  %19426 = vmatprep.subr.bf16.mxu1 %v21095_v11  ;;  %v6055_v48 = vshrl.u32 %v5786_v5, 16  ;;  %v6058_v43 = vshll.u32 %v5786_v5, 16 }
 0x57c   : > { %v5869_v46 = vrot.slane %v5787_v37, 4  ;;  %v6064_v47 = vshrl.u32 %v5787_v37, 16  ;;  %v6067_v55 = vshll.u32 %v5787_v37, 16  ;;  %v21098_v37 = vld [vmem:[%s28859_s3 + $0x118] sm:$0xff]   ;;  %v24995_v45 = vsel %vm3454_vm4, %v6926_v13, %v6930_v6 }
 0x57d   : > { %v6057_v14 = vrot.slane %v6055_v48, 3  ;;  %v6060_v8 = vrot.slane %v6058_v43, 4  ;;  %v28892_v48 = vrot.slane %v24839_v0, 4  ;;  %v7149_v0 = vrot.slane %v7147_v7, 3 }
 0x57e   : > { %v5870_v11 = vsel %vm712_vm0, %v5865_v10, %v5869_v46  ;;  %v6066_v35 = vrot.slane %v6064_v47, 3  ;;  %v6069_v5 = vrot.slane %v6067_v55, 4  ;;  %19427 = vmatpush3.bf16.msra.mxu1 %v21096_v26  ;;  %v21099_v47 = vld [vmem:[%s28859_s3 + $0x160] sm:$0xff]   ;;  %v24990_v46 = vshrl.u32 %v24898_v59, 16 }
 0x57f   : > { %6011 = vmatprep.mubr.bf16.mxu0 %v5870_v11  ;;  %v5868_v43 = vsel %vm712_vm0, %v28892_v48, %v5867_v24  ;;  %v6061_v3 = vor.u32 %v6060_v8, %v6057_v14  ;;  %19428 = vmatprep.subr.bf16.mxu1 %v21097_v63  ;;  %v6922_v55 = vrot.slane %v6920_v56, 1  ;;  %v24992_v10 = vor.u32 %v6277_v42, %v6276_v20  ;;  %v21102_v11 = vld [vmem:[%s28859_s3 + $0x128] sm:$0xff]  }
 0x580   : > { %6012 = vmatmul.mubr.bf16.gmra.mrb[12].mxu0 %v5868_v43  ;;  %v6070_v1 = vor.u32 %v6069_v5, %v6066_v35  ;;  %v6918_v14 = vor.u32 %v6902_v52, %v24990_v46  ;;  %v7162_v24 = vor.u32 %v7161_v12, %v24967_v49  ;;  %v7152_v8 = vrot.slane %v7150_v34, 4  ;;  %v21100_v35 = vld [vmem:[%s28859_s3 + $0x120] sm:$0xff]   ;;  %v21103_v43 = vld [vmem:[%s28859_s3 + $0x170] sm:$0xff]  }
 0x581   : > { %v7590_v42 = vshrl.u32 %v24774_v33, 16  ;;  %v7593_v26 = vshll.u32 %v24774_v33, 16  ;;  %v7584_v63 = vshll.u32 %v24768_v62, 16  ;;  %v6062_v12 = vsel %vm1167_vm1, %v24908_v51, %v6061_v3 }
 0x582   : > { %v6071_v56 = vsel %vm1167_vm1, %v24904_v60, %v6070_v1  ;;  %19429 = vmatpush3.bf16.msra.mxu1 %v21098_v37  ;;  %v21101_v60 = vld [vmem:[%s28859_s3 + $0x168] sm:$0xff]   ;;  %v25016_v6 = vsel %vm3454_vm4, %v6918_v14, %v6922_v55  ;;  %v7142_v7 = vrot.slane %v24965_v19, 3  ;;  %v7143_v20 = vrot.slane %v24929_v27, 4 }
 0x583   : > { %6212 = vmatprep.mubr.bf16.mxu1 %v6071_v56  ;;  %19430 = vmatprep.subr.bf16.mxu1 %v21099_v47  ;;  %v6279_v62 = vsel %vm1775_vm2, %v6275_v31, %v24992_v10  ;;  %v6257_v33 = vshrl.u32 %v24749_v57, 16  ;;  %v7130_v49 = vrot.slane %v24990_v46, 3  ;;  %v7131_v34 = vrot.slane %v24959_v44, 4  ;;  %v6222_v37 = vld [vmem:[#allocation3 + $0x48] sm:$0x1f] }
 0x584   : > { %6213 = vmatmul.mubr.bf16.gmra.mrb[4].mxu1 %v6062_v12  ;;  %v25023_v51 = vor.u32 %v7143_v20, %v7142_v7  ;;  %v7153_v13 = vor.u32 %v7152_v8, %v7149_v0  ;;  %v6260_v5 = vshll.u32 %v24749_v57, 16  ;;  %v7592_v48 = vrot.slane %v7590_v42, 4  ;;  %v21104_v8 = vld [vmem:[%s28859_s3 + $0x130] sm:$0xff]  }
 0x585   : > { %6430 = vmatprep.mubr.bf16.mxu1 %v6279_v62  ;;  %v7595_v31 = vrot.slane %v7593_v26, 5  ;;  %v25034_v3 = vor.u32 %v7131_v34, %v7130_v49  ;;  %v7583_v55 = vrot.slane %v7581_v28, 4  ;;  %v7586_v1 = vrot.slane %v7584_v63, 5 }
 0x586   : > { %19431 = vmatpush3.bf16.msra.mxu1 %v21100_v35  ;;  %v25038_v47 = vsel %vm1167_vm1, %v25023_v51, %v7162_v24  ;;  %v6290_v0 = vshrl.u32 %v6222_v37, 16  ;;  %v6293_v14 = vshll.u32 %v6222_v37, 16  ;;  %v7576_v56 = vrot.slane %v24965_v19, 4  ;;  %v21105_v24 = vld [vmem:[%s28859_s3 + $0x178] sm:$0xff]   ;;  %v21107_v37 = vld [vmem:[%s28859_s3 + $0x1c0] sm:$0xff]  }
 0x587   : > { %19432 = vmatprep.subr.bf16.mxu1 %v21101_v60  ;;  %v25042_v57 = vsel %vm1167_vm1, %v25034_v3, %v7153_v13  ;;  %v7577_v35 = vrot.slane %v24929_v27, 5  ;;  %v7596_v42 = vor.u32 %v7595_v31, %v7592_v48  ;;  %v6259_v28 = vrot.slane %v6257_v33, 4  ;;  %v6221_v13 = vld [vmem:[#allocation3 + $0x40] sm:$0x1f]  ;;  %v21106_v33 = vld [vmem:[%s28859_s3 + $0x138] sm:$0xff]  }
 0x588   : > { %v6262_v26 = vrot.slane %v6260_v5, 5  ;;  %v7564_v63 = vrot.slane %v24990_v46, 4  ;;  %v7587_v12 = vor.u32 %v7586_v1, %v7583_v55  ;;  %v6264_v60 = vrot.slane %v24854_v16, 4 }
 0x589   : > { %v6265_v7 = vrot.slane %v24857_v17, 5  ;;  %v25055_v20 = vor.u32 %v7577_v35, %v7576_v56  ;;  %v7565_v62 = vrot.slane %v24959_v44, 5  ;;  %v6292_v49 = vrot.slane %v6290_v0, 4  ;;  %v21108_v0 = vld [vmem:[%s28859_s3 + $0x180] sm:$0xff]  }
 0x58a   : > { %19433 = vmatpush3.bf16.msra.mxu1 %v21102_v11  ;;  %v6295_v34 = vrot.slane %v6293_v14, 5  ;;  %v6263_v17 = vor.u32 %v6262_v26, %v6259_v28  ;;  %v6281_v31 = vshrl.u32 %v6221_v13, 16  ;;  %v21109_v14 = vld [vmem:[%s28859_s3 + $0x1c8] sm:$0xff]   ;;  %v6499_v28 = vrot.slane %v24865_v21, 7  ;;  %v21113_v21 = vld [vmem:[%s28859_s3 + $0x1d8] sm:$0xff]  }
 0x58b   : > { %19434 = vmatprep.subr.bf16.mxu1 %v21103_v43  ;;  %v25061_v11 = vor.u32 %v7565_v62, %v7564_v63  ;;  %v25065_v5 = vsel %vm1775_vm2, %v25055_v20, %v7596_v42  ;;  %v6266_v48 = vor.u32 %v6265_v7, %v6264_v60  ;;  %v6284_v43 = vshll.u32 %v6221_v13, 16  ;;  %v21110_v26 = vld [vmem:[%s28859_s3 + $0x188] sm:$0xff]   ;;  %v21111_v63 = vld [vmem:[%s28859_s3 + $0x1d0] sm:$0xff]  }
 0x58c   : > { %v6296_v1 = vor.u32 %v6295_v34, %v6292_v49  ;;  %v6283_v56 = vrot.slane %v6281_v31, 4  ;;  %v6500_v7 = vor.u32 %v6499_v28, %v24871_v36  ;;  %v21114_v36 = vld [vmem:[%s28859_s3 + $0x198] sm:$0xff]   ;;  %v21115_v49 = vld [vmem:[%s28859_s3 + $0x1e0] sm:$0xff]   ;;  %v21117_v13 = vld [vmem:[%s28859_s3 + $0x1e8] sm:$0xff]   ;;  %v6513_v31 = vrot.slane %v24965_v19, 7 }
 0x58d   : > { %v25072_v55 = vsel %vm1775_vm2, %v25061_v11, %v7587_v12  ;;  %v6286_v35 = vrot.slane %v6284_v43, 5  ;;  %v21116_v34 = vld [vmem:[%s28859_s3 + $0x1a0] sm:$0xff]   ;;  %v21122_v43 = vld [vmem:[%s28859_s3 + $0x1b8] sm:$0xff]   ;;  %v21125_v19 = vld [vmem:[%s28859_s3 + $0x248] sm:$0xff]  }
 0x58e   : > { %19435 = vmatpush3.bf16.msra.mxu1 %v21104_v8  ;;  %v6267_v8 = vsel %vm1775_vm2, %v6263_v17, %v6266_v48  ;;  %v6297_v42 = vsel %vm1775_vm2, %v24992_v10, %v6296_v1  ;;  %v21119_v17 = vld [vmem:[%s28859_s3 + $0x1f0] sm:$0xff]   ;;  %v21123_v1 = vld [vmem:[%s28859_s3 + $0x240] sm:$0xff]  }
 0x58f   : > { %19436 = vmatprep.subr.bf16.mxu1 %v21105_v24  ;;  %v6496_v24 = vshrl.u32 %v24760_v18, 16  ;;  %v6287_v12 = vor.u32 %v6286_v35, %v6283_v56  ;;  %v21112_v18 = vld [vmem:[%s28859_s3 + $0x190] sm:$0xff]   ;;  %v21126_v35 = vld [vmem:[%s28859_s3 + $0x208] sm:$0xff]  }
 0x591   : > { %v6498_v60 = vrot.slane %v6496_v24, 7  ;;  %v6288_v10 = vsel %vm1775_vm2, %v6266_v48, %v6287_v12  ;;  %v21121_v48 = vld [vmem:[%s28859_s3 + $0x1f8] sm:$0xff]   ;;  %v28896_v12 = vmax.f32 %v24801_v58, 0.0  ;;  %v21132_v58 = vld [vmem:[%s28859_s3 + $0x220] sm:$0xff]  }
 0x592   : > { %19437 = vmatpush3.bf16.msra.mxu1 %v21106_v33  ;;  %v21118_v33 = vld [vmem:[%s28859_s3 + $0x1a8] sm:$0xff]  }
 0x593   : > { %19450 = vmatprep.subr.bf16.mxu1 %v21107_v37  ;;  %v6501_v62 = vsel %vm2375_vm3, %v6498_v60, %v6500_v7  ;;  %v21120_v37 = vld [vmem:[%s28859_s3 + $0x1b0] sm:$0xff]   ;;  %v28897_v60 = vmax.f32 %v24811_v25, 0.0  ;;  %v21133_v25 = vld [vmem:[%s28859_s3 + $0x268] sm:$0xff]  }
 0x595   : > { %6431 = vmatmul.mubr.bf16.vlgmr.msra.gmra.mrb[8].mxu1 %v6267_v8  ;;  %v6505_v8 = vrot.slane %v24990_v46, 7  ;;  %v21129_v46 = vld [vmem:[%s28859_s3 + $0x258] sm:$0xff]   ;;  %v22448_v7 = vpack.c.bf16 %v28897_v60, %v28896_v12  ;;  %v7086_v60 = vld [vmem:[#allocation3 + $0x28] sm:$0xf8] }
 0x596   : > { %6438 = vmatprep.mubr.bf16.mxu1 %v6297_v42  ;;  %19451 = vmatpush3.bf16.msra.mxu1 %v21108_v0  ;;  %v6516_v0 = vor.u32 %v24929_v27, %v6513_v31  ;;  %v21127_v42 = vld [vmem:[%s28859_s3 + $0x250] sm:$0xff]   ;;  %v21149_v27 = vld [vmem:[%s28859_s3 + $0x2e8] sm:$0xff]  }
 0x597   : > { %19452 = vmatprep.subr.bf16.mxu1 %v21109_v14  ;;  %v21124_v14 = vld [vmem:[%s28859_s3 + $0x200] sm:$0xff]   ;;  %v6508_v24 = vor.u32 %v24959_v44, %v6505_v8  ;;  %v21160_v44 = vld [vmem:[%s28859_s3 + $0x310] sm:$0xff]   ;;  %v22357_v31 = vld [vmem:[%s28865_s9 + $0x268] sm:$0xff]  }
 0x598   : > { %v6517_v56 = vsel %vm2375_vm3, %v6499_v28, %v6516_v0  ;;  %v28893_v28 = vrot.slane %v24854_v16, 7  ;;  %v21130_v16 = vld [vmem:[%s28859_s3 + $0x218] sm:$0xff]  }
 0x59a   : > { %19453 = vmatpush3.bf16.msra.mxu1 %v21110_v26  ;;  %v6509_v26 = vsel %vm2375_vm3, %v28893_v28, %v6508_v24 }
 0x59b   : > { %19454 = vmatprep.subr.bf16.mxu1 %v21111_v63  ;;  %v22351_v63 = vld [vmem:[%s28865_s9 + $0x250] sm:$0xff]  }
 0x59d   : > { %6439 = vmatmul.mubr.bf16.gmra.mrb[12].mxu1 %v6288_v10  ;;  %v21135_v10 = vld [vmem:[%s28859_s3 + $0x270] sm:$0xff]  }
 0x59e   : > { %19455 = vmatpush3.bf16.msra.mxu1 %v21112_v18  ;;  %6650 = vmatprep.mubr.bf16.mxu1 %v6501_v62  ;;  %v21131_v18 = vld [vmem:[%s28859_s3 + $0x260] sm:$0xff]   ;;  %v21136_v62 = vld [vmem:[%s28859_s3 + $0x230] sm:$0xff]  }
 0x59f   : > { %19456 = vmatprep.subr.bf16.mxu1 %v21113_v21  ;;  %v21134_v21 = vld [vmem:[%s28859_s3 + $0x228] sm:$0xff]  }
 0x5a2   : > { %19457 = vmatpush3.bf16.msra.mxu1 %v21114_v36  ;;  %v21137_v36 = vld [vmem:[%s28859_s3 + $0x278] sm:$0xff]  }
 0x5a3   : > { %19458 = vmatprep.subr.bf16.mxu1 %v21115_v49  ;;  %v21138_v49 = vld [vmem:[%s28859_s3 + $0x238] sm:$0xff]  }
 0x5a6   : > { %19459 = vmatpush3.bf16.msra.mxu1 %v21116_v34  ;;  %v21139_v34 = vld [vmem:[%s28859_s3 + $0x2c0] sm:$0xff]  }
 0x5a7   : > { %19460 = vmatprep.subr.bf16.mxu1 %v21117_v13  ;;  %v21140_v13 = vld [vmem:[%s28859_s3 + $0x280] sm:$0xff]  }
 0x5aa   : > { %19461 = vmatpush3.bf16.msra.mxu1 %v21118_v33  ;;  %v21141_v33 = vld [vmem:[%s28859_s3 + $0x2c8] sm:$0xff]  }
 0x5ab   : > { %19462 = vmatprep.subr.bf16.mxu1 %v21119_v17  ;;  %v28898_v17 = vmax.f32 %v24795_v38, 0.0  ;;  %v21142_v38 = vld [vmem:[%s28859_s3 + $0x288] sm:$0xff]  }
 0x5ae   : > { %19463 = vmatpush3.bf16.msra.mxu1 %v21120_v37  ;;  %v28899_v37 = vmax.f32 %v24804_v32, 0.0  ;;  %v21143_v32 = vld [vmem:[%s28859_s3 + $0x2d0] sm:$0xff]  }
 0x5af   : > { %19464 = vmatprep.subr.bf16.mxu1 %v21121_v48 }
 0x5b0   : > { %v22451_v48 = vpack.c.bf16 %v28899_v37, %v28898_v17  ;;  %v21163_v17 = vld [vmem:[%s28859_s3 + $0x360] sm:$0xff]  }
 0x5b1   : > { %v21164_v37 = vld [vmem:[%s28859_s3 + $0x320] sm:$0xff]  }
 0x5b2   : > { %19465 = vmatpush3.bf16.msra.mxu1 %v21122_v43  ;;  %v28902_v43 = vmax.f32 %v24850_v4, 0.0  ;;  %v21144_v4 = vld [vmem:[%s28859_s3 + $0x290] sm:$0xff]  }
 0x5b3   : > { %19478 = vmatprep.subr.bf16.mxu1 %v21123_v1  ;;  %v28903_v1 = vmax.f32 %v24868_v61, 0.0  ;;  %v21145_v61 = vld [vmem:[%s28859_s3 + $0x2d8] sm:$0xff]  }
 0x5b5   : > { %6651 = vmatmul.mubr.bf16.vlgmr.msra.gmra.mrb[16].mxu1 %v24943_v15  ;;  %v21128_v15 = vld [vmem:[%s28859_s3 + $0x210] sm:$0xff]   ;;  %v22454_v0 = vpack.c.bf16 %v28903_v1, %v28902_v43 }
 0x5b6   : > { %6658 = vmatprep.mubr.bf16.mxu1 %v6517_v56  ;;  %19479 = vmatpush3.bf16.msra.mxu1 %v21124_v14  ;;  %v28904_v14 = vmax.f32 %v24847_v9, 0.0  ;;  %v6915_v56 = vsel %vm3454_vm4, %v24948_v53, %v6914_v2  ;;  %v21147_v9 = vld [vmem:[%s28859_s3 + $0x2e0] sm:$0xff]   ;;  %v21150_v2 = vld [vmem:[%s28859_s3 + $0x2a8] sm:$0xff]   ;;  %v21167_v43 = vld [vmem:[%s28859_s3 + $0x370] sm:$0xff]  }
 0x5b7   : > { %19480 = vmatprep.subr.bf16.mxu1 %v21125_v19  ;;  %v28905_v19 = vmax.f32 %v24861_v41, 0.0  ;;  %v21148_v41 = vld [vmem:[%s28859_s3 + $0x2a0] sm:$0xff]  }
 0x5b8   : > { %v6853_v53 = vld [vmem:[#allocation3 + $0x20] sm:$0xff] }
 0x5b9   : > { %v22457_v8 = vpack.c.bf16 %v28905_v19, %v28904_v14  ;;  %v6895_v24 = vshll.u32 %v6853_v53, 16  ;;  %v6893_v12 = vshrl.u32 %v6853_v53, 16  ;;  %v21170_v14 = vld [vmem:[%s28859_s3 + $0x338] sm:$0xff]   ;;  %v21171_v19 = vld [vmem:[%s28859_s3 + $0x3c0] sm:$0xff]   ;;  %v21175_v53 = vld [vmem:[%s28859_s3 + $0x3d0] sm:$0xff]  }
 0x5ba   : > { %19481 = vmatpush3.bf16.msra.mxu1 %v21126_v35  ;;  %v21146_v35 = vld [vmem:[%s28859_s3 + $0x298] sm:$0xff]  }
 0x5bb   : > { %19482 = vmatprep.subr.bf16.mxu1 %v21127_v42  ;;  %v21151_v42 = vld [vmem:[%s28859_s3 + $0x2f0] sm:$0xff]   ;;  %v6897_v28 = vrot.slane %v6895_v24, 1 }
 0x5bd   : > { %6659 = vmatmul.mubr.bf16.gmra.mrb[20].mxu1 %v6509_v26  ;;  %v21154_v26 = vld [vmem:[%s28859_s3 + $0x2b8] sm:$0xff]  }
 0x5be   : > { %19483 = vmatpush3.bf16.msra.mxu1 %v21128_v15  ;;  %22449 = vmatprep.mubr.msk.bf16.mxu1 %vm25161_vm9, %v22448_v7  ;;  %v21152_v15 = vld [vmem:[%s28859_s3 + $0x2b0] sm:$0xff]   ;;  %v21155_v7 = vld [vmem:[%s28859_s3 + $0x340] sm:$0xff]  }
 0x5bf   : > { %19484 = vmatprep.subr.bf16.mxu1 %v21129_v46  ;;  %v21153_v46 = vld [vmem:[%s28859_s3 + $0x2f8] sm:$0xff]  }
 0x5c2   : > { %19485 = vmatpush3.bf16.msra.mxu1 %v21130_v16  ;;  %v6898_v16 = vor.u32 %v6897_v28, %v6893_v12  ;;  %v21182_v28 = vld [vmem:[%s28859_s3 + $0x3a8] sm:$0xff]   ;;  %v21184_v12 = vld [vmem:[%s28859_s3 + $0x3b0] sm:$0xff]  }
 0x5c3   : > { %19486 = vmatprep.subr.bf16.mxu1 %v21131_v18  ;;  %v7135_v18 = vshrl.u32 %v7086_v60, 16 }
 0x5c6   : > { %19487 = vmatpush3.bf16.msra.mxu1 %v21132_v58  ;;  %v7138_v58 = vshll.u32 %v7086_v60, 16  ;;  %v21185_v60 = vld [vmem:[%s28859_s3 + $0x3f8] sm:$0xff]  }
 0x5c7   : > { %19488 = vmatprep.subr.bf16.mxu1 %v21133_v25  ;;  %v21156_v25 = vld [vmem:[%s28859_s3 + $0x300] sm:$0xff]  }
 0x5ca   : > { %19489 = vmatpush3.bf16.msra.mxu1 %v21134_v21  ;;  %v21157_v21 = vld [vmem:[%s28859_s3 + $0x348] sm:$0xff]  }
 0x5cb   : > { %19490 = vmatprep.subr.bf16.mxu1 %v21135_v10  ;;  %v6903_v10 = vsel %vm3454_vm4, %v6898_v16, %v6902_v52  ;;  %v21161_v52 = vld [vmem:[%s28859_s3 + $0x358] sm:$0xff]  }
 0x5cc   : > { %v21186_v16 = vld [vmem:[%s28859_s3 + $0x3b8] sm:$0xff]  }
 0x5ce   : > { %19491 = vmatpush3.bf16.msra.mxu1 %v21136_v62  ;;  %v7137_v62 = vrot.slane %v7135_v18, 3  ;;  %v21187_v18 = vld [vmem:[%s28859_s3 + $0x440] sm:$0xff]  }
 0x5cf   : > { %19492 = vmatprep.subr.bf16.mxu1 %v21137_v36  ;;  %v7140_v36 = vrot.slane %v7138_v58, 4 }
 0x5d2   : > { %19493 = vmatpush3.bf16.msra.mxu1 %v21138_v49  ;;  %v21158_v49 = vld [vmem:[%s28859_s3 + $0x308] sm:$0xff]  }
 0x5d3   : > { %19506 = vmatprep.subr.bf16.mxu1 %v21139_v34  ;;  %v21159_v34 = vld [vmem:[%s28859_s3 + $0x350] sm:$0xff]  }
 0x5d5   : > { %22452 = vmatmul.mubr.msk.bf16.vlgmr.msra.gmra.mrb[24].mxu1 %vm25161_vm9, %v22451_v48  ;;  %v21166_v48 = vld [vmem:[%s28859_s3 + $0x328] sm:$0xff]  }
 0x5d6   : > { %22455 = vmatprep.mubr.msk.bf16.mxu1 %vm25217_vm10, %v22454_v0  ;;  %19507 = vmatpush3.bf16.msra.mxu1 %v21140_v13  ;;  %v7141_v13 = vor.u32 %v7140_v36, %v7137_v62  ;;  %v21188_v36 = vld [vmem:[%s28859_s3 + $0x400] sm:$0xff]  }
 0x5d7   : > { %19508 = vmatprep.subr.bf16.mxu1 %v21141_v33  ;;  %v21162_v33 = vld [vmem:[%s28859_s3 + $0x318] sm:$0xff]  }
 0x5da   : > { %19509 = vmatpush3.bf16.msra.mxu1 %v21142_v38  ;;  %v21168_v38 = vld [vmem:[%s28859_s3 + $0x330] sm:$0xff]  }
 0x5db   : > { %19510 = vmatprep.subr.bf16.mxu1 %v21143_v32  ;;  %v21169_v32 = vld [vmem:[%s28859_s3 + $0x378] sm:$0xff]  }
 0x5dd   : > { %22458 = vmatmul.mubr.msk.bf16.gmra.mrb[28].mxu1 %vm25217_vm10, %v22457_v8 }
 0x5de   : > { %19511 = vmatpush3.bf16.msra.mxu1 %v21144_v4  ;;  %7064 = vmatprep.mubr.bf16.mxu1 %v6915_v56  ;;  %v21172_v56 = vld [vmem:[%s28859_s3 + $0x380] sm:$0xff]  }
 0x5df   : > { %19512 = vmatprep.subr.bf16.mxu1 %v21145_v61 }
 0x5e2   : > { %19513 = vmatpush3.bf16.msra.mxu1 %v21146_v35  ;;  %v21173_v35 = vld [vmem:[%s28859_s3 + $0x3c8] sm:$0xff]  }
 0x5e3   : > { %19514 = vmatprep.subr.bf16.mxu1 %v21147_v9 }
 0x5e6   : > { %19515 = vmatpush3.bf16.msra.mxu1 %v21148_v41  ;;  %v21174_v41 = vld [vmem:[%s28859_s3 + $0x388] sm:$0xff]  }
 0x5e7   : > { %19516 = vmatprep.subr.bf16.mxu1 %v21149_v27  ;;  %v7318_v27 = vld [vmem:[#allocation3 + $0x28] sm:$0xf0] }
 0x5e8   : > { %v7572_v62 = vshll.u32 %v7318_v27, 16 }
 0x5ea   : > { %19517 = vmatpush3.bf16.msra.mxu1 %v21150_v2  ;;  %v7361_v2 = vrot.slane %v7318_v27, 4 }
 0x5eb   : > { %19518 = vmatprep.subr.bf16.mxu1 %v21151_v42  ;;  %v7362_v42 = vrot.slane %v24906_v30, 4  ;;  %v21178_v30 = vld [vmem:[%s28859_s3 + $0x398] sm:$0xff]  }
 0x5ed   : > { %v7363_v24 = vsel %vm712_vm0, %v7361_v2, %v7362_v42 }
 0x5ee   : > { %19519 = vmatpush3.bf16.msra.mxu1 %v21152_v15  ;;  %v21179_v15 = vld [vmem:[%s28859_s3 + $0x3e0] sm:$0xff]  }
 0x5ef   : > { %19520 = vmatprep.subr.bf16.mxu1 %v21153_v46  ;;  %v21180_v46 = vld [vmem:[%s28859_s3 + $0x3a0] sm:$0xff]  }
 0x5f2   : > { %19521 = vmatpush3.bf16.msra.mxu1 %v21154_v26  ;;  %v21183_v26 = vld [vmem:[%s28859_s3 + $0x3f0] sm:$0xff]  }
 0x5f3   : > { %19534 = vmatprep.subr.bf16.mxu1 %v21155_v7  ;;  %v25382_v7 = vld [vmem:[#allocation3 + $0x20] sm:$0xf0] }
 0x5f4   : > { %v7358_v58 = vrot.slane %v25382_v7, 4 }
 0x5f5   : > { %7065 = vmatmul.mubr.bf16.vlgmr.msra.gmra.mrb[32].mxu1 %v6903_v10  ;;  %v7569_v10 = vshrl.u32 %v7318_v27, 16 }
 0x5f6   : > { %7072 = vmatprep.mubr.bf16.mxu1 %v24995_v45  ;;  %19535 = vmatpush3.bf16.msra.mxu1 %v21156_v25  ;;  %v7145_v45 = vsel %vm1167_vm1, %v7141_v13, %v25023_v51  ;;  %v7085_v51 = vld [vmem:[#allocation3 + $0x20] sm:$0xf8]  ;;  %v7359_v25 = vrot.slane %v24898_v59, 4 }
 0x5f7   : > { %19536 = vmatprep.subr.bf16.mxu1 %v21157_v21  ;;  %v7123_v1 = vshrl.u32 %v7085_v51, 16  ;;  %v7126_v0 = vshll.u32 %v7085_v51, 16  ;;  %v7366_v21 = vrot.slane %v24772_v29, 4  ;;  %v7571_v59 = vrot.slane %v7569_v10, 4  ;;  %v21190_v29 = vld [vmem:[%s28859_s3 + $0x408] sm:$0xff]  }
 0x5f9   : > { %v7125_v4 = vrot.slane %v7123_v1, 3  ;;  %v7128_v61 = vrot.slane %v7126_v0, 4  ;;  %v7367_v13 = vsel %vm712_vm0, %v7362_v42, %v7366_v21  ;;  %v21201_v42 = vld [vmem:[%s28859_s3 + $0x478] sm:$0xff]  }
 0x5fa   : > { %19537 = vmatpush3.bf16.msra.mxu1 %v21158_v49  ;;  %v21189_v49 = vld [vmem:[%s28859_s3 + $0x448] sm:$0xff]  }
 0x5fb   : > { %19538 = vmatprep.subr.bf16.mxu1 %v21159_v34  ;;  %v7129_v8 = vor.u32 %v7128_v61, %v7125_v4  ;;  %v7360_v34 = vsel %vm712_vm0, %v7358_v58, %v7359_v25  ;;  %v21198_v61 = vld [vmem:[%s28859_s3 + $0x428] sm:$0xff]  }
 0x5fd   : > { %7073 = vmatmul.mubr.bf16.gmra.mrb[36].mxu1 %v25016_v6  ;;  %v21165_v6 = vld [vmem:[%s28859_s3 + $0x368] sm:$0xff]   ;;  %v7133_v9 = vsel %vm1167_vm1, %v7129_v8, %v25034_v3  ;;  %v21176_v3 = vld [vmem:[%s28859_s3 + $0x390] sm:$0xff]  }
 0x5fe   : > { %19539 = vmatpush3.bf16.msra.mxu1 %v21160_v44  ;;  %7296 = vmatprep.mubr.bf16.mxu1 %v7145_v45  ;;  %v7574_v44 = vrot.slane %v7572_v62, 5  ;;  %v7364_v45 = vrot.slane %v24766_v22, 4  ;;  %v21194_v22 = vld [vmem:[%s28859_s3 + $0x418] sm:$0xff]  }
 0x5ff   : > { %19540 = vmatprep.subr.bf16.mxu1 %v21161_v52  ;;  %v21191_v52 = vld [vmem:[%s28859_s3 + $0x450] sm:$0xff]  }
 0x602   : > { %19541 = vmatpush3.bf16.msra.mxu1 %v21162_v33  ;;  %v7575_v33 = vor.u32 %v7574_v44, %v7571_v59 }
 0x603   : > { %19542 = vmatprep.subr.bf16.mxu1 %v21163_v17  ;;  %v21192_v17 = vld [vmem:[%s28859_s3 + $0x410] sm:$0xff]  }
 0x604   : > { %v7579_v51 = vsel %vm1775_vm2, %v7575_v33, %v25055_v20  ;;  %v21197_v20 = vld [vmem:[%s28859_s3 + $0x468] sm:$0xff]  }
 0x606   : > { %19543 = vmatpush3.bf16.msra.mxu1 %v21164_v37  ;;  %v21193_v37 = vld [vmem:[%s28859_s3 + $0x458] sm:$0xff]  }
 0x607   : > { %19544 = vmatprep.subr.bf16.mxu1 %v21165_v6  ;;  %v7365_v6 = vsel %vm712_vm0, %v7359_v25, %v7364_v45 }
 0x60a   : > { %19545 = vmatpush3.bf16.msra.mxu1 %v21166_v48  ;;  %v21195_v48 = vld [vmem:[%s28859_s3 + $0x460] sm:$0xff]  }
 0x60b   : > { %19546 = vmatprep.subr.bf16.mxu1 %v21167_v43  ;;  %v21196_v43 = vld [vmem:[%s28859_s3 + $0x420] sm:$0xff]  }
 0x60e   : > { %19547 = vmatpush3.bf16.msra.mxu1 %v21168_v38 }
 0x60f   : > { %19548 = vmatprep.subr.bf16.mxu1 %v21169_v32 }
 0x612   : > { %19549 = vmatpush3.bf16.msra.mxu1 %v21170_v14 }
 0x613   : > { %19562 = vmatprep.subr.bf16.mxu1 %v21171_v19  ;;  %v21199_v19 = vld [vmem:[%s28859_s3 + $0x470] sm:$0xff]  }
 0x615   : > { %7297 = vmatmul.mubr.bf16.vlgmr.msra.gmra.mrb[40].mxu1 %v7133_v9 }
 0x616   : > { %7304 = vmatprep.mubr.bf16.mxu1 %v25038_v47  ;;  %19563 = vmatpush3.bf16.msra.mxu1 %v21172_v56  ;;  %v21177_v47 = vld [vmem:[%s28859_s3 + $0x3d8] sm:$0xff]   ;;  %v7557_v56 = vshrl.u32 %v25382_v7, 16 }
 0x617   : > { %19564 = vmatprep.subr.bf16.mxu1 %v21173_v35  ;;  %v7560_v35 = vshll.u32 %v25382_v7, 16 }
 0x61a   : > { %19565 = vmatpush3.bf16.msra.mxu1 %v21174_v41 }
 0x61b   : > { %19566 = vmatprep.subr.bf16.mxu1 %v21175_v53  ;;  %v21200_v53 = vld [vmem:[%s28859_s3 + $0x430] sm:$0xff]  }
 0x61d   : > { %7305 = vmatmul.mubr.bf16.gmra.mrb[44].mxu1 %v25042_v57  ;;  %v21181_v57 = vld [vmem:[%s28859_s3 + $0x3e8] sm:$0xff]  }
 0x61e   : > { %19567 = vmatpush3.bf16.msra.mxu1 %v21176_v3  ;;  %7500 = vmatprep.mubr.bf16.mxu1 %v7363_v24  ;;  %v7559_v24 = vrot.slane %v7557_v56, 4 }
 0x61f   : > { %19568 = vmatprep.subr.bf16.mxu1 %v21177_v47 }
 0x622   : > { %19569 = vmatpush3.bf16.msra.mxu1 %v21178_v30  ;;  %v7562_v30 = vrot.slane %v7560_v35, 5 }
 0x623   : > { %19570 = vmatprep.subr.bf16.mxu1 %v21179_v15 }
 0x626   : > { %19571 = vmatpush3.bf16.msra.mxu1 %v21180_v46  ;;  %v21202_v46 = vld [vmem:[%s28859_s3 + $0x438] sm:$0xff]  }
 0x627   : > { %19572 = vmatprep.subr.bf16.mxu1 %v21181_v57  ;;  %v7563_v57 = vor.u32 %v7562_v30, %v7559_v24 }
 0x62a   : > { %19573 = vmatpush3.bf16.msra.mxu1 %v21182_v28 }
 0x62b   : > { %19574 = vmatprep.subr.bf16.mxu1 %v21183_v26 }
 0x62e   : > { %19575 = vmatpush3.bf16.msra.mxu1 %v21184_v12  ;;  %v7567_v12 = vsel %vm1775_vm2, %v7563_v57, %v25061_v11 }
 0x62f   : > { %19576 = vmatprep.subr.bf16.mxu1 %v21185_v60 }
 0x632   : > { %19577 = vmatpush3.bf16.msra.mxu1 %v21186_v16 }
 0x633   : > { %19590 = vmatprep.subr.bf16.mxu1 %v21187_v18 }
 0x635   : > { %7501 = vmatmul.mubr.bf16.vlgmr.msra.gmra.mrb[48].mxu1 %v7360_v34 }
 0x636   : > { %7508 = vmatprep.mubr.bf16.mxu1 %v7367_v13  ;;  %19591 = vmatpush3.bf16.msra.mxu1 %v21188_v36  ;;  %v25450_v13 = vld [vmem:[#allocation2 + $0x8] sm:$0xff] }
 0x637   : > { %19592 = vmatprep.subr.bf16.mxu1 %v21189_v49 }
 0x63a   : > { %19593 = vmatpush3.bf16.msra.mxu1 %v21190_v29 }
 0x63b   : > { %19594 = vmatprep.subr.bf16.mxu1 %v21191_v52 }
 0x63d   : > { %7509 = vmatmul.mubr.bf16.gmra.mrb[52].mxu1 %v7365_v6 }
 0x63e   : > { %19595 = vmatpush3.bf16.msra.mxu1 %v21192_v17  ;;  %7730 = vmatprep.mubr.bf16.mxu1 %v7579_v51 }
 0x63f   : > { %19596 = vmatprep.subr.bf16.mxu1 %v21193_v37 }
 0x642   : > { %19597 = vmatpush3.bf16.msra.mxu1 %v21194_v22 }
 0x643   : > { %v19382_v1 = vpop.f32.mrb[8].mxu0  ;;  %19598 = vmatprep.subr.bf16.mxu1 %v21195_v48 }
 0x644   : > { %v19383_v0 = vpop.f32.mrb[9].mxu0 }
 0x645   : > { %v19384_v38 = vadd.f32 %v19383_v0, %v19382_v1  ;;  %v19385_v32 = vpop.f32.mrb[10].mxu0 }
 0x646   : > { %19599 = vmatpush3.bf16.msra.mxu1 %v21196_v43  ;;  %v19386_v4 = vpop.f32.mrb[11].mxu0 }
 0x647   : > { %v19387_v14 = vadd.f32 %v19386_v4, %v19385_v32  ;;  %19600 = vmatprep.subr.bf16.mxu1 %v21197_v20 }
 0x648   : > { %v19410_v8 = vpop.f32.mrb[0].mxu1 }
 0x649   : > { %v19411_v9 = vpop.f32.mrb[1].mxu1 }
 0x64a   : > { %v19412_v41 = vadd.f32 %v19411_v9, %v19410_v8  ;;  %19601 = vmatpush3.bf16.msra.mxu1 %v21198_v61  ;;  %v19413_v27 = vpop.f32.mrb[2].mxu1 }
 0x64b   : > { %v19414_v2 = vpop.f32.mrb[3].mxu1  ;;  %19602 = vmatprep.subr.bf16.mxu1 %v21199_v19 }
 0x64c   : > { %v6207_v3 = vadd.f32 %v19412_v41, %v19384_v38  ;;  %v19415_v47 = vadd.f32 %v19414_v2, %v19413_v27  ;;  %v21203_v2 = vld [vmem:[%s28861_s5 + $0x80] ss:$8 sps:$4 sm:$0xff]  }
 0x64e   : > { %v6210_v15 = vadd.f32 %v19415_v47, %v19387_v14  ;;  %19603 = vmatpush3.bf16.msra.mxu1 %v21200_v53  ;;  %v21206_v47 = vld [vmem:[%s28861_s5 + $0x90] ss:$8 sps:$4 sm:$0xff]  }
 0x64f   : > { %19604 = vmatprep.subr.bf16.mxu1 %v21201_v42  ;;  %v21205_v42 = vld [vmem:[%s28861_s5 + $0x84] ss:$8 sps:$4 sm:$0xff]  }
 0x652   : > { %19605 = vmatpush3.bf16.msra.mxu1 %v21202_v46 }
 0x653   : > { %v19388_v28 = vpop.f32.mrb[12].mxu0  ;;  %7917 = vmatprep.subr.bf16.mxu1 %v21205_v42 }
 0x654   : > { %v19389_v26 = vpop.f32.mrb[13].mxu0 }
 0x655   : > { %v19390_v60 = vadd.f32 %v19389_v26, %v19388_v28  ;;  %v19391_v7 = vpop.f32.mrb[14].mxu0  ;;  %7731 = vmatmul.mubr.bf16.vlgmr.msra.gmra.mrb[56].mxu1 %v7567_v12 }
 0x656   : > { %v19392_v16 = vpop.f32.mrb[15].mxu0  ;;  %7738 = vmatprep.mubr.bf16.mxu1 %v25065_v5  ;;  %7918 = vmatpush1.bf16.msra.mxu1 %v21203_v2 }
 0x657   : > { %v19393_v18 = vadd.f32 %v19392_v16, %v19391_v7  ;;  %v19416_v58 = vpop.f32.mrb[4].mxu1 }
 0x658   : > { %v19417_v25 = vpop.f32.mrb[5].mxu1 }
 0x659   : > { %v19418_v21 = vadd.f32 %v19417_v25, %v19416_v58  ;;  %v19419_v10 = vpop.f32.mrb[6].mxu1  ;;  %v21209_v58 = vld [vmem:[%s28861_s5 + $0xa0] ss:$8 sps:$4 sm:$0xff]   ;;  %v21211_v25 = vld [vmem:[%s28861_s5 + $0xa4] ss:$8 sps:$4 sm:$0xff]  }
 0x65a   : > { %v19420_v62 = vpop.f32.mrb[7].mxu1 }
 0x65b   : > { %v6215_v36 = vadd.f32 %v19418_v21, %v19390_v60  ;;  %v19421_v49 = vadd.f32 %v19420_v62, %v19419_v10 }
 0x65d   : > { %v6218_v34 = vadd.f32 %v19421_v49, %v19393_v18  ;;  %7739 = vmatmul.mubr.bf16.gmra.mrb[60].mxu1 %v25072_v55  ;;  %v21212_v49 = vld [vmem:[%s28861_s5 + $0xb0] ss:$8 sps:$4 sm:$0xff]  }
 0x65e   : > { %7949 = vmatprep.mubr.bf16.mxu1 %v25450_v13 }
 0x668   : > { %v19438_v11 = vpop.f32.mrb[8].mxu1 }
 0x669   : > { %v19439_v59 = vpop.f32.mrb[9].mxu1 }
 0x66a   : > { %v19440_v44 = vadd.f32 %v19439_v59, %v19438_v11  ;;  %v19441_v29 = vpop.f32.mrb[10].mxu1  ;;  %v21215_v11 = vld [vmem:[%s28861_s5 + $0xc0] ss:$8 sps:$4 sm:$0xff]   ;;  %v21217_v59 = vld [vmem:[%s28861_s5 + $0xc4] ss:$8 sps:$4 sm:$0xff]  }
 0x66b   : > { %v19442_v5 = vpop.f32.mrb[11].mxu1 }
 0x66c   : > { %v6447_v52 = vadd.f32 %v19440_v44, %v6207_v3  ;;  %v19443_v45 = vadd.f32 %v19442_v5, %v19441_v29  ;;  %v21208_v3 = vld [vmem:[%s28861_s5 + $0x94] ss:$8 sps:$4 sm:$0xff]   ;;  %v21218_v44 = vld [vmem:[%s28861_s5 + $0xd0] ss:$8 sps:$4 sm:$0xff]   ;;  %v21223_v5 = vld [vmem:[%s28861_s5 + $0xe4] ss:$8 sps:$4 sm:$0xff]  }
 0x66d   : > { %7919 = vmatprep.subr.bf16.mxu1 %v21208_v3  ;;  %v21220_v29 = vld [vmem:[%s28861_s5 + $0xd4] ss:$8 sps:$4 sm:$0xff]  }
 0x66e   : > { %v6448_v33 = vadd.f32 %v19443_v45, %v6210_v15  ;;  %7920 = vmatpush1.bf16.msra.mxu1 %v21206_v47  ;;  %v21226_v45 = vld [vmem:[%s28861_s5 + $0xf4] ss:$8 sps:$4 sm:$0xff]  }
 0x66f   : > { %7921 = vmatprep.subr.bf16.mxu1 %v21211_v25 }
 0x670   : > { %v19444_v17 = vpop.f32.mrb[12].mxu1 }
 0x671   : > { %v19445_v37 = vpop.f32.mrb[13].mxu1 }
 0x672   : > { %v19446_v6 = vadd.f32 %v19445_v37, %v19444_v17  ;;  %v19447_v51 = vpop.f32.mrb[14].mxu1  ;;  %7922 = vmatpush1.bf16.msra.mxu1 %v21209_v58  ;;  %v21229_v17 = vld [vmem:[%s28861_s5 + $0x4] ss:$8 sps:$4 sm:$0xff]  }
 0x673   : > { %v19448_v22 = vpop.f32.mrb[15].mxu1 }
 0x674   : > { %v6449_v48 = vadd.f32 %v19446_v6, %v6215_v36  ;;  %v19449_v43 = vadd.f32 %v19448_v22, %v19447_v51 }
 0x676   : > { %v6450_v55 = vadd.f32 %v19449_v43, %v6218_v34  ;;  %v21214_v34 = vld [vmem:[%s28861_s5 + $0xb4] ss:$8 sps:$4 sm:$0xff]  }
 0x677   : > { %7923 = vmatprep.subr.bf16.mxu1 %v21214_v34 }
 0x678   : > { %7924 = vmatpush1.bf16.msra.mxu1 %v21212_v49 }
 0x679   : > { %7925 = vmatprep.subr.bf16.mxu1 %v21217_v59 }
 0x67c   : > { %7926 = vmatpush1.bf16.msra.mxu1 %v21215_v11 }
 0x67d   : > { %7927 = vmatprep.subr.bf16.mxu1 %v21220_v29 }
 0x680   : > { %7928 = vmatpush1.bf16.msra.mxu1 %v21218_v44 }
 0x681   : > { %7929 = vmatprep.subr.bf16.mxu1 %v21223_v5 }
 0x688   : > { %v19466_v1 = vpop.f32.mrb[16].mxu1 }
 0x689   : > { %v19467_v20 = vpop.f32.mrb[17].mxu1 }
 0x68a   : > { %v19468_v0 = vadd.f32 %v19467_v20, %v19466_v1  ;;  %v19469_v38 = vpop.f32.mrb[18].mxu1 }
 0x68b   : > { %v19470_v32 = vpop.f32.mrb[19].mxu1 }
 0x68c   : > { %v6667_v4 = vadd.f32 %v19468_v0, %v6447_v52  ;;  %v19471_v61 = vadd.f32 %v19470_v32, %v19469_v38  ;;  %v21221_v52 = vld [vmem:[%s28861_s5 + $0xe0] ss:$8 sps:$4 sm:$0xff]  }
 0x68d   : > { %7930 = vmatpush1.bf16.msra.mxu1 %v21221_v52 }
 0x68e   : > { %v6668_v14 = vadd.f32 %v19471_v61, %v6448_v33  ;;  %v21224_v33 = vld [vmem:[%s28861_s5 + $0xf0] ss:$8 sps:$4 sm:$0xff]   ;;  %7931 = vmatprep.subr.bf16.mxu1 %v21226_v45 }
 0x690   : > { %v19472_v19 = vpop.f32.mrb[20].mxu1 }
 0x691   : > { %v19473_v8 = vpop.f32.mrb[21].mxu1  ;;  %7932 = vmatpush1.bf16.msra.mxu1 %v21224_v33 }
 0x692   : > { %v19474_v56 = vadd.f32 %v19473_v8, %v19472_v19  ;;  %v19475_v35 = vpop.f32.mrb[22].mxu1  ;;  %8078 = vmatprep.subr.bf16.mxu1 %v21229_v17  ;;  %v25504_v8 = vld [vmem:[#allocation2 + $0x60] sm:$0x1] }
 0x693   : > { %v19476_v9 = vpop.f32.mrb[23].mxu1  ;;  %v17677_v17 = vld [vmem:[%s28860_s4] ss:$0 sm:$0xff] }
 0x694   : > { %v6669_v41 = vadd.f32 %v19474_v56, %v6449_v48  ;;  %v19477_v27 = vadd.f32 %v19476_v9, %v19475_v35  ;;  %v25506_v56 = vld [vmem:[#allocation2 + $0x60] sm:$0xf] }
 0x695   : > { %v25508_v35 = vld [vmem:[#allocation2 + $0x60] sm:$0x1f] }
 0x696   : > { %v6670_v53 = vadd.f32 %v19477_v27, %v6450_v55  ;;  %14385 = vst [vmem:[#allocation2 + $0x60] sm:$0xff] %v25450_v13 }
 0x6a8   : > { %v19494_v24 = vpop.f32.mrb[24].mxu1 }
 0x6a9   : > { %v19495_v30 = vpop.f32.mrb[25].mxu1 }
 0x6aa   : > { %v19496_v15 = vadd.f32 %v19495_v30, %v19494_v24  ;;  %v19497_v46 = vpop.f32.mrb[26].mxu1 }
 0x6ab   : > { %v19498_v57 = vpop.f32.mrb[27].mxu1 }
 0x6ac   : > { %v6849_v28 = vadd.f32 %v19496_v15, %v6667_v4  ;;  %v19499_v26 = vadd.f32 %v19498_v57, %v19497_v46 }
 0x6ae   : > { %v6850_v12 = vadd.f32 %v19499_v26, %v6668_v14 }
 0x6b0   : > { %v19500_v60 = vpop.f32.mrb[28].mxu1 }
 0x6b1   : > { %v19501_v7 = vpop.f32.mrb[29].mxu1 }
 0x6b2   : > { %v19502_v16 = vadd.f32 %v19501_v7, %v19500_v60  ;;  %v19503_v18 = vpop.f32.mrb[30].mxu1 }
 0x6b3   : > { %v19504_v21 = vpop.f32.mrb[31].mxu1 }
 0x6b4   : > { %v6851_v10 = vadd.f32 %v19502_v16, %v6669_v41  ;;  %v19505_v62 = vadd.f32 %v19504_v21, %v19503_v18 }
 0x6b6   : > { %v6852_v36 = vadd.f32 %v19505_v62, %v6670_v53 }
 0x6c8   : > { %v19522_v37 = vpop.f32.mrb[32].mxu1 }
 0x6c9   : > { %v19523_v6 = vpop.f32.mrb[33].mxu1 }
 0x6ca   : > { %v19524_v51 = vadd.f32 %v19523_v6, %v19522_v37  ;;  %v19525_v22 = vpop.f32.mrb[34].mxu1 }
 0x6cb   : > { %v19526_v48 = vpop.f32.mrb[35].mxu1 }
 0x6cc   : > { %v7081_v43 = vadd.f32 %v19524_v51, %v6849_v28  ;;  %v19527_v55 = vadd.f32 %v19526_v48, %v19525_v22 }
 0x6ce   : > { %v7082_v1 = vadd.f32 %v19527_v55, %v6850_v12 }
 0x6d0   : > { %v19528_v20 = vpop.f32.mrb[36].mxu1 }
 0x6d1   : > { %v19529_v0 = vpop.f32.mrb[37].mxu1 }
 0x6d2   : > { %v19530_v38 = vadd.f32 %v19529_v0, %v19528_v20  ;;  %v19531_v32 = vpop.f32.mrb[38].mxu1 }
 0x6d3   : > { %v19532_v4 = vpop.f32.mrb[39].mxu1 }
 0x6d4   : > { %v7083_v61 = vadd.f32 %v19530_v38, %v6851_v10  ;;  %v19533_v14 = vadd.f32 %v19532_v4, %v19531_v32  ;;  %v25520_v4 = vld [vmem:[#allocation2] sm:$0xf0] }
 0x6d6   : > { %v7084_v19 = vadd.f32 %v19533_v14, %v6852_v36 }
 0x6e8   : > { %v19550_v9 = vpop.f32.mrb[40].mxu1 }
 0x6e9   : > { %v19551_v41 = vpop.f32.mrb[41].mxu1 }
 0x6ea   : > { %v19552_v27 = vadd.f32 %v19551_v41, %v19550_v9  ;;  %v19553_v53 = vpop.f32.mrb[42].mxu1 }
 0x6eb   : > { %v19554_v2 = vpop.f32.mrb[43].mxu1 }
 0x6ec   : > { %v7313_v42 = vadd.f32 %v19552_v27, %v7081_v43  ;;  %v19555_v3 = vadd.f32 %v19554_v2, %v19553_v53  ;;  %v7830_v53 = vrot.slane %v25520_v4, 4 }
 0x6ee   : > { %v7314_v47 = vadd.f32 %v19555_v3, %v7082_v1  ;;  %v21227_v3 = vld [vmem:[%s28861_s5] ss:$8 sps:$4 sm:$0xff]  }
 0x6f0   : > { %v19556_v24 = vpop.f32.mrb[44].mxu1 }
 0x6f1   : > { %v19557_v30 = vpop.f32.mrb[45].mxu1 }
 0x6f2   : > { %v19558_v15 = vadd.f32 %v19557_v30, %v19556_v24  ;;  %v19559_v46 = vpop.f32.mrb[46].mxu1 }
 0x6f3   : > { %v19560_v57 = vpop.f32.mrb[47].mxu1 }
 0x6f4   : > { %v7315_v28 = vadd.f32 %v19558_v15, %v7083_v61  ;;  %v19561_v26 = vadd.f32 %v19560_v57, %v19559_v46  ;;  %v21232_v46 = vld [vmem:[%s28861_s5 + $0x14] ss:$8 sps:$4 sm:$0xff]  }
 0x6f6   : > { %v7316_v12 = vadd.f32 %v19561_v26, %v7084_v19 }
 0x708   : > { %v19578_v60 = vpop.f32.mrb[48].mxu1 }
 0x709   : > { %v19579_v7 = vpop.f32.mrb[49].mxu1 }
 0x70a   : > { %v19580_v16 = vadd.f32 %v19579_v7, %v19578_v60  ;;  %v19581_v18 = vpop.f32.mrb[50].mxu1  ;;  %v8863_v60 = vshrl.u32 %v25506_v56, 16  ;;  %v8866_v7 = vshll.u32 %v25506_v56, 16 }
 0x70b   : > { %v19582_v58 = vpop.f32.mrb[51].mxu1 }
 0x70c   : > { %v7517_v25 = vadd.f32 %v19580_v16, %v7313_v42  ;;  %v19583_v21 = vadd.f32 %v19582_v58, %v19581_v18  ;;  %v21230_v16 = vld [vmem:[%s28861_s5 + $0x10] ss:$8 sps:$4 sm:$0xff]  }
 0x70e   : > { %v7518_v10 = vadd.f32 %v19583_v21, %v7314_v47 }
 0x710   : > { %v19584_v62 = vpop.f32.mrb[52].mxu1 }
 0x711   : > { %v19585_v36 = vpop.f32.mrb[53].mxu1 }
 0x712   : > { %v19586_v49 = vadd.f32 %v19585_v36, %v19584_v62  ;;  %v19587_v34 = vpop.f32.mrb[54].mxu1  ;;  %v8684_v36 = vshll.u32 %v25504_v8, 16 }
 0x713   : > { %v19588_v11 = vpop.f32.mrb[55].mxu1 }
 0x714   : > { %v7519_v59 = vadd.f32 %v19586_v49, %v7315_v28  ;;  %v19589_v44 = vadd.f32 %v19588_v11, %v19587_v34  ;;  %v9214_v49 = vshrl.u32 %v25508_v35, 16  ;;  %v8865_v11 = vrot.slane %v8863_v60, 3 }
 0x716   : > { %v7520_v29 = vadd.f32 %v19589_v44, %v7316_v12  ;;  %v9217_v44 = vshll.u32 %v25508_v35, 16 }
 0x728   : > { %v19606_v5 = vpop.f32.mrb[56].mxu1 }
 0x729   : > { %v19607_v52 = vpop.f32.mrb[57].mxu1 }
 0x72a   : > { %v19608_v45 = vadd.f32 %v19607_v52, %v19606_v5  ;;  %v19609_v33 = vpop.f32.mrb[58].mxu1  ;;  %v21238_v52 = vld [vmem:[%s28861_s5 + $0x34] ss:$8 sps:$4 sm:$0xff]  }
 0x72b   : > { %v19610_v37 = vpop.f32.mrb[59].mxu1 }
 0x72c   : > { %v7747_v6 = vadd.f32 %v19608_v45, %v7517_v25  ;;  %v19611_v51 = vadd.f32 %v19610_v37, %v19609_v33  ;;  %v21235_v25 = vld [vmem:[%s28861_s5 + $0x24] ss:$8 sps:$4 sm:$0xff]   ;;  %v8686_v45 = vrot.slane %v8684_v36, 1  ;;  %v9216_v33 = vrot.slane %v9214_v49, 4 }
 0x72e   : > { %v25514_v22 = vadd.f32 %v17677_v17, %v7747_v6  ;;  %v7748_v48 = vadd.f32 %v19611_v51, %v7518_v10  ;;  %v9219_v51 = vrot.slane %v9217_v44, 5  ;;  %v21248_v44 = vld [vmem:[%s28861_s5 + $0x70] ss:$8 sps:$4 sm:$0xff]  }
 0x730   : > { %v7762_v43 = vmax.f32 %v25514_v22, 0.0  ;;  %v25517_v55 = vadd.f32 %v17677_v17, %v7748_v48  ;;  %v19612_v1 = vpop.f32.mrb[60].mxu1  ;;  %v21236_v48 = vld [vmem:[%s28861_s5 + $0x30] ss:$8 sps:$4 sm:$0xff]   ;;  %v21329_v22 = vld [vmem:[%s28861_s5 + $0x2a0] ss:$8 sps:$4 sm:$0xff]  }
 0x731   : > { %v19613_v20 = vpop.f32.mrb[61].mxu1 }
 0x732   : > { %v7763_v0 = vmax.f32 %v25517_v55, 0.0  ;;  %v19614_v38 = vadd.f32 %v19613_v20, %v19612_v1  ;;  %v19615_v32 = vpop.f32.mrb[62].mxu1  ;;  %v7766_v14 = vsel %vm24797_vm5, %v7762_v43, 0.0  ;;  %v21241_v20 = vld [vmem:[%s28861_s5 + $0x44] ss:$8 sps:$4 sm:$0xff]  }
 0x733   : > { %v19616_v61 = vpop.f32.mrb[63].mxu1 }
 0x734   : > { %v7767_v19 = vsel %vm24807_vm6, %v7763_v0, 0.0  ;;  %v7749_v9 = vadd.f32 %v19614_v38, %v7519_v59  ;;  %v19617_v41 = vadd.f32 %v19616_v61, %v19615_v32  ;;  %v8868_v59 = vrot.slane %v8866_v7, 4  ;;  %v7790_v7 = vld [vmem:[#allocation2] sm:$0xf8] }
 0x735   : > { %v25530_v27 = vpack.c.bf16 %v7767_v19, %v7766_v14 }
 0x736   : > { %v25533_v2 = vadd.f32 %v17677_v17, %v7749_v9  ;;  %v7750_v42 = vadd.f32 %v19617_v41, %v7520_v29  ;;  %v21233_v29 = vld [vmem:[%s28861_s5 + $0x20] ss:$8 sps:$4 sm:$0xff]   ;;  %v8869_v6 = vor.u32 %v8868_v59, %v8865_v11 }
 0x737   : > { %7788 = vst [vmem:[#allocation2 + $0x20] sm:$0xff] %v25530_v27  ;;  %v7831_v47 = vrot.slane %v25530_v27, 4  ;;  %v25541_v24 = vshrl.u32 %v25530_v27, 16  ;;  %v25550_v57 = vshll.u32 %v25530_v27, 16  ;;  %v21247_v27 = vld [vmem:[%s28861_s5 + $0x64] ss:$8 sps:$4 sm:$0xff]  }
 0x738   : > { %v7764_v30 = vmax.f32 %v25533_v2, 0.0  ;;  %v25544_v15 = vadd.f32 %v17677_v17, %v7750_v42  ;;  %v21424_v2 = vld [vmem:[%s28863_s7 + $0x224] ss:$16 sps:$4 sm:$0xff]  }
 0x739   : > { %v7832_v28 = vsel %vm712_vm0, %v7830_v53, %v7831_v47  ;;  %v8336_v12 = vrot.slane %v25541_v24, 7  ;;  %v8673_v10 = vrot.slane %v25550_v57, 1  ;;  %v9220_v53 = vor.u32 %v9219_v51, %v9216_v33 }
 0x73a   : > { %v7765_v26 = vmax.f32 %v25544_v15, 0.0  ;;  %7950 = vmatmul.mubr.bf16.vlgmr.msra.gmra.mrb[64].mxu1 %v7832_v28  ;;  %v7768_v18 = vsel %vm24817_vm7, %v7764_v30, 0.0  ;;  %v7981_v11 = vrot.slane %v25541_v24, 3  ;;  %v7984_v59 = vrot.slane %v25550_v57, 4  ;;  %v21422_v15 = vld [vmem:[%s28863_s7 + $0x220] ss:$16 sps:$4 sm:$0xff]  }
 0x73b   : > { %8079 = vmatpush1.bf16.msra.mxu1 %v21227_v3  ;;  %7959 = vmatprep.mubr.bf16.mxu1 %v25450_v13  ;;  %v25577_v21 = vor.u32 %v8336_v12, %v25550_v57  ;;  %v25585_v34 = vor.u32 %v8673_v10, %v25541_v24  ;;  %v21239_v3 = vld [vmem:[%s28861_s5 + $0x40] ss:$8 sps:$4 sm:$0xff]   ;;  %v21250_v10 = vld [vmem:[%s28861_s5 + $0x74] ss:$8 sps:$4 sm:$0xff]  }
 0x73c   : > { %v7769_v58 = vsel %vm24831_vm8, %v7765_v26, 0.0  ;;  %8080 = vmatprep.subr.bf16.mxu1 %v21232_v46  ;;  %v21244_v46 = vld [vmem:[%s28861_s5 + $0x54] ss:$8 sps:$4 sm:$0xff]   ;;  %v22463_v55 = vpack.c.bf16 %v7765_v26, %v7764_v30  ;;  %v21337_v30 = vld [vmem:[%s28861_s5 + $0x2c4] ss:$8 sps:$4 sm:$0xff]  }
 0x73d   : > { %v25580_v62 = vpack.c.bf16 %v7769_v58, %v7768_v18  ;;  %v21242_v18 = vld [vmem:[%s28861_s5 + $0x50] ss:$8 sps:$4 sm:$0xff]   ;;  %v7971_v58 = vshrl.u32 %v7790_v7, 16  ;;  %v21430_v26 = vld [vmem:[%s28863_s7 + $0x244] ss:$16 sps:$4 sm:$0xff]  }
 0x73f   : > { %7789 = vst [vmem:[#allocation2 + $0x40] sm:$0xff] %v25580_v62  ;;  %8081 = vmatpush1.bf16.msra.mxu1 %v21230_v16  ;;  %v25593_v5 = vshrl.u32 %v25580_v62, 16  ;;  %v25596_v8 = vshll.u32 %v25580_v62, 16  ;;  %v7973_v36 = vrot.slane %v7971_v58, 3  ;;  %v8150_v58 = vshrl.u32 %v25520_v4, 16 }
 0x740   : > { %8082 = vmatprep.subr.bf16.mxu1 %v21235_v25  ;;  %v21245_v25 = vld [vmem:[%s28861_s5 + $0x60] ss:$8 sps:$4 sm:$0xff]  }
 0x741   : > { %v8678_v35 = vrot.slane %v25596_v8, 1  ;;  %v8858_v17 = vrot.slane %v25593_v5, 3  ;;  %v8859_v37 = vrot.slane %v25596_v8, 4  ;;  %v9209_v32 = vrot.slane %v25593_v5, 4 }
 0x742   : > { %v9210_v14 = vrot.slane %v25596_v8, 5 }
 0x743   : > { %8083 = vmatpush1.bf16.msra.mxu1 %v21233_v29  ;;  %v8682_v1 = vor.u32 %v8678_v35, %v25593_v5  ;;  %v25613_v38 = vor.u32 %v8859_v37, %v8858_v17  ;;  %v21253_v29 = vld [vmem:[%s28861_s5 + $0x104] ss:$8 sps:$4 sm:$0xff]   ;;  %v21251_v37 = vld [vmem:[%s28861_s5 + $0x100] ss:$8 sps:$4 sm:$0xff]  }
 0x744   : > { %8084 = vmatprep.subr.bf16.mxu1 %v21238_v52  ;;  %v25633_v28 = vor.u32 %v9210_v14, %v9209_v32  ;;  %v21259_v32 = vld [vmem:[%s28861_s5 + $0x124] ss:$8 sps:$4 sm:$0xff]  }
 0x745   : > { %v25617_v61 = vsel %vm3454_vm4, %v8682_v1, %v8686_v45  ;;  %v25624_v41 = vsel %vm1167_vm1, %v25613_v38, %v8869_v6  ;;  %v7985_v45 = vor.u32 %v7984_v59, %v7981_v11  ;;  %v21256_v6 = vld [vmem:[%s28861_s5 + $0x114] ss:$8 sps:$4 sm:$0xff]   ;;  %v8157_v11 = vrot.slane %v25541_v24, 4  ;;  %v21311_v24 = vld [vmem:[%s28861_s5 + $0x240] ss:$8 sps:$4 sm:$0xff]  }
 0x746   : > { %v7792_v19 = vld [vmem:[#allocation2 + $0x40] sm:$0xf]  ;;  %v25640_v16 = vsel %vm1775_vm2, %v25633_v28, %v9220_v53  ;;  %v21262_v53 = vld [vmem:[%s28861_s5 + $0x134] ss:$8 sps:$4 sm:$0xff]   ;;  %v8158_v59 = vrot.slane %v25550_v57, 5 }
 0x747   : > { %v25620_v9 = vld [vmem:[#allocation2 + $0x40] sm:$0x1f]  ;;  %v7833_v42 = vrot.slane %v7792_v19, 4  ;;  %8085 = vmatpush1.bf16.msra.mxu1 %v21236_v48  ;;  %v7988_v33 = vshrl.u32 %v7792_v19, 16  ;;  %v7991_v17 = vshll.u32 %v7792_v19, 16 }
 0x748   : > { %14381 = vst [vmem:[#allocation2 + $0x40] sm:$0xff] %v25450_v13  ;;  %8086 = vmatprep.subr.bf16.mxu1 %v21241_v20  ;;  %v21254_v20 = vld [vmem:[%s28861_s5 + $0x110] ss:$8 sps:$4 sm:$0xff]   ;;  %v21257_v19 = vld [vmem:[%s28861_s5 + $0x120] ss:$8 sps:$4 sm:$0xff]  }
 0x749   : > { %v7834_v60 = vsel %vm712_vm0, %v7831_v47, %v7833_v42  ;;  %v7974_v47 = vshll.u32 %v7790_v7, 16  ;;  %v7990_v48 = vrot.slane %v7988_v33, 3  ;;  %v7993_v1 = vrot.slane %v7991_v17, 4  ;;  %v21268_v7 = vld [vmem:[%s28861_s5 + $0x154] ss:$8 sps:$4 sm:$0xff]  }
 0x74a   : > { %7960 = vmatmul.mubr.bf16.gmra.mrb[68].mxu1 %v7834_v60  ;;  %v21263_v60 = vld [vmem:[%s28861_s5 + $0x140] ss:$8 sps:$4 sm:$0xff]   ;;  %v8165_v33 = vshll.u32 %v25620_v9, 16  ;;  %v21280_v17 = vld [vmem:[%s28861_s5 + $0x194] ss:$8 sps:$4 sm:$0xff]  }
 0x74b   : > { %8087 = vmatpush1.bf16.msra.mxu1 %v21239_v3  ;;  %8110 = vmatprep.mubr.bf16.mxu1 %v25450_v13  ;;  %v7976_v49 = vrot.slane %v7974_v47, 4  ;;  %v7994_v14 = vor.u32 %v7993_v1, %v7990_v48  ;;  %v21260_v3 = vld [vmem:[%s28861_s5 + $0x130] ss:$8 sps:$4 sm:$0xff]   ;;  %v8153_v47 = vshll.u32 %v25520_v4, 16  ;;  %v21275_v57 = vld [vmem:[%s28861_s5 + $0x180] ss:$8 sps:$4 sm:$0xff]  }
 0x74c   : > { %8088 = vmatprep.subr.bf16.mxu1 %v21244_v46  ;;  %v21265_v46 = vld [vmem:[%s28861_s5 + $0x144] ss:$8 sps:$4 sm:$0xff]   ;;  %v21272_v4 = vld [vmem:[%s28861_s5 + $0x170] ss:$8 sps:$4 sm:$0xff]  }
 0x74d   : > { %v7977_v52 = vor.u32 %v7976_v49, %v7973_v36  ;;  %v7995_v42 = vsel %vm1167_vm1, %v7985_v45, %v7994_v14  ;;  %v8152_v36 = vrot.slane %v8150_v58, 4  ;;  %v8155_v49 = vrot.slane %v8153_v47, 5  ;;  %v21283_v48 = vld [vmem:[%s28861_s5 + $0x1a4] ss:$8 sps:$4 sm:$0xff]   ;;  %v21296_v47 = vld [vmem:[%s28861_s5 + $0x1f0] ss:$8 sps:$4 sm:$0xff]  }
 0x74f   : > { %8089 = vmatpush1.bf16.msra.mxu1 %v21242_v18  ;;  %v7986_v51 = vsel %vm1167_vm1, %v7977_v52, %v7985_v45  ;;  %v21266_v18 = vld [vmem:[%s28861_s5 + $0x150] ss:$8 sps:$4 sm:$0xff]   ;;  %v8159_v52 = vor.u32 %v8158_v59, %v8157_v11  ;;  %v8162_v45 = vshrl.u32 %v25620_v9, 16  ;;  %v8342_v59 = vrot.slane %v25593_v5, 7  ;;  %v21310_v5 = vld [vmem:[%s28861_s5 + $0x234] ss:$8 sps:$4 sm:$0xff]  }
 0x750   : > { %8090 = vmatprep.subr.bf16.mxu1 %v21247_v27  ;;  %v21271_v27 = vld [vmem:[%s28861_s5 + $0x164] ss:$8 sps:$4 sm:$0xff]   ;;  %v21278_v9 = vld [vmem:[%s28861_s5 + $0x190] ss:$8 sps:$4 sm:$0xff]  }
 0x753   : > { %8091 = vmatpush1.bf16.msra.mxu1 %v21245_v25  ;;  %v21269_v25 = vld [vmem:[%s28861_s5 + $0x160] ss:$8 sps:$4 sm:$0xff]  }
 0x754   : > { %8092 = vmatprep.subr.bf16.mxu1 %v21250_v10  ;;  %v21274_v10 = vld [vmem:[%s28861_s5 + $0x174] ss:$8 sps:$4 sm:$0xff]  }
 0x757   : > { %8093 = vmatpush1.bf16.msra.mxu1 %v21248_v44  ;;  %v21277_v44 = vld [vmem:[%s28861_s5 + $0x184] ss:$8 sps:$4 sm:$0xff]  }
 0x758   : > { %8252 = vmatprep.subr.bf16.mxu1 %v21253_v29  ;;  %v8156_v29 = vor.u32 %v8155_v49, %v8152_v36  ;;  %v21299_v36 = vld [vmem:[%s28861_s5 + $0x200] ss:$8 sps:$4 sm:$0xff]   ;;  %v21304_v49 = vld [vmem:[%s28861_s5 + $0x214] ss:$8 sps:$4 sm:$0xff]  }
 0x75a   : > { %8111 = vmatmul.mubr.bf16.vlgmr.msra.gmra.mrb[64].mxu1 %v7986_v51  ;;  %v8167_v51 = vrot.slane %v8165_v33, 5  ;;  %v21313_v33 = vld [vmem:[%s28861_s5 + $0x244] ss:$8 sps:$4 sm:$0xff]  }
 0x75b   : > { %8253 = vmatpush1.bf16.msra.mxu1 %v21251_v37  ;;  %8120 = vmatprep.mubr.bf16.mxu1 %v25450_v13  ;;  %v8160_v37 = vsel %vm1775_vm2, %v8156_v29, %v8159_v52  ;;  %v8345_v29 = vor.u32 %v25596_v8, %v8342_v59  ;;  %v21446_v59 = vld [vmem:[%s28863_s7 + $0x2a0] ss:$16 sps:$4 sm:$0xff]  }
 0x75c   : > { %8254 = vmatprep.subr.bf16.mxu1 %v21256_v6  ;;  %v8164_v6 = vrot.slane %v8162_v45, 4  ;;  %v21308_v45 = vld [vmem:[%s28861_s5 + $0x230] ss:$8 sps:$4 sm:$0xff]  }
 0x75d   : > { %v21458_v8 = vld [vmem:[%s28863_s7 + $0x2e0] ss:$16 sps:$4 sm:$0xff]  }
 0x75e   : > { %v8168_v1 = vor.u32 %v8167_v51, %v8164_v6  ;;  %v21322_v6 = vld [vmem:[%s28861_s5 + $0x274] ss:$8 sps:$4 sm:$0xff]   ;;  %v21320_v51 = vld [vmem:[%s28861_s5 + $0x270] ss:$8 sps:$4 sm:$0xff]  }
 0x75f   : > { %8255 = vmatpush1.bf16.msra.mxu1 %v21254_v20  ;;  %v21281_v20 = vld [vmem:[%s28861_s5 + $0x1a0] ss:$8 sps:$4 sm:$0xff]  }
 0x760   : > { %8256 = vmatprep.subr.bf16.mxu1 %v21259_v32  ;;  %v21286_v32 = vld [vmem:[%s28861_s5 + $0x1b4] ss:$8 sps:$4 sm:$0xff]   ;;  %v8169_v14 = vsel %vm1775_vm2, %v8159_v52, %v8168_v1  ;;  %v8346_v52 = vsel %vm2375_vm3, %v8336_v12, %v8345_v29 }
 0x761   : > { %v21316_v12 = vld [vmem:[%s28861_s5 + $0x254] ss:$8 sps:$4 sm:$0xff]  }
 0x762   : > { %8121 = vmatmul.mubr.bf16.gmra.mrb[68].mxu1 %v7995_v42  ;;  %v21287_v42 = vld [vmem:[%s28861_s5 + $0x1c0] ss:$8 sps:$4 sm:$0xff]   ;;  %v21328_v1 = vld [vmem:[%s28861_s5 + $0x294] ss:$8 sps:$4 sm:$0xff]  }
 0x763   : > { %8257 = vmatpush1.bf16.msra.mxu1 %v21257_v19  ;;  %8284 = vmatprep.mubr.bf16.mxu1 %v25450_v13  ;;  %v21284_v19 = vld [vmem:[%s28861_s5 + $0x1b0] ss:$8 sps:$4 sm:$0xff]   ;;  %v21352_v29 = vld [vmem:[%s28861_s5 + $0x314] ss:$8 sps:$4 sm:$0xff]  }
 0x764   : > { %8258 = vmatprep.subr.bf16.mxu1 %v21262_v53  ;;  %v21289_v53 = vld [vmem:[%s28861_s5 + $0x1c4] ss:$8 sps:$4 sm:$0xff]  }
 0x767   : > { %8259 = vmatpush1.bf16.msra.mxu1 %v21260_v3  ;;  %v21292_v3 = vld [vmem:[%s28861_s5 + $0x1d4] ss:$8 sps:$4 sm:$0xff]  }
 0x768   : > { %8260 = vmatprep.subr.bf16.mxu1 %v21265_v46  ;;  %v21290_v46 = vld [vmem:[%s28861_s5 + $0x1d0] ss:$8 sps:$4 sm:$0xff]  }
 0x76b   : > { %8261 = vmatpush1.bf16.msra.mxu1 %v21263_v60  ;;  %v21295_v60 = vld [vmem:[%s28861_s5 + $0x1e4] ss:$8 sps:$4 sm:$0xff]  }
 0x76c   : > { %8262 = vmatprep.subr.bf16.mxu1 %v21268_v7  ;;  %v8313_v7 = vld [vmem:[#allocation2] sm:$0x80] }
 0x76d   : > { %v8333_v58 = vshrl.u32 %v8313_v7, 16  ;;  %v21338_v7 = vld [vmem:[%s28861_s5 + $0x2d0] ss:$8 sps:$4 sm:$0xff]  }
 0x76f   : > { %8263 = vmatpush1.bf16.msra.mxu1 %v21266_v18  ;;  %v21293_v18 = vld [vmem:[%s28861_s5 + $0x1e0] ss:$8 sps:$4 sm:$0xff]  }
 0x770   : > { %8264 = vmatprep.subr.bf16.mxu1 %v21271_v27  ;;  %v21298_v27 = vld [vmem:[%s28861_s5 + $0x1f4] ss:$8 sps:$4 sm:$0xff]  }
 0x773   : > { %8265 = vmatpush1.bf16.msra.mxu1 %v21269_v25  ;;  %v21301_v25 = vld [vmem:[%s28861_s5 + $0x204] ss:$8 sps:$4 sm:$0xff]  }
 0x774   : > { %8266 = vmatprep.subr.bf16.mxu1 %v21274_v10  ;;  %v8335_v10 = vrot.slane %v8333_v58, 7  ;;  %v21442_v58 = vld [vmem:[%s28863_s7 + $0x284] ss:$16 sps:$4 sm:$0xff]  }
 0x776   : > { %v8338_v11 = vsel %vm2375_vm3, %v8335_v10, %v25577_v21  ;;  %v21305_v21 = vld [vmem:[%s28861_s5 + $0x220] ss:$8 sps:$4 sm:$0xff]  }
 0x777   : > { %8267 = vmatpush1.bf16.msra.mxu1 %v21272_v4  ;;  %v21302_v4 = vld [vmem:[%s28861_s5 + $0x210] ss:$8 sps:$4 sm:$0xff]  }
 0x778   : > { %8429 = vmatprep.subr.bf16.mxu1 %v21277_v44  ;;  %v21307_v44 = vld [vmem:[%s28861_s5 + $0x224] ss:$8 sps:$4 sm:$0xff]   ;;  %v21440_v10 = vld [vmem:[%s28863_s7 + $0x280] ss:$16 sps:$4 sm:$0xff]  }
 0x77a   : > { %8285 = vmatmul.mubr.bf16.vlgmr.msra.gmra.mrb[64].mxu1 %v8160_v37  ;;  %v21317_v37 = vld [vmem:[%s28861_s5 + $0x260] ss:$8 sps:$4 sm:$0xff]  }
 0x77b   : > { %8430 = vmatpush1.bf16.msra.mxu1 %v21275_v57  ;;  %8294 = vmatprep.mubr.bf16.mxu1 %v25450_v13  ;;  %v21314_v57 = vld [vmem:[%s28861_s5 + $0x250] ss:$8 sps:$4 sm:$0xff]  }
 0x77c   : > { %8431 = vmatprep.subr.bf16.mxu1 %v21280_v17  ;;  %v21319_v17 = vld [vmem:[%s28861_s5 + $0x264] ss:$8 sps:$4 sm:$0xff]  }
 0x77f   : > { %8432 = vmatpush1.bf16.msra.mxu1 %v21278_v9  ;;  %v21325_v9 = vld [vmem:[%s28861_s5 + $0x284] ss:$8 sps:$4 sm:$0xff]  }
 0x780   : > { %8433 = vmatprep.subr.bf16.mxu1 %v21283_v48  ;;  %v21323_v48 = vld [vmem:[%s28861_s5 + $0x280] ss:$8 sps:$4 sm:$0xff]  }
 0x782   : > { %8295 = vmatmul.mubr.bf16.gmra.mrb[68].mxu1 %v8169_v14  ;;  %v21331_v14 = vld [vmem:[%s28861_s5 + $0x2a4] ss:$8 sps:$4 sm:$0xff]  }
 0x783   : > { %8434 = vmatpush1.bf16.msra.mxu1 %v21281_v20  ;;  %8461 = vmatprep.mubr.bf16.mxu1 %v25450_v13  ;;  %v22460_v20 = vpack.c.bf16 %v7763_v0, %v7762_v43  ;;  %v21334_v43 = vld [vmem:[%s28861_s5 + $0x2b4] ss:$8 sps:$4 sm:$0xff]   ;;  %v21419_v0 = vld [vmem:[%s28863_s7 + $0x200] ss:$16 sps:$4 sm:$0xff]  }
 0x784   : > { %8435 = vmatprep.subr.bf16.mxu1 %v21286_v32  ;;  %v21326_v32 = vld [vmem:[%s28861_s5 + $0x290] ss:$8 sps:$4 sm:$0xff]  }
 0x787   : > { %8436 = vmatpush1.bf16.msra.mxu1 %v21284_v19  ;;  %v21421_v19 = vld [vmem:[%s28863_s7 + $0x204] ss:$16 sps:$4 sm:$0xff]  }
 0x788   : > { %8437 = vmatprep.subr.bf16.mxu1 %v21289_v53  ;;  %v21332_v53 = vld [vmem:[%s28861_s5 + $0x2b0] ss:$8 sps:$4 sm:$0xff]   ;;  %9902 = vmatprep.subr.bf16.mxu0 %v21421_v19 }
 0x789   : > { %9903 = vmatpush1.bf16.msra.mxu0 %v21419_v0  ;;  %v21368_v19 = vld [vmem:[%s28861_s5 + $0x370] ss:$8 sps:$4 sm:$0xff]  }
 0x78a   : > { %9904 = vmatprep.subr.bf16.mxu0 %v21424_v2 }
 0x78b   : > { %8438 = vmatpush1.bf16.msra.mxu1 %v21287_v42  ;;  %v21335_v42 = vld [vmem:[%s28861_s5 + $0x2c0] ss:$8 sps:$4 sm:$0xff]  }
 0x78c   : > { %8439 = vmatprep.subr.bf16.mxu1 %v21292_v3  ;;  %v21340_v3 = vld [vmem:[%s28861_s5 + $0x2d4] ss:$8 sps:$4 sm:$0xff]  }
 0x78d   : > { %9905 = vmatpush1.bf16.msra.mxu0 %v21422_v15  ;;  %v21376_v15 = vld [vmem:[%s28861_s5 + $0x394] ss:$8 sps:$4 sm:$0xff]  }
 0x78e   : > { %9906 = vmatprep.subr.bf16.mxu0 %v21430_v26 }
 0x78f   : > { %8440 = vmatpush1.bf16.msra.mxu1 %v21290_v46  ;;  %v21428_v46 = vld [vmem:[%s28863_s7 + $0x240] ss:$16 sps:$4 sm:$0xff]  }
 0x790   : > { %8441 = vmatprep.subr.bf16.mxu1 %v21295_v60  ;;  %v21436_v60 = vld [vmem:[%s28863_s7 + $0x264] ss:$16 sps:$4 sm:$0xff]  }
 0x791   : > { %9907 = vmatpush1.bf16.msra.mxu0 %v21428_v46  ;;  %v21379_v46 = vld [vmem:[%s28861_s5 + $0x3a4] ss:$8 sps:$4 sm:$0xff]  }
 0x792   : > { %9908 = vmatprep.subr.bf16.mxu0 %v21436_v60  ;;  %v21382_v60 = vld [vmem:[%s28861_s5 + $0x3b4] ss:$8 sps:$4 sm:$0xff]  }
 0x793   : > { %8442 = vmatpush1.bf16.msra.mxu1 %v21293_v18  ;;  %v21343_v18 = vld [vmem:[%s28861_s5 + $0x2e4] ss:$8 sps:$4 sm:$0xff]  }
 0x794   : > { %8443 = vmatprep.subr.bf16.mxu1 %v21298_v27  ;;  %v21434_v27 = vld [vmem:[%s28863_s7 + $0x260] ss:$16 sps:$4 sm:$0xff]  }
 0x795   : > { %9909 = vmatpush1.bf16.msra.mxu0 %v21434_v27  ;;  %v21383_v27 = vld [vmem:[%s28861_s5 + $0x3c0] ss:$8 sps:$4 sm:$0xff]  }
 0x796   : > { %9910 = vmatprep.subr.bf16.mxu0 %v21442_v58  ;;  %v21386_v58 = vld [vmem:[%s28861_s5 + $0x3d0] ss:$8 sps:$4 sm:$0xff]  }
 0x797   : > { %8444 = vmatpush1.bf16.msra.mxu1 %v21296_v47  ;;  %v21341_v47 = vld [vmem:[%s28861_s5 + $0x2e0] ss:$8 sps:$4 sm:$0xff]  }
 0x798   : > { %8587 = vmatprep.subr.bf16.mxu1 %v21301_v25  ;;  %v21346_v25 = vld [vmem:[%s28861_s5 + $0x2f4] ss:$8 sps:$4 sm:$0xff]  }
 0x799   : > { %9911 = vmatpush1.bf16.msra.mxu0 %v21440_v10  ;;  %v21394_v10 = vld [vmem:[%s28861_s5 + $0x3f4] ss:$8 sps:$4 sm:$0xff]  }
 0x79a   : > { %8462 = vmatmul.mubr.bf16.vlgmr.msra.gmra.mrb[64].mxu1 %v8338_v11  ;;  %v21349_v11 = vld [vmem:[%s28861_s5 + $0x304] ss:$8 sps:$4 sm:$0xff]  }
 0x79b   : > { %8588 = vmatpush1.bf16.msra.mxu1 %v21299_v36  ;;  %8471 = vmatprep.mubr.bf16.mxu1 %v25450_v13  ;;  %v21448_v36 = vld [vmem:[%s28863_s7 + $0x2a4] ss:$16 sps:$4 sm:$0xff]  }
 0x79c   : > { %8589 = vmatprep.subr.bf16.mxu1 %v21304_v49  ;;  %v21344_v49 = vld [vmem:[%s28861_s5 + $0x2f0] ss:$8 sps:$4 sm:$0xff]   ;;  %9912 = vmatprep.subr.bf16.mxu0 %v21448_v36  ;;  %v9014_v36 = vld [vmem:[#allocation2 + $0x20] sm:$0xf0] }
 0x79d   : > { %9913 = vmatpush1.bf16.msra.mxu0 %v21446_v59  ;;  %v9035_v59 = vrot.slane %v9014_v36, 4 }
 0x79f   : > { %8590 = vmatpush1.bf16.msra.mxu1 %v21302_v4  ;;  %v21454_v4 = vld [vmem:[%s28863_s7 + $0x2c4] ss:$16 sps:$4 sm:$0xff]  }
 0x7a0   : > { %8591 = vmatprep.subr.bf16.mxu1 %v21307_v44  ;;  %v21347_v44 = vld [vmem:[%s28861_s5 + $0x300] ss:$8 sps:$4 sm:$0xff]   ;;  %9914 = vmatprep.subr.bf16.mxu0 %v21454_v4  ;;  %v9036_v4 = vrot.slane %v25580_v62, 4  ;;  %v21403_v62 = vld [vmem:[%s28861_s5 + $0x424] ss:$8 sps:$4 sm:$0xff]  }
 0x7a2   : > { %8472 = vmatmul.mubr.bf16.gmra.mrb[68].mxu1 %v8346_v52  ;;  %v21460_v52 = vld [vmem:[%s28863_s7 + $0x2e4] ss:$16 sps:$4 sm:$0xff]  }
 0x7a3   : > { %8592 = vmatpush1.bf16.msra.mxu1 %v21305_v21  ;;  %8619 = vmatprep.mubr.bf16.mxu1 %v25450_v13  ;;  %v8679_v21 = vsel %vm3454_vm4, %v25585_v34, %v8678_v35  ;;  %v21355_v34 = vld [vmem:[%s28861_s5 + $0x324] ss:$8 sps:$4 sm:$0xff]  }
 0x7a4   : > { %8593 = vmatprep.subr.bf16.mxu1 %v21310_v5  ;;  %v21452_v5 = vld [vmem:[%s28863_s7 + $0x2c0] ss:$16 sps:$4 sm:$0xff]   ;;  %v21466_v35 = vld [vmem:[%s28863_s7 + $0x304] ss:$16 sps:$4 sm:$0xff]  }
 0x7a5   : > { %9915 = vmatpush1.bf16.msra.mxu0 %v21452_v5  ;;  %v21398_v5 = vld [vmem:[%s28861_s5 + $0x410] ss:$8 sps:$4 sm:$0xff]  }
 0x7a6   : > { %9916 = vmatprep.subr.bf16.mxu0 %v21460_v52  ;;  %v9038_v52 = vrot.slane %v25506_v56, 4  ;;  %v21409_v56 = vld [vmem:[%s28861_s5 + $0x444] ss:$8 sps:$4 sm:$0xff]  }
 0x7a7   : > { %8594 = vmatpush1.bf16.msra.mxu1 %v21308_v45  ;;  %v21350_v45 = vld [vmem:[%s28861_s5 + $0x310] ss:$8 sps:$4 sm:$0xff]  }
 0x7a8   : > { %8595 = vmatprep.subr.bf16.mxu1 %v21313_v33  ;;  %v21353_v33 = vld [vmem:[%s28861_s5 + $0x320] ss:$8 sps:$4 sm:$0xff]  }
 0x7a9   : > { %9917 = vmatpush1.bf16.msra.mxu0 %v21458_v8  ;;  %v9039_v8 = vsel %vm712_vm0, %v9036_v4, %v9038_v52  ;;  %v21506_v52 = vld [vmem:[%s28863_s7 + $0x3e0] ss:$16 sps:$4 sm:$0xff]  }
 0x7aa   : > { %9918 = vmatprep.subr.bf16.mxu0 %v21466_v35  ;;  %v21404_v35 = vld [vmem:[%s28861_s5 + $0x430] ss:$8 sps:$4 sm:$0xff]  }
 0x7ab   : > { %8596 = vmatpush1.bf16.msra.mxu1 %v21311_v24  ;;  %v21358_v24 = vld [vmem:[%s28861_s5 + $0x334] ss:$8 sps:$4 sm:$0xff]  }
 0x7ac   : > { %8597 = vmatprep.subr.bf16.mxu1 %v21316_v12  ;;  %v21464_v12 = vld [vmem:[%s28863_s7 + $0x300] ss:$16 sps:$4 sm:$0xff]  }
 0x7ad   : > { %9919 = vmatpush1.bf16.msra.mxu0 %v21464_v12  ;;  %v21410_v12 = vld [vmem:[%s28861_s5 + $0x450] ss:$8 sps:$4 sm:$0xff]  }
 0x7af   : > { %8598 = vmatpush1.bf16.msra.mxu1 %v21314_v57  ;;  %v21472_v57 = vld [vmem:[%s28863_s7 + $0x324] ss:$16 sps:$4 sm:$0xff]  }
 0x7b0   : > { %8599 = vmatprep.subr.bf16.mxu1 %v21319_v17  ;;  %v21356_v17 = vld [vmem:[%s28861_s5 + $0x330] ss:$8 sps:$4 sm:$0xff]   ;;  %9920 = vmatprep.subr.bf16.mxu0 %v21472_v57  ;;  %v21415_v57 = vld [vmem:[%s28861_s5 + $0x464] ss:$8 sps:$4 sm:$0xff]  }
 0x7b3   : > { %8600 = vmatpush1.bf16.msra.mxu1 %v21317_v37  ;;  %v21361_v37 = vld [vmem:[%s28861_s5 + $0x344] ss:$8 sps:$4 sm:$0xff]  }
 0x7b4   : > { %8601 = vmatprep.subr.bf16.mxu1 %v21322_v6  ;;  %v21478_v6 = vld [vmem:[%s28863_s7 + $0x344] ss:$16 sps:$4 sm:$0xff]  }
 0x7b7   : > { %8602 = vmatpush1.bf16.msra.mxu1 %v21320_v51  ;;  %v21364_v51 = vld [vmem:[%s28861_s5 + $0x354] ss:$8 sps:$4 sm:$0xff]  }
 0x7b8   : > { %8770 = vmatprep.subr.bf16.mxu1 %v21325_v9  ;;  %v21476_v9 = vld [vmem:[%s28863_s7 + $0x340] ss:$16 sps:$4 sm:$0xff]  }
 0x7ba   : > { %22461 = vmatmul.mubr.msk.bf16.vlgmr.msra.gmra.mrb[64].mxu1 %vm25161_vm9, %v22460_v20  ;;  %v21367_v20 = vld [vmem:[%s28861_s5 + $0x364] ss:$8 sps:$4 sm:$0xff]  }
 0x7bb   : > { %8771 = vmatpush1.bf16.msra.mxu1 %v21323_v48  ;;  %8629 = vmatprep.mubr.bf16.mxu1 %v25450_v13  ;;  %v8831_v48 = vld [vmem:[#allocation2 + $0x20] sm:$0xf8] }
 0x7bc   : > { %8772 = vmatprep.subr.bf16.mxu1 %v21328_v1  ;;  %v21362_v1 = vld [vmem:[%s28861_s5 + $0x350] ss:$8 sps:$4 sm:$0xff]  }
 0x7bf   : > { %8773 = vmatpush1.bf16.msra.mxu1 %v21326_v32  ;;  %v8851_v32 = vshrl.u32 %v8831_v48, 16 }
 0x7c0   : > { %8774 = vmatprep.subr.bf16.mxu1 %v21331_v14  ;;  %v8854_v14 = vshll.u32 %v8831_v48, 16  ;;  %v21427_v48 = vld [vmem:[%s28863_s7 + $0x4] ss:$16 sps:$4 sm:$0xff]  }
 0x7c2   : > { %22464 = vmatmul.mubr.msk.bf16.gmra.mrb[68].mxu1 %vm25217_vm10, %v22463_v55  ;;  %v8853_v55 = vrot.slane %v8851_v32, 3  ;;  %v8856_v0 = vrot.slane %v8854_v14, 4  ;;  %v21433_v32 = vld [vmem:[%s28863_s7 + $0x24] ss:$16 sps:$4 sm:$0xff]  }
 0x7c3   : > { %8775 = vmatpush1.bf16.msra.mxu1 %v21329_v22  ;;  %8802 = vmatprep.mubr.bf16.mxu1 %v25450_v13  ;;  %v21365_v22 = vld [vmem:[%s28861_s5 + $0x360] ss:$8 sps:$4 sm:$0xff]  }
 0x7c4   : > { %8776 = vmatprep.subr.bf16.mxu1 %v21334_v43  ;;  %v21370_v43 = vld [vmem:[%s28861_s5 + $0x374] ss:$8 sps:$4 sm:$0xff]   ;;  %v8857_v2 = vor.u32 %v8856_v0, %v8853_v55  ;;  %v21437_v55 = vld [vmem:[%s28863_s7 + $0x40] ss:$16 sps:$4 sm:$0xff]  }
 0x7c5   : > { %v21443_v0 = vld [vmem:[%s28863_s7 + $0x60] ss:$16 sps:$4 sm:$0xff]  }
 0x7c6   : > { %v8861_v26 = vsel %vm1167_vm1, %v8857_v2, %v25613_v38  ;;  %v21377_v38 = vld [vmem:[%s28861_s5 + $0x3a0] ss:$8 sps:$4 sm:$0xff]  }
 0x7c7   : > { %8777 = vmatpush1.bf16.msra.mxu1 %v21332_v53  ;;  %v21373_v53 = vld [vmem:[%s28861_s5 + $0x384] ss:$8 sps:$4 sm:$0xff]   ;;  %v21455_v2 = vld [vmem:[%s28863_s7 + $0xa0] ss:$16 sps:$4 sm:$0xff]  }
 0x7c8   : > { %8778 = vmatprep.subr.bf16.mxu1 %v21337_v30  ;;  %v21371_v30 = vld [vmem:[%s28861_s5 + $0x380] ss:$8 sps:$4 sm:$0xff]  }
 0x7cb   : > { %8779 = vmatpush1.bf16.msra.mxu1 %v21335_v42  ;;  %v21374_v42 = vld [vmem:[%s28861_s5 + $0x390] ss:$8 sps:$4 sm:$0xff]  }
 0x7cc   : > { %8780 = vmatprep.subr.bf16.mxu1 %v21340_v3  ;;  %v26024_v3 = vld [vmem:[#allocation2 + $0x8] sm:$0xff] }
 0x7cf   : > { %8781 = vmatpush1.bf16.msra.mxu1 %v21338_v7  ;;  %v21380_v7 = vld [vmem:[%s28861_s5 + $0x3b0] ss:$8 sps:$4 sm:$0xff]  }
 0x7d0   : > { %8782 = vmatprep.subr.bf16.mxu1 %v21343_v18  ;;  %v21385_v18 = vld [vmem:[%s28861_s5 + $0x3c4] ss:$8 sps:$4 sm:$0xff]  }
 0x7d3   : > { %8783 = vmatpush1.bf16.msra.mxu1 %v21341_v47  ;;  %v21391_v47 = vld [vmem:[%s28861_s5 + $0x3e4] ss:$8 sps:$4 sm:$0xff]  }
 0x7d4   : > { %8784 = vmatprep.subr.bf16.mxu1 %v21346_v25  ;;  %v21389_v25 = vld [vmem:[%s28861_s5 + $0x3e0] ss:$8 sps:$4 sm:$0xff]  }
 0x7d7   : > { %8785 = vmatpush1.bf16.msra.mxu1 %v21344_v49  ;;  %v21392_v49 = vld [vmem:[%s28861_s5 + $0x3f0] ss:$8 sps:$4 sm:$0xff]  }
 0x7d8   : > { %8953 = vmatprep.subr.bf16.mxu1 %v21349_v11  ;;  %v21397_v11 = vld [vmem:[%s28861_s5 + $0x404] ss:$8 sps:$4 sm:$0xff]  }
 0x7da   : > { %8803 = vmatmul.mubr.bf16.vlgmr.msra.gmra.mrb[64].mxu1 %v8679_v21  ;;  %v9037_v21 = vsel %vm712_vm0, %v9035_v59, %v9036_v4  ;;  %v21499_v59 = vld [vmem:[%s28863_s7 + $0x184] ss:$16 sps:$4 sm:$0xff]  }
 0x7db   : > { %8954 = vmatpush1.bf16.msra.mxu1 %v21347_v44  ;;  %8812 = vmatprep.mubr.bf16.mxu1 %v25450_v13  ;;  %v21395_v44 = vld [vmem:[%s28861_s5 + $0x400] ss:$8 sps:$4 sm:$0xff]   ;;  %v21502_v4 = vld [vmem:[%s28863_s7 + $0x3c4] ss:$16 sps:$4 sm:$0xff]  }
 0x7dc   : > { %8955 = vmatprep.subr.bf16.mxu1 %v21352_v29  ;;  %v21400_v29 = vld [vmem:[%s28861_s5 + $0x414] ss:$8 sps:$4 sm:$0xff]  }
 0x7df   : > { %8956 = vmatpush1.bf16.msra.mxu1 %v21350_v45  ;;  %v21401_v45 = vld [vmem:[%s28861_s5 + $0x420] ss:$8 sps:$4 sm:$0xff]  }
 0x7e0   : > { %8957 = vmatprep.subr.bf16.mxu1 %v21355_v34  ;;  %v21406_v34 = vld [vmem:[%s28861_s5 + $0x434] ss:$8 sps:$4 sm:$0xff]  }
 0x7e2   : > { %8813 = vmatmul.mubr.bf16.gmra.mrb[68].mxu1 %v25617_v61  ;;  %v21470_v61 = vld [vmem:[%s28863_s7 + $0x320] ss:$16 sps:$4 sm:$0xff]  }
 0x7e3   : > { %8958 = vmatpush1.bf16.msra.mxu1 %v21353_v33  ;;  %8985 = vmatprep.mubr.bf16.mxu1 %v25450_v13  ;;  %v21359_v13 = vld [vmem:[%s28861_s5 + $0x340] ss:$8 sps:$4 sm:$0xff]  }
 0x7e4   : > { %8959 = vmatprep.subr.bf16.mxu1 %v21358_v24  ;;  %9921 = vmatpush1.bf16.msra.mxu0 %v21470_v61  ;;  %v21407_v33 = vld [vmem:[%s28861_s5 + $0x440] ss:$8 sps:$4 sm:$0xff]   ;;  %v21412_v24 = vld [vmem:[%s28861_s5 + $0x454] ss:$8 sps:$4 sm:$0xff]  }
 0x7e5   : > { %9922 = vmatprep.subr.bf16.mxu0 %v21478_v6  ;;  %v21413_v61 = vld [vmem:[%s28861_s5 + $0x460] ss:$8 sps:$4 sm:$0xff]   ;;  %v21418_v6 = vld [vmem:[%s28861_s5 + $0x474] ss:$8 sps:$4 sm:$0xff]  }
 0x7e7   : > { %8960 = vmatpush1.bf16.msra.mxu1 %v21356_v17  ;;  %v9202_v17 = vshrl.u32 %v9014_v36, 16 }
 0x7e8   : > { %8961 = vmatprep.subr.bf16.mxu1 %v21361_v37  ;;  %9923 = vmatpush1.bf16.msra.mxu0 %v21476_v9  ;;  %v9205_v37 = vshll.u32 %v9014_v36, 16  ;;  %v21416_v9 = vld [vmem:[%s28861_s5 + $0x470] ss:$8 sps:$4 sm:$0xff]  }
 0x7e9   : > { %v21494_v36 = vld [vmem:[%s28863_s7 + $0x3a0] ss:$16 sps:$4 sm:$0xff]  }
 0x7eb   : > { %8962 = vmatpush1.bf16.msra.mxu1 %v21359_v13  ;;  %v9204_v13 = vrot.slane %v9202_v17, 4  ;;  %v26259_v17 = vld [vmem:[#allocation3] sm:$0xf0] }
 0x7ec   : > { %8963 = vmatprep.subr.bf16.mxu1 %v21364_v51  ;;  %v9207_v51 = vrot.slane %v9205_v37, 5  ;;  %v28906_v37 = vld [vmem:[#allocation5_spill] sm:$0xff] }
 0x7ef   : > { %8964 = vmatpush1.bf16.msra.mxu1 %v21362_v1  ;;  %v9208_v1 = vor.u32 %v9207_v51, %v9204_v13 }
 0x7f0   : > { %8965 = vmatprep.subr.bf16.mxu1 %v21367_v20  ;;  %v21425_v20 = vld [vmem:[%s28863_s7] ss:$16 sps:$4 sm:$0xff]  }
 0x7f1   : > { %v9212_v14 = vsel %vm1775_vm2, %v9208_v1, %v25633_v28  ;;  %v21445_v28 = vld [vmem:[%s28863_s7 + $0x64] ss:$16 sps:$4 sm:$0xff]  }
 0x7f3   : > { %8966 = vmatpush1.bf16.msra.mxu1 %v21365_v22  ;;  %v21431_v22 = vld [vmem:[%s28863_s7 + $0x20] ss:$16 sps:$4 sm:$0xff]  }
 0x7f4   : > { %8967 = vmatprep.subr.bf16.mxu1 %v21370_v43  ;;  %v21439_v43 = vld [vmem:[%s28863_s7 + $0x44] ss:$16 sps:$4 sm:$0xff]  }
 0x7f7   : > { %8968 = vmatpush1.bf16.msra.mxu1 %v21368_v19  ;;  %v21451_v19 = vld [vmem:[%s28863_s7 + $0x84] ss:$16 sps:$4 sm:$0xff]  }
 0x7f8   : > { %9122 = vmatprep.subr.bf16.mxu1 %v21373_v53  ;;  %v21449_v53 = vld [vmem:[%s28863_s7 + $0x80] ss:$16 sps:$4 sm:$0xff]  }
 0x7fa   : > { %8986 = vmatmul.mubr.bf16.vlgmr.msra.gmra.mrb[64].mxu1 %v8861_v26  ;;  %v21469_v26 = vld [vmem:[%s28863_s7 + $0xe4] ss:$16 sps:$4 sm:$0xff]  }
 0x7fb   : > { %9123 = vmatpush1.bf16.msra.mxu1 %v21371_v30  ;;  %8995 = vmatprep.mubr.bf16.mxu1 %v26024_v3  ;;  %v21463_v30 = vld [vmem:[%s28863_s7 + $0xc4] ss:$16 sps:$4 sm:$0xff]  }
 0x7fc   : > { %9124 = vmatprep.subr.bf16.mxu1 %v21376_v15  ;;  %v21461_v15 = vld [vmem:[%s28863_s7 + $0xc0] ss:$16 sps:$4 sm:$0xff]  }
 0x7ff   : > { %9125 = vmatpush1.bf16.msra.mxu1 %v21374_v42  ;;  %v21467_v42 = vld [vmem:[%s28863_s7 + $0xe0] ss:$16 sps:$4 sm:$0xff]  }
 0x800   : > { %9126 = vmatprep.subr.bf16.mxu1 %v21379_v46  ;;  %v21473_v46 = vld [vmem:[%s28863_s7 + $0x100] ss:$16 sps:$4 sm:$0xff]  }
 0x802   : > { %8996 = vmatmul.mubr.bf16.gmra.mrb[68].mxu1 %v25624_v41  ;;  %v21388_v41 = vld [vmem:[%s28861_s5 + $0x3d4] ss:$8 sps:$4 sm:$0xff]  }
 0x803   : > { %9127 = vmatpush1.bf16.msra.mxu1 %v21377_v38  ;;  %9154 = vmatprep.mubr.bf16.mxu1 %v26024_v3  ;;  %v21481_v38 = vld [vmem:[%s28863_s7 + $0x124] ss:$16 sps:$4 sm:$0xff]  }
 0x804   : > { %9128 = vmatprep.subr.bf16.mxu1 %v21382_v60  ;;  %v21479_v60 = vld [vmem:[%s28863_s7 + $0x120] ss:$16 sps:$4 sm:$0xff]  }
 0x807   : > { %9129 = vmatpush1.bf16.msra.mxu1 %v21380_v7  ;;  %v21482_v7 = vld [vmem:[%s28863_s7 + $0x360] ss:$16 sps:$4 sm:$0xff]  }
 0x808   : > { %9130 = vmatprep.subr.bf16.mxu1 %v21385_v18  ;;  %v21484_v18 = vld [vmem:[%s28863_s7 + $0x364] ss:$16 sps:$4 sm:$0xff]  }
 0x809   : > { %9924 = vmatprep.subr.bf16.mxu0 %v21484_v18 }
 0x80a   : > { %9925 = vmatpush1.bf16.msra.mxu0 %v21482_v7 }
 0x80b   : > { %9131 = vmatpush1.bf16.msra.mxu1 %v21383_v27  ;;  %v21485_v27 = vld [vmem:[%s28863_s7 + $0x140] ss:$16 sps:$4 sm:$0xff]  }
 0x80c   : > { %9132 = vmatprep.subr.bf16.mxu1 %v21388_v41  ;;  %v21487_v41 = vld [vmem:[%s28863_s7 + $0x144] ss:$16 sps:$4 sm:$0xff]  }
 0x80f   : > { %9133 = vmatpush1.bf16.msra.mxu1 %v21386_v58  ;;  %v21490_v58 = vld [vmem:[%s28863_s7 + $0x384] ss:$16 sps:$4 sm:$0xff]  }
 0x810   : > { %9134 = vmatprep.subr.bf16.mxu1 %v21391_v47  ;;  %v21493_v47 = vld [vmem:[%s28863_s7 + $0x164] ss:$16 sps:$4 sm:$0xff]   ;;  %9926 = vmatprep.subr.bf16.mxu0 %v21490_v58 }
 0x813   : > { %9135 = vmatpush1.bf16.msra.mxu1 %v21389_v25  ;;  %v21488_v25 = vld [vmem:[%s28863_s7 + $0x380] ss:$16 sps:$4 sm:$0xff]  }
 0x814   : > { %9136 = vmatprep.subr.bf16.mxu1 %v21394_v10  ;;  %v21491_v10 = vld [vmem:[%s28863_s7 + $0x160] ss:$16 sps:$4 sm:$0xff]   ;;  %9927 = vmatpush1.bf16.msra.mxu0 %v21488_v25  ;;  %v9568_v25 = vrot.slane %v26259_v17, 4 }
 0x817   : > { %9137 = vmatpush1.bf16.msra.mxu1 %v21392_v49  ;;  %v21496_v49 = vld [vmem:[%s28863_s7 + $0x3a4] ss:$16 sps:$4 sm:$0xff]  }
 0x818   : > { %9304 = vmatprep.subr.bf16.mxu1 %v21397_v11  ;;  %v21497_v11 = vld [vmem:[%s28863_s7 + $0x180] ss:$16 sps:$4 sm:$0xff]   ;;  %9928 = vmatprep.subr.bf16.mxu0 %v21496_v49 }
 0x819   : > { %9929 = vmatpush1.bf16.msra.mxu0 %v21494_v36 }
 0x81a   : > { %9155 = vmatmul.mubr.bf16.vlgmr.msra.gmra.mrb[64].mxu1 %v9037_v21  ;;  %9930 = vmatprep.subr.bf16.mxu0 %v21502_v4  ;;  %v21503_v21 = vld [vmem:[%s28863_s7 + $0x1a0] ss:$16 sps:$4 sm:$0xff]  }
 0x81b   : > { %9305 = vmatpush1.bf16.msra.mxu1 %v21395_v44  ;;  %9164 = vmatprep.mubr.bf16.mxu1 %v26024_v3  ;;  %v21505_v44 = vld [vmem:[%s28863_s7 + $0x1a4] ss:$16 sps:$4 sm:$0xff]  }
 0x81c   : > { %9306 = vmatprep.subr.bf16.mxu1 %v21400_v29  ;;  %v21500_v29 = vld [vmem:[%s28863_s7 + $0x3c0] ss:$16 sps:$4 sm:$0xff]  }
 0x81d   : > { %9931 = vmatpush1.bf16.msra.mxu0 %v21500_v29 }
 0x81f   : > { %9307 = vmatpush1.bf16.msra.mxu1 %v21398_v5  ;;  %v21508_v5 = vld [vmem:[%s28863_s7 + $0x3e4] ss:$16 sps:$4 sm:$0xff]  }
 0x820   : > { %9308 = vmatprep.subr.bf16.mxu1 %v21403_v62  ;;  %v21511_v62 = vld [vmem:[%s28863_s7 + $0x1c4] ss:$16 sps:$4 sm:$0xff]   ;;  %9932 = vmatprep.subr.bf16.mxu0 %v21508_v5 }
 0x821   : > { %9933 = vmatpush1.bf16.msra.mxu0 %v21506_v52 }
 0x822   : > { %9165 = vmatmul.mubr.bf16.gmra.mrb[68].mxu1 %v9039_v8  ;;  %v21517_v8 = vld [vmem:[%s28863_s7 + $0x1e4] ss:$16 sps:$4 sm:$0xff]  }
 0x823   : > { %9309 = vmatpush1.bf16.msra.mxu1 %v21401_v45  ;;  %9336 = vmatprep.mubr.bf16.mxu1 %v26024_v3  ;;  %v21509_v45 = vld [vmem:[%s28863_s7 + $0x1c0] ss:$16 sps:$4 sm:$0xff]  }
 0x824   : > { %9310 = vmatprep.subr.bf16.mxu1 %v21406_v34  ;;  %v21514_v34 = vld [vmem:[%s28863_s7 + $0x20c] ss:$16 sps:$4 sm:$0xff]  }
 0x825   : > { %9955 = vmatprep.subr.bf16.mxu0 %v21514_v34 }
 0x827   : > { %9311 = vmatpush1.bf16.msra.mxu1 %v21404_v35  ;;  %v21515_v35 = vld [vmem:[%s28863_s7 + $0x1e0] ss:$16 sps:$4 sm:$0xff]  }
 0x828   : > { %9312 = vmatprep.subr.bf16.mxu1 %v21409_v56  ;;  %v21523_v56 = vld [vmem:[%s28863_s7 + $0xc] ss:$16 sps:$4 sm:$0xff]  }
 0x82b   : > { %9313 = vmatpush1.bf16.msra.mxu1 %v21407_v33  ;;  %v9365_v33 = vld [vmem:[%s28862_s6] sm:$0x3] }
 0x82c   : > { %9314 = vmatprep.subr.bf16.mxu1 %v21412_v24  ;;  %v9426_v24 = vld [vmem:[#allocation3 + $0x8] sm:$0xf8] }
 0x82d   : > { %v10026_v13 = vshrl.u32 %v9426_v24, 16  ;;  %v10029_v51 = vshll.u32 %v9426_v24, 16 }
 0x82f   : > { %9315 = vmatpush1.bf16.msra.mxu1 %v21410_v12  ;;  %v9425_v12 = vld [vmem:[#allocation3] sm:$0xf8] }
 0x830   : > { %9316 = vmatprep.subr.bf16.mxu1 %v21415_v57  ;;  %v9370_v57 = vrot.slane %v9365_v33, %v24781_v39  ;;  %v10012_v1 = vshll.u32 %v9425_v12, 16 }
 0x833   : > { %9317 = vmatpush1.bf16.msra.mxu1 %v21413_v61  ;;  %v9374_v61 = vrot.slane %v9365_v33, %v28906_v37 }
 0x834   : > { %9318 = vmatprep.subr.bf16.mxu1 %v21418_v6  ;;  %v26262_v6 = vld [vmem:[#allocation3 + $0x8] sm:$0xf0] }
 0x837   : > { %9319 = vmatpush1.bf16.msra.mxu1 %v21416_v9  ;;  %v10009_v9 = vshrl.u32 %v9425_v12, 16 }
 0x838   : > { %10384 = vmatprep.subr.bf16.mxu1 %v21427_v48 }
 0x83a   : > { %9337 = vmatmul.mubr.bf16.vlgmr.msra.gmra.mrb[64].mxu1 %v9212_v14 }
 0x83b   : > { %9346 = vmatprep.mubr.bf16.mxu1 %v26024_v3  ;;  %10385 = vmatpush1.bf16.msra.mxu1 %v21425_v20  ;;  %v21475_v3 = vld [vmem:[%s28863_s7 + $0x104] ss:$16 sps:$4 sm:$0xff]   ;;  %v10558_v20 = vshrl.u32 %v26259_v17, 16 }
 0x83c   : > { %10386 = vmatprep.subr.bf16.mxu1 %v21433_v32 }
 0x83f   : > { %10387 = vmatpush1.bf16.msra.mxu1 %v21431_v22  ;;  %v10570_v22 = vshrl.u32 %v26262_v6, 16 }
 0x840   : > { %10388 = vmatprep.subr.bf16.mxu1 %v21439_v43  ;;  %v10573_v43 = vshll.u32 %v26262_v6, 16 }
 0x842   : > { %9347 = vmatmul.mubr.bf16.gmra.mrb[68].mxu1 %v25640_v16  ;;  %v21457_v16 = vld [vmem:[%s28863_s7 + $0xa4] ss:$16 sps:$4 sm:$0xff]   ;;  %v26280_v7 = vrot.slane %v10573_v43, 5 }
 0x843   : > { %10389 = vmatpush1.bf16.msra.mxu1 %v21437_v55  ;;  %v10561_v55 = vshll.u32 %v26259_v17, 16 }
 0x844   : > { %10390 = vmatprep.subr.bf16.mxu1 %v21445_v28 }
 0x845   : > { %v26282_v18 = vrot.slane %v10561_v55, 5 }
 0x847   : > { %10391 = vmatpush1.bf16.msra.mxu1 %v21443_v0 }
 0x848   : > { %10392 = vmatprep.subr.bf16.mxu1 %v21451_v19  ;;  %v26268_v19 = vrot.slane %v10026_v13, 3 }
 0x84b   : > { %10393 = vmatpush1.bf16.msra.mxu1 %v21449_v53 }
 0x84c   : > { %10394 = vmatprep.subr.bf16.mxu1 %v21457_v16 }
 0x84f   : > { %10395 = vmatpush1.bf16.msra.mxu1 %v21455_v2 }
 0x850   : > { %10396 = vmatprep.subr.bf16.mxu1 %v21463_v30  ;;  %v26270_v30 = vrot.slane %v10029_v51, 4  ;;  %v21512_v51 = vld [vmem:[%s28863_s7 + $0x208] ss:$16 sps:$4 sm:$0xff]  }
 0x853   : > { %10397 = vmatpush1.bf16.msra.mxu1 %v21461_v15  ;;  %v26272_v15 = vrot.slane %v10009_v9, 3 }
 0x854   : > { %10398 = vmatprep.subr.bf16.mxu1 %v21469_v26 }
 0x857   : > { %10399 = vmatpush1.bf16.msra.mxu1 %v21467_v42 }
 0x858   : > { %10400 = vmatprep.subr.bf16.mxu1 %v21475_v3  ;;  %v26274_v3 = vrot.slane %v10012_v1, 4 }
 0x85a   : > { %v10015_v4 = vor.u32 %v26274_v3, %v26272_v15  ;;  %v21521_v3 = vld [vmem:[%s28863_s7 + $0x8] ss:$16 sps:$4 sm:$0xff]  }
 0x85b   : > { %10401 = vmatpush1.bf16.msra.mxu1 %v21473_v46  ;;  %v26276_v46 = vrot.slane %v10558_v20, 4 }
 0x85c   : > { %10402 = vmatprep.subr.bf16.mxu1 %v21481_v38 }
 0x85f   : > { %10403 = vmatpush1.bf16.msra.mxu1 %v21479_v60  ;;  %v26278_v60 = vrot.slane %v10570_v22, 4 }
 0x860   : > { %10404 = vmatprep.subr.bf16.mxu1 %v21487_v41  ;;  %v9571_v41 = vrot.slane %v26262_v6, 4 }
 0x861   : > { %v10576_v5 = vor.u32 %v26280_v7, %v26278_v60  ;;  %v21526_v60 = vld [vmem:[%s28863_s7 + $0x24c] ss:$16 sps:$4 sm:$0xff]  }
 0x863   : > { %10405 = vmatpush1.bf16.msra.mxu1 %v21485_v27 }
 0x864   : > { %10406 = vmatprep.subr.bf16.mxu1 %v21493_v47 }
 0x867   : > { %10407 = vmatpush1.bf16.msra.mxu1 %v21491_v10  ;;  %v10032_v10 = vor.u32 %v26270_v30, %v26268_v19  ;;  %v21518_v30 = vld [vmem:[%s28863_s7 + $0x228] ss:$16 sps:$4 sm:$0xff]  }
 0x868   : > { %10408 = vmatprep.subr.bf16.mxu1 %v21499_v59 }
 0x86b   : > { %10409 = vmatpush1.bf16.msra.mxu1 %v21497_v11 }
 0x86c   : > { %10410 = vmatprep.subr.bf16.mxu1 %v21505_v44 }
 0x86f   : > { %10411 = vmatpush1.bf16.msra.mxu1 %v21503_v21 }
 0x870   : > { %10412 = vmatprep.subr.bf16.mxu1 %v21511_v62  ;;  %v10564_v62 = vor.u32 %v26282_v18, %v26276_v46  ;;  %v21538_v46 = vld [vmem:[%s28863_s7 + $0x28c] ss:$16 sps:$4 sm:$0xff]  }
 0x871   : > { %v21541_v18 = vld [vmem:[%s28863_s7 + $0x6c] ss:$16 sps:$4 sm:$0xff]  }
 0x873   : > { %10413 = vmatpush1.bf16.msra.mxu1 %v21509_v45 }
 0x874   : > { %10414 = vmatprep.subr.bf16.mxu1 %v21517_v8 }
 0x877   : > { %10415 = vmatpush1.bf16.msra.mxu1 %v21515_v35 }
 0x878   : > { %10437 = vmatprep.subr.bf16.mxu1 %v21523_v56 }
 0x90d   : > { %v9338_v48 = vpop.f32.mrb[64].mxu1 }
 0x90e   : > { %v9377_v32 = vadd.f32 %v9370_v57, %v9338_v48  ;;  %v9340_v14 = vpop.f32.mrb[65].mxu1 }
 0x90f   : > { %v9378_v28 = vadd.f32 %v9374_v61, %v9340_v14  ;;  %v9342_v0 = vpop.f32.mrb[66].mxu1 }
 0x910   : > { %v9385_v53 = vmax.f32 %v9377_v32, 0.0  ;;  %v9379_v16 = vadd.f32 %v9370_v57, %v9342_v0  ;;  %v9344_v2 = vpop.f32.mrb[67].mxu1 }
 0x911   : > { %v9386_v26 = vmax.f32 %v9378_v28, 0.0  ;;  %v9380_v42 = vadd.f32 %v9374_v61, %v9344_v2 }
 0x912   : > { %v9387_v38 = vmax.f32 %v9379_v16, 0.0  ;;  %v9393_v58 = vsel %vm24797_vm5, %v9385_v53, 0.0 }
 0x913   : > { %v9388_v27 = vmax.f32 %v9380_v42, 0.0  ;;  %v9394_v36 = vsel %vm24797_vm5, %v9386_v26, 0.0 }
 0x914   : > { %v9395_v47 = vsel %vm24807_vm6, %v9387_v38, 0.0 }
 0x915   : > { %v26294_v49 = vpack.c.bf16 %v9395_v47, %v9393_v58  ;;  %v9396_v11 = vsel %vm24807_vm6, %v9388_v27, 0.0  ;;  %v9348_v59 = vpop.f32.mrb[68].mxu1  ;;  %v21529_v58 = vld [vmem:[%s28863_s7 + $0x2c] ss:$16 sps:$4 sm:$0xff]  }
 0x916   : > { %v26300_v44 = vpack.c.bf16 %v9396_v11, %v9394_v36  ;;  %v9381_v29 = vadd.f32 %v9370_v57, %v9348_v59  ;;  %v9350_v21 = vpop.f32.mrb[69].mxu1  ;;  %v21524_v59 = vld [vmem:[%s28863_s7 + $0x248] ss:$16 sps:$4 sm:$0xff]  }
 0x917   : > { %9421 = vst [vmem:[#allocation3 + $0x20] sm:$0xff] %v26294_v49  ;;  %v9382_v52 = vadd.f32 %v9374_v61, %v9350_v21  ;;  %v9352_v45 = vpop.f32.mrb[70].mxu1  ;;  %v9569_v34 = vrot.slane %v26294_v49, 4  ;;  %v26309_v8 = vshrl.u32 %v26294_v49, 16  ;;  %v10020_v35 = vshll.u32 %v26294_v49, 16 }
 0x918   : > { %9422 = vst [vmem:[#allocation3 + $0x28] sm:$0xff] %v26300_v44  ;;  %v9389_v56 = vmax.f32 %v9381_v29, 0.0  ;;  %v9383_v33 = vadd.f32 %v9370_v57, %v9352_v45  ;;  %v9354_v24 = vpop.f32.mrb[71].mxu1  ;;  %v9572_v12 = vrot.slane %v26300_v44, 4  ;;  %v26315_v17 = vshrl.u32 %v26300_v44, 16 }
 0x919   : > { %v9390_v6 = vmax.f32 %v9382_v52, 0.0  ;;  %v9384_v13 = vadd.f32 %v9374_v61, %v9354_v24  ;;  %v26323_v9 = vsel %vm712_vm0, %v9568_v25, %v9569_v34  ;;  %v10037_v48 = vshll.u32 %v26300_v44, 16  ;;  %v21520_v61 = vld [vmem:[%s28863_s7 + $0x22c] ss:$16 sps:$4 sm:$0xff]   ;;  %v21527_v21 = vld [vmem:[%s28863_s7 + $0x28] ss:$16 sps:$4 sm:$0xff]  }
 0x91a   : > { %v9397_v57 = vsel %vm24817_vm7, %v9389_v56, 0.0  ;;  %v9391_v1 = vmax.f32 %v9383_v33, 0.0  ;;  %v26331_v20 = vsel %vm712_vm0, %v9571_v41, %v9572_v12  ;;  %v10036_v32 = vrot.slane %v26315_v17, 3  ;;  %v21535_v45 = vld [vmem:[%s28863_s7 + $0x4c] ss:$16 sps:$4 sm:$0xff]  }
 0x91b   : > { %v9398_v14 = vsel %vm24817_vm7, %v9390_v6, 0.0  ;;  %v9392_v22 = vmax.f32 %v9384_v13, 0.0  ;;  %9934 = vmatprep.mubr.bf16.mxu0 %v26331_v20  ;;  %v10039_v43 = vrot.slane %v10037_v48, 4  ;;  %v10019_v55 = vrot.slane %v26309_v8, 3  ;;  %v21533_v56 = vld [vmem:[%s28863_s7 + $0x48] ss:$16 sps:$4 sm:$0xff]  }
 0x91c   : > { %v9399_v28 = vsel %vm24831_vm8, %v9391_v1, 0.0  ;;  %9935 = vmatmul.mubr.bf16.vlgmr.msra.gmra.mrb[16].mxu0 %v26323_v9  ;;  %v10022_v0 = vrot.slane %v10020_v35, 4  ;;  %v10577_v19 = vrot.slane %v26315_v17, 4  ;;  %v10578_v53 = vrot.slane %v10037_v48, 5  ;;  %v21536_v1 = vld [vmem:[%s28863_s7 + $0x288] ss:$16 sps:$4 sm:$0xff]  }
 0x91d   : > { %v9403_v16 = vpack.c.bf16 %v9399_v28, %v9397_v57  ;;  %v9400_v2 = vsel %vm24831_vm8, %v9392_v22, 0.0  ;;  %9956 = vmatpush1.bf16.msra.mxu0 %v21512_v51  ;;  %v26350_v15 = vor.u32 %v10039_v43, %v10036_v32  ;;  %v10565_v26 = vrot.slane %v26309_v8, 4  ;;  %v21542_v49 = vld [vmem:[%s28863_s7 + $0x2a8] ss:$16 sps:$4 sm:$0xff]  }
 0x91e   : > { %v9404_v42 = vpack.c.bf16 %v9400_v2, %v9398_v14  ;;  %9957 = vmatprep.subr.bf16.mxu0 %v21520_v61  ;;  %v26356_v38 = vor.u32 %v10022_v0, %v10019_v55  ;;  %v26361_v7 = vor.u32 %v10578_v53, %v10577_v19  ;;  %v10566_v27 = vrot.slane %v10020_v35, 5  ;;  %v21539_v14 = vld [vmem:[%s28863_s7 + $0x68] ss:$16 sps:$4 sm:$0xff]   ;;  %v21544_v0 = vld [vmem:[%s28863_s7 + $0x2ac] ss:$16 sps:$4 sm:$0xff]  }
 0x91f   : > { %9423 = vst [vmem:[#allocation3 + $0x40] sm:$0xff] %v9403_v16  ;;  %v26365_v41 = vsel %vm1167_vm1, %v10032_v10, %v26350_v15  ;;  %v11125_v47 = vrot.slane %v26315_v17, 7  ;;  %v11118_v25 = vrot.slane %v26309_v8, 7  ;;  %v21761_v17 = vld [vmem:[%s28863_s7 + $0x648] ss:$16 sps:$4 sm:$0xff]  }
 0x920   : > { %9424 = vst [vmem:[#allocation3 + $0x48] sm:$0xff] %v9404_v42  ;;  %10416 = vmatprep.mubr.bf16.mxu1 %v26365_v41  ;;  %v26375_v36 = vsel %vm1167_vm1, %v10015_v4, %v26356_v38  ;;  %v26379_v11 = vsel %vm1775_vm2, %v10576_v5, %v26361_v7  ;;  %v26381_v10 = vor.u32 %v10566_v27, %v10565_v26  ;;  %v21532_v5 = vld [vmem:[%s28863_s7 + $0x26c] ss:$16 sps:$4 sm:$0xff]   ;;  %v21545_v42 = vld [vmem:[%s28863_s7 + $0x88] ss:$16 sps:$4 sm:$0xff]  }
 0x921   : > { %9958 = vmatpush1.bf16.msra.mxu0 %v21518_v30  ;;  %10417 = vmatmul.mubr.bf16.vlgmr.msra.gmra.mrb[72].mxu1 %v26375_v36  ;;  %v26389_v29 = vor.u32 %v11125_v47, %v10037_v48  ;;  %v26393_v4 = vor.u32 %v11118_v25, %v10020_v35  ;;  %v21530_v35 = vld [vmem:[%s28863_s7 + $0x268] ss:$16 sps:$4 sm:$0xff]   ;;  %v21553_v27 = vld [vmem:[%s28863_s7 + $0xac] ss:$16 sps:$4 sm:$0xff]  }
 0x922   : > { %10438 = vmatpush1.bf16.msra.mxu1 %v21521_v3  ;;  %9959 = vmatprep.subr.bf16.mxu0 %v21526_v60  ;;  %v26406_v52 = vsel %vm1775_vm2, %v10564_v62, %v26381_v10  ;;  %v21767_v8 = vld [vmem:[%s28863_s7 + $0x688] ss:$16 sps:$4 sm:$0xff]  }
 0x923   : > { %10439 = vmatprep.subr.bf16.mxu1 %v21529_v58 }
 0x925   : > { %9960 = vmatpush1.bf16.msra.mxu0 %v21524_v59 }
 0x926   : > { %v9429_v33 = vld [vmem:[#allocation3 + $0x40] sm:$0xf]  ;;  %10440 = vmatpush1.bf16.msra.mxu1 %v21527_v21  ;;  %9961 = vmatprep.subr.bf16.mxu0 %v21532_v5 }
 0x927   : > { %v9430_v62 = vld [vmem:[#allocation3 + $0x48] sm:$0xf]  ;;  %v9574_v24 = vrot.slane %v9429_v33, 4  ;;  %10441 = vmatprep.subr.bf16.mxu1 %v21535_v45  ;;  %v10043_v6 = vshrl.u32 %v9429_v33, 16  ;;  %v10046_v13 = vshll.u32 %v9429_v33, 16  ;;  %v11047_v19 = vld [vmem:[#allocation3 + $0x40] sm:$0xff] }
 0x928   : > { %v9576_v51 = vrot.slane %v9430_v62, 4  ;;  %v10052_v48 = vshrl.u32 %v9430_v62, 16  ;;  %v10055_v57 = vshll.u32 %v9430_v62, 16  ;;  %v11048_v22 = vld [vmem:[#allocation3 + $0x48] sm:$0xff]  ;;  %v26467_v3 = vshrl.u32 %v11047_v19, 16 }
 0x929   : > { %9962 = vmatpush1.bf16.msra.mxu0 %v21530_v35  ;;  %v10045_v61 = vrot.slane %v10043_v6, 3  ;;  %v10048_v32 = vrot.slane %v10046_v13, 4  ;;  %v26441_v53 = vsel %vm712_vm0, %v9569_v34, %v9574_v24  ;;  %v26447_v2 = vshrl.u32 %v11048_v22, 16  ;;  %v13212_v35 = vld [vmem:[#allocation3 + $0x28] sm:$0xf0] }
 0x92a   : > { %v26432_v43 = vsel %vm712_vm0, %v9572_v12, %v9576_v51  ;;  %v10054_v55 = vrot.slane %v10052_v48, 3  ;;  %v10057_v28 = vrot.slane %v10055_v57, 4  ;;  %10442 = vmatpush1.bf16.msra.mxu1 %v21533_v56  ;;  %9963 = vmatprep.subr.bf16.mxu0 %v21538_v46  ;;  %v21547_v12 = vld [vmem:[%s28863_s7 + $0x8c] ss:$16 sps:$4 sm:$0xff]   ;;  %v26449_v30 = vshll.u32 %v11048_v22, 16 }
 0x92b   : > { %9944 = vmatprep.mubr.bf16.mxu0 %v26432_v43  ;;  %v10049_v44 = vor.u32 %v10048_v32, %v10045_v61  ;;  %10443 = vmatprep.subr.bf16.mxu1 %v21541_v18  ;;  %v26455_v34 = vshll.u32 %v11047_v19, 16  ;;  %v12743_v59 = vrot.slane %v26447_v2, 3  ;;  %v21551_v56 = vld [vmem:[%s28863_s7 + $0xa8] ss:$16 sps:$4 sm:$0xff]   ;;  %v12731_v33 = vrot.slane %v26467_v3, 3 }
 0x92c   : > { %9945 = vmatmul.mubr.bf16.gmra.mrb[20].mxu0 %v26441_v53  ;;  %v10058_v16 = vor.u32 %v10057_v28, %v10054_v55  ;;  %v12190_v60 = vrot.slane %v26449_v30, 1  ;;  %v12744_v45 = vrot.slane %v26449_v30, 4  ;;  %v21559_v46 = vld [vmem:[%s28863_s7 + $0xcc] ss:$16 sps:$4 sm:$0xff]   ;;  %v13820_v24 = vshrl.u32 %v13212_v35, 16 }
 0x92d   : > { %9987 = vmatprep.mubr.bf16.mxu0 %v26331_v20  ;;  %9964 = vmatpush1.bf16.msra.mxu0 %v21536_v1  ;;  %v21550_v20 = vld [vmem:[%s28863_s7 + $0x2cc] ss:$16 sps:$4 sm:$0xff]   ;;  %v12178_v58 = vrot.slane %v26455_v34, 1  ;;  %v12732_v62 = vrot.slane %v26455_v34, 4  ;;  %v21554_v6 = vld [vmem:[%s28863_s7 + $0x2e8] ss:$16 sps:$4 sm:$0xff]  }
 0x92e   : > { %v26459_v26 = vsel %vm1167_vm1, %v26350_v15, %v10058_v16  ;;  %10444 = vmatpush1.bf16.msra.mxu1 %v21539_v14  ;;  %9965 = vmatprep.subr.bf16.mxu0 %v21544_v0  ;;  %v26473_v15 = vsel %vm1167_vm1, %v26356_v38, %v10049_v44  ;;  %v26484_v21 = vor.u32 %v12190_v60, %v26447_v2  ;;  %v21548_v38 = vld [vmem:[%s28863_s7 + $0x2c8] ss:$16 sps:$4 sm:$0xff]   ;;  %v13211_v51 = vld [vmem:[#allocation3 + $0x20] sm:$0xf0]  ;;  %v13823_v48 = vshll.u32 %v13212_v35, 16 }
 0x92f   : > { %10426 = vmatprep.mubr.bf16.mxu1 %v26459_v26  ;;  %10445 = vmatprep.subr.bf16.mxu1 %v21547_v12  ;;  %v26493_v5 = vor.u32 %v12178_v58, %v26467_v3  ;;  %v26506_v18 = vor.u32 %v12744_v45, %v12743_v59  ;;  %v26512_v13 = vor.u32 %v12732_v62, %v12731_v33  ;;  %v21557_v57 = vld [vmem:[%s28863_s7 + $0xc8] ss:$16 sps:$4 sm:$0xff]   ;;  %v21562_v1 = vld [vmem:[%s28863_s7 + $0x30c] ss:$16 sps:$4 sm:$0xff]   ;;  %v13822_v61 = vrot.slane %v13820_v24, 4 }
 0x930   : > { %10427 = vmatmul.mubr.bf16.gmra.mrb[76].mxu1 %v26473_v15  ;;  %v21565_v32 = vld [vmem:[%s28863_s7 + $0xec] ss:$16 sps:$4 sm:$0xff]   ;;  %v13825_v14 = vrot.slane %v13823_v48, 5  ;;  %v13827_v22 = vrot.slane %v26447_v2, 4  ;;  %v13828_v55 = vrot.slane %v26449_v30, 5  ;;  %v13808_v28 = vshrl.u32 %v13211_v51, 16 }
 0x931   : > { %10469 = vmatprep.mubr.bf16.mxu1 %v26365_v41  ;;  %9966 = vmatpush1.bf16.msra.mxu0 %v21542_v49  ;;  %v21556_v41 = vld [vmem:[%s28863_s7 + $0x2ec] ss:$16 sps:$4 sm:$0xff]   ;;  %v13811_v0 = vshll.u32 %v13211_v51, 16  ;;  %v21560_v19 = vld [vmem:[%s28863_s7 + $0x308] ss:$16 sps:$4 sm:$0xff]   ;;  %v13815_v44 = vrot.slane %v26467_v3, 4 }
 0x932   : > { %10446 = vmatpush1.bf16.msra.mxu1 %v21545_v42  ;;  %9967 = vmatprep.subr.bf16.mxu0 %v21550_v20  ;;  %v13816_v12 = vrot.slane %v26455_v34, 5  ;;  %v21563_v16 = vld [vmem:[%s28863_s7 + $0xe8] ss:$16 sps:$4 sm:$0xff]   ;;  %v21568_v49 = vld [vmem:[%s28863_s7 + $0x32c] ss:$16 sps:$4 sm:$0xff]   ;;  %v13826_v42 = vor.u32 %v13825_v14, %v13822_v61  ;;  %v26536_v20 = vor.u32 %v13828_v55, %v13827_v22 }
 0x933   : > { %10447 = vmatprep.subr.bf16.mxu1 %v21553_v27  ;;  %v13810_v27 = vrot.slane %v13808_v28, 4  ;;  %v13813_v59 = vrot.slane %v13811_v0, 5  ;;  %v21569_v33 = vld [vmem:[%s28863_s7 + $0x108] ss:$16 sps:$4 sm:$0xff]   ;;  %v21577_v24 = vld [vmem:[%s28863_s7 + $0x12c] ss:$16 sps:$4 sm:$0xff]  }
 0x934   : > { %v26541_v45 = vor.u32 %v13816_v12, %v13815_v44  ;;  %v26545_v35 = vsel %vm1775_vm2, %v13826_v42, %v26536_v20  ;;  %v21575_v51 = vld [vmem:[%s28863_s7 + $0x128] ss:$16 sps:$4 sm:$0xff]   ;;  %v21580_v48 = vld [vmem:[%s28863_s7 + $0x36c] ss:$16 sps:$4 sm:$0xff]  }
 0x935   : > { %9968 = vmatpush1.bf16.msra.mxu0 %v21548_v38  ;;  %v21571_v38 = vld [vmem:[%s28863_s7 + $0x10c] ss:$16 sps:$4 sm:$0xff]   ;;  %v21581_v61 = vld [vmem:[%s28863_s7 + $0x148] ss:$16 sps:$4 sm:$0xff]  }
 0x936   : > { %10448 = vmatpush1.bf16.msra.mxu1 %v21551_v56  ;;  %9969 = vmatprep.subr.bf16.mxu0 %v21556_v41  ;;  %v13814_v56 = vor.u32 %v13813_v59, %v13810_v27  ;;  %v21566_v41 = vld [vmem:[%s28863_s7 + $0x328] ss:$16 sps:$4 sm:$0xff]   ;;  %v21589_v14 = vld [vmem:[%s28863_s7 + $0x16c] ss:$16 sps:$4 sm:$0xff]  }
 0x937   : > { %10449 = vmatprep.subr.bf16.mxu1 %v21559_v46  ;;  %v21574_v46 = vld [vmem:[%s28863_s7 + $0x34c] ss:$16 sps:$4 sm:$0xff]   ;;  %v21584_v22 = vld [vmem:[%s28863_s7 + $0x388] ss:$16 sps:$4 sm:$0xff]  }
 0x938   : > { %v26558_v62 = vsel %vm1775_vm2, %v13814_v56, %v26541_v45  ;;  %v21587_v55 = vld [vmem:[%s28863_s7 + $0x168] ss:$16 sps:$4 sm:$0xff]   ;;  %v21592_v28 = vld [vmem:[%s28863_s7 + $0x3ac] ss:$16 sps:$4 sm:$0xff]  }
 0x939   : > { %9970 = vmatpush1.bf16.msra.mxu0 %v21554_v6  ;;  %v21572_v6 = vld [vmem:[%s28863_s7 + $0x348] ss:$16 sps:$4 sm:$0xff]   ;;  %v21595_v0 = vld [vmem:[%s28863_s7 + $0x18c] ss:$16 sps:$4 sm:$0xff]  }
 0x93a   : > { %10450 = vmatpush1.bf16.msra.mxu1 %v21557_v57  ;;  %9971 = vmatprep.subr.bf16.mxu0 %v21562_v1  ;;  %v21583_v57 = vld [vmem:[%s28863_s7 + $0x14c] ss:$16 sps:$4 sm:$0xff]   ;;  %v21578_v1 = vld [vmem:[%s28863_s7 + $0x368] ss:$16 sps:$4 sm:$0xff]  }
 0x93b   : > { %10451 = vmatprep.subr.bf16.mxu1 %v21565_v32  ;;  %v21586_v32 = vld [vmem:[%s28863_s7 + $0x38c] ss:$16 sps:$4 sm:$0xff]   ;;  %v21593_v44 = vld [vmem:[%s28863_s7 + $0x188] ss:$16 sps:$4 sm:$0xff]  }
 0x93c   : > { %v21598_v12 = vld [vmem:[%s28863_s7 + $0x3cc] ss:$16 sps:$4 sm:$0xff]   ;;  %v21599_v42 = vld [vmem:[%s28863_s7 + $0x1a8] ss:$16 sps:$4 sm:$0xff]  }
 0x93d   : > { %9972 = vmatpush1.bf16.msra.mxu0 %v21560_v19  ;;  %v21590_v19 = vld [vmem:[%s28863_s7 + $0x3a8] ss:$16 sps:$4 sm:$0xff]   ;;  %v21604_v27 = vld [vmem:[%s28863_s7 + $0x3ec] ss:$16 sps:$4 sm:$0xff]  }
 0x93e   : > { %10452 = vmatpush1.bf16.msra.mxu1 %v21563_v16  ;;  %9973 = vmatprep.subr.bf16.mxu0 %v21568_v49  ;;  %v21601_v16 = vld [vmem:[%s28863_s7 + $0x1ac] ss:$16 sps:$4 sm:$0xff]   ;;  %v21596_v49 = vld [vmem:[%s28863_s7 + $0x3c8] ss:$16 sps:$4 sm:$0xff]  }
 0x93f   : > { %10453 = vmatprep.subr.bf16.mxu1 %v21571_v38  ;;  %v21607_v59 = vld [vmem:[%s28863_s7 + $0x1cc] ss:$16 sps:$4 sm:$0xff]   ;;  %v21602_v38 = vld [vmem:[%s28863_s7 + $0x3e8] ss:$16 sps:$4 sm:$0xff]  }
 0x940   : > { %v21605_v56 = vld [vmem:[%s28863_s7 + $0x1c8] ss:$16 sps:$4 sm:$0xff]  }
 0x941   : > { %9974 = vmatpush1.bf16.msra.mxu0 %v21566_v41  ;;  %v21610_v41 = vld [vmem:[%s28863_s7 + $0x1ec] ss:$16 sps:$4 sm:$0xff]  }
 0x942   : > { %10454 = vmatpush1.bf16.msra.mxu1 %v21569_v33  ;;  %9975 = vmatprep.subr.bf16.mxu0 %v21574_v46  ;;  %v21608_v33 = vld [vmem:[%s28863_s7 + $0x1e8] ss:$16 sps:$4 sm:$0xff]   ;;  %v21613_v46 = vld [vmem:[%s28863_s7 + $0x404] ss:$16 sps:$4 sm:$0xff]  }
 0x943   : > { %10455 = vmatprep.subr.bf16.mxu1 %v21577_v24  ;;  %v21611_v24 = vld [vmem:[%s28863_s7 + $0x400] ss:$16 sps:$4 sm:$0xff]  }
 0x945   : > { %9976 = vmatpush1.bf16.msra.mxu0 %v21572_v6  ;;  %v21616_v6 = vld [vmem:[%s28863_s7 + $0x424] ss:$16 sps:$4 sm:$0xff]  }
 0x946   : > { %10456 = vmatpush1.bf16.msra.mxu1 %v21575_v51  ;;  %9977 = vmatprep.subr.bf16.mxu0 %v21580_v48  ;;  %v21617_v51 = vld [vmem:[%s28863_s7 + $0x440] ss:$16 sps:$4 sm:$0xff]  }
 0x947   : > { %10457 = vmatprep.subr.bf16.mxu1 %v21583_v57  ;;  %v21623_v48 = vld [vmem:[%s28863_s7 + $0x480] ss:$16 sps:$4 sm:$0xff]  }
 0x948   : > { %v21626_v57 = vld [vmem:[%s28863_s7 + $0x4a0] ss:$16 sps:$4 sm:$0xff]  }
 0x949   : > { %9978 = vmatpush1.bf16.msra.mxu0 %v21578_v1  ;;  %v21631_v1 = vld [vmem:[%s28863_s7 + $0x4c4] ss:$16 sps:$4 sm:$0xff]  }
 0x94a   : > { %10458 = vmatpush1.bf16.msra.mxu1 %v21581_v61  ;;  %9979 = vmatprep.subr.bf16.mxu0 %v21586_v32  ;;  %v21629_v61 = vld [vmem:[%s28863_s7 + $0x4c0] ss:$16 sps:$4 sm:$0xff]   ;;  %v21634_v32 = vld [vmem:[%s28863_s7 + $0x4e4] ss:$16 sps:$4 sm:$0xff]  }
 0x94b   : > { %10459 = vmatprep.subr.bf16.mxu1 %v21589_v14  ;;  %v21632_v14 = vld [vmem:[%s28863_s7 + $0x4e0] ss:$16 sps:$4 sm:$0xff]  }
 0x94d   : > { %9980 = vmatpush1.bf16.msra.mxu0 %v21584_v22  ;;  %v21637_v22 = vld [vmem:[%s28863_s7 + $0x504] ss:$16 sps:$4 sm:$0xff]  }
 0x94e   : > { %10460 = vmatpush1.bf16.msra.mxu1 %v21587_v55  ;;  %9981 = vmatprep.subr.bf16.mxu0 %v21592_v28  ;;  %v21635_v55 = vld [vmem:[%s28863_s7 + $0x500] ss:$16 sps:$4 sm:$0xff]   ;;  %v21640_v28 = vld [vmem:[%s28863_s7 + $0x524] ss:$16 sps:$4 sm:$0xff]  }
 0x94f   : > { %10461 = vmatprep.subr.bf16.mxu1 %v21595_v0  ;;  %v21638_v0 = vld [vmem:[%s28863_s7 + $0x520] ss:$16 sps:$4 sm:$0xff]  }
 0x951   : > { %9982 = vmatpush1.bf16.msra.mxu0 %v21590_v19  ;;  %v21643_v19 = vld [vmem:[%s28863_s7 + $0x544] ss:$16 sps:$4 sm:$0xff]  }
 0x952   : > { %10462 = vmatpush1.bf16.msra.mxu1 %v21593_v44  ;;  %9983 = vmatprep.subr.bf16.mxu0 %v21598_v12  ;;  %v21641_v44 = vld [vmem:[%s28863_s7 + $0x540] ss:$16 sps:$4 sm:$0xff]   ;;  %v21646_v12 = vld [vmem:[%s28863_s7 + $0x564] ss:$16 sps:$4 sm:$0xff]  }
 0x953   : > { %10463 = vmatprep.subr.bf16.mxu1 %v21601_v16  ;;  %v21644_v16 = vld [vmem:[%s28863_s7 + $0x560] ss:$16 sps:$4 sm:$0xff]  }
 0x955   : > { %9984 = vmatpush1.bf16.msra.mxu0 %v21596_v49  ;;  %v21649_v49 = vld [vmem:[%s28863_s7 + $0x584] ss:$16 sps:$4 sm:$0xff]  }
 0x956   : > { %10464 = vmatpush1.bf16.msra.mxu1 %v21599_v42  ;;  %9985 = vmatprep.subr.bf16.mxu0 %v21604_v27  ;;  %v21647_v42 = vld [vmem:[%s28863_s7 + $0x580] ss:$16 sps:$4 sm:$0xff]   ;;  %v21652_v27 = vld [vmem:[%s28863_s7 + $0x5a4] ss:$16 sps:$4 sm:$0xff]  }
 0x957   : > { %10465 = vmatprep.subr.bf16.mxu1 %v21607_v59  ;;  %v21650_v59 = vld [vmem:[%s28863_s7 + $0x5a0] ss:$16 sps:$4 sm:$0xff]  }
 0x959   : > { %9986 = vmatpush1.bf16.msra.mxu0 %v21602_v38  ;;  %v10491_v38 = vld [vmem:[#allocation3 + $0x48] sm:$0x1f] }
 0x95a   : > { %10466 = vmatpush1.bf16.msra.mxu1 %v21605_v56  ;;  %v21655_v56 = vld [vmem:[%s28863_s7 + $0x5c4] ss:$16 sps:$4 sm:$0xff]  }
 0x95b   : > { %10467 = vmatprep.subr.bf16.mxu1 %v21610_v41  ;;  %v10591_v41 = vshrl.u32 %v10491_v38, 16 }
 0x95c   : > { %9988 = vmatmul.mubr.bf16.vlgmr.msra.gmra.mrb[24].mxu0 %v26323_v9  ;;  %v21614_v9 = vld [vmem:[%s28863_s7 + $0x420] ss:$16 sps:$4 sm:$0xff]  }
 0x95d   : > { %9997 = vmatprep.mubr.bf16.mxu0 %v26432_v43  ;;  %v21619_v43 = vld [vmem:[%s28863_s7 + $0x444] ss:$16 sps:$4 sm:$0xff]  }
 0x95e   : > { %10468 = vmatpush1.bf16.msra.mxu1 %v21608_v33  ;;  %v10594_v33 = vshll.u32 %v10491_v38, 16  ;;  %v21683_v38 = vld [vmem:[%s28863_s7 + $0x508] ss:$16 sps:$4 sm:$0xff]  }
 0x95f   : > { %10923 = vmatprep.subr.bf16.mxu1 %v21613_v46  ;;  %v21653_v46 = vld [vmem:[%s28863_s7 + $0x5c0] ss:$16 sps:$4 sm:$0xff]  }
 0x961   : > { %10470 = vmatmul.mubr.bf16.vlgmr.msra.gmra.mrb[80].mxu1 %v26375_v36  ;;  %v21622_v36 = vld [vmem:[%s28863_s7 + $0x464] ss:$16 sps:$4 sm:$0xff]  }
 0x962   : > { %10479 = vmatprep.mubr.bf16.mxu1 %v26459_v26  ;;  %10924 = vmatpush1.bf16.msra.mxu1 %v21611_v24  ;;  %v21620_v26 = vld [vmem:[%s28863_s7 + $0x460] ss:$16 sps:$4 sm:$0xff]   ;;  %v21658_v24 = vld [vmem:[%s28863_s7 + $0x5e4] ss:$16 sps:$4 sm:$0xff]  }
 0x963   : > { %10925 = vmatprep.subr.bf16.mxu1 %v21616_v6  ;;  %v10593_v6 = vrot.slane %v10591_v41, 4  ;;  %v21686_v41 = vld [vmem:[%s28863_s7 + $0x528] ss:$16 sps:$4 sm:$0xff]  }
 0x964   : > { %9998 = vmatmul.mubr.bf16.gmra.mrb[28].mxu0 %v26441_v53  ;;  %v21625_v53 = vld [vmem:[%s28863_s7 + $0x484] ss:$16 sps:$4 sm:$0xff]  }
 0x966   : > { %10926 = vmatpush1.bf16.msra.mxu1 %v21614_v9  ;;  %v10596_v9 = vrot.slane %v10594_v33, 5  ;;  %v21691_v33 = vld [vmem:[%s28863_s7 + $0x54c] ss:$16 sps:$4 sm:$0xff]  }
 0x967   : > { %10927 = vmatprep.subr.bf16.mxu1 %v21619_v43  ;;  %v10490_v43 = vld [vmem:[#allocation3 + $0x40] sm:$0x1f] }
 0x969   : > { %10480 = vmatmul.mubr.bf16.gmra.mrb[84].mxu1 %v26473_v15  ;;  %v21628_v15 = vld [vmem:[%s28863_s7 + $0x4a4] ss:$16 sps:$4 sm:$0xff]  }
 0x96a   : > { %10928 = vmatpush1.bf16.msra.mxu1 %v21617_v51  ;;  %10955 = vmatprep.mubr.bf16.mxu1 %v26379_v11  ;;  %v21656_v51 = vld [vmem:[%s28863_s7 + $0x5e0] ss:$16 sps:$4 sm:$0xff]  }
 0x96b   : > { %10929 = vmatprep.subr.bf16.mxu1 %v21622_v36  ;;  %v21661_v36 = vld [vmem:[%s28863_s7 + $0x40c] ss:$16 sps:$4 sm:$0xff]  }
 0x96e   : > { %10930 = vmatpush1.bf16.msra.mxu1 %v21620_v26  ;;  %v10582_v26 = vshrl.u32 %v10490_v43, 16 }
 0x96f   : > { %10931 = vmatprep.subr.bf16.mxu1 %v21625_v53  ;;  %v10585_v53 = vshll.u32 %v10490_v43, 16  ;;  %v21695_v43 = vld [vmem:[%s28863_s7 + $0x588] ss:$16 sps:$4 sm:$0xff]  }
 0x972   : > { %10932 = vmatpush1.bf16.msra.mxu1 %v21623_v48  ;;  %v10597_v48 = vor.u32 %v10596_v9, %v10593_v6  ;;  %v21692_v6 = vld [vmem:[%s28863_s7 + $0x568] ss:$16 sps:$4 sm:$0xff]   ;;  %v21697_v9 = vld [vmem:[%s28863_s7 + $0x58c] ss:$16 sps:$4 sm:$0xff]  }
 0x973   : > { %10933 = vmatprep.subr.bf16.mxu1 %v21628_v15  ;;  %v21659_v15 = vld [vmem:[%s28863_s7 + $0x408] ss:$16 sps:$4 sm:$0xff]  }
 0x976   : > { %10934 = vmatpush1.bf16.msra.mxu1 %v21626_v57  ;;  %v21664_v57 = vld [vmem:[%s28863_s7 + $0x42c] ss:$16 sps:$4 sm:$0xff]  }
 0x977   : > { %10935 = vmatprep.subr.bf16.mxu1 %v21631_v1  ;;  %v10584_v1 = vrot.slane %v10582_v26, 4  ;;  %v21703_v26 = vld [vmem:[%s28863_s7 + $0x5cc] ss:$16 sps:$4 sm:$0xff]  }
 0x97a   : > { %10936 = vmatpush1.bf16.msra.mxu1 %v21629_v61  ;;  %v10587_v61 = vrot.slane %v10585_v53, 5  ;;  %v21701_v53 = vld [vmem:[%s28863_s7 + $0x5c8] ss:$16 sps:$4 sm:$0xff]  }
 0x97b   : > { %10937 = vmatprep.subr.bf16.mxu1 %v21634_v32  ;;  %v26750_v32 = vsel %vm1775_vm2, %v26361_v7, %v10597_v48  ;;  %v21670_v7 = vld [vmem:[%s28863_s7 + $0x46c] ss:$16 sps:$4 sm:$0xff]  }
 0x97c   : > { %v21706_v48 = vld [vmem:[%s28863_s7 + $0x5ec] ss:$16 sps:$4 sm:$0xff]  }
 0x97e   : > { %10938 = vmatpush1.bf16.msra.mxu1 %v21632_v14  ;;  %v21662_v14 = vld [vmem:[%s28863_s7 + $0x428] ss:$16 sps:$4 sm:$0xff]  }
 0x97f   : > { %10939 = vmatprep.subr.bf16.mxu1 %v21637_v22  ;;  %v21667_v22 = vld [vmem:[%s28863_s7 + $0x44c] ss:$16 sps:$4 sm:$0xff]  }
 0x982   : > { %10940 = vmatpush1.bf16.msra.mxu1 %v21635_v55  ;;  %v10588_v55 = vor.u32 %v10587_v61, %v10584_v1  ;;  %v21707_v1 = vld [vmem:[%s28863_s7 + $0x600] ss:$16 sps:$4 sm:$0xff]   ;;  %v11046_v61 = vld [vmem:[#allocation3 + $0x8] sm:$0x80] }
 0x983   : > { %10941 = vmatprep.subr.bf16.mxu1 %v21640_v28  ;;  %v21665_v28 = vld [vmem:[%s28863_s7 + $0x448] ss:$16 sps:$4 sm:$0xff]  }
 0x986   : > { %10942 = vmatpush1.bf16.msra.mxu1 %v21638_v0  ;;  %v26767_v0 = vsel %vm1775_vm2, %v26381_v10, %v10588_v55  ;;  %v21671_v10 = vld [vmem:[%s28863_s7 + $0x488] ss:$16 sps:$4 sm:$0xff]   ;;  %v21710_v55 = vld [vmem:[%s28863_s7 + $0x620] ss:$16 sps:$4 sm:$0xff]  }
 0x987   : > { %10943 = vmatprep.subr.bf16.mxu1 %v21643_v19  ;;  %v21668_v19 = vld [vmem:[%s28863_s7 + $0x468] ss:$16 sps:$4 sm:$0xff]  }
 0x98a   : > { %10944 = vmatpush1.bf16.msra.mxu1 %v21641_v44  ;;  %v21673_v44 = vld [vmem:[%s28863_s7 + $0x48c] ss:$16 sps:$4 sm:$0xff]  }
 0x98b   : > { %10945 = vmatprep.subr.bf16.mxu1 %v21646_v12  ;;  %v21676_v12 = vld [vmem:[%s28863_s7 + $0x4ac] ss:$16 sps:$4 sm:$0xff]  }
 0x98e   : > { %10946 = vmatpush1.bf16.msra.mxu1 %v21644_v16  ;;  %v21679_v16 = vld [vmem:[%s28863_s7 + $0x4cc] ss:$16 sps:$4 sm:$0xff]  }
 0x98f   : > { %10947 = vmatprep.subr.bf16.mxu1 %v21649_v49  ;;  %v21677_v49 = vld [vmem:[%s28863_s7 + $0x4c8] ss:$16 sps:$4 sm:$0xff]  }
 0x992   : > { %10948 = vmatpush1.bf16.msra.mxu1 %v21647_v42  ;;  %v21682_v42 = vld [vmem:[%s28863_s7 + $0x4ec] ss:$16 sps:$4 sm:$0xff]  }
 0x993   : > { %10949 = vmatprep.subr.bf16.mxu1 %v21652_v27  ;;  %v21680_v27 = vld [vmem:[%s28863_s7 + $0x4e8] ss:$16 sps:$4 sm:$0xff]  }
 0x996   : > { %10950 = vmatpush1.bf16.msra.mxu1 %v21650_v59  ;;  %v21685_v59 = vld [vmem:[%s28863_s7 + $0x50c] ss:$16 sps:$4 sm:$0xff]  }
 0x997   : > { %10951 = vmatprep.subr.bf16.mxu1 %v21655_v56  ;;  %v21688_v56 = vld [vmem:[%s28863_s7 + $0x52c] ss:$16 sps:$4 sm:$0xff]  }
 0x99a   : > { %10952 = vmatpush1.bf16.msra.mxu1 %v21653_v46  ;;  %v21689_v46 = vld [vmem:[%s28863_s7 + $0x548] ss:$16 sps:$4 sm:$0xff]  }
 0x99b   : > { %10953 = vmatprep.subr.bf16.mxu1 %v21658_v24  ;;  %v21694_v24 = vld [vmem:[%s28863_s7 + $0x56c] ss:$16 sps:$4 sm:$0xff]  }
 0x99e   : > { %10954 = vmatpush1.bf16.msra.mxu1 %v21656_v51  ;;  %v21700_v51 = vld [vmem:[%s28863_s7 + $0x5ac] ss:$16 sps:$4 sm:$0xff]  }
 0x99f   : > { %10976 = vmatprep.subr.bf16.mxu1 %v21661_v36  ;;  %v21698_v36 = vld [vmem:[%s28863_s7 + $0x5a8] ss:$16 sps:$4 sm:$0xff]  }
 0x9a1   : > { %10956 = vmatmul.mubr.bf16.vlgmr.msra.gmra.mrb[72].mxu1 %v26406_v52 }
 0x9a2   : > { %10965 = vmatprep.mubr.bf16.mxu1 %v26750_v32  ;;  %10977 = vmatpush1.bf16.msra.mxu1 %v21659_v15  ;;  %v21704_v15 = vld [vmem:[%s28863_s7 + $0x5e8] ss:$16 sps:$4 sm:$0xff]  }
 0x9a3   : > { %10978 = vmatprep.subr.bf16.mxu1 %v21664_v57  ;;  %v21709_v57 = vld [vmem:[%s28863_s7 + $0x604] ss:$16 sps:$4 sm:$0xff]  }
 0x9a6   : > { %10979 = vmatpush1.bf16.msra.mxu1 %v21662_v14  ;;  %v21712_v14 = vld [vmem:[%s28863_s7 + $0x624] ss:$16 sps:$4 sm:$0xff]  }
 0x9a7   : > { %10980 = vmatprep.subr.bf16.mxu1 %v21667_v22  ;;  %v11122_v22 = vshrl.u32 %v11046_v61, 16  ;;  %v21746_v61 = vld [vmem:[%s28863_s7 + $0x7a0] ss:$16 sps:$4 sm:$0xff]  }
 0x9a9   : > { %10966 = vmatmul.mubr.bf16.gmra.mrb[76].mxu1 %v26767_v0 }
 0x9aa   : > { %10981 = vmatpush1.bf16.msra.mxu1 %v21665_v28  ;;  %11008 = vmatprep.mubr.bf16.mxu1 %v26379_v11  ;;  %v21674_v11 = vld [vmem:[%s28863_s7 + $0x4a8] ss:$16 sps:$4 sm:$0xff]   ;;  %v21715_v28 = vld [vmem:[%s28863_s7 + $0x644] ss:$16 sps:$4 sm:$0xff]  }
 0x9ab   : > { %10982 = vmatprep.subr.bf16.mxu1 %v21670_v7  ;;  %v11124_v7 = vrot.slane %v11122_v22, 7  ;;  %v11045_v22 = vld [vmem:[#allocation3] sm:$0x80] }
 0x9ae   : > { %10983 = vmatpush1.bf16.msra.mxu1 %v21668_v19  ;;  %v21713_v19 = vld [vmem:[%s28863_s7 + $0x640] ss:$16 sps:$4 sm:$0xff]  }
 0x9af   : > { %10984 = vmatprep.subr.bf16.mxu1 %v21673_v44  ;;  %v21716_v44 = vld [vmem:[%s28863_s7 + $0x660] ss:$16 sps:$4 sm:$0xff]  }
 0x9b2   : > { %10985 = vmatpush1.bf16.msra.mxu1 %v21671_v10  ;;  %v21721_v10 = vld [vmem:[%s28863_s7 + $0x684] ss:$16 sps:$4 sm:$0xff]  }
 0x9b3   : > { %10986 = vmatprep.subr.bf16.mxu1 %v21676_v12 }
 0x9b6   : > { %10987 = vmatpush1.bf16.msra.mxu1 %v21674_v11 }
 0x9b7   : > { %10988 = vmatprep.subr.bf16.mxu1 %v21679_v16 }
 0x9ba   : > { %10989 = vmatpush1.bf16.msra.mxu1 %v21677_v49 }
 0x9bb   : > { %10990 = vmatprep.subr.bf16.mxu1 %v21682_v42  ;;  %v21722_v42 = vld [vmem:[%s28863_s7 + $0x6a0] ss:$16 sps:$4 sm:$0xff]  }
 0x9be   : > { %10991 = vmatpush1.bf16.msra.mxu1 %v21680_v27  ;;  %v21727_v27 = vld [vmem:[%s28863_s7 + $0x6c4] ss:$16 sps:$4 sm:$0xff]  }
 0x9bf   : > { %10992 = vmatprep.subr.bf16.mxu1 %v21685_v59  ;;  %v21725_v59 = vld [vmem:[%s28863_s7 + $0x6c0] ss:$16 sps:$4 sm:$0xff]  }
 0x9c2   : > { %10993 = vmatpush1.bf16.msra.mxu1 %v21683_v38  ;;  %v21730_v38 = vld [vmem:[%s28863_s7 + $0x6e4] ss:$16 sps:$4 sm:$0xff]  }
 0x9c3   : > { %10994 = vmatprep.subr.bf16.mxu1 %v21688_v56  ;;  %v21728_v56 = vld [vmem:[%s28863_s7 + $0x6e0] ss:$16 sps:$4 sm:$0xff]  }
 0x9c6   : > { %10995 = vmatpush1.bf16.msra.mxu1 %v21686_v41  ;;  %v21733_v41 = vld [vmem:[%s28863_s7 + $0x704] ss:$16 sps:$4 sm:$0xff]  }
 0x9c7   : > { %10996 = vmatprep.subr.bf16.mxu1 %v21691_v33  ;;  %v21731_v33 = vld [vmem:[%s28863_s7 + $0x700] ss:$16 sps:$4 sm:$0xff]  }
 0x9ca   : > { %10997 = vmatpush1.bf16.msra.mxu1 %v21689_v46 }
 0x9cb   : > { %10998 = vmatprep.subr.bf16.mxu1 %v21694_v24  ;;  %v21736_v24 = vld [vmem:[%s28863_s7 + $0x724] ss:$16 sps:$4 sm:$0xff]  }
 0x9ce   : > { %10999 = vmatpush1.bf16.msra.mxu1 %v21692_v6 }
 0x9cf   : > { %11000 = vmatprep.subr.bf16.mxu1 %v21697_v9 }
 0x9d2   : > { %11001 = vmatpush1.bf16.msra.mxu1 %v21695_v43 }
 0x9d3   : > { %11002 = vmatprep.subr.bf16.mxu1 %v21700_v51  ;;  %v21734_v51 = vld [vmem:[%s28863_s7 + $0x720] ss:$16 sps:$4 sm:$0xff]  }
 0x9d6   : > { %11003 = vmatpush1.bf16.msra.mxu1 %v21698_v36  ;;  %v21739_v36 = vld [vmem:[%s28863_s7 + $0x744] ss:$16 sps:$4 sm:$0xff]  }
 0x9d7   : > { %11004 = vmatprep.subr.bf16.mxu1 %v21703_v26  ;;  %v21737_v26 = vld [vmem:[%s28863_s7 + $0x740] ss:$16 sps:$4 sm:$0xff]  }
 0x9da   : > { %11005 = vmatpush1.bf16.msra.mxu1 %v21701_v53  ;;  %v21742_v53 = vld [vmem:[%s28863_s7 + $0x764] ss:$16 sps:$4 sm:$0xff]  }
 0x9db   : > { %11006 = vmatprep.subr.bf16.mxu1 %v21706_v48  ;;  %v21740_v48 = vld [vmem:[%s28863_s7 + $0x760] ss:$16 sps:$4 sm:$0xff]  }
 0x9de   : > { %11007 = vmatpush1.bf16.msra.mxu1 %v21704_v15  ;;  %v21745_v15 = vld [vmem:[%s28863_s7 + $0x784] ss:$16 sps:$4 sm:$0xff]  }
 0x9df   : > { %11468 = vmatprep.subr.bf16.mxu1 %v21709_v57  ;;  %v21743_v57 = vld [vmem:[%s28863_s7 + $0x780] ss:$16 sps:$4 sm:$0xff]  }
 0x9e1   : > { %11009 = vmatmul.mubr.bf16.vlgmr.msra.gmra.mrb[80].mxu1 %v26406_v52  ;;  %v21718_v52 = vld [vmem:[%s28863_s7 + $0x664] ss:$16 sps:$4 sm:$0xff]  }
 0x9e2   : > { %11018 = vmatprep.mubr.bf16.mxu1 %v26750_v32  ;;  %11469 = vmatpush1.bf16.msra.mxu1 %v21707_v1  ;;  %v26872_v32 = vsel %vm2375_vm3, %v11124_v7, %v26389_v29  ;;  %v21724_v29 = vld [vmem:[%s28863_s7 + $0x6a4] ss:$16 sps:$4 sm:$0xff]   ;;  %v11115_v7 = vshrl.u32 %v11045_v22, 16  ;;  %v21776_v22 = vld [vmem:[%s28863_s7 + $0x6e8] ss:$16 sps:$4 sm:$0xff]  }
 0x9e3   : > { %11470 = vmatprep.subr.bf16.mxu1 %v21712_v14  ;;  %v21748_v1 = vld [vmem:[%s28863_s7 + $0x7a4] ss:$16 sps:$4 sm:$0xff]  }
 0x9e4   : > { %v21751_v14 = vld [vmem:[%s28863_s7 + $0x7c4] ss:$16 sps:$4 sm:$0xff]  }
 0x9e6   : > { %11471 = vmatpush1.bf16.msra.mxu1 %v21710_v55  ;;  %v21749_v55 = vld [vmem:[%s28863_s7 + $0x7c0] ss:$16 sps:$4 sm:$0xff]  }
 0x9e7   : > { %11472 = vmatprep.subr.bf16.mxu1 %v21715_v28  ;;  %v21754_v28 = vld [vmem:[%s28863_s7 + $0x7e4] ss:$16 sps:$4 sm:$0xff]  }
 0x9e9   : > { %11019 = vmatmul.mubr.bf16.gmra.mrb[84].mxu1 %v26767_v0  ;;  %v21719_v0 = vld [vmem:[%s28863_s7 + $0x680] ss:$16 sps:$4 sm:$0xff]  }
 0x9ea   : > { %11473 = vmatpush1.bf16.msra.mxu1 %v21713_v19  ;;  %11500 = vmatprep.mubr.bf16.mxu1 %v26872_v32  ;;  %v11139_v19 = vrot.slane %v26447_v2, 7  ;;  %v21760_v2 = vld [vmem:[%s28863_s7 + $0x62c] ss:$16 sps:$4 sm:$0xff]  }
 0x9eb   : > { %11474 = vmatprep.subr.bf16.mxu1 %v21718_v52  ;;  %v21752_v52 = vld [vmem:[%s28863_s7 + $0x7e0] ss:$16 sps:$4 sm:$0xff]  }
 0x9ee   : > { %11475 = vmatpush1.bf16.msra.mxu1 %v21716_v44  ;;  %v21757_v44 = vld [vmem:[%s28863_s7 + $0x60c] ss:$16 sps:$4 sm:$0xff]  }
 0x9ef   : > { %v26884_v12 = vpop.f32.mrb[16].mxu0  ;;  %11476 = vmatprep.subr.bf16.mxu1 %v21721_v10  ;;  %v11117_v10 = vrot.slane %v11115_v7, 7  ;;  %v21784_v7 = vld [vmem:[%s28863_s7 + $0x72c] ss:$16 sps:$4 sm:$0xff]  }
 0x9f0   : > { %v26889_v11 = vpop.f32.mrb[17].mxu0 }
 0x9f1   : > { %v26891_v16 = vpop.f32.mrb[18].mxu0 }
 0x9f2   : > { %11477 = vmatpush1.bf16.msra.mxu1 %v21719_v0  ;;  %v26893_v49 = vpop.f32.mrb[19].mxu0  ;;  %v11142_v0 = vor.u32 %v26449_v30, %v11139_v19  ;;  %v21782_v19 = vld [vmem:[%s28863_s7 + $0x728] ss:$16 sps:$4 sm:$0xff]   ;;  %v21911_v30 = vld [vmem:[%s28863_s7 + $0xa80] ss:$16 sps:$4 sm:$0xff]  }
 0x9f3   : > { %11478 = vmatprep.subr.bf16.mxu1 %v21724_v29  ;;  %v21755_v29 = vld [vmem:[%s28863_s7 + $0x608] ss:$16 sps:$4 sm:$0xff]  }
 0x9f6   : > { %11479 = vmatpush1.bf16.msra.mxu1 %v21722_v42  ;;  %v26979_v42 = vsel %vm2375_vm3, %v11117_v10, %v26393_v4  ;;  %v21763_v4 = vld [vmem:[%s28863_s7 + $0x64c] ss:$16 sps:$4 sm:$0xff]  }
 0x9f7   : > { %11480 = vmatprep.subr.bf16.mxu1 %v21727_v27  ;;  %v11131_v27 = vrot.slane %v26467_v3, 7  ;;  %v21790_v10 = vld [vmem:[%s28863_s7 + $0x76c] ss:$16 sps:$4 sm:$0xff]  }
 0x9f9   : > { %v11134_v3 = vor.u32 %v26455_v34, %v11131_v27  ;;  %v21796_v27 = vld [vmem:[%s28863_s7 + $0x7ac] ss:$16 sps:$4 sm:$0xff]  }
 0x9fa   : > { %11481 = vmatpush1.bf16.msra.mxu1 %v21725_v59  ;;  %v26986_v59 = vsel %vm2375_vm3, %v11125_v47, %v11142_v0  ;;  %v21766_v47 = vld [vmem:[%s28863_s7 + $0x66c] ss:$16 sps:$4 sm:$0xff]   ;;  %v21788_v0 = vld [vmem:[%s28863_s7 + $0x768] ss:$16 sps:$4 sm:$0xff]  }
 0x9fb   : > { %11482 = vmatprep.subr.bf16.mxu1 %v21730_v38  ;;  %v21758_v38 = vld [vmem:[%s28863_s7 + $0x628] ss:$16 sps:$4 sm:$0xff]   ;;  %v21955_v34 = vld [vmem:[%s28863_s7 + $0xa4c] ss:$16 sps:$4 sm:$0xff]  }
 0x9fe   : > { %11483 = vmatpush1.bf16.msra.mxu1 %v21728_v56  ;;  %v27005_v56 = vsel %vm2375_vm3, %v11118_v25, %v11134_v3  ;;  %v21797_v3 = vld [vmem:[%s28863_s7 + $0x7c8] ss:$16 sps:$4 sm:$0xff]  }
 0x9ff   : > { %v26916_v46 = vpop.f32.mrb[20].mxu0  ;;  %11484 = vmatprep.subr.bf16.mxu1 %v21733_v41  ;;  %v21764_v41 = vld [vmem:[%s28863_s7 + $0x668] ss:$16 sps:$4 sm:$0xff]  }
 0xa00   : > { %v26921_v6 = vpop.f32.mrb[21].mxu0 }
 0xa01   : > { %v26923_v9 = vpop.f32.mrb[22].mxu0 }
 0xa02   : > { %v26925_v43 = vpop.f32.mrb[23].mxu0  ;;  %11485 = vmatpush1.bf16.msra.mxu1 %v21731_v33  ;;  %v21769_v33 = vld [vmem:[%s28863_s7 + $0x68c] ss:$16 sps:$4 sm:$0xff]  }
 0xa03   : > { %11486 = vmatprep.subr.bf16.mxu1 %v21736_v24 }
 0xa06   : > { %11487 = vmatpush1.bf16.msra.mxu1 %v21734_v51 }
 0xa07   : > { %11488 = vmatprep.subr.bf16.mxu1 %v21739_v36 }
 0xa0a   : > { %11489 = vmatpush1.bf16.msra.mxu1 %v21737_v26  ;;  %v21770_v26 = vld [vmem:[%s28863_s7 + $0x6a8] ss:$16 sps:$4 sm:$0xff]  }
 0xa0b   : > { %11490 = vmatprep.subr.bf16.mxu1 %v21742_v53  ;;  %v21775_v53 = vld [vmem:[%s28863_s7 + $0x6cc] ss:$16 sps:$4 sm:$0xff]  }
 0xa0e   : > { %11491 = vmatpush1.bf16.msra.mxu1 %v21740_v48  ;;  %v21773_v48 = vld [vmem:[%s28863_s7 + $0x6c8] ss:$16 sps:$4 sm:$0xff]  }
 0xa0f   : > { %11492 = vmatprep.subr.bf16.mxu1 %v21745_v15 }
 0xa12   : > { %11493 = vmatpush1.bf16.msra.mxu1 %v21743_v57  ;;  %v21778_v57 = vld [vmem:[%s28863_s7 + $0x6ec] ss:$16 sps:$4 sm:$0xff]  }
 0xa13   : > { %11494 = vmatprep.subr.bf16.mxu1 %v21748_v1 }
 0xa16   : > { %11495 = vmatpush1.bf16.msra.mxu1 %v21746_v61 }
 0xa17   : > { %11496 = vmatprep.subr.bf16.mxu1 %v21751_v14 }
 0xa1a   : > { %11497 = vmatpush1.bf16.msra.mxu1 %v21749_v55  ;;  %v21781_v55 = vld [vmem:[%s28863_s7 + $0x70c] ss:$16 sps:$4 sm:$0xff]  }
 0xa1b   : > { %11498 = vmatprep.subr.bf16.mxu1 %v21754_v28  ;;  %v21779_v28 = vld [vmem:[%s28863_s7 + $0x708] ss:$16 sps:$4 sm:$0xff]  }
 0xa1e   : > { %11499 = vmatpush1.bf16.msra.mxu1 %v21752_v52  ;;  %v21787_v52 = vld [vmem:[%s28863_s7 + $0x74c] ss:$16 sps:$4 sm:$0xff]  }
 0xa1f   : > { %11521 = vmatprep.subr.bf16.mxu1 %v21757_v44  ;;  %v21785_v44 = vld [vmem:[%s28863_s7 + $0x748] ss:$16 sps:$4 sm:$0xff]  }
 0xa21   : > { %11501 = vmatmul.mubr.bf16.vlgmr.msra.gmra.mrb[72].mxu1 %v26979_v42 }
 0xa22   : > { %11510 = vmatprep.mubr.bf16.mxu1 %v26986_v59  ;;  %11522 = vmatpush1.bf16.msra.mxu1 %v21755_v29  ;;  %v21793_v29 = vld [vmem:[%s28863_s7 + $0x78c] ss:$16 sps:$4 sm:$0xff]  }
 0xa23   : > { %11523 = vmatprep.subr.bf16.mxu1 %v21760_v2  ;;  %v21791_v2 = vld [vmem:[%s28863_s7 + $0x788] ss:$16 sps:$4 sm:$0xff]  }
 0xa26   : > { %11524 = vmatpush1.bf16.msra.mxu1 %v21758_v38  ;;  %v21794_v38 = vld [vmem:[%s28863_s7 + $0x7a8] ss:$16 sps:$4 sm:$0xff]  }
 0xa27   : > { %11525 = vmatprep.subr.bf16.mxu1 %v21763_v4  ;;  %v21799_v4 = vld [vmem:[%s28863_s7 + $0x7cc] ss:$16 sps:$4 sm:$0xff]  }
 0xa29   : > { %11511 = vmatmul.mubr.bf16.gmra.mrb[76].mxu1 %v27005_v56 }
 0xa2a   : > { %11526 = vmatpush1.bf16.msra.mxu1 %v21761_v17  ;;  %11553 = vmatprep.mubr.bf16.mxu1 %v26872_v32  ;;  %v21772_v32 = vld [vmem:[%s28863_s7 + $0x6ac] ss:$16 sps:$4 sm:$0xff]  }
 0xa2b   : > { %11527 = vmatprep.subr.bf16.mxu1 %v21766_v47  ;;  %v21802_v17 = vld [vmem:[%s28863_s7 + $0x7ec] ss:$16 sps:$4 sm:$0xff]   ;;  %v21800_v47 = vld [vmem:[%s28863_s7 + $0x7e8] ss:$16 sps:$4 sm:$0xff]  }
 0xa2e   : > { %11528 = vmatpush1.bf16.msra.mxu1 %v21764_v41  ;;  %v21805_v41 = vld [vmem:[%s28863_s7 + $0x804] ss:$16 sps:$4 sm:$0xff]  }
 0xa2f   : > { %v27018_v25 = vpop.f32.mrb[24].mxu0  ;;  %11529 = vmatprep.subr.bf16.mxu1 %v21769_v33  ;;  %v21803_v33 = vld [vmem:[%s28863_s7 + $0x800] ss:$16 sps:$4 sm:$0xff]  }
 0xa30   : > { %v27023_v24 = vpop.f32.mrb[25].mxu0 }
 0xa31   : > { %v27025_v51 = vpop.f32.mrb[26].mxu0 }
 0xa32   : > { %11530 = vmatpush1.bf16.msra.mxu1 %v21767_v8  ;;  %v27027_v36 = vpop.f32.mrb[27].mxu0  ;;  %v21808_v8 = vld [vmem:[%s28863_s7 + $0x824] ss:$16 sps:$4 sm:$0xff]  }
 0xa33   : > { %11531 = vmatprep.subr.bf16.mxu1 %v21772_v32  ;;  %v21806_v32 = vld [vmem:[%s28863_s7 + $0x820] ss:$16 sps:$4 sm:$0xff]  }
 0xa36   : > { %11532 = vmatpush1.bf16.msra.mxu1 %v21770_v26  ;;  %v21811_v26 = vld [vmem:[%s28863_s7 + $0x844] ss:$16 sps:$4 sm:$0xff]  }
 0xa37   : > { %v27038_v15 = vpop.f32.mrb[28].mxu0  ;;  %11533 = vmatprep.subr.bf16.mxu1 %v21775_v53  ;;  %v21809_v53 = vld [vmem:[%s28863_s7 + $0x840] ss:$16 sps:$4 sm:$0xff]  }
 0xa38   : > { %v27043_v1 = vpop.f32.mrb[29].mxu0 }
 0xa39   : > { %v27045_v61 = vpop.f32.mrb[30].mxu0 }
 0xa3a   : > { %11534 = vmatpush1.bf16.msra.mxu1 %v21773_v48  ;;  %v27047_v14 = vpop.f32.mrb[31].mxu0  ;;  %v21812_v48 = vld [vmem:[%s28863_s7 + $0x860] ss:$16 sps:$4 sm:$0xff]  }
 0xa3b   : > { %11535 = vmatprep.subr.bf16.mxu1 %v21778_v57  ;;  %v21817_v57 = vld [vmem:[%s28863_s7 + $0x884] ss:$16 sps:$4 sm:$0xff]  }
 0xa3e   : > { %11536 = vmatpush1.bf16.msra.mxu1 %v21776_v22  ;;  %v21815_v22 = vld [vmem:[%s28863_s7 + $0x880] ss:$16 sps:$4 sm:$0xff]  }
 0xa3f   : > { %11537 = vmatprep.subr.bf16.mxu1 %v21781_v55  ;;  %v21818_v55 = vld [vmem:[%s28863_s7 + $0x8a0] ss:$16 sps:$4 sm:$0xff]  }
 0xa42   : > { %11538 = vmatpush1.bf16.msra.mxu1 %v21779_v28  ;;  %v21823_v28 = vld [vmem:[%s28863_s7 + $0x8c4] ss:$16 sps:$4 sm:$0xff]  }
 0xa43   : > { %11539 = vmatprep.subr.bf16.mxu1 %v21784_v7  ;;  %v21821_v7 = vld [vmem:[%s28863_s7 + $0x8c0] ss:$16 sps:$4 sm:$0xff]  }
 0xa46   : > { %11540 = vmatpush1.bf16.msra.mxu1 %v21782_v19  ;;  %v21826_v19 = vld [vmem:[%s28863_s7 + $0x8e4] ss:$16 sps:$4 sm:$0xff]  }
 0xa47   : > { %11541 = vmatprep.subr.bf16.mxu1 %v21787_v52  ;;  %v21824_v52 = vld [vmem:[%s28863_s7 + $0x8e0] ss:$16 sps:$4 sm:$0xff]  }
 0xa4a   : > { %11542 = vmatpush1.bf16.msra.mxu1 %v21785_v44  ;;  %v21829_v44 = vld [vmem:[%s28863_s7 + $0x904] ss:$16 sps:$4 sm:$0xff]  }
 0xa4b   : > { %11543 = vmatprep.subr.bf16.mxu1 %v21790_v10  ;;  %v21827_v10 = vld [vmem:[%s28863_s7 + $0x900] ss:$16 sps:$4 sm:$0xff]  }
 0xa4e   : > { %11544 = vmatpush1.bf16.msra.mxu1 %v21788_v0  ;;  %v21832_v0 = vld [vmem:[%s28863_s7 + $0x924] ss:$16 sps:$4 sm:$0xff]  }
 0xa4f   : > { %11545 = vmatprep.subr.bf16.mxu1 %v21793_v29  ;;  %v21830_v29 = vld [vmem:[%s28863_s7 + $0x920] ss:$16 sps:$4 sm:$0xff]  }
 0xa52   : > { %11546 = vmatpush1.bf16.msra.mxu1 %v21791_v2  ;;  %v21835_v2 = vld [vmem:[%s28863_s7 + $0x944] ss:$16 sps:$4 sm:$0xff]  }
 0xa53   : > { %11547 = vmatprep.subr.bf16.mxu1 %v21796_v27  ;;  %v21833_v27 = vld [vmem:[%s28863_s7 + $0x940] ss:$16 sps:$4 sm:$0xff]  }
 0xa56   : > { %11548 = vmatpush1.bf16.msra.mxu1 %v21794_v38  ;;  %v21838_v38 = vld [vmem:[%s28863_s7 + $0x964] ss:$16 sps:$4 sm:$0xff]  }
 0xa57   : > { %11549 = vmatprep.subr.bf16.mxu1 %v21799_v4  ;;  %v21836_v4 = vld [vmem:[%s28863_s7 + $0x960] ss:$16 sps:$4 sm:$0xff]  }
 0xa5a   : > { %11550 = vmatpush1.bf16.msra.mxu1 %v21797_v3  ;;  %v21841_v3 = vld [vmem:[%s28863_s7 + $0x984] ss:$16 sps:$4 sm:$0xff]  }
 0xa5b   : > { %11551 = vmatprep.subr.bf16.mxu1 %v21802_v17  ;;  %v21839_v17 = vld [vmem:[%s28863_s7 + $0x980] ss:$16 sps:$4 sm:$0xff]  }
 0xa5e   : > { %11552 = vmatpush1.bf16.msra.mxu1 %v21800_v47  ;;  %v21844_v47 = vld [vmem:[%s28863_s7 + $0x9a4] ss:$16 sps:$4 sm:$0xff]  }
 0xa5f   : > { %11975 = vmatprep.subr.bf16.mxu1 %v21805_v41  ;;  %v21842_v41 = vld [vmem:[%s28863_s7 + $0x9a0] ss:$16 sps:$4 sm:$0xff]  }
 0xa61   : > { %11554 = vmatmul.mubr.bf16.vlgmr.msra.gmra.mrb[80].mxu1 %v26979_v42  ;;  %v21814_v42 = vld [vmem:[%s28863_s7 + $0x864] ss:$16 sps:$4 sm:$0xff]  }
 0xa62   : > { %11563 = vmatprep.mubr.bf16.mxu1 %v26986_v59  ;;  %11976 = vmatpush1.bf16.msra.mxu1 %v21803_v33  ;;  %v27124_v59 = vld [vmem:[#allocation3 + $0x28] sm:$0xff]  ;;  %v21847_v33 = vld [vmem:[%s28863_s7 + $0x9c4] ss:$16 sps:$4 sm:$0xff]  }
 0xa63   : > { %11977 = vmatprep.subr.bf16.mxu1 %v21808_v8  ;;  %v21845_v8 = vld [vmem:[%s28863_s7 + $0x9c0] ss:$16 sps:$4 sm:$0xff]  }
 0xa66   : > { %11978 = vmatpush1.bf16.msra.mxu1 %v21806_v32  ;;  %v21850_v32 = vld [vmem:[%s28863_s7 + $0x9e4] ss:$16 sps:$4 sm:$0xff]  }
 0xa67   : > { %11979 = vmatprep.subr.bf16.mxu1 %v21811_v26  ;;  %v21848_v26 = vld [vmem:[%s28863_s7 + $0x9e0] ss:$16 sps:$4 sm:$0xff]  }
 0xa69   : > { %11564 = vmatmul.mubr.bf16.gmra.mrb[84].mxu1 %v27005_v56  ;;  %v21820_v56 = vld [vmem:[%s28863_s7 + $0x8a4] ss:$16 sps:$4 sm:$0xff]  }
 0xa6a   : > { %11980 = vmatpush1.bf16.msra.mxu1 %v21809_v53  ;;  %12007 = vmatprep.mubr.bf16.mxu1 %v27124_v59  ;;  %v21853_v53 = vld [vmem:[%s28863_s7 + $0x80c] ss:$16 sps:$4 sm:$0xff]  }
 0xa6b   : > { %11981 = vmatprep.subr.bf16.mxu1 %v21814_v42  ;;  %v21851_v42 = vld [vmem:[%s28863_s7 + $0x808] ss:$16 sps:$4 sm:$0xff]  }
 0xa6e   : > { %11982 = vmatpush1.bf16.msra.mxu1 %v21812_v48  ;;  %v21856_v48 = vld [vmem:[%s28863_s7 + $0x82c] ss:$16 sps:$4 sm:$0xff]  }
 0xa6f   : > { %11983 = vmatprep.subr.bf16.mxu1 %v21817_v57  ;;  %v27211_v57 = vld [vmem:[#allocation3 + $0x20] sm:$0xff] }
 0xa72   : > { %11984 = vmatpush1.bf16.msra.mxu1 %v21815_v22  ;;  %v27214_v22 = vld [vmem:[#allocation3 + $0x48] sm:$0xff] }
 0xa73   : > { %11985 = vmatprep.subr.bf16.mxu1 %v21820_v56  ;;  %v21854_v56 = vld [vmem:[%s28863_s7 + $0x828] ss:$16 sps:$4 sm:$0xff]  }
 0xa76   : > { %11986 = vmatpush1.bf16.msra.mxu1 %v21818_v55  ;;  %v21859_v55 = vld [vmem:[%s28863_s7 + $0x84c] ss:$16 sps:$4 sm:$0xff]  }
 0xa77   : > { %11987 = vmatprep.subr.bf16.mxu1 %v21823_v28  ;;  %v21857_v28 = vld [vmem:[%s28863_s7 + $0x848] ss:$16 sps:$4 sm:$0xff]  }
 0xa7a   : > { %11988 = vmatpush1.bf16.msra.mxu1 %v21821_v7  ;;  %v21862_v7 = vld [vmem:[%s28863_s7 + $0x86c] ss:$16 sps:$4 sm:$0xff]  }
 0xa7b   : > { %11989 = vmatprep.subr.bf16.mxu1 %v21826_v19  ;;  %v27229_v19 = vld [vmem:[#allocation3 + $0x40] sm:$0xff] }
 0xa7e   : > { %11990 = vmatpush1.bf16.msra.mxu1 %v21824_v52  ;;  %v21860_v52 = vld [vmem:[%s28863_s7 + $0x868] ss:$16 sps:$4 sm:$0xff]  }
 0xa7f   : > { %11991 = vmatprep.subr.bf16.mxu1 %v21829_v44  ;;  %v21865_v44 = vld [vmem:[%s28863_s7 + $0x88c] ss:$16 sps:$4 sm:$0xff]  }
 0xa82   : > { %11992 = vmatpush1.bf16.msra.mxu1 %v21827_v10  ;;  %v21863_v10 = vld [vmem:[%s28863_s7 + $0x888] ss:$16 sps:$4 sm:$0xff]  }
 0xa83   : > { %11993 = vmatprep.subr.bf16.mxu1 %v21832_v0  ;;  %v21868_v0 = vld [vmem:[%s28863_s7 + $0x8ac] ss:$16 sps:$4 sm:$0xff]  }
 0xa86   : > { %11994 = vmatpush1.bf16.msra.mxu1 %v21830_v29  ;;  %v21871_v29 = vld [vmem:[%s28863_s7 + $0x8cc] ss:$16 sps:$4 sm:$0xff]  }
 0xa87   : > { %11995 = vmatprep.subr.bf16.mxu1 %v21835_v2  ;;  %v21869_v2 = vld [vmem:[%s28863_s7 + $0x8c8] ss:$16 sps:$4 sm:$0xff]  }
 0xa8a   : > { %11996 = vmatpush1.bf16.msra.mxu1 %v21833_v27  ;;  %v21874_v27 = vld [vmem:[%s28863_s7 + $0x8ec] ss:$16 sps:$4 sm:$0xff]  }
 0xa8b   : > { %11997 = vmatprep.subr.bf16.mxu1 %v21838_v38  ;;  %v21872_v38 = vld [vmem:[%s28863_s7 + $0x8e8] ss:$16 sps:$4 sm:$0xff]  }
 0xa8e   : > { %11998 = vmatpush1.bf16.msra.mxu1 %v21836_v4  ;;  %v21877_v4 = vld [vmem:[%s28863_s7 + $0x90c] ss:$16 sps:$4 sm:$0xff]  }
 0xa8f   : > { %11999 = vmatprep.subr.bf16.mxu1 %v21841_v3  ;;  %v21875_v3 = vld [vmem:[%s28863_s7 + $0x908] ss:$16 sps:$4 sm:$0xff]  }
 0xa92   : > { %12000 = vmatpush1.bf16.msra.mxu1 %v21839_v17  ;;  %v21880_v17 = vld [vmem:[%s28863_s7 + $0x92c] ss:$16 sps:$4 sm:$0xff]  }
 0xa93   : > { %12001 = vmatprep.subr.bf16.mxu1 %v21844_v47  ;;  %v21878_v47 = vld [vmem:[%s28863_s7 + $0x928] ss:$16 sps:$4 sm:$0xff]  }
 0xa96   : > { %12002 = vmatpush1.bf16.msra.mxu1 %v21842_v41  ;;  %v21883_v41 = vld [vmem:[%s28863_s7 + $0x94c] ss:$16 sps:$4 sm:$0xff]  }
 0xa97   : > { %12003 = vmatprep.subr.bf16.mxu1 %v21847_v33  ;;  %v21881_v33 = vld [vmem:[%s28863_s7 + $0x948] ss:$16 sps:$4 sm:$0xff]  }
 0xa9a   : > { %12004 = vmatpush1.bf16.msra.mxu1 %v21845_v8  ;;  %v21886_v8 = vld [vmem:[%s28863_s7 + $0x96c] ss:$16 sps:$4 sm:$0xff]  }
 0xa9b   : > { %12005 = vmatprep.subr.bf16.mxu1 %v21850_v32  ;;  %v21884_v32 = vld [vmem:[%s28863_s7 + $0x968] ss:$16 sps:$4 sm:$0xff]  }
 0xa9e   : > { %12006 = vmatpush1.bf16.msra.mxu1 %v21848_v26  ;;  %v21889_v26 = vld [vmem:[%s28863_s7 + $0x98c] ss:$16 sps:$4 sm:$0xff]  }
 0xa9f   : > { %12028 = vmatprep.subr.bf16.mxu1 %v21853_v53  ;;  %v21887_v53 = vld [vmem:[%s28863_s7 + $0x988] ss:$16 sps:$4 sm:$0xff]  }
 0xaa1   : > { %12008 = vmatmul.mubr.bf16.vlgmr.msra.gmra.mrb[72].mxu1 %v27211_v57 }
 0xaa2   : > { %12017 = vmatprep.mubr.bf16.mxu1 %v27214_v22  ;;  %12029 = vmatpush1.bf16.msra.mxu1 %v21851_v42  ;;  %v21892_v42 = vld [vmem:[%s28863_s7 + $0x9ac] ss:$16 sps:$4 sm:$0xff]  }
 0xaa3   : > { %12030 = vmatprep.subr.bf16.mxu1 %v21856_v48  ;;  %v21890_v48 = vld [vmem:[%s28863_s7 + $0x9a8] ss:$16 sps:$4 sm:$0xff]  }
 0xaa6   : > { %12031 = vmatpush1.bf16.msra.mxu1 %v21854_v56  ;;  %v21895_v56 = vld [vmem:[%s28863_s7 + $0x9cc] ss:$16 sps:$4 sm:$0xff]  }
 0xaa7   : > { %12032 = vmatprep.subr.bf16.mxu1 %v21859_v55  ;;  %v21893_v55 = vld [vmem:[%s28863_s7 + $0x9c8] ss:$16 sps:$4 sm:$0xff]  }
 0xaa9   : > { %12018 = vmatmul.mubr.bf16.gmra.mrb[76].mxu1 %v27229_v19 }
 0xaaa   : > { %12033 = vmatpush1.bf16.msra.mxu1 %v21857_v28  ;;  %12060 = vmatprep.mubr.bf16.mxu1 %v27124_v59  ;;  %v21866_v59 = vld [vmem:[%s28863_s7 + $0x8a8] ss:$16 sps:$4 sm:$0xff]   ;;  %v21898_v28 = vld [vmem:[%s28863_s7 + $0x9ec] ss:$16 sps:$4 sm:$0xff]  }
 0xaab   : > { %12034 = vmatprep.subr.bf16.mxu1 %v21862_v7  ;;  %v21896_v7 = vld [vmem:[%s28863_s7 + $0x9e8] ss:$16 sps:$4 sm:$0xff]  }
 0xaae   : > { %12035 = vmatpush1.bf16.msra.mxu1 %v21860_v52  ;;  %v21901_v52 = vld [vmem:[%s28863_s7 + $0xa04] ss:$16 sps:$4 sm:$0xff]  }
 0xaaf   : > { %12036 = vmatprep.subr.bf16.mxu1 %v21865_v44  ;;  %v12098_v44 = vld [vmem:[#allocation3 + $0x28] sm:$0xff] }
 0xab2   : > { %12037 = vmatpush1.bf16.msra.mxu1 %v21863_v10  ;;  %v21899_v10 = vld [vmem:[%s28863_s7 + $0xa00] ss:$16 sps:$4 sm:$0xff]  }
 0xab3   : > { %12038 = vmatprep.subr.bf16.mxu1 %v21868_v0  ;;  %v21904_v0 = vld [vmem:[%s28863_s7 + $0xa24] ss:$16 sps:$4 sm:$0xff]  }
 0xab6   : > { %12039 = vmatpush1.bf16.msra.mxu1 %v21866_v59  ;;  %v12183_v59 = vshll.u32 %v12098_v44, 16 }
 0xab7   : > { %12040 = vmatprep.subr.bf16.mxu1 %v21871_v29  ;;  %v21902_v29 = vld [vmem:[%s28863_s7 + $0xa20] ss:$16 sps:$4 sm:$0xff]  }
 0xaba   : > { %12041 = vmatpush1.bf16.msra.mxu1 %v21869_v2  ;;  %v21907_v2 = vld [vmem:[%s28863_s7 + $0xa44] ss:$16 sps:$4 sm:$0xff]  }
 0xabb   : > { %12042 = vmatprep.subr.bf16.mxu1 %v21874_v27  ;;  %v12185_v27 = vrot.slane %v12183_v59, 1  ;;  %v21940_v59 = vld [vmem:[%s28863_s7 + $0xba4] ss:$16 sps:$4 sm:$0xff]  }
 0xabe   : > { %12043 = vmatpush1.bf16.msra.mxu1 %v21872_v38  ;;  %v12181_v38 = vshrl.u32 %v12098_v44, 16  ;;  %v21932_v44 = vld [vmem:[%s28863_s7 + $0xb60] ss:$16 sps:$4 sm:$0xff]  }
 0xabf   : > { %12044 = vmatprep.subr.bf16.mxu1 %v21877_v4  ;;  %v21905_v4 = vld [vmem:[%s28863_s7 + $0xa40] ss:$16 sps:$4 sm:$0xff]  }
 0xac2   : > { %12045 = vmatpush1.bf16.msra.mxu1 %v21875_v3  ;;  %v21910_v3 = vld [vmem:[%s28863_s7 + $0xa64] ss:$16 sps:$4 sm:$0xff]  }
 0xac3   : > { %12046 = vmatprep.subr.bf16.mxu1 %v21880_v17 }
 0xac6   : > { %12047 = vmatpush1.bf16.msra.mxu1 %v21878_v47  ;;  %v21908_v47 = vld [vmem:[%s28863_s7 + $0xa60] ss:$16 sps:$4 sm:$0xff]  }
 0xac7   : > { %12048 = vmatprep.subr.bf16.mxu1 %v21883_v41  ;;  %v21913_v41 = vld [vmem:[%s28863_s7 + $0xa84] ss:$16 sps:$4 sm:$0xff]  }
 0xaca   : > { %12049 = vmatpush1.bf16.msra.mxu1 %v21881_v33  ;;  %v21914_v33 = vld [vmem:[%s28863_s7 + $0xaa0] ss:$16 sps:$4 sm:$0xff]  }
 0xacb   : > { %12050 = vmatprep.subr.bf16.mxu1 %v21886_v8  ;;  %v21919_v8 = vld [vmem:[%s28863_s7 + $0xac4] ss:$16 sps:$4 sm:$0xff]  }
 0xace   : > { %12051 = vmatpush1.bf16.msra.mxu1 %v21884_v32  ;;  %v21917_v32 = vld [vmem:[%s28863_s7 + $0xac0] ss:$16 sps:$4 sm:$0xff]  }
 0xacf   : > { %12052 = vmatprep.subr.bf16.mxu1 %v21889_v26  ;;  %v21922_v26 = vld [vmem:[%s28863_s7 + $0xae4] ss:$16 sps:$4 sm:$0xff]  }
 0xad2   : > { %12053 = vmatpush1.bf16.msra.mxu1 %v21887_v53  ;;  %v21920_v53 = vld [vmem:[%s28863_s7 + $0xae0] ss:$16 sps:$4 sm:$0xff]  }
 0xad3   : > { %12054 = vmatprep.subr.bf16.mxu1 %v21892_v42  ;;  %v21925_v42 = vld [vmem:[%s28863_s7 + $0xb04] ss:$16 sps:$4 sm:$0xff]  }
 0xad6   : > { %12055 = vmatpush1.bf16.msra.mxu1 %v21890_v48  ;;  %v21923_v48 = vld [vmem:[%s28863_s7 + $0xb00] ss:$16 sps:$4 sm:$0xff]  }
 0xad7   : > { %12056 = vmatprep.subr.bf16.mxu1 %v21895_v56  ;;  %v21928_v56 = vld [vmem:[%s28863_s7 + $0xb24] ss:$16 sps:$4 sm:$0xff]  }
 0xada   : > { %12057 = vmatpush1.bf16.msra.mxu1 %v21893_v55  ;;  %v21926_v55 = vld [vmem:[%s28863_s7 + $0xb20] ss:$16 sps:$4 sm:$0xff]  }
 0xadb   : > { %12058 = vmatprep.subr.bf16.mxu1 %v21898_v28  ;;  %v21931_v28 = vld [vmem:[%s28863_s7 + $0xb44] ss:$16 sps:$4 sm:$0xff]  }
 0xade   : > { %12059 = vmatpush1.bf16.msra.mxu1 %v21896_v7  ;;  %v21929_v7 = vld [vmem:[%s28863_s7 + $0xb40] ss:$16 sps:$4 sm:$0xff]  }
 0xadf   : > { %12532 = vmatprep.subr.bf16.mxu1 %v21901_v52  ;;  %v21934_v52 = vld [vmem:[%s28863_s7 + $0xb64] ss:$16 sps:$4 sm:$0xff]  }
 0xae1   : > { %12061 = vmatmul.mubr.bf16.vlgmr.msra.gmra.mrb[80].mxu1 %v27211_v57  ;;  %v12186_v57 = vor.u32 %v12185_v27, %v12181_v38  ;;  %v12097_v27 = vld [vmem:[#allocation3 + $0x20] sm:$0xff] }
 0xae2   : > { %12070 = vmatprep.mubr.bf16.mxu1 %v27214_v22  ;;  %12533 = vmatpush1.bf16.msra.mxu1 %v21899_v10  ;;  %v21937_v10 = vld [vmem:[%s28863_s7 + $0xb84] ss:$16 sps:$4 sm:$0xff]   ;;  %v21941_v38 = vld [vmem:[%s28863_s7 + $0xbc0] ss:$16 sps:$4 sm:$0xff]  }
 0xae3   : > { %12534 = vmatprep.subr.bf16.mxu1 %v21904_v0  ;;  %v27335_v17 = vsel %vm3454_vm4, %v12186_v57, %v12190_v60  ;;  %v21916_v60 = vld [vmem:[%s28863_s7 + $0xaa4] ss:$16 sps:$4 sm:$0xff]   ;;  %v21935_v0 = vld [vmem:[%s28863_s7 + $0xb80] ss:$16 sps:$4 sm:$0xff]   ;;  %v12102_v57 = vld [vmem:[#allocation3 + $0x68] sm:$0x1] }
 0xae6   : > { %12535 = vmatpush1.bf16.msra.mxu1 %v21902_v29  ;;  %v21938_v29 = vld [vmem:[%s28863_s7 + $0xba0] ss:$16 sps:$4 sm:$0xff]  }
 0xae7   : > { %12536 = vmatprep.subr.bf16.mxu1 %v21907_v2  ;;  %v21943_v2 = vld [vmem:[%s28863_s7 + $0xbc4] ss:$16 sps:$4 sm:$0xff]  }
 0xae9   : > { %12071 = vmatmul.mubr.bf16.gmra.mrb[84].mxu1 %v27229_v19 }
 0xaea   : > { %12537 = vmatpush1.bf16.msra.mxu1 %v21905_v4  ;;  %12564 = vmatprep.mubr.bf16.mxu1 %v27335_v17  ;;  %v12171_v4 = vshll.u32 %v12097_v27, 16 }
 0xaeb   : > { %12538 = vmatprep.subr.bf16.mxu1 %v21910_v3  ;;  %v21946_v3 = vld [vmem:[%s28863_s7 + $0xbe4] ss:$16 sps:$4 sm:$0xff]  }
 0xaee   : > { %12539 = vmatpush1.bf16.msra.mxu1 %v21908_v47  ;;  %v12204_v47 = vshll.u32 %v12102_v57, 16  ;;  %v21976_v57 = vld [vmem:[%s28863_s7 + $0xb2c] ss:$16 sps:$4 sm:$0xff]  }
 0xaef   : > { %12540 = vmatprep.subr.bf16.mxu1 %v21913_v41  ;;  %v21944_v41 = vld [vmem:[%s28863_s7 + $0xbe0] ss:$16 sps:$4 sm:$0xff]  }
 0xaf2   : > { %12541 = vmatpush1.bf16.msra.mxu1 %v21911_v30  ;;  %v12173_v30 = vrot.slane %v12171_v4, 1  ;;  %v21971_v4 = vld [vmem:[%s28863_s7 + $0xb08] ss:$16 sps:$4 sm:$0xff]  }
 0xaf3   : > { %12542 = vmatprep.subr.bf16.mxu1 %v21916_v60  ;;  %v21949_v60 = vld [vmem:[%s28863_s7 + $0xa0c] ss:$16 sps:$4 sm:$0xff]  }
 0xaf6   : > { %12543 = vmatpush1.bf16.msra.mxu1 %v21914_v33  ;;  %v12169_v33 = vshrl.u32 %v12097_v27, 16  ;;  %v21968_v27 = vld [vmem:[%s28863_s7 + $0xae8] ss:$16 sps:$4 sm:$0xff]  }
 0xaf7   : > { %12544 = vmatprep.subr.bf16.mxu1 %v21919_v8  ;;  %v12206_v8 = vrot.slane %v12204_v47, 1  ;;  %v21979_v47 = vld [vmem:[%s28863_s7 + $0xb4c] ss:$16 sps:$4 sm:$0xff]  }
 0xafa   : > { %12545 = vmatpush1.bf16.msra.mxu1 %v21917_v32  ;;  %v12101_v32 = vld [vmem:[#allocation3 + $0x60] sm:$0x1] }
 0xafb   : > { %12546 = vmatprep.subr.bf16.mxu1 %v21922_v26  ;;  %v12174_v26 = vor.u32 %v12173_v30, %v12169_v33  ;;  %v21982_v30 = vld [vmem:[%s28863_s7 + $0xb6c] ss:$16 sps:$4 sm:$0xff]  }
 0xafc   : > { %v21985_v33 = vld [vmem:[%s28863_s7 + $0xb8c] ss:$16 sps:$4 sm:$0xff]  }
 0xafe   : > { %12547 = vmatpush1.bf16.msra.mxu1 %v21920_v53  ;;  %v21947_v53 = vld [vmem:[%s28863_s7 + $0xa08] ss:$16 sps:$4 sm:$0xff]  }
 0xaff   : > { %12548 = vmatprep.subr.bf16.mxu1 %v21925_v42  ;;  %v21952_v42 = vld [vmem:[%s28863_s7 + $0xa2c] ss:$16 sps:$4 sm:$0xff]  }
 0xb02   : > { %12549 = vmatpush1.bf16.msra.mxu1 %v21923_v48  ;;  %v27425_v48 = vsel %vm3454_vm4, %v12174_v26, %v12178_v58  ;;  %v21986_v26 = vld [vmem:[%s28863_s7 + $0xba8] ss:$16 sps:$4 sm:$0xff]  }
 0xb03   : > { %12550 = vmatprep.subr.bf16.mxu1 %v21928_v56  ;;  %v12196_v56 = vshll.u32 %v12101_v32, 16  ;;  %v21988_v32 = vld [vmem:[%s28863_s7 + $0xbac] ss:$16 sps:$4 sm:$0xff]  }
 0xb05   : > { %v12198_v58 = vrot.slane %v12196_v56, 1  ;;  %v21994_v56 = vld [vmem:[%s28863_s7 + $0xbec] ss:$16 sps:$4 sm:$0xff]  }
 0xb06   : > { %12551 = vmatpush1.bf16.msra.mxu1 %v21926_v55  ;;  %v27430_v55 = vsel %vm3454_vm4, %v26484_v21, %v12206_v8  ;;  %v21958_v21 = vld [vmem:[%s28863_s7 + $0xa6c] ss:$16 sps:$4 sm:$0xff]   ;;  %v21983_v8 = vld [vmem:[%s28863_s7 + $0xb88] ss:$16 sps:$4 sm:$0xff]  }
 0xb07   : > { %12552 = vmatprep.subr.bf16.mxu1 %v21931_v28  ;;  %v21950_v28 = vld [vmem:[%s28863_s7 + $0xa28] ss:$16 sps:$4 sm:$0xff]  }
 0xb0a   : > { %12553 = vmatpush1.bf16.msra.mxu1 %v21929_v7  ;;  %v21953_v7 = vld [vmem:[%s28863_s7 + $0xa48] ss:$16 sps:$4 sm:$0xff]  }
 0xb0b   : > { %12554 = vmatprep.subr.bf16.mxu1 %v21934_v52  ;;  %v27447_v52 = vsel %vm3454_vm4, %v26493_v5, %v12198_v58  ;;  %v21959_v5 = vld [vmem:[%s28863_s7 + $0xa88] ss:$16 sps:$4 sm:$0xff]  }
 0xb0c   : > { %v12655_v58 = vld [vmem:[#allocation3 + $0x28] sm:$0xf8] }
 0xb0e   : > { %12555 = vmatpush1.bf16.msra.mxu1 %v21932_v44  ;;  %v21956_v44 = vld [vmem:[%s28863_s7 + $0xa68] ss:$16 sps:$4 sm:$0xff]  }
 0xb0f   : > { %12556 = vmatprep.subr.bf16.mxu1 %v21937_v10  ;;  %v21961_v10 = vld [vmem:[%s28863_s7 + $0xa8c] ss:$16 sps:$4 sm:$0xff]  }
 0xb12   : > { %12557 = vmatpush1.bf16.msra.mxu1 %v21935_v0  ;;  %v21964_v0 = vld [vmem:[%s28863_s7 + $0xaac] ss:$16 sps:$4 sm:$0xff]  }
 0xb13   : > { %12558 = vmatprep.subr.bf16.mxu1 %v21940_v59  ;;  %v21967_v59 = vld [vmem:[%s28863_s7 + $0xacc] ss:$16 sps:$4 sm:$0xff]  }
 0xb16   : > { %12559 = vmatpush1.bf16.msra.mxu1 %v21938_v29  ;;  %v21965_v29 = vld [vmem:[%s28863_s7 + $0xac8] ss:$16 sps:$4 sm:$0xff]  }
 0xb17   : > { %12560 = vmatprep.subr.bf16.mxu1 %v21943_v2  ;;  %v21970_v2 = vld [vmem:[%s28863_s7 + $0xaec] ss:$16 sps:$4 sm:$0xff]  }
 0xb1a   : > { %12561 = vmatpush1.bf16.msra.mxu1 %v21941_v38  ;;  %v21973_v38 = vld [vmem:[%s28863_s7 + $0xb0c] ss:$16 sps:$4 sm:$0xff]  }
 0xb1b   : > { %12562 = vmatprep.subr.bf16.mxu1 %v21946_v3  ;;  %v21974_v3 = vld [vmem:[%s28863_s7 + $0xb28] ss:$16 sps:$4 sm:$0xff]  }
 0xb1e   : > { %12563 = vmatpush1.bf16.msra.mxu1 %v21944_v41  ;;  %v21977_v41 = vld [vmem:[%s28863_s7 + $0xb48] ss:$16 sps:$4 sm:$0xff]  }
 0xb1f   : > { %12585 = vmatprep.subr.bf16.mxu1 %v21949_v60  ;;  %v21980_v60 = vld [vmem:[%s28863_s7 + $0xb68] ss:$16 sps:$4 sm:$0xff]  }
 0xb21   : > { %12565 = vmatmul.mubr.bf16.vlgmr.msra.gmra.mrb[72].mxu1 %v27425_v48 }
 0xb22   : > { %12574 = vmatprep.mubr.bf16.mxu1 %v27430_v55  ;;  %12586 = vmatpush1.bf16.msra.mxu1 %v21947_v53  ;;  %v21991_v53 = vld [vmem:[%s28863_s7 + $0xbcc] ss:$16 sps:$4 sm:$0xff]  }
 0xb23   : > { %12587 = vmatprep.subr.bf16.mxu1 %v21952_v42  ;;  %v21989_v42 = vld [vmem:[%s28863_s7 + $0xbc8] ss:$16 sps:$4 sm:$0xff]  }
 0xb26   : > { %12588 = vmatpush1.bf16.msra.mxu1 %v21950_v28  ;;  %v21992_v28 = vld [vmem:[%s28863_s7 + $0xbe8] ss:$16 sps:$4 sm:$0xff]  }
 0xb27   : > { %12589 = vmatprep.subr.bf16.mxu1 %v21955_v34  ;;  %v21997_v34 = vld [vmem:[%s28863_s7 + $0xc04] ss:$16 sps:$4 sm:$0xff]  }
 0xb29   : > { %12575 = vmatmul.mubr.bf16.gmra.mrb[76].mxu1 %v27447_v52 }
 0xb2a   : > { %12590 = vmatpush1.bf16.msra.mxu1 %v21953_v7  ;;  %12617 = vmatprep.mubr.bf16.mxu1 %v27335_v17  ;;  %v21962_v17 = vld [vmem:[%s28863_s7 + $0xaa8] ss:$16 sps:$4 sm:$0xff]   ;;  %v21995_v7 = vld [vmem:[%s28863_s7 + $0xc00] ss:$16 sps:$4 sm:$0xff]  }
 0xb2b   : > { %12591 = vmatprep.subr.bf16.mxu1 %v21958_v21  ;;  %v22000_v21 = vld [vmem:[%s28863_s7 + $0xc24] ss:$16 sps:$4 sm:$0xff]  }
 0xb2e   : > { %12592 = vmatpush1.bf16.msra.mxu1 %v21956_v44  ;;  %v12736_v44 = vshrl.u32 %v12655_v58, 16 }
 0xb2f   : > { %12593 = vmatprep.subr.bf16.mxu1 %v21961_v10  ;;  %v12739_v10 = vshll.u32 %v12655_v58, 16  ;;  %v22036_v58 = vld [vmem:[%s28863_s7 + $0xda4] ss:$16 sps:$4 sm:$0xff]  }
 0xb32   : > { %12594 = vmatpush1.bf16.msra.mxu1 %v21959_v5  ;;  %v21998_v5 = vld [vmem:[%s28863_s7 + $0xc20] ss:$16 sps:$4 sm:$0xff]  }
 0xb33   : > { %12595 = vmatprep.subr.bf16.mxu1 %v21964_v0  ;;  %v22003_v0 = vld [vmem:[%s28863_s7 + $0xc44] ss:$16 sps:$4 sm:$0xff]  }
 0xb36   : > { %12596 = vmatpush1.bf16.msra.mxu1 %v21962_v17  ;;  %v12738_v17 = vrot.slane %v12736_v44, 3  ;;  %v22039_v44 = vld [vmem:[%s28863_s7 + $0xdc4] ss:$16 sps:$4 sm:$0xff]  }
 0xb37   : > { %12597 = vmatprep.subr.bf16.mxu1 %v21967_v59  ;;  %v12741_v59 = vrot.slane %v12739_v10, 4  ;;  %v12654_v10 = vld [vmem:[#allocation3 + $0x20] sm:$0xf8] }
 0xb3a   : > { %12598 = vmatpush1.bf16.msra.mxu1 %v21965_v29  ;;  %v22001_v29 = vld [vmem:[%s28863_s7 + $0xc40] ss:$16 sps:$4 sm:$0xff]  }
 0xb3b   : > { %12599 = vmatprep.subr.bf16.mxu1 %v21970_v2 }
 0xb3e   : > { %12600 = vmatpush1.bf16.msra.mxu1 %v21968_v27  ;;  %v22004_v27 = vld [vmem:[%s28863_s7 + $0xc60] ss:$16 sps:$4 sm:$0xff]  }
 0xb3f   : > { %12601 = vmatprep.subr.bf16.mxu1 %v21973_v38  ;;  %v22009_v38 = vld [vmem:[%s28863_s7 + $0xc84] ss:$16 sps:$4 sm:$0xff]  }
 0xb42   : > { %12602 = vmatpush1.bf16.msra.mxu1 %v21971_v4  ;;  %v22012_v4 = vld [vmem:[%s28863_s7 + $0xca4] ss:$16 sps:$4 sm:$0xff]  }
 0xb43   : > { %12603 = vmatprep.subr.bf16.mxu1 %v21976_v57  ;;  %v22010_v57 = vld [vmem:[%s28863_s7 + $0xca0] ss:$16 sps:$4 sm:$0xff]  }
 0xb46   : > { %12604 = vmatpush1.bf16.msra.mxu1 %v21974_v3  ;;  %v22015_v3 = vld [vmem:[%s28863_s7 + $0xcc4] ss:$16 sps:$4 sm:$0xff]  }
 0xb47   : > { %12605 = vmatprep.subr.bf16.mxu1 %v21979_v47  ;;  %v22013_v47 = vld [vmem:[%s28863_s7 + $0xcc0] ss:$16 sps:$4 sm:$0xff]  }
 0xb4a   : > { %12606 = vmatpush1.bf16.msra.mxu1 %v21977_v41  ;;  %v22018_v41 = vld [vmem:[%s28863_s7 + $0xce4] ss:$16 sps:$4 sm:$0xff]  }
 0xb4b   : > { %12607 = vmatprep.subr.bf16.mxu1 %v21982_v30  ;;  %v22016_v30 = vld [vmem:[%s28863_s7 + $0xce0] ss:$16 sps:$4 sm:$0xff]  }
 0xb4e   : > { %12608 = vmatpush1.bf16.msra.mxu1 %v21980_v60  ;;  %v22021_v60 = vld [vmem:[%s28863_s7 + $0xd04] ss:$16 sps:$4 sm:$0xff]  }
 0xb4f   : > { %12609 = vmatprep.subr.bf16.mxu1 %v21985_v33  ;;  %v22019_v33 = vld [vmem:[%s28863_s7 + $0xd00] ss:$16 sps:$4 sm:$0xff]  }
 0xb52   : > { %12610 = vmatpush1.bf16.msra.mxu1 %v21983_v8  ;;  %v22024_v8 = vld [vmem:[%s28863_s7 + $0xd24] ss:$16 sps:$4 sm:$0xff]  }
 0xb53   : > { %12611 = vmatprep.subr.bf16.mxu1 %v21988_v32  ;;  %v22022_v32 = vld [vmem:[%s28863_s7 + $0xd20] ss:$16 sps:$4 sm:$0xff]  }
 0xb56   : > { %12612 = vmatpush1.bf16.msra.mxu1 %v21986_v26  ;;  %v22027_v26 = vld [vmem:[%s28863_s7 + $0xd44] ss:$16 sps:$4 sm:$0xff]  }
 0xb57   : > { %12613 = vmatprep.subr.bf16.mxu1 %v21991_v53  ;;  %v22025_v53 = vld [vmem:[%s28863_s7 + $0xd40] ss:$16 sps:$4 sm:$0xff]  }
 0xb5a   : > { %12614 = vmatpush1.bf16.msra.mxu1 %v21989_v42  ;;  %v22030_v42 = vld [vmem:[%s28863_s7 + $0xd64] ss:$16 sps:$4 sm:$0xff]  }
 0xb5b   : > { %12615 = vmatprep.subr.bf16.mxu1 %v21994_v56  ;;  %v22028_v56 = vld [vmem:[%s28863_s7 + $0xd60] ss:$16 sps:$4 sm:$0xff]  }
 0xb5e   : > { %12616 = vmatpush1.bf16.msra.mxu1 %v21992_v28  ;;  %v22033_v28 = vld [vmem:[%s28863_s7 + $0xd84] ss:$16 sps:$4 sm:$0xff]  }
 0xb5f   : > { %13089 = vmatprep.subr.bf16.mxu1 %v21997_v34  ;;  %v22031_v34 = vld [vmem:[%s28863_s7 + $0xd80] ss:$16 sps:$4 sm:$0xff]  }
 0xb61   : > { %12618 = vmatmul.mubr.bf16.vlgmr.msra.gmra.mrb[80].mxu1 %v27425_v48  ;;  %v12742_v48 = vor.u32 %v12741_v59, %v12738_v17  ;;  %v22037_v17 = vld [vmem:[%s28863_s7 + $0xdc0] ss:$16 sps:$4 sm:$0xff]   ;;  %v12724_v59 = vshrl.u32 %v12654_v10, 16 }
 0xb62   : > { %12627 = vmatprep.mubr.bf16.mxu1 %v27430_v55  ;;  %13090 = vmatpush1.bf16.msra.mxu1 %v21995_v7  ;;  %v22006_v55 = vld [vmem:[%s28863_s7 + $0xc64] ss:$16 sps:$4 sm:$0xff]   ;;  %v22034_v7 = vld [vmem:[%s28863_s7 + $0xda0] ss:$16 sps:$4 sm:$0xff]  }
 0xb63   : > { %13091 = vmatprep.subr.bf16.mxu1 %v22000_v21  ;;  %v27552_v2 = vsel %vm1167_vm1, %v12742_v48, %v26506_v18  ;;  %v27618_v21 = vld [vmem:[#allocation3 + $0x68] sm:$0xf]  ;;  %v22042_v48 = vld [vmem:[%s28863_s7 + $0xde4] ss:$16 sps:$4 sm:$0xff]  }
 0xb66   : > { %13092 = vmatpush1.bf16.msra.mxu1 %v21998_v5  ;;  %v12757_v5 = vshrl.u32 %v27618_v21, 16 }
 0xb67   : > { %13093 = vmatprep.subr.bf16.mxu1 %v22003_v0  ;;  %v12760_v0 = vshll.u32 %v27618_v21, 16 }
 0xb69   : > { %12628 = vmatmul.mubr.bf16.gmra.mrb[84].mxu1 %v27447_v52  ;;  %v22007_v52 = vld [vmem:[%s28863_s7 + $0xc80] ss:$16 sps:$4 sm:$0xff]  }
 0xb6a   : > { %13094 = vmatpush1.bf16.msra.mxu1 %v22001_v29  ;;  %13121 = vmatprep.mubr.bf16.mxu1 %v27552_v2  ;;  %v12727_v29 = vshll.u32 %v12654_v10, 16  ;;  %v22057_v10 = vld [vmem:[%s28863_s7 + $0xc8c] ss:$16 sps:$4 sm:$0xff]  }
 0xb6b   : > { %13095 = vmatprep.subr.bf16.mxu1 %v22006_v55  ;;  %v12759_v55 = vrot.slane %v12757_v5, 3  ;;  %v22060_v5 = vld [vmem:[%s28863_s7 + $0xcac] ss:$16 sps:$4 sm:$0xff]  }
 0xb6e   : > { %13096 = vmatpush1.bf16.msra.mxu1 %v22004_v27  ;;  %v12762_v27 = vrot.slane %v12760_v0, 4  ;;  %v22063_v0 = vld [vmem:[%s28863_s7 + $0xccc] ss:$16 sps:$4 sm:$0xff]  }
 0xb6f   : > { %13097 = vmatprep.subr.bf16.mxu1 %v22009_v38  ;;  %v27631_v38 = vld [vmem:[#allocation3 + $0x60] sm:$0xf] }
 0xb72   : > { %13098 = vmatpush1.bf16.msra.mxu1 %v22007_v52  ;;  %v22040_v52 = vld [vmem:[%s28863_s7 + $0xde0] ss:$16 sps:$4 sm:$0xff]  }
 0xb73   : > { %13099 = vmatprep.subr.bf16.mxu1 %v22012_v4  ;;  %v12726_v4 = vrot.slane %v12724_v59, 3  ;;  %v22066_v59 = vld [vmem:[%s28863_s7 + $0xcec] ss:$16 sps:$4 sm:$0xff]  }
 0xb76   : > { %13100 = vmatpush1.bf16.msra.mxu1 %v22010_v57  ;;  %v12729_v57 = vrot.slane %v12727_v29, 4  ;;  %v22064_v29 = vld [vmem:[%s28863_s7 + $0xce8] ss:$16 sps:$4 sm:$0xff]  }
 0xb77   : > { %13101 = vmatprep.subr.bf16.mxu1 %v22015_v3  ;;  %v22045_v3 = vld [vmem:[%s28863_s7 + $0xc0c] ss:$16 sps:$4 sm:$0xff]  }
 0xb7a   : > { %13102 = vmatpush1.bf16.msra.mxu1 %v22013_v47  ;;  %v12748_v47 = vshrl.u32 %v27631_v38, 16 }
 0xb7b   : > { %13103 = vmatprep.subr.bf16.mxu1 %v22018_v41  ;;  %v12751_v41 = vshll.u32 %v27631_v38, 16 }
 0xb7e   : > { %13104 = vmatpush1.bf16.msra.mxu1 %v22016_v30  ;;  %v12763_v30 = vor.u32 %v12762_v27, %v12759_v55  ;;  %v22067_v55 = vld [vmem:[%s28863_s7 + $0xd08] ss:$16 sps:$4 sm:$0xff]   ;;  %v22072_v27 = vld [vmem:[%s28863_s7 + $0xd2c] ss:$16 sps:$4 sm:$0xff]  }
 0xb7f   : > { %13105 = vmatprep.subr.bf16.mxu1 %v22021_v60  ;;  %v12730_v60 = vor.u32 %v12729_v57, %v12726_v4  ;;  %v22075_v4 = vld [vmem:[%s28863_s7 + $0xd4c] ss:$16 sps:$4 sm:$0xff]   ;;  %v22073_v57 = vld [vmem:[%s28863_s7 + $0xd48] ss:$16 sps:$4 sm:$0xff]  }
 0xb82   : > { %13106 = vmatpush1.bf16.msra.mxu1 %v22019_v33  ;;  %v22043_v33 = vld [vmem:[%s28863_s7 + $0xc08] ss:$16 sps:$4 sm:$0xff]  }
 0xb83   : > { %13107 = vmatprep.subr.bf16.mxu1 %v22024_v8  ;;  %v22048_v8 = vld [vmem:[%s28863_s7 + $0xc2c] ss:$16 sps:$4 sm:$0xff]  }
 0xb86   : > { %13108 = vmatpush1.bf16.msra.mxu1 %v22022_v32  ;;  %v27649_v32 = vsel %vm1167_vm1, %v12730_v60, %v26512_v13  ;;  %v22084_v60 = vld [vmem:[%s28863_s7 + $0xdac] ss:$16 sps:$4 sm:$0xff]  }
 0xb87   : > { %13109 = vmatprep.subr.bf16.mxu1 %v22027_v26  ;;  %v12750_v26 = vrot.slane %v12748_v47, 3  ;;  %v22076_v47 = vld [vmem:[%s28863_s7 + $0xd68] ss:$16 sps:$4 sm:$0xff]  }
 0xb8a   : > { %13110 = vmatpush1.bf16.msra.mxu1 %v22025_v53  ;;  %v12753_v53 = vrot.slane %v12751_v41, 4  ;;  %v22081_v41 = vld [vmem:[%s28863_s7 + $0xd8c] ss:$16 sps:$4 sm:$0xff]  }
 0xb8b   : > { %13111 = vmatprep.subr.bf16.mxu1 %v22030_v42  ;;  %v27654_v42 = vsel %vm1167_vm1, %v26506_v18, %v12763_v30  ;;  %v22054_v18 = vld [vmem:[%s28863_s7 + $0xc6c] ss:$16 sps:$4 sm:$0xff]   ;;  %v22079_v30 = vld [vmem:[%s28863_s7 + $0xd88] ss:$16 sps:$4 sm:$0xff]  }
 0xb8e   : > { %13112 = vmatpush1.bf16.msra.mxu1 %v22028_v56  ;;  %v22046_v56 = vld [vmem:[%s28863_s7 + $0xc28] ss:$16 sps:$4 sm:$0xff]  }
 0xb8f   : > { %13113 = vmatprep.subr.bf16.mxu1 %v22033_v28  ;;  %v22051_v28 = vld [vmem:[%s28863_s7 + $0xc4c] ss:$16 sps:$4 sm:$0xff]  }
 0xb92   : > { %13114 = vmatpush1.bf16.msra.mxu1 %v22031_v34  ;;  %v12754_v34 = vor.u32 %v12753_v53, %v12750_v26  ;;  %v22085_v26 = vld [vmem:[%s28863_s7 + $0xdc8] ss:$16 sps:$4 sm:$0xff]   ;;  %v22090_v53 = vld [vmem:[%s28863_s7 + $0xdec] ss:$16 sps:$4 sm:$0xff]  }
 0xb93   : > { %13115 = vmatprep.subr.bf16.mxu1 %v22036_v58  ;;  %v22049_v58 = vld [vmem:[%s28863_s7 + $0xc48] ss:$16 sps:$4 sm:$0xff]  }
 0xb96   : > { %13116 = vmatpush1.bf16.msra.mxu1 %v22034_v7  ;;  %v27671_v7 = vsel %vm1167_vm1, %v26512_v13, %v12754_v34  ;;  %v22055_v13 = vld [vmem:[%s28863_s7 + $0xc88] ss:$16 sps:$4 sm:$0xff]   ;;  %v22091_v34 = vld [vmem:[%s28863_s7 + $0xe00] ss:$16 sps:$4 sm:$0xff]  }
 0xb97   : > { %13117 = vmatprep.subr.bf16.mxu1 %v22039_v44  ;;  %v22052_v44 = vld [vmem:[%s28863_s7 + $0xc68] ss:$16 sps:$4 sm:$0xff]  }
 0xb9a   : > { %13118 = vmatpush1.bf16.msra.mxu1 %v22037_v17  ;;  %v22061_v17 = vld [vmem:[%s28863_s7 + $0xcc8] ss:$16 sps:$4 sm:$0xff]  }
 0xb9b   : > { %13119 = vmatprep.subr.bf16.mxu1 %v22042_v48  ;;  %v22069_v48 = vld [vmem:[%s28863_s7 + $0xd0c] ss:$16 sps:$4 sm:$0xff]  }
 0xb9e   : > { %13120 = vmatpush1.bf16.msra.mxu1 %v22040_v52  ;;  %v22070_v52 = vld [vmem:[%s28863_s7 + $0xd28] ss:$16 sps:$4 sm:$0xff]  }
 0xb9f   : > { %13142 = vmatprep.subr.bf16.mxu1 %v22045_v3  ;;  %v22078_v3 = vld [vmem:[%s28863_s7 + $0xd6c] ss:$16 sps:$4 sm:$0xff]  }
 0xba1   : > { %13122 = vmatmul.mubr.bf16.vlgmr.msra.gmra.mrb[72].mxu1 %v27649_v32 }
 0xba2   : > { %13131 = vmatprep.mubr.bf16.mxu1 %v27654_v42  ;;  %13143 = vmatpush1.bf16.msra.mxu1 %v22043_v33  ;;  %v22082_v33 = vld [vmem:[%s28863_s7 + $0xda8] ss:$16 sps:$4 sm:$0xff]  }
 0xba3   : > { %13144 = vmatprep.subr.bf16.mxu1 %v22048_v8  ;;  %v22087_v8 = vld [vmem:[%s28863_s7 + $0xdcc] ss:$16 sps:$4 sm:$0xff]  }
 0xba6   : > { %13145 = vmatpush1.bf16.msra.mxu1 %v22046_v56  ;;  %v22088_v56 = vld [vmem:[%s28863_s7 + $0xde8] ss:$16 sps:$4 sm:$0xff]  }
 0xba7   : > { %13146 = vmatprep.subr.bf16.mxu1 %v22051_v28  ;;  %v22093_v28 = vld [vmem:[%s28863_s7 + $0xe04] ss:$16 sps:$4 sm:$0xff]  }
 0xba9   : > { %13132 = vmatmul.mubr.bf16.gmra.mrb[76].mxu1 %v27671_v7 }
 0xbaa   : > { %13147 = vmatpush1.bf16.msra.mxu1 %v22049_v58  ;;  %13174 = vmatprep.mubr.bf16.mxu1 %v27552_v2  ;;  %v22058_v2 = vld [vmem:[%s28863_s7 + $0xca8] ss:$16 sps:$4 sm:$0xff]   ;;  %v22096_v58 = vld [vmem:[%s28863_s7 + $0xe24] ss:$16 sps:$4 sm:$0xff]  }
 0xbab   : > { %13148 = vmatprep.subr.bf16.mxu1 %v22054_v18  ;;  %v22094_v18 = vld [vmem:[%s28863_s7 + $0xe20] ss:$16 sps:$4 sm:$0xff]  }
 0xbae   : > { %13149 = vmatpush1.bf16.msra.mxu1 %v22052_v44  ;;  %v22099_v44 = vld [vmem:[%s28863_s7 + $0xe44] ss:$16 sps:$4 sm:$0xff]  }
 0xbaf   : > { %13150 = vmatprep.subr.bf16.mxu1 %v22057_v10  ;;  %v13288_v10 = vrot.slane %v27214_v22, 4  ;;  %v22145_v22 = vld [vmem:[%s28863_s7 + $0xe48] ss:$16 sps:$4 sm:$0xff]  }
 0xbb2   : > { %13151 = vmatpush1.bf16.msra.mxu1 %v22055_v13  ;;  %v22097_v13 = vld [vmem:[%s28863_s7 + $0xe40] ss:$16 sps:$4 sm:$0xff]  }
 0xbb3   : > { %13152 = vmatprep.subr.bf16.mxu1 %v22060_v5  ;;  %v22102_v5 = vld [vmem:[%s28863_s7 + $0xe64] ss:$16 sps:$4 sm:$0xff]  }
 0xbb6   : > { %13153 = vmatpush1.bf16.msra.mxu1 %v22058_v2 }
 0xbb7   : > { %13154 = vmatprep.subr.bf16.mxu1 %v22063_v0  ;;  %v22100_v0 = vld [vmem:[%s28863_s7 + $0xe60] ss:$16 sps:$4 sm:$0xff]  }
 0xbba   : > { %13155 = vmatpush1.bf16.msra.mxu1 %v22061_v17  ;;  %v22105_v17 = vld [vmem:[%s28863_s7 + $0xe84] ss:$16 sps:$4 sm:$0xff]  }
 0xbbb   : > { %13156 = vmatprep.subr.bf16.mxu1 %v22066_v59  ;;  %v22108_v59 = vld [vmem:[%s28863_s7 + $0xea4] ss:$16 sps:$4 sm:$0xff]  }
 0xbbe   : > { %13157 = vmatpush1.bf16.msra.mxu1 %v22064_v29  ;;  %v22106_v29 = vld [vmem:[%s28863_s7 + $0xea0] ss:$16 sps:$4 sm:$0xff]  }
 0xbbf   : > { %13158 = vmatprep.subr.bf16.mxu1 %v22069_v48  ;;  %v22111_v48 = vld [vmem:[%s28863_s7 + $0xec4] ss:$16 sps:$4 sm:$0xff]  }
 0xbc2   : > { %13159 = vmatpush1.bf16.msra.mxu1 %v22067_v55  ;;  %v22109_v55 = vld [vmem:[%s28863_s7 + $0xec0] ss:$16 sps:$4 sm:$0xff]  }
 0xbc3   : > { %13160 = vmatprep.subr.bf16.mxu1 %v22072_v27  ;;  %v22114_v27 = vld [vmem:[%s28863_s7 + $0xee4] ss:$16 sps:$4 sm:$0xff]  }
 0xbc6   : > { %13161 = vmatpush1.bf16.msra.mxu1 %v22070_v52  ;;  %v22112_v52 = vld [vmem:[%s28863_s7 + $0xee0] ss:$16 sps:$4 sm:$0xff]  }
 0xbc7   : > { %13162 = vmatprep.subr.bf16.mxu1 %v22075_v4  ;;  %v22117_v4 = vld [vmem:[%s28863_s7 + $0xf04] ss:$16 sps:$4 sm:$0xff]  }
 0xbca   : > { %13163 = vmatpush1.bf16.msra.mxu1 %v22073_v57  ;;  %v22115_v57 = vld [vmem:[%s28863_s7 + $0xf00] ss:$16 sps:$4 sm:$0xff]  }
 0xbcb   : > { %13164 = vmatprep.subr.bf16.mxu1 %v22078_v3  ;;  %v22120_v3 = vld [vmem:[%s28863_s7 + $0xf24] ss:$16 sps:$4 sm:$0xff]  }
 0xbce   : > { %13165 = vmatpush1.bf16.msra.mxu1 %v22076_v47  ;;  %v22118_v47 = vld [vmem:[%s28863_s7 + $0xf20] ss:$16 sps:$4 sm:$0xff]  }
 0xbcf   : > { %13166 = vmatprep.subr.bf16.mxu1 %v22081_v41  ;;  %v22123_v41 = vld [vmem:[%s28863_s7 + $0xf44] ss:$16 sps:$4 sm:$0xff]  }
 0xbd2   : > { %13167 = vmatpush1.bf16.msra.mxu1 %v22079_v30  ;;  %v22121_v30 = vld [vmem:[%s28863_s7 + $0xf40] ss:$16 sps:$4 sm:$0xff]  }
 0xbd3   : > { %13168 = vmatprep.subr.bf16.mxu1 %v22084_v60  ;;  %v22126_v60 = vld [vmem:[%s28863_s7 + $0xf64] ss:$16 sps:$4 sm:$0xff]  }
 0xbd6   : > { %13169 = vmatpush1.bf16.msra.mxu1 %v22082_v33  ;;  %v22124_v33 = vld [vmem:[%s28863_s7 + $0xf60] ss:$16 sps:$4 sm:$0xff]  }
 0xbd7   : > { %13170 = vmatprep.subr.bf16.mxu1 %v22087_v8  ;;  %v22129_v8 = vld [vmem:[%s28863_s7 + $0xf84] ss:$16 sps:$4 sm:$0xff]  }
 0xbda   : > { %13171 = vmatpush1.bf16.msra.mxu1 %v22085_v26  ;;  %v22127_v26 = vld [vmem:[%s28863_s7 + $0xf80] ss:$16 sps:$4 sm:$0xff]  }
 0xbdb   : > { %13172 = vmatprep.subr.bf16.mxu1 %v22090_v53  ;;  %v22132_v53 = vld [vmem:[%s28863_s7 + $0xfa4] ss:$16 sps:$4 sm:$0xff]  }
 0xbde   : > { %13173 = vmatpush1.bf16.msra.mxu1 %v22088_v56  ;;  %v22130_v56 = vld [vmem:[%s28863_s7 + $0xfa0] ss:$16 sps:$4 sm:$0xff]  }
 0xbdf   : > { %13618 = vmatprep.subr.bf16.mxu1 %v22093_v28  ;;  %v22135_v28 = vld [vmem:[%s28863_s7 + $0xfc4] ss:$16 sps:$4 sm:$0xff]  }
 0xbe1   : > { %13175 = vmatmul.mubr.bf16.vlgmr.msra.gmra.mrb[80].mxu1 %v27649_v32  ;;  %v22445_v32 = vld [vmem:[#allocation3 + $0x28] sm:$0xf0] }
 0xbe2   : > { %13184 = vmatprep.mubr.bf16.mxu1 %v27654_v42  ;;  %13619 = vmatpush1.bf16.msra.mxu1 %v22091_v34  ;;  %v13287_v42 = vrot.slane %v22445_v32, 4  ;;  %v22133_v34 = vld [vmem:[%s28863_s7 + $0xfc0] ss:$16 sps:$4 sm:$0xff]   ;;  %v13292_v32 = vrot.slane %v27618_v21, 4  ;;  %v22142_v21 = vld [vmem:[%s28863_s7 + $0xe28] ss:$16 sps:$4 sm:$0xff]  }
 0xbe3   : > { %13620 = vmatprep.subr.bf16.mxu1 %v22096_v58  ;;  %v22138_v58 = vld [vmem:[%s28863_s7 + $0xfe4] ss:$16 sps:$4 sm:$0xff]  }
 0xbe4   : > { %v27778_v2 = vsel %vm712_vm0, %v13287_v42, %v13288_v10  ;;  %v22446_v42 = vld [vmem:[#allocation3 + $0x20] sm:$0xf0] }
 0xbe6   : > { %13621 = vmatpush1.bf16.msra.mxu1 %v22094_v18  ;;  %v22136_v18 = vld [vmem:[%s28863_s7 + $0xfe0] ss:$16 sps:$4 sm:$0xff]  }
 0xbe7   : > { %13622 = vmatprep.subr.bf16.mxu1 %v22099_v44  ;;  %v22141_v44 = vld [vmem:[%s28863_s7 + $0xe0c] ss:$16 sps:$4 sm:$0xff]  }
 0xbe9   : > { %13185 = vmatmul.mubr.bf16.gmra.mrb[84].mxu1 %v27671_v7  ;;  %v22103_v7 = vld [vmem:[%s28863_s7 + $0xe80] ss:$16 sps:$4 sm:$0xff]  }
 0xbea   : > { %13623 = vmatpush1.bf16.msra.mxu1 %v22097_v13  ;;  %13650 = vmatprep.mubr.bf16.mxu1 %v27778_v2  ;;  %v13285_v13 = vrot.slane %v27229_v19, 4  ;;  %v27874_v19 = vsel %vm712_vm0, %v13288_v10, %v13292_v32  ;;  %v22150_v10 = vld [vmem:[%s28863_s7 + $0xe6c] ss:$16 sps:$4 sm:$0xff]  }
 0xbeb   : > { %13624 = vmatprep.subr.bf16.mxu1 %v22102_v5  ;;  %v13284_v5 = vrot.slane %v22446_v42, 4  ;;  %v22186_v32 = vld [vmem:[%s28863_s7 + $0xfec] ss:$16 sps:$4 sm:$0xff]   ;;  %v22184_v42 = vld [vmem:[%s28863_s7 + $0xfe8] ss:$16 sps:$4 sm:$0xff]  }
 0xbee   : > { %13625 = vmatpush1.bf16.msra.mxu1 %v22100_v0  ;;  %v22139_v0 = vld [vmem:[%s28863_s7 + $0xe08] ss:$16 sps:$4 sm:$0xff]  }
 0xbef   : > { %13626 = vmatprep.subr.bf16.mxu1 %v22105_v17  ;;  %v22144_v17 = vld [vmem:[%s28863_s7 + $0xe2c] ss:$16 sps:$4 sm:$0xff]  }
 0xbf2   : > { %13627 = vmatpush1.bf16.msra.mxu1 %v22103_v7  ;;  %v27868_v7 = vsel %vm712_vm0, %v13284_v5, %v13285_v13  ;;  %v22189_v5 = vld [vmem:[%s28863_s7 + $0x1004] ss:$16 sps:$4 sm:$0xff]  }
 0xbf3   : > { %13628 = vmatprep.subr.bf16.mxu1 %v22108_v59  ;;  %v22147_v59 = vld [vmem:[%s28863_s7 + $0xe4c] ss:$16 sps:$4 sm:$0xff]  }
 0xbf6   : > { %13629 = vmatpush1.bf16.msra.mxu1 %v22106_v29  ;;  %v13290_v29 = vrot.slane %v27631_v38, 4  ;;  %v22148_v38 = vld [vmem:[%s28863_s7 + $0xe68] ss:$16 sps:$4 sm:$0xff]  }
 0xbf7   : > { %13630 = vmatprep.subr.bf16.mxu1 %v22111_v48 }
 0xbf8   : > { %v27891_v48 = vsel %vm712_vm0, %v13285_v13, %v13290_v29  ;;  %v22181_v13 = vld [vmem:[%s28863_s7 + $0xfc8] ss:$16 sps:$4 sm:$0xff]   ;;  %v22193_v29 = vld [vmem:[%s28863_s7 + $0x1040] ss:$16 sps:$4 sm:$0xff]  }
 0xbfa   : > { %13631 = vmatpush1.bf16.msra.mxu1 %v22109_v55  ;;  %v22153_v55 = vld [vmem:[%s28863_s7 + $0xe8c] ss:$16 sps:$4 sm:$0xff]  }
 0xbfb   : > { %13632 = vmatprep.subr.bf16.mxu1 %v22114_v27  ;;  %v22151_v27 = vld [vmem:[%s28863_s7 + $0xe88] ss:$16 sps:$4 sm:$0xff]  }
 0xbfe   : > { %13633 = vmatpush1.bf16.msra.mxu1 %v22112_v52  ;;  %v22156_v52 = vld [vmem:[%s28863_s7 + $0xeac] ss:$16 sps:$4 sm:$0xff]  }
 0xbff   : > { %13634 = vmatprep.subr.bf16.mxu1 %v22117_v4  ;;  %v22159_v4 = vld [vmem:[%s28863_s7 + $0xecc] ss:$16 sps:$4 sm:$0xff]  }
 0xc02   : > { %13635 = vmatpush1.bf16.msra.mxu1 %v22115_v57  ;;  %v22157_v57 = vld [vmem:[%s28863_s7 + $0xec8] ss:$16 sps:$4 sm:$0xff]  }
 0xc03   : > { %13636 = vmatprep.subr.bf16.mxu1 %v22120_v3  ;;  %v22162_v3 = vld [vmem:[%s28863_s7 + $0xeec] ss:$16 sps:$4 sm:$0xff]  }
 0xc06   : > { %13637 = vmatpush1.bf16.msra.mxu1 %v22118_v47  ;;  %v22160_v47 = vld [vmem:[%s28863_s7 + $0xee8] ss:$16 sps:$4 sm:$0xff]  }
 0xc07   : > { %13638 = vmatprep.subr.bf16.mxu1 %v22123_v41  ;;  %v22165_v41 = vld [vmem:[%s28863_s7 + $0xf0c] ss:$16 sps:$4 sm:$0xff]  }
 0xc0a   : > { %13639 = vmatpush1.bf16.msra.mxu1 %v22121_v30  ;;  %v22163_v30 = vld [vmem:[%s28863_s7 + $0xf08] ss:$16 sps:$4 sm:$0xff]  }
 0xc0b   : > { %13640 = vmatprep.subr.bf16.mxu1 %v22126_v60  ;;  %v22168_v60 = vld [vmem:[%s28863_s7 + $0xf2c] ss:$16 sps:$4 sm:$0xff]  }
 0xc0e   : > { %13641 = vmatpush1.bf16.msra.mxu1 %v22124_v33  ;;  %v22166_v33 = vld [vmem:[%s28863_s7 + $0xf28] ss:$16 sps:$4 sm:$0xff]  }
 0xc0f   : > { %13642 = vmatprep.subr.bf16.mxu1 %v22129_v8  ;;  %v22171_v8 = vld [vmem:[%s28863_s7 + $0xf4c] ss:$16 sps:$4 sm:$0xff]  }
 0xc12   : > { %13643 = vmatpush1.bf16.msra.mxu1 %v22127_v26  ;;  %v22169_v26 = vld [vmem:[%s28863_s7 + $0xf48] ss:$16 sps:$4 sm:$0xff]  }
 0xc13   : > { %13644 = vmatprep.subr.bf16.mxu1 %v22132_v53  ;;  %v22174_v53 = vld [vmem:[%s28863_s7 + $0xf6c] ss:$16 sps:$4 sm:$0xff]  }
 0xc16   : > { %13645 = vmatpush1.bf16.msra.mxu1 %v22130_v56  ;;  %v22172_v56 = vld [vmem:[%s28863_s7 + $0xf68] ss:$16 sps:$4 sm:$0xff]  }
 0xc17   : > { %13646 = vmatprep.subr.bf16.mxu1 %v22135_v28  ;;  %v22177_v28 = vld [vmem:[%s28863_s7 + $0xf8c] ss:$16 sps:$4 sm:$0xff]  }
 0xc1a   : > { %13647 = vmatpush1.bf16.msra.mxu1 %v22133_v34  ;;  %v22175_v34 = vld [vmem:[%s28863_s7 + $0xf88] ss:$16 sps:$4 sm:$0xff]  }
 0xc1b   : > { %13648 = vmatprep.subr.bf16.mxu1 %v22138_v58  ;;  %v22180_v58 = vld [vmem:[%s28863_s7 + $0xfac] ss:$16 sps:$4 sm:$0xff]  }
 0xc1e   : > { %13649 = vmatpush1.bf16.msra.mxu1 %v22136_v18  ;;  %v22178_v18 = vld [vmem:[%s28863_s7 + $0xfa8] ss:$16 sps:$4 sm:$0xff]  }
 0xc1f   : > { %13671 = vmatprep.subr.bf16.mxu1 %v22141_v44  ;;  %v22183_v44 = vld [vmem:[%s28863_s7 + $0xfcc] ss:$16 sps:$4 sm:$0xff]  }
 0xc21   : > { %13651 = vmatmul.mubr.bf16.vlgmr.msra.gmra.mrb[72].mxu1 %v27868_v7 }
 0xc22   : > { %13660 = vmatprep.mubr.bf16.mxu1 %v27874_v19  ;;  %13672 = vmatpush1.bf16.msra.mxu1 %v22139_v0  ;;  %v22187_v0 = vld [vmem:[%s28863_s7 + $0x1000] ss:$16 sps:$4 sm:$0xff]  }
 0xc23   : > { %13673 = vmatprep.subr.bf16.mxu1 %v22144_v17  ;;  %v22192_v17 = vld [vmem:[%s28863_s7 + $0x1024] ss:$16 sps:$4 sm:$0xff]  }
 0xc26   : > { %13674 = vmatpush1.bf16.msra.mxu1 %v22142_v21  ;;  %v22190_v21 = vld [vmem:[%s28863_s7 + $0x1020] ss:$16 sps:$4 sm:$0xff]  }
 0xc27   : > { %13675 = vmatprep.subr.bf16.mxu1 %v22147_v59  ;;  %v22195_v59 = vld [vmem:[%s28863_s7 + $0x1044] ss:$16 sps:$4 sm:$0xff]  }
 0xc29   : > { %13661 = vmatmul.mubr.bf16.gmra.mrb[76].mxu1 %v27891_v48 }
 0xc2a   : > { %13676 = vmatpush1.bf16.msra.mxu1 %v22145_v22  ;;  %13703 = vmatprep.mubr.bf16.mxu1 %v27778_v2  ;;  %v22154_v2 = vld [vmem:[%s28863_s7 + $0xea8] ss:$16 sps:$4 sm:$0xff]   ;;  %v22201_v22 = vld [vmem:[%s28863_s7 + $0x1084] ss:$16 sps:$4 sm:$0xff]  }
 0xc2b   : > { %13677 = vmatprep.subr.bf16.mxu1 %v22150_v10  ;;  %v22199_v10 = vld [vmem:[%s28863_s7 + $0x1080] ss:$16 sps:$4 sm:$0xff]  }
 0xc2e   : > { %13678 = vmatpush1.bf16.msra.mxu1 %v22148_v38  ;;  %v22202_v38 = vld [vmem:[%s28863_s7 + $0x10a0] ss:$16 sps:$4 sm:$0xff]  }
 0xc2f   : > { %13679 = vmatprep.subr.bf16.mxu1 %v22153_v55  ;;  %v22207_v55 = vld [vmem:[%s28863_s7 + $0x10c4] ss:$16 sps:$4 sm:$0xff]  }
 0xc32   : > { %13680 = vmatpush1.bf16.msra.mxu1 %v22151_v27  ;;  %v22205_v27 = vld [vmem:[%s28863_s7 + $0x10c0] ss:$16 sps:$4 sm:$0xff]  }
 0xc33   : > { %13681 = vmatprep.subr.bf16.mxu1 %v22156_v52  ;;  %v22210_v52 = vld [vmem:[%s28863_s7 + $0x10e4] ss:$16 sps:$4 sm:$0xff]  }
 0xc36   : > { %13682 = vmatpush1.bf16.msra.mxu1 %v22154_v2  ;;  %v22208_v2 = vld [vmem:[%s28863_s7 + $0x10e0] ss:$16 sps:$4 sm:$0xff]  }
 0xc37   : > { %13683 = vmatprep.subr.bf16.mxu1 %v22159_v4  ;;  %v22213_v4 = vld [vmem:[%s28863_s7 + $0x1104] ss:$16 sps:$4 sm:$0xff]  }
 0xc3a   : > { %13684 = vmatpush1.bf16.msra.mxu1 %v22157_v57  ;;  %v22211_v57 = vld [vmem:[%s28863_s7 + $0x1100] ss:$16 sps:$4 sm:$0xff]  }
 0xc3b   : > { %13685 = vmatprep.subr.bf16.mxu1 %v22162_v3  ;;  %v22216_v3 = vld [vmem:[%s28863_s7 + $0x1124] ss:$16 sps:$4 sm:$0xff]  }
 0xc3e   : > { %13686 = vmatpush1.bf16.msra.mxu1 %v22160_v47  ;;  %v22214_v47 = vld [vmem:[%s28863_s7 + $0x1120] ss:$16 sps:$4 sm:$0xff]  }
 0xc3f   : > { %13687 = vmatprep.subr.bf16.mxu1 %v22165_v41  ;;  %v22219_v41 = vld [vmem:[%s28863_s7 + $0x1144] ss:$16 sps:$4 sm:$0xff]  }
 0xc42   : > { %13688 = vmatpush1.bf16.msra.mxu1 %v22163_v30  ;;  %v22217_v30 = vld [vmem:[%s28863_s7 + $0x1140] ss:$16 sps:$4 sm:$0xff]  }
 0xc43   : > { %13689 = vmatprep.subr.bf16.mxu1 %v22168_v60  ;;  %v22222_v60 = vld [vmem:[%s28863_s7 + $0x1164] ss:$16 sps:$4 sm:$0xff]  }
 0xc46   : > { %13690 = vmatpush1.bf16.msra.mxu1 %v22166_v33  ;;  %v22220_v33 = vld [vmem:[%s28863_s7 + $0x1160] ss:$16 sps:$4 sm:$0xff]  }
 0xc47   : > { %13691 = vmatprep.subr.bf16.mxu1 %v22171_v8  ;;  %v22225_v8 = vld [vmem:[%s28863_s7 + $0x1184] ss:$16 sps:$4 sm:$0xff]  }
 0xc4a   : > { %13692 = vmatpush1.bf16.msra.mxu1 %v22169_v26  ;;  %v22223_v26 = vld [vmem:[%s28863_s7 + $0x1180] ss:$16 sps:$4 sm:$0xff]  }
 0xc4b   : > { %13693 = vmatprep.subr.bf16.mxu1 %v22174_v53  ;;  %v22228_v53 = vld [vmem:[%s28863_s7 + $0x11a4] ss:$16 sps:$4 sm:$0xff]  }
 0xc4e   : > { %13694 = vmatpush1.bf16.msra.mxu1 %v22172_v56  ;;  %v22226_v56 = vld [vmem:[%s28863_s7 + $0x11a0] ss:$16 sps:$4 sm:$0xff]  }
 0xc4f   : > { %13695 = vmatprep.subr.bf16.mxu1 %v22177_v28  ;;  %v13741_v28 = vld [vmem:[#allocation3 + $0x68] sm:$0x1f] }
 0xc52   : > { %13696 = vmatpush1.bf16.msra.mxu1 %v22175_v34  ;;  %v22231_v34 = vld [vmem:[%s28863_s7 + $0x11c4] ss:$16 sps:$4 sm:$0xff]  }
 0xc53   : > { %13697 = vmatprep.subr.bf16.mxu1 %v22180_v58  ;;  %v13841_v58 = vshrl.u32 %v13741_v28, 16 }
 0xc56   : > { %13698 = vmatpush1.bf16.msra.mxu1 %v22178_v18  ;;  %v13844_v18 = vshll.u32 %v13741_v28, 16  ;;  %v22265_v28 = vld [vmem:[%s28863_s7 + $0x1148] ss:$16 sps:$4 sm:$0xff]  }
 0xc57   : > { %13699 = vmatprep.subr.bf16.mxu1 %v22183_v44  ;;  %v22229_v44 = vld [vmem:[%s28863_s7 + $0x11c0] ss:$16 sps:$4 sm:$0xff]  }
 0xc5a   : > { %13700 = vmatpush1.bf16.msra.mxu1 %v22181_v13  ;;  %v22234_v13 = vld [vmem:[%s28863_s7 + $0x11e4] ss:$16 sps:$4 sm:$0xff]  }
 0xc5b   : > { %13701 = vmatprep.subr.bf16.mxu1 %v22186_v32  ;;  %v13843_v32 = vrot.slane %v13841_v58, 4  ;;  %v22268_v58 = vld [vmem:[%s28863_s7 + $0x1168] ss:$16 sps:$4 sm:$0xff]  }
 0xc5e   : > { %13702 = vmatpush1.bf16.msra.mxu1 %v22184_v42  ;;  %v13846_v42 = vrot.slane %v13844_v18, 5  ;;  %v22273_v18 = vld [vmem:[%s28863_s7 + $0x118c] ss:$16 sps:$4 sm:$0xff]  }
 0xc5f   : > { %14173 = vmatprep.subr.bf16.mxu1 %v22189_v5  ;;  %v13740_v5 = vld [vmem:[#allocation3 + $0x60] sm:$0x1f] }
 0xc61   : > { %13704 = vmatmul.mubr.bf16.vlgmr.msra.gmra.mrb[80].mxu1 %v27868_v7  ;;  %v22198_v7 = vld [vmem:[%s28863_s7 + $0x1064] ss:$16 sps:$4 sm:$0xff]  }
 0xc62   : > { %13713 = vmatprep.mubr.bf16.mxu1 %v27874_v19  ;;  %14174 = vmatpush1.bf16.msra.mxu1 %v22187_v0  ;;  %v22196_v19 = vld [vmem:[%s28863_s7 + $0x1060] ss:$16 sps:$4 sm:$0xff]  }
 0xc63   : > { %14175 = vmatprep.subr.bf16.mxu1 %v22192_v17  ;;  %v22232_v0 = vld [vmem:[%s28863_s7 + $0x11e0] ss:$16 sps:$4 sm:$0xff]   ;;  %v22237_v17 = vld [vmem:[%s28863_s7 + $0x100c] ss:$16 sps:$4 sm:$0xff]  }
 0xc66   : > { %14176 = vmatpush1.bf16.msra.mxu1 %v22190_v21  ;;  %v13832_v21 = vshrl.u32 %v13740_v5, 16 }
 0xc67   : > { %14177 = vmatprep.subr.bf16.mxu1 %v22195_v59  ;;  %v13835_v59 = vshll.u32 %v13740_v5, 16  ;;  %v22277_v5 = vld [vmem:[%s28863_s7 + $0x11c8] ss:$16 sps:$4 sm:$0xff]  }
 0xc69   : > { %13714 = vmatmul.mubr.bf16.gmra.mrb[84].mxu1 %v27891_v48  ;;  %v22204_v48 = vld [vmem:[%s28863_s7 + $0x10a4] ss:$16 sps:$4 sm:$0xff]  }
 0xc6a   : > { %14178 = vmatpush1.bf16.msra.mxu1 %v22193_v29  ;;  %14205 = vmatprep.mubr.bf16.mxu1 %v26545_v35  ;;  %v13847_v29 = vor.u32 %v13846_v42, %v13843_v32  ;;  %v22274_v32 = vld [vmem:[%s28863_s7 + $0x11a8] ss:$16 sps:$4 sm:$0xff]   ;;  %v22279_v42 = vld [vmem:[%s28863_s7 + $0x11cc] ss:$16 sps:$4 sm:$0xff]  }
 0xc6b   : > { %14179 = vmatprep.subr.bf16.mxu1 %v22198_v7  ;;  %v22235_v7 = vld [vmem:[%s28863_s7 + $0x1008] ss:$16 sps:$4 sm:$0xff]  }
 0xc6e   : > { %14180 = vmatpush1.bf16.msra.mxu1 %v22196_v19  ;;  %v22240_v19 = vld [vmem:[%s28863_s7 + $0x102c] ss:$16 sps:$4 sm:$0xff]  }
 0xc6f   : > { %14181 = vmatprep.subr.bf16.mxu1 %v22201_v22  ;;  %v13834_v22 = vrot.slane %v13832_v21, 4  ;;  %v22283_v21 = vld [vmem:[%s28865_s9 + $0x140] sm:$0xff]  }
 0xc70   : > { %19618 = vmatprep.subr.bf16.mxu0 %v22283_v21 }
 0xc72   : > { %14182 = vmatpush1.bf16.msra.mxu1 %v22199_v10  ;;  %v13837_v10 = vrot.slane %v13835_v59, 5  ;;  %v22284_v59 = vld [vmem:[%s28865_s9 + $0x100] sm:$0xff]  }
 0xc73   : > { %14183 = vmatprep.subr.bf16.mxu1 %v22204_v48  ;;  %v28082_v48 = vsel %vm1775_vm2, %v26536_v20, %v13847_v29  ;;  %v22246_v20 = vld [vmem:[%s28863_s7 + $0x106c] ss:$16 sps:$4 sm:$0xff]   ;;  %19619 = vmatpush3.bf16.msra.mxu0 %v22284_v59 }
 0xc74   : > { %v22285_v29 = vld [vmem:[%s28865_s9 + $0x148] sm:$0xff]  }
 0xc75   : > { %19620 = vmatprep.subr.bf16.mxu0 %v22285_v29 }
 0xc76   : > { %14184 = vmatpush1.bf16.msra.mxu1 %v22202_v38  ;;  %v22238_v38 = vld [vmem:[%s28863_s7 + $0x1028] ss:$16 sps:$4 sm:$0xff]  }
 0xc77   : > { %14185 = vmatprep.subr.bf16.mxu1 %v22207_v55  ;;  %v22243_v55 = vld [vmem:[%s28863_s7 + $0x104c] ss:$16 sps:$4 sm:$0xff]  }
 0xc7a   : > { %14186 = vmatpush1.bf16.msra.mxu1 %v22205_v27  ;;  %v13838_v27 = vor.u32 %v13837_v10, %v13834_v22  ;;  %v22289_v22 = vld [vmem:[%s28865_s9 + $0x158] sm:$0xff]  }
 0xc7b   : > { %14187 = vmatprep.subr.bf16.mxu1 %v22210_v52  ;;  %v22241_v52 = vld [vmem:[%s28863_s7 + $0x1048] ss:$16 sps:$4 sm:$0xff]  }
 0xc7c   : > { %v22290_v10 = vld [vmem:[%s28865_s9 + $0x118] sm:$0xff]  }
 0xc7e   : > { %14188 = vmatpush1.bf16.msra.mxu1 %v22208_v2  ;;  %v13839_v2 = vsel %vm1775_vm2, %v26541_v45, %v13838_v27  ;;  %v22252_v45 = vld [vmem:[%s28863_s7 + $0x10ac] ss:$16 sps:$4 sm:$0xff]  }
 0xc7f   : > { %14189 = vmatprep.subr.bf16.mxu1 %v22213_v4  ;;  %v22244_v4 = vld [vmem:[%s28863_s7 + $0x1068] ss:$16 sps:$4 sm:$0xff]  }
 0xc80   : > { %v22294_v27 = vld [vmem:[%s28865_s9 + $0x128] sm:$0xff]  }
 0xc82   : > { %14190 = vmatpush1.bf16.msra.mxu1 %v22211_v57  ;;  %v22249_v57 = vld [vmem:[%s28863_s7 + $0x108c] ss:$16 sps:$4 sm:$0xff]  }
 0xc83   : > { %14191 = vmatprep.subr.bf16.mxu1 %v22216_v3  ;;  %v22247_v3 = vld [vmem:[%s28863_s7 + $0x1088] ss:$16 sps:$4 sm:$0xff]  }
 0xc86   : > { %14192 = vmatpush1.bf16.msra.mxu1 %v22214_v47  ;;  %v22255_v47 = vld [vmem:[%s28863_s7 + $0x10cc] ss:$16 sps:$4 sm:$0xff]  }
 0xc87   : > { %14193 = vmatprep.subr.bf16.mxu1 %v22219_v41  ;;  %v22253_v41 = vld [vmem:[%s28863_s7 + $0x10c8] ss:$16 sps:$4 sm:$0xff]  }
 0xc8a   : > { %14194 = vmatpush1.bf16.msra.mxu1 %v22217_v30  ;;  %v22258_v30 = vld [vmem:[%s28863_s7 + $0x10ec] ss:$16 sps:$4 sm:$0xff]  }
 0xc8b   : > { %14195 = vmatprep.subr.bf16.mxu1 %v22222_v60  ;;  %v22256_v60 = vld [vmem:[%s28863_s7 + $0x10e8] ss:$16 sps:$4 sm:$0xff]  }
 0xc8e   : > { %14196 = vmatpush1.bf16.msra.mxu1 %v22220_v33  ;;  %v22261_v33 = vld [vmem:[%s28863_s7 + $0x110c] ss:$16 sps:$4 sm:$0xff]  }
 0xc8f   : > { %14197 = vmatprep.subr.bf16.mxu1 %v22225_v8  ;;  %v22259_v8 = vld [vmem:[%s28863_s7 + $0x1108] ss:$16 sps:$4 sm:$0xff]  }
 0xc92   : > { %14198 = vmatpush1.bf16.msra.mxu1 %v22223_v26  ;;  %v22264_v26 = vld [vmem:[%s28863_s7 + $0x112c] ss:$16 sps:$4 sm:$0xff]  }
 0xc93   : > { %14199 = vmatprep.subr.bf16.mxu1 %v22228_v53  ;;  %v22262_v53 = vld [vmem:[%s28863_s7 + $0x1128] ss:$16 sps:$4 sm:$0xff]  }
 0xc96   : > { %14200 = vmatpush1.bf16.msra.mxu1 %v22226_v56  ;;  %v22267_v56 = vld [vmem:[%s28863_s7 + $0x114c] ss:$16 sps:$4 sm:$0xff]  }
 0xc97   : > { %14201 = vmatprep.subr.bf16.mxu1 %v22231_v34  ;;  %v22270_v34 = vld [vmem:[%s28863_s7 + $0x116c] ss:$16 sps:$4 sm:$0xff]  }
 0xc9a   : > { %14202 = vmatpush1.bf16.msra.mxu1 %v22229_v44  ;;  %v22271_v44 = vld [vmem:[%s28863_s7 + $0x1188] ss:$16 sps:$4 sm:$0xff]  }
 0xc9b   : > { %14203 = vmatprep.subr.bf16.mxu1 %v22234_v13  ;;  %v22276_v13 = vld [vmem:[%s28863_s7 + $0x11ac] ss:$16 sps:$4 sm:$0xff]  }
 0xc9e   : > { %14204 = vmatpush1.bf16.msra.mxu1 %v22232_v0  ;;  %v22282_v0 = vld [vmem:[%s28863_s7 + $0x11ec] ss:$16 sps:$4 sm:$0xff]  }
 0xc9f   : > { %14226 = vmatprep.subr.bf16.mxu1 %v22237_v17  ;;  %v22280_v17 = vld [vmem:[%s28863_s7 + $0x11e8] ss:$16 sps:$4 sm:$0xff]  }
 0xca1   : > { %14206 = vmatmul.mubr.bf16.vlgmr.msra.gmra.mrb[72].mxu1 %v26558_v62 }
 0xca2   : > { %14215 = vmatprep.mubr.bf16.mxu1 %v28082_v48  ;;  %14227 = vmatpush1.bf16.msra.mxu1 %v22235_v7  ;;  %v22287_v7 = vld [vmem:[%s28865_s9 + $0x150] sm:$0xff]  }
 0xca3   : > { %14228 = vmatprep.subr.bf16.mxu1 %v22240_v19  ;;  %v22288_v19 = vld [vmem:[%s28865_s9 + $0x110] sm:$0xff]  }
 0xca6   : > { %14229 = vmatpush1.bf16.msra.mxu1 %v22238_v38  ;;  %v22292_v38 = vld [vmem:[%s28865_s9 + $0x120] sm:$0xff]  }
 0xca7   : > { %14230 = vmatprep.subr.bf16.mxu1 %v22243_v55  ;;  %v22293_v55 = vld [vmem:[%s28865_s9 + $0x168] sm:$0xff]  }
 0xca9   : > { %14216 = vmatmul.mubr.bf16.gmra.mrb[76].mxu1 %v13839_v2 }
 0xcaa   : > { %14231 = vmatpush1.bf16.msra.mxu1 %v22241_v52  ;;  %14258 = vmatprep.mubr.bf16.mxu1 %v26545_v35  ;;  %v22250_v35 = vld [vmem:[%s28863_s7 + $0x10a8] ss:$16 sps:$4 sm:$0xff]   ;;  %v22295_v52 = vld [vmem:[%s28865_s9 + $0x170] sm:$0xff]  }
 0xcab   : > { %14232 = vmatprep.subr.bf16.mxu1 %v22246_v20  ;;  %v22296_v20 = vld [vmem:[%s28865_s9 + $0x130] sm:$0xff]  }
 0xcae   : > { %14233 = vmatpush1.bf16.msra.mxu1 %v22244_v4  ;;  %v22298_v4 = vld [vmem:[%s28865_s9 + $0x138] sm:$0xff]  }
 0xcaf   : > { %14234 = vmatprep.subr.bf16.mxu1 %v22249_v57  ;;  %v22299_v57 = vld [vmem:[%s28865_s9 + $0x1c0] sm:$0xff]  }
 0xcb2   : > { %14235 = vmatpush1.bf16.msra.mxu1 %v22247_v3  ;;  %v28231_v3 = vld [vmem:[%s28864_s8] sm:$0xf] }
 0xcb3   : > { %14236 = vmatprep.subr.bf16.mxu1 %v22252_v45  ;;  %v14300_v45 = vrot.slane %v28231_v3, %v24781_v39 }
 0xcb6   : > { %14237 = vmatpush1.bf16.msra.mxu1 %v22250_v35 }
 0xcb7   : > { %14238 = vmatprep.subr.bf16.mxu1 %v22255_v47  ;;  %v14304_v47 = vrot.slane %v28231_v3, %v28906_v37 }
 0xcba   : > { %14239 = vmatpush1.bf16.msra.mxu1 %v22253_v41 }
 0xcbb   : > { %14240 = vmatprep.subr.bf16.mxu1 %v22258_v30 }
 0xcbe   : > { %14241 = vmatpush1.bf16.msra.mxu1 %v22256_v60 }
 0xcbf   : > { %14242 = vmatprep.subr.bf16.mxu1 %v22261_v33 }
 0xcc2   : > { %14243 = vmatpush1.bf16.msra.mxu1 %v22259_v8 }
 0xcc3   : > { %14244 = vmatprep.subr.bf16.mxu1 %v22264_v26 }
 0xcc6   : > { %14245 = vmatpush1.bf16.msra.mxu1 %v22262_v53 }
 0xcc7   : > { %14246 = vmatprep.subr.bf16.mxu1 %v22267_v56 }
 0xcca   : > { %14247 = vmatpush1.bf16.msra.mxu1 %v22265_v28 }
 0xccb   : > { %14248 = vmatprep.subr.bf16.mxu1 %v22270_v34 }
 0xcce   : > { %14249 = vmatpush1.bf16.msra.mxu1 %v22268_v58 }
 0xccf   : > { %14250 = vmatprep.subr.bf16.mxu1 %v22273_v18 }
 0xcd2   : > { %14251 = vmatpush1.bf16.msra.mxu1 %v22271_v44 }
 0xcd3   : > { %14252 = vmatprep.subr.bf16.mxu1 %v22276_v13 }
 0xcd6   : > { %14253 = vmatpush1.bf16.msra.mxu1 %v22274_v32 }
 0xcd7   : > { %14254 = vmatprep.subr.bf16.mxu1 %v22279_v42 }
 0xcda   : > { %14255 = vmatpush1.bf16.msra.mxu1 %v22277_v5 }
 0xcdb   : > { %14256 = vmatprep.subr.bf16.mxu1 %v22282_v0 }
 0xcde   : > { %14257 = vmatpush1.bf16.msra.mxu1 %v22280_v17 }
 0xce1   : > { %14259 = vmatmul.mubr.bf16.vlgmr.msra.gmra.mrb[80].mxu1 %v26558_v62  ;;  %v22286_v62 = vld [vmem:[%s28865_s9 + $0x108] sm:$0xff]  }
 0xce2   : > { %14268 = vmatprep.mubr.bf16.mxu1 %v28082_v48  ;;  %19621 = vmatpush3.bf16.msra.mxu0 %v22286_v62  ;;  %v22291_v48 = vld [vmem:[%s28865_s9 + $0x160] sm:$0xff]  }
 0xce3   : > { %19622 = vmatprep.subr.bf16.mxu0 %v22287_v7 }
 0xce6   : > { %19623 = vmatpush3.bf16.msra.mxu0 %v22288_v19 }
 0xce7   : > { %19624 = vmatprep.subr.bf16.mxu0 %v22289_v22 }
 0xce9   : > { %14269 = vmatmul.mubr.bf16.gmra.mrb[84].mxu1 %v13839_v2  ;;  %v22297_v2 = vld [vmem:[%s28865_s9 + $0x178] sm:$0xff]  }
 0xcea   : > { %19625 = vmatpush3.bf16.msra.mxu0 %v22290_v10 }
 0xceb   : > { %19626 = vmatprep.subr.bf16.mxu0 %v22291_v48 }
 0xcee   : > { %19627 = vmatpush3.bf16.msra.mxu0 %v22292_v38 }
 0xcef   : > { %19628 = vmatprep.subr.bf16.mxu0 %v22293_v55 }
 0xcf2   : > { %19629 = vmatpush3.bf16.msra.mxu0 %v22294_v27  ;;  %v14470_v27 = vld [vmem:[#allocation2 + $0x48] sm:$0x1] }
 0xcf3   : > { %19630 = vmatprep.subr.bf16.mxu0 %v22295_v52 }
 0xcf6   : > { %19631 = vmatpush3.bf16.msra.mxu0 %v22296_v20 }
 0xcf7   : > { %19632 = vmatprep.subr.bf16.mxu0 %v22297_v2 }
 0xcfa   : > { %19633 = vmatpush3.bf16.msra.mxu0 %v22298_v4 }
 0xcfb   : > { %19646 = vmatprep.subr.bf16.mxu0 %v22299_v57 }
 0xd74   : > { %v14207_v35 = vpop.f32.mrb[72].mxu1 }
 0xd75   : > { %v19842_v41 = vadd.f32 %v14207_v35, %v26884_v12  ;;  %v14209_v30 = vpop.f32.mrb[73].mxu1  ;;  %v14598_v35 = vshll.u32 %v14470_v27, 16  ;;  %v22302_v27 = vld [vmem:[%s28865_s9 + $0x188] sm:$0xff]  }
 0xd76   : > { %v19843_v60 = vadd.f32 %v14209_v30, %v26889_v11  ;;  %v14211_v33 = vpop.f32.mrb[74].mxu1 }
 0xd77   : > { %v28239_v8 = vadd.f32 %v19842_v41, %v14300_v45  ;;  %v19844_v26 = vadd.f32 %v14211_v33, %v26891_v16  ;;  %v14213_v53 = vpop.f32.mrb[75].mxu1 }
 0xd78   : > { %v28242_v56 = vadd.f32 %v19843_v60, %v14304_v47  ;;  %v19845_v28 = vadd.f32 %v14213_v53, %v26893_v49 }
 0xd79   : > { %v14333_v39 = vmax.f32 %v28239_v8, 0.0  ;;  %v28246_v34 = vadd.f32 %v19844_v26, %v14300_v45  ;;  %v22335_v8 = vld [vmem:[%s28865_s9 + $0xd0] sm:$0xff]  }
 0xd7a   : > { %v14334_v37 = vmax.f32 %v28242_v56, 0.0  ;;  %v28249_v12 = vadd.f32 %v19845_v28, %v14304_v47  ;;  %v22324_v56 = vld [vmem:[%s28865_s9 + $0x20] sm:$0xff]  }
 0xd7b   : > { %v14337_v11 = vmax.f32 %v28246_v34, 0.0  ;;  %v14349_v16 = vsel %vm24797_vm5, %v14333_v39, 0.0  ;;  %v22337_v34 = vld [vmem:[%s28865_s9 + $0xd8] sm:$0xff]  }
 0xd7c   : > { %v14338_v58 = vmax.f32 %v28249_v12, 0.0  ;;  %v14217_v18 = vpop.f32.mrb[76].mxu1  ;;  %v14350_v32 = vsel %vm24797_vm5, %v14334_v37, 0.0  ;;  %v22326_v12 = vld [vmem:[%s28865_s9 + $0x28] sm:$0xff]  }
 0xd7d   : > { %v14353_v49 = vsel %vm24807_vm6, %v14337_v11, 0.0  ;;  %v19846_v44 = vadd.f32 %v14217_v18, %v26916_v46  ;;  %v14219_v13 = vpop.f32.mrb[77].mxu1 }
 0xd7e   : > { %v14365_v42 = vpack.c.bf16 %v14353_v49, %v14349_v16  ;;  %v14354_v5 = vsel %vm24807_vm6, %v14338_v58, 0.0  ;;  %v19847_v0 = vadd.f32 %v14219_v13, %v26921_v6  ;;  %v14221_v17 = vpop.f32.mrb[78].mxu1  ;;  %v14600_v49 = vrot.slane %v14598_v35, 1  ;;  %v22304_v35 = vld [vmem:[%s28865_s9 + $0x190] sm:$0xff]  }
 0xd7f   : > { %v14366_v21 = vpack.c.bf16 %v14354_v5, %v14350_v32  ;;  %v28271_v59 = vadd.f32 %v19846_v44, %v14300_v45  ;;  %v19848_v46 = vadd.f32 %v14221_v17, %v26923_v9  ;;  %v14223_v29 = vpop.f32.mrb[79].mxu1  ;;  %v14469_v44 = vld [vmem:[#allocation2 + $0x40] sm:$0x1] }
 0xd80   : > { %14389 = vst [vmem:[#allocation2] sm:$0xff] %v14365_v42  ;;  %v28274_v62 = vadd.f32 %v19847_v0, %v14304_v47  ;;  %v19849_v7 = vadd.f32 %v14223_v29, %v26925_v43  ;;  %v14541_v55 = vshll.u32 %v14365_v42, 16  ;;  %v14539_v26 = vshrl.u32 %v14365_v42, 16  ;;  %v22300_v32 = vld [vmem:[%s28865_s9 + $0x180] sm:$0xff]   ;;  %v22301_v42 = vld [vmem:[%s28865_s9 + $0x1c8] sm:$0xff]  }
 0xd81   : > { %14390 = vst [vmem:[#allocation2 + $0x8] sm:$0xff] %v14366_v21  ;;  %v14341_v19 = vmax.f32 %v28271_v59, 0.0  ;;  %v28278_v22 = vadd.f32 %v19848_v46, %v14300_v45  ;;  %v14553_v38 = vshll.u32 %v14366_v21, 16  ;;  %v14551_v30 = vshrl.u32 %v14366_v21, 16  ;;  %v22339_v59 = vld [vmem:[%s28865_s9 + $0xe0] sm:$0xff]  }
 0xd82   : > { %v14342_v10 = vmax.f32 %v28274_v62, 0.0  ;;  %v28281_v6 = vadd.f32 %v19849_v7, %v14304_v47  ;;  %v14543_v47 = vrot.slane %v14541_v55, 1  ;;  %v14590_v46 = vshll.u32 %v14469_v44, 16  ;;  %v22315_v44 = vld [vmem:[%s28865_s9 + $0x40] sm:$0xff]  }
 0xd83   : > { %v14345_v48 = vmax.f32 %v28278_v22, 0.0  ;;  %v14357_v43 = vsel %vm24817_vm7, %v14341_v19, 0.0  ;;  %v14555_v45 = vrot.slane %v14553_v38, 1  ;;  %v22341_v22 = vld [vmem:[%s28865_s9 + $0xe8] sm:$0xff]  }
 0xd84   : > { %v14346_v9 = vmax.f32 %v28281_v6, 0.0  ;;  %v14358_v20 = vsel %vm24817_vm7, %v14342_v10, 0.0  ;;  %v14544_v13 = vor.u32 %v14543_v47, %v14539_v26  ;;  %v22305_v47 = vld [vmem:[%s28865_s9 + $0x1d8] sm:$0xff]   ;;  %v22309_v26 = vld [vmem:[%s28865_s9 + $0x1e8] sm:$0xff]  }
 0xd85   : > { %v14361_v52 = vsel %vm24831_vm8, %v14345_v48, 0.0  ;;  %v14556_v18 = vor.u32 %v14555_v45, %v14551_v30  ;;  %v14592_v45 = vrot.slane %v14590_v46, 1  ;;  %v22306_v30 = vld [vmem:[%s28865_s9 + $0x198] sm:$0xff]   ;;  %v22342_v6 = vld [vmem:[%s28865_s9 + $0xa8] sm:$0xff]  }
 0xd86   : > { %v28297_v2 = vpack.c.bf16 %v14361_v52, %v14357_v43  ;;  %v14362_v4 = vsel %vm24831_vm8, %v14346_v9, 0.0  ;;  %v22303_v52 = vld [vmem:[%s28865_s9 + $0x1d0] sm:$0xff]  }
 0xd87   : > { %v28303_v57 = vpack.c.bf16 %v14362_v4, %v14358_v20 }
 0xd88   : > { %14393 = vst [vmem:[#allocation2 + $0x20] sm:$0xff] %v28297_v2  ;;  %v14546_v41 = vshll.u32 %v28297_v2, 16  ;;  %v14586_v33 = vshrl.u32 %v28297_v2, 16 }
 0xd89   : > { %14394 = vst [vmem:[#allocation2 + $0x28] sm:$0xff] %v28303_v57  ;;  %v14558_v60 = vshll.u32 %v28303_v57, 16  ;;  %v14594_v28 = vshrl.u32 %v28303_v57, 16 }
 0xd8a   : > { %v14548_v53 = vrot.slane %v14546_v41, 1  ;;  %v15690_v17 = vrot.slane %v14586_v33, 4  ;;  %v15691_v55 = vrot.slane %v14546_v41, 5 }
 0xd8b   : > { %v14560_v16 = vrot.slane %v14558_v60, 1  ;;  %v15702_v29 = vrot.slane %v14594_v28, 4  ;;  %v15703_v7 = vrot.slane %v14558_v60, 5  ;;  %v22307_v60 = vld [vmem:[%s28865_s9 + $0x1e0] sm:$0xff]  }
 0xd8c   : > { %v14549_v21 = vsel %vm3454_vm4, %v14544_v13, %v14548_v53  ;;  %v28328_v20 = vor.u32 %v15691_v55, %v15690_v17  ;;  %v14588_v4 = vor.u32 %v14586_v33, %v14548_v53  ;;  %v22308_v33 = vld [vmem:[%s28865_s9 + $0x1a0] sm:$0xff]   ;;  %v22310_v53 = vld [vmem:[%s28865_s9 + $0x1a8] sm:$0xff]  }
 0xd8d   : > { %v14561_v5 = vsel %vm3454_vm4, %v14556_v18, %v14560_v16  ;;  %v14596_v0 = vor.u32 %v14594_v28, %v14560_v16  ;;  %v28323_v43 = vor.u32 %v15703_v7, %v15702_v29  ;;  %v22311_v28 = vld [vmem:[%s28865_s9 + $0x1f0] sm:$0xff]   ;;  %v22313_v16 = vld [vmem:[%s28865_s9 + $0x1f8] sm:$0xff]   ;;  %v28907_v13 = vld [vmem:[#allocation4_spill] sm:$0xff] }
 0xd8e   : > { %14850 = vmatprep.mubr.bf16.mxu0 %v14561_v5  ;;  %v14593_v41 = vsel %vm3454_vm4, %v14588_v4, %v14592_v45  ;;  %v22312_v18 = vld [vmem:[%s28865_s9 + $0x1b0] sm:$0xff]   ;;  %v14311_v5 = vsub.s32 3, %v28907_v13 }
 0xd8f   : > { %14851 = vmatmul.mubr.bf16.vlgmr.msra.gmra.mrb[32].mxu0 %v14549_v21  ;;  %v14601_v38 = vsel %vm3454_vm4, %v14596_v0, %v14600_v49  ;;  %v22314_v49 = vld [vmem:[%s28865_s9 + $0x1b8] sm:$0xff]  }
 0xd90   : > { %14858 = vmatprep.mubr.bf16.mxu0 %v14601_v38  ;;  %19647 = vmatpush3.bf16.msra.mxu0 %v22300_v32  ;;  %v14307_v32 = vsub.s32 2, %v28907_v13 }
 0xd91   : > { %19648 = vmatprep.subr.bf16.mxu0 %v22301_v42  ;;  %v14312_v42 = vrot.slane %v28231_v3, %v14311_v5 }
 0xd92   : > { %v14308_v0 = vrot.slane %v28231_v3, %v14307_v32 }
 0xd94   : > { %19649 = vmatpush3.bf16.msra.mxu0 %v22302_v27 }
 0xd95   : > { %19650 = vmatprep.subr.bf16.mxu0 %v22303_v52 }
 0xd97   : > { %14859 = vmatmul.mubr.bf16.gmra.mrb[36].mxu0 %v14593_v41 }
 0xd98   : > { %19651 = vmatpush3.bf16.msra.mxu0 %v22304_v35 }
 0xd99   : > { %19652 = vmatprep.subr.bf16.mxu0 %v22305_v47 }
 0xd9c   : > { %19653 = vmatpush3.bf16.msra.mxu0 %v22306_v30 }
 0xd9d   : > { %19654 = vmatprep.subr.bf16.mxu0 %v22307_v60 }
 0xda0   : > { %19655 = vmatpush3.bf16.msra.mxu0 %v22308_v33 }
 0xda1   : > { %19656 = vmatprep.subr.bf16.mxu0 %v22309_v26 }
 0xda4   : > { %19657 = vmatpush3.bf16.msra.mxu0 %v22310_v53 }
 0xda5   : > { %19658 = vmatprep.subr.bf16.mxu0 %v22311_v28 }
 0xda8   : > { %19659 = vmatpush3.bf16.msra.mxu0 %v22312_v18 }
 0xda9   : > { %19660 = vmatprep.subr.bf16.mxu0 %v22313_v16 }
 0xdac   : > { %19661 = vmatpush3.bf16.msra.mxu0 %v22314_v49 }
 0xdad   : > { %19674 = vmatprep.subr.bf16.mxu0 %v22315_v44 }
 0xdb4   : > { %v14260_v17 = vpop.f32.mrb[80].mxu1 }
 0xdb5   : > { %v19850_v21 = vadd.f32 %v14260_v17, %v27018_v25  ;;  %v14262_v46 = vpop.f32.mrb[81].mxu1 }
 0xdb6   : > { %v19851_v29 = vadd.f32 %v14262_v46, %v27023_v24  ;;  %v14264_v7 = vpop.f32.mrb[82].mxu1 }
 0xdb7   : > { %v28373_v38 = vadd.f32 %v19850_v21, %v14308_v0  ;;  %v19852_v55 = vadd.f32 %v14264_v7, %v27025_v51  ;;  %v14266_v27 = vpop.f32.mrb[83].mxu1 }
 0xdb8   : > { %v28376_v52 = vadd.f32 %v19851_v29, %v14312_v42  ;;  %v19853_v4 = vadd.f32 %v14266_v27, %v27027_v36  ;;  %v14472_v29 = vld [vmem:[#allocation2 + $0x58] sm:$0x1] }
 0xdb9   : > { %v14335_v45 = vmax.f32 %v28373_v38, 0.0  ;;  %v28380_v35 = vadd.f32 %v19852_v55, %v14308_v0  ;;  %v28600_v38 = vld [vmem:[#allocation2 + $0x8] sm:$0xf0] }
 0xdba   : > { %v14336_v3 = vmax.f32 %v28376_v52, 0.0  ;;  %v28383_v25 = vadd.f32 %v19853_v4, %v14312_v42  ;;  %v22345_v52 = vld [vmem:[%s28865_s9 + $0xf8] sm:$0xff]  }
 0xdbb   : > { %v14339_v24 = vmax.f32 %v28380_v35, 0.0  ;;  %v14351_v51 = vsel %vm24797_vm5, %v14335_v45, 0.0  ;;  %v15295_v35 = vrot.slane %v28303_v57, 4 }
 0xdbc   : > { %v14340_v47 = vmax.f32 %v28383_v25, 0.0  ;;  %v14270_v41 = vpop.f32.mrb[84].mxu1  ;;  %v14352_v33 = vsel %vm24797_vm5, %v14336_v3, 0.0  ;;  %v22347_v25 = vld [vmem:[%s28865_s9 + $0x240] sm:$0xff]  }
 0xdbd   : > { %v14355_v36 = vsel %vm24807_vm6, %v14339_v24, 0.0  ;;  %v19854_v30 = vadd.f32 %v14270_v41, %v27038_v15  ;;  %v14272_v60 = vpop.f32.mrb[85].mxu1  ;;  %v14614_v41 = vshll.u32 %v14472_v29, 16  ;;  %v22317_v29 = vld [vmem:[%s28865_s9 + $0x48] sm:$0xff]  }
 0xdbe   : > { %v14367_v26 = vpack.c.bf16 %v14355_v36, %v14351_v51  ;;  %v14356_v53 = vsel %vm24807_vm6, %v14340_v47, 0.0  ;;  %v19855_v28 = vadd.f32 %v14272_v60, %v27043_v1  ;;  %v14274_v18 = vpop.f32.mrb[86].mxu1  ;;  %v22478_v62 = vpack.c.bf16 %v14340_v47, %v14336_v3  ;;  %v22346_v3 = vld [vmem:[%s28865_s9 + $0xb8] sm:$0xff]   ;;  %v22348_v47 = vld [vmem:[%s28865_s9 + $0x200] sm:$0xff]  }
 0xdbf   : > { %v14368_v16 = vpack.c.bf16 %v14356_v53, %v14352_v33  ;;  %v28405_v49 = vadd.f32 %v19854_v30, %v14308_v0  ;;  %v19856_v15 = vadd.f32 %v14274_v18, %v27045_v61  ;;  %v14276_v44 = vpop.f32.mrb[87].mxu1 }
 0xdc0   : > { %14391 = vst [vmem:[#allocation2 + $0x10] sm:$0xff] %v14367_v26  ;;  %v28408_v13 = vadd.f32 %v19855_v28, %v14312_v42  ;;  %v19857_v54 = vadd.f32 %v14276_v44, %v27047_v14  ;;  %v14565_v46 = vshll.u32 %v14367_v26, 16  ;;  %v14563_v33 = vshrl.u32 %v14367_v26, 16  ;;  %v14471_v44 = vld [vmem:[#allocation2 + $0x50] sm:$0x1] }
 0xdc1   : > { %14392 = vst [vmem:[#allocation2 + $0x18] sm:$0xff] %v14368_v16  ;;  %v14343_v32 = vmax.f32 %v28405_v49, 0.0  ;;  %v28412_v5 = vadd.f32 %v19856_v15, %v14308_v0  ;;  %v14577_v21 = vshll.u32 %v14368_v16, 16  ;;  %v14575_v23 = vshrl.u32 %v14368_v16, 16  ;;  %v22356_v49 = vld [vmem:[%s28865_s9 + $0x220] sm:$0xff]  }
 0xdc2   : > { %v14344_v50 = vmax.f32 %v28408_v13, 0.0  ;;  %v28415_v1 = vadd.f32 %v19857_v54, %v14312_v42  ;;  %v14567_v51 = vrot.slane %v14565_v46, 1  ;;  %v14616_v15 = vrot.slane %v14614_v41, 1  ;;  %v22353_v13 = vld [vmem:[%s28865_s9 + $0x258] sm:$0xff]  }
 0xdc3   : > { %v14347_v17 = vmax.f32 %v28412_v5, 0.0  ;;  %v14359_v14 = vsel %vm24817_vm7, %v14343_v32, 0.0  ;;  %v14579_v4 = vrot.slane %v14577_v21, 1  ;;  %v22316_v21 = vld [vmem:[%s28865_s9] sm:$0xff]   ;;  %v22359_v5 = vld [vmem:[%s28865_s9 + $0x270] sm:$0xff]  }
 0xdc4   : > { %v14348_v61 = vmax.f32 %v28415_v1, 0.0  ;;  %v14360_v42 = vsel %vm24817_vm7, %v14344_v50, 0.0  ;;  %v14568_v54 = vor.u32 %v14567_v51, %v14563_v33  ;;  %v22318_v51 = vld [vmem:[%s28865_s9 + $0x8] sm:$0xff]   ;;  %v22319_v33 = vld [vmem:[%s28865_s9 + $0x50] sm:$0xff]   ;;  %v22354_v1 = vld [vmem:[%s28865_s9 + $0x218] sm:$0xff]  }
 0xdc5   : > { %v14363_v0 = vsel %vm24831_vm8, %v14347_v17, 0.0  ;;  %v14580_v28 = vor.u32 %v14579_v4, %v14575_v23 }
 0xdc6   : > { %v28431_v7 = vpack.c.bf16 %v14363_v0, %v14359_v14  ;;  %v14364_v55 = vsel %vm24831_vm8, %v14348_v61, 0.0  ;;  %v14606_v0 = vshll.u32 %v14471_v44, 16  ;;  %v22323_v44 = vld [vmem:[%s28865_s9 + $0x60] sm:$0xff]  }
 0xdc7   : > { %v28437_v27 = vpack.c.bf16 %v14364_v55, %v14360_v42 }
 0xdc8   : > { %14395 = vst [vmem:[#allocation2 + $0x30] sm:$0xff] %v28431_v7  ;;  %v14570_v36 = vshll.u32 %v28431_v7, 16  ;;  %v14602_v60 = vshrl.u32 %v28431_v7, 16 }
 0xdc9   : > { %14396 = vst [vmem:[#allocation2 + $0x38] sm:$0xff] %v28437_v27  ;;  %v14582_v30 = vshll.u32 %v28437_v27, 16  ;;  %v14610_v40 = vshrl.u32 %v28437_v27, 16 }
 0xdca   : > { %v14572_v53 = vrot.slane %v14570_v36, 1  ;;  %v15714_v26 = vrot.slane %v14602_v60, 4  ;;  %v15715_v41 = vrot.slane %v14570_v36, 5  ;;  %v22320_v36 = vld [vmem:[%s28865_s9 + $0x10] sm:$0xff]  }
 0xdcb   : > { %v14584_v18 = vrot.slane %v14582_v30, 1  ;;  %v15726_v42 = vrot.slane %v14610_v40, 4  ;;  %v15727_v55 = vrot.slane %v14582_v30, 5 }
 0xdcc   : > { %v14573_v14 = vsel %vm3454_vm4, %v14568_v54, %v14572_v53  ;;  %v14604_v30 = vor.u32 %v14602_v60, %v14572_v53  ;;  %v22466_v60 = vpack.c.bf16 %v14338_v58, %v14334_v37  ;;  %v22322_v53 = vld [vmem:[%s28865_s9 + $0x18] sm:$0xff]   ;;  %v22325_v37 = vld [vmem:[%s28865_s9 + $0x68] sm:$0xff]   ;;  %v22327_v58 = vld [vmem:[%s28865_s9 + $0x70] sm:$0xff]  }
 0xdcd   : > { %v14585_v46 = vsel %vm3454_vm4, %v14580_v28, %v14584_v18  ;;  %v14612_v16 = vor.u32 %v14610_v40, %v14584_v18  ;;  %v28457_v23 = vor.u32 %v15727_v55, %v15726_v42  ;;  %v28462_v28 = vor.u32 %v15715_v41, %v15714_v26  ;;  %v22321_v18 = vld [vmem:[%s28865_s9 + $0x58] sm:$0xff]   ;;  %v22328_v54 = vld [vmem:[%s28865_s9 + $0x30] sm:$0xff]   ;;  %v22333_v26 = vld [vmem:[%s28865_s9 + $0xc8] sm:$0xff]  }
 0xdce   : > { %14899 = vmatprep.mubr.bf16.mxu0 %v14585_v46  ;;  %v14608_v40 = vrot.slane %v14606_v0, 1  ;;  %v22330_v46 = vld [vmem:[%s28865_s9 + $0x38] sm:$0xff]   ;;  %v22472_v0 = vpack.c.bf16 %v14346_v9, %v14342_v10  ;;  %v22334_v42 = vld [vmem:[%s28865_s9 + $0x88] sm:$0xff]   ;;  %v22344_v9 = vld [vmem:[%s28865_s9 + $0xb0] sm:$0xff]   ;;  %v22484_v41 = vpack.c.bf16 %v14348_v61, %v14344_v50  ;;  %v22487_v50 = vpack.c.bf16 %v14347_v17, %v14343_v32 }
 0xdcf   : > { %14900 = vmatmul.mubr.bf16.vlgmr.msra.gmra.mrb[40].mxu0 %v14573_v14  ;;  %v14617_v4 = vsel %vm3454_vm4, %v14612_v16, %v14616_v15  ;;  %v22331_v16 = vld [vmem:[%s28865_s9 + $0xc0] sm:$0xff]   ;;  %v22469_v14 = vpack.c.bf16 %v14337_v11, %v14333_v39  ;;  %v22336_v39 = vld [vmem:[%s28865_s9 + $0x90] sm:$0xff]   ;;  %v22475_v11 = vpack.c.bf16 %v14345_v48, %v14341_v19  ;;  %v22338_v10 = vld [vmem:[%s28865_s9 + $0x98] sm:$0xff]  }
 0xdd0   : > { %19675 = vmatpush3.bf16.msra.mxu0 %v22316_v21  ;;  %14907 = vmatprep.mubr.bf16.mxu0 %v14617_v4  ;;  %v14609_v15 = vsel %vm3454_vm4, %v14604_v30, %v14608_v40  ;;  %v22329_v21 = vld [vmem:[%s28865_s9 + $0x78] sm:$0xff]   ;;  %v22340_v19 = vld [vmem:[%s28865_s9 + $0xa0] sm:$0xff]   ;;  %v22343_v48 = vld [vmem:[%s28865_s9 + $0xf0] sm:$0xff]   ;;  %v22481_v4 = vpack.c.bf16 %v14339_v24, %v14335_v45  ;;  %v15294_v45 = vrot.slane %v28600_v38, 4 }
 0xdd1   : > { %19676 = vmatprep.subr.bf16.mxu0 %v22317_v29  ;;  %v22332_v29 = vld [vmem:[%s28865_s9 + $0x80] sm:$0xff]   ;;  %v22349_v55 = vld [vmem:[%s28865_s9 + $0x248] sm:$0xff]   ;;  %v22352_v24 = vld [vmem:[%s28865_s9 + $0x210] sm:$0xff]  }
 0xdd2   : > { %v15296_v57 = vsel %vm712_vm0, %v15294_v45, %v15295_v35  ;;  %v22355_v61 = vld [vmem:[%s28865_s9 + $0x260] sm:$0xff]   ;;  %v22358_v32 = vld [vmem:[%s28865_s9 + $0x228] sm:$0xff]   ;;  %v22360_v17 = vld [vmem:[%s28865_s9 + $0x230] sm:$0xff]  }
 0xdd3   : > { %v28644_v30 = vld [vmem:[#allocation2] sm:$0xf0]  ;;  %v22362_v40 = vld [vmem:[%s28865_s9 + $0x238] sm:$0xff]  }
 0xdd4   : > { %19677 = vmatpush3.bf16.msra.mxu0 %v22318_v51  ;;  %v22350_v51 = vld [vmem:[%s28865_s9 + $0x208] sm:$0xff]  }
 0xdd5   : > { %19678 = vmatprep.subr.bf16.mxu0 %v22319_v33  ;;  %v22361_v33 = vld [vmem:[%s28865_s9 + $0x278] sm:$0xff]  }
 0xdd7   : > { %14908 = vmatmul.mubr.bf16.gmra.mrb[44].mxu0 %v14609_v15  ;;  %v15291_v15 = vrot.slane %v28644_v30, 4 }
 0xdd8   : > { %19679 = vmatpush3.bf16.msra.mxu0 %v22320_v36  ;;  %22467 = vmatprep.mubr.msk.bf16.mxu0 %vm25161_vm9, %v22466_v60  ;;  %v15211_v36 = vld [vmem:[#allocation2 + $0x48] sm:$0xf]  ;;  %v15292_v60 = vrot.slane %v28297_v2, 4 }
 0xdd9   : > { %19680 = vmatprep.subr.bf16.mxu0 %v22321_v18  ;;  %v22363_v18 = vld [vmem:[%s28865_s9 + $0x2c0] sm:$0xff]   ;;  %v22366_v2 = vld [vmem:[%s28865_s9 + $0x288] sm:$0xff]  }
 0xddc   : > { %19681 = vmatpush3.bf16.msra.mxu0 %v22322_v53  ;;  %v15305_v53 = vrot.slane %v15211_v36, 4 }
 0xddd   : > { %19682 = vmatprep.subr.bf16.mxu0 %v22323_v44  ;;  %v22364_v44 = vld [vmem:[%s28865_s9 + $0x280] sm:$0xff]  }
 0xde0   : > { %19683 = vmatpush3.bf16.msra.mxu0 %v22324_v56  ;;  %v22365_v56 = vld [vmem:[%s28865_s9 + $0x2c8] sm:$0xff]  }
 0xde1   : > { %19684 = vmatprep.subr.bf16.mxu0 %v22325_v37  ;;  %v15293_v37 = vsel %vm712_vm0, %v15291_v15, %v15292_v60  ;;  %v15686_v15 = vshll.u32 %v28644_v30, 16 }
 0xde4   : > { %19685 = vmatpush3.bf16.msra.mxu0 %v22326_v12  ;;  %v15306_v12 = vsel %vm712_vm0, %v15295_v35, %v15305_v53  ;;  %v22383_v35 = vld [vmem:[%s28865_s9 + $0x350] sm:$0xff]  }
 0xde5   : > { %19686 = vmatprep.subr.bf16.mxu0 %v22327_v58  ;;  %v15210_v58 = vld [vmem:[#allocation2 + $0x40] sm:$0xf] }
 0xde8   : > { %19687 = vmatpush3.bf16.msra.mxu0 %v22328_v54  ;;  %v28665_v54 = vld [vmem:[#allocation2 + $0x18] sm:$0xf0] }
 0xde9   : > { %19688 = vmatprep.subr.bf16.mxu0 %v22329_v21  ;;  %v22367_v21 = vld [vmem:[%s28865_s9 + $0x2d0] sm:$0xff]  }
 0xdec   : > { %19689 = vmatpush3.bf16.msra.mxu0 %v22330_v46  ;;  %v15303_v46 = vrot.slane %v15210_v58, 4 }
 0xded   : > { %19702 = vmatprep.subr.bf16.mxu0 %v22331_v16  ;;  %v15300_v16 = vrot.slane %v28665_v54, 4 }
 0xdef   : > { %22470 = vmatmul.mubr.msk.bf16.vlgmr.msra.gmra.mrb[48].mxu0 %vm25161_vm9, %v22469_v14  ;;  %v22369_v14 = vld [vmem:[%s28865_s9 + $0x2d8] sm:$0xff]  }
 0xdf0   : > { %22473 = vmatprep.mubr.msk.bf16.mxu0 %vm25217_vm10, %v22472_v0  ;;  %19703 = vmatpush3.bf16.msra.mxu0 %v22332_v29  ;;  %v15301_v29 = vrot.slane %v28437_v27, 4  ;;  %v15304_v0 = vsel %vm712_vm0, %v15292_v60, %v15303_v46  ;;  %v22370_v27 = vld [vmem:[%s28865_s9 + $0x298] sm:$0xff]   ;;  %v15688_v46 = vrot.slane %v15686_v15, 5 }
 0xdf1   : > { %19704 = vmatprep.subr.bf16.mxu0 %v22333_v26  ;;  %v22368_v26 = vld [vmem:[%s28865_s9 + $0x290] sm:$0xff]  }
 0xdf4   : > { %19705 = vmatpush3.bf16.msra.mxu0 %v22334_v42  ;;  %v15302_v42 = vsel %vm712_vm0, %v15300_v16, %v15301_v29 }
 0xdf5   : > { %19706 = vmatprep.subr.bf16.mxu0 %v22335_v8  ;;  %v22371_v8 = vld [vmem:[%s28865_s9 + $0x2e0] sm:$0xff]  }
 0xdf7   : > { %22476 = vmatmul.mubr.msk.bf16.gmra.mrb[52].mxu0 %vm25217_vm10, %v22475_v11  ;;  %v22374_v11 = vld [vmem:[%s28865_s9 + $0x2a8] sm:$0xff]  }
 0xdf8   : > { %19707 = vmatpush3.bf16.msra.mxu0 %v22336_v39  ;;  %22479 = vmatprep.mubr.msk.bf16.mxu0 %vm25161_vm9, %v22478_v62  ;;  %v22372_v39 = vld [vmem:[%s28865_s9 + $0x2a0] sm:$0xff]   ;;  %v22375_v62 = vld [vmem:[%s28865_s9 + $0x2f0] sm:$0xff]  }
 0xdf9   : > { %19708 = vmatprep.subr.bf16.mxu0 %v22337_v34  ;;  %v22373_v34 = vld [vmem:[%s28865_s9 + $0x2e8] sm:$0xff]  }
 0xdfc   : > { %19709 = vmatpush3.bf16.msra.mxu0 %v22338_v10  ;;  %v22376_v10 = vld [vmem:[%s28865_s9 + $0x2b0] sm:$0xff]  }
 0xdfd   : > { %19710 = vmatprep.subr.bf16.mxu0 %v22339_v59  ;;  %v22377_v59 = vld [vmem:[%s28865_s9 + $0x2f8] sm:$0xff]  }
 0xe00   : > { %19711 = vmatpush3.bf16.msra.mxu0 %v22340_v19  ;;  %v28704_v19 = vld [vmem:[#allocation2 + $0x10] sm:$0xf0] }
 0xe01   : > { %19712 = vmatprep.subr.bf16.mxu0 %v22341_v22  ;;  %v22378_v22 = vld [vmem:[%s28865_s9 + $0x2b8] sm:$0xff]  }
 0xe04   : > { %19713 = vmatpush3.bf16.msra.mxu0 %v22342_v6  ;;  %v15213_v6 = vld [vmem:[#allocation2 + $0x58] sm:$0xf] }
 0xe05   : > { %19714 = vmatprep.subr.bf16.mxu0 %v22343_v48  ;;  %v22379_v48 = vld [vmem:[%s28865_s9 + $0x340] sm:$0xff]  }
 0xe08   : > { %19715 = vmatpush3.bf16.msra.mxu0 %v22344_v9  ;;  %v15297_v9 = vrot.slane %v28704_v19, 4 }
 0xe09   : > { %19716 = vmatprep.subr.bf16.mxu0 %v22345_v52  ;;  %v15298_v52 = vrot.slane %v28431_v7, 4 }
 0xe0c   : > { %19717 = vmatpush3.bf16.msra.mxu0 %v22346_v3  ;;  %v15309_v3 = vrot.slane %v15213_v6, 4  ;;  %v22396_v6 = vld [vmem:[%s28865_s9 + $0x380] sm:$0xff]  }
 0xe0d   : > { %19730 = vmatprep.subr.bf16.mxu0 %v22347_v25  ;;  %v15695_v25 = vshrl.u32 %v28600_v38, 16 }
 0xe0e   : > { %v15310_v7 = vsel %vm712_vm0, %v15301_v29, %v15309_v3 }
 0xe0f   : > { %22482 = vmatmul.mubr.msk.bf16.vlgmr.msra.gmra.mrb[56].mxu0 %vm25161_vm9, %v22481_v4  ;;  %v22381_v4 = vld [vmem:[%s28865_s9 + $0x348] sm:$0xff]  }
 0xe10   : > { %22485 = vmatprep.mubr.msk.bf16.mxu0 %vm25217_vm10, %v22484_v41  ;;  %19731 = vmatpush3.bf16.msra.mxu0 %v22348_v47  ;;  %v15698_v47 = vshll.u32 %v28600_v38, 16  ;;  %v15299_v41 = vsel %vm712_vm0, %v15297_v9, %v15298_v52  ;;  %v22382_v38 = vld [vmem:[%s28865_s9 + $0x308] sm:$0xff]  }
 0xe11   : > { %19732 = vmatprep.subr.bf16.mxu0 %v22349_v55  ;;  %v22380_v55 = vld [vmem:[%s28865_s9 + $0x300] sm:$0xff]   ;;  %v22397_v9 = vld [vmem:[%s28865_s9 + $0x3c8] sm:$0xff]  }
 0xe12   : > { %v15700_v45 = vrot.slane %v15698_v47, 5 }
 0xe14   : > { %19733 = vmatpush3.bf16.msra.mxu0 %v22350_v51  ;;  %v15212_v51 = vld [vmem:[#allocation2 + $0x50] sm:$0xf] }
 0xe15   : > { %19734 = vmatprep.subr.bf16.mxu0 %v22351_v63  ;;  %v15697_v63 = vrot.slane %v15695_v25, 4 }
 0xe17   : > { %22488 = vmatmul.mubr.msk.bf16.gmra.mrb[60].mxu0 %vm25217_vm10, %v22487_v50  ;;  %v22384_v50 = vld [vmem:[%s28865_s9 + $0x310] sm:$0xff]  }
 0xe18   : > { %19735 = vmatpush3.bf16.msra.mxu0 %v22352_v24  ;;  %15543 = vmatprep.mubr.bf16.mxu0 %v15296_v57  ;;  %v15307_v24 = vrot.slane %v15212_v51, 4  ;;  %v22385_v57 = vld [vmem:[%s28865_s9 + $0x358] sm:$0xff]  }
 0xe19   : > { %19736 = vmatprep.subr.bf16.mxu0 %v22353_v13  ;;  %v15701_v13 = vor.u32 %v15700_v45, %v15697_v63  ;;  %v22401_v45 = vld [vmem:[%s28865_s9 + $0x3d8] sm:$0xff]  }
 0xe1c   : > { %19737 = vmatpush3.bf16.msra.mxu0 %v22354_v1  ;;  %v15308_v1 = vsel %vm712_vm0, %v15298_v52, %v15307_v24  ;;  %v22402_v24 = vld [vmem:[%s28865_s9 + $0x398] sm:$0xff]  }
 0xe1d   : > { %19738 = vmatprep.subr.bf16.mxu0 %v22355_v61  ;;  %v15705_v61 = vsel %vm1775_vm2, %v15701_v13, %v28323_v43  ;;  %v22403_v13 = vld [vmem:[%s28865_s9 + $0x3e0] sm:$0xff]  }
 0xe20   : > { %19739 = vmatpush3.bf16.msra.mxu0 %v22356_v49  ;;  %v22386_v49 = vld [vmem:[%s28865_s9 + $0x318] sm:$0xff]  }
 0xe21   : > { %19740 = vmatprep.subr.bf16.mxu0 %v22357_v31  ;;  %v22387_v31 = vld [vmem:[%s28865_s9 + $0x360] sm:$0xff]  }
 0xe24   : > { %19741 = vmatpush3.bf16.msra.mxu0 %v22358_v32  ;;  %v22388_v32 = vld [vmem:[%s28865_s9 + $0x320] sm:$0xff]  }
 0xe25   : > { %19742 = vmatprep.subr.bf16.mxu0 %v22359_v5  ;;  %v22389_v5 = vld [vmem:[%s28865_s9 + $0x368] sm:$0xff]  }
 0xe28   : > { %19743 = vmatpush3.bf16.msra.mxu0 %v22360_v17  ;;  %v22390_v17 = vld [vmem:[%s28865_s9 + $0x328] sm:$0xff]  }
 0xe29   : > { %19744 = vmatprep.subr.bf16.mxu0 %v22361_v33  ;;  %v15614_v33 = vld [vmem:[#allocation2 + $0x48] sm:$0x1f] }
 0xe2a   : > { %v15740_v53 = vshrl.u32 %v15614_v33, 16 }
 0xe2c   : > { %19745 = vmatpush3.bf16.msra.mxu0 %v22362_v40  ;;  %v22391_v40 = vld [vmem:[%s28865_s9 + $0x370] sm:$0xff]   ;;  %v15742_v16 = vrot.slane %v15740_v53, 4 }
 0xe2d   : > { %19758 = vmatprep.subr.bf16.mxu0 %v22363_v18  ;;  %v15683_v18 = vshrl.u32 %v28644_v30, 16 }
 0xe2f   : > { %15544 = vmatmul.mubr.bf16.vlgmr.msra.gmra.mrb[64].mxu0 %v15293_v37  ;;  %v15685_v30 = vrot.slane %v15683_v18, 4 }
 0xe30   : > { %15551 = vmatprep.mubr.bf16.mxu0 %v15306_v12  ;;  %19759 = vmatpush3.bf16.msra.mxu0 %v22364_v44  ;;  %v15743_v44 = vshll.u32 %v15614_v33, 16  ;;  %v22392_v12 = vld [vmem:[%s28865_s9 + $0x330] sm:$0xff]   ;;  %v22409_v33 = vld [vmem:[%s28865_s9 + $0x3f8] sm:$0xff]  }
 0xe31   : > { %19760 = vmatprep.subr.bf16.mxu0 %v22365_v56 }
 0xe32   : > { %v15745_v29 = vrot.slane %v15743_v44, 5 }
 0xe34   : > { %19761 = vmatpush3.bf16.msra.mxu0 %v22366_v2  ;;  %v22393_v2 = vld [vmem:[%s28865_s9 + $0x378] sm:$0xff]  }
 0xe35   : > { %19762 = vmatprep.subr.bf16.mxu0 %v22367_v21 }
 0xe37   : > { %15552 = vmatmul.mubr.bf16.gmra.mrb[68].mxu0 %v15304_v0  ;;  %v22395_v0 = vld [vmem:[%s28865_s9 + $0x3c0] sm:$0xff]  }
 0xe38   : > { %19763 = vmatpush3.bf16.msra.mxu0 %v22368_v26  ;;  %15592 = vmatprep.mubr.bf16.mxu0 %v15302_v42  ;;  %v15613_v26 = vld [vmem:[#allocation2 + $0x40] sm:$0x1f] }
 0xe39   : > { %19764 = vmatprep.subr.bf16.mxu0 %v22369_v14  ;;  %v22394_v14 = vld [vmem:[%s28865_s9 + $0x338] sm:$0xff]  }
 0xe3c   : > { %19765 = vmatpush3.bf16.msra.mxu0 %v22370_v27  ;;  %v15689_v27 = vor.u32 %v15688_v46, %v15685_v30 }
 0xe3d   : > { %19766 = vmatprep.subr.bf16.mxu0 %v22371_v8  ;;  %v15731_v8 = vshrl.u32 %v15613_v26, 16 }
 0xe3e   : > { %v15693_v3 = vsel %vm1775_vm2, %v15689_v27, %v28328_v20 }
 0xe40   : > { %19767 = vmatpush3.bf16.msra.mxu0 %v22372_v39  ;;  %v15734_v39 = vshll.u32 %v15613_v26, 16 }
 0xe41   : > { %19768 = vmatprep.subr.bf16.mxu0 %v22373_v34 }
 0xe42   : > { %v15736_v25 = vrot.slane %v15734_v39, 5 }
 0xe44   : > { %19769 = vmatpush3.bf16.msra.mxu0 %v22374_v11  ;;  %v15746_v11 = vor.u32 %v15745_v29, %v15742_v16 }
 0xe45   : > { %19770 = vmatprep.subr.bf16.mxu0 %v22375_v62  ;;  %v15719_v62 = vshrl.u32 %v28665_v54, 16 }
 0xe46   : > { %v15747_v47 = vsel %vm1775_vm2, %v28323_v43, %v15746_v11  ;;  %v22400_v43 = vld [vmem:[%s28865_s9 + $0x390] sm:$0xff]  }
 0xe48   : > { %19771 = vmatpush3.bf16.msra.mxu0 %v22376_v10  ;;  %v15722_v10 = vshll.u32 %v28665_v54, 16  ;;  %v15733_v54 = vrot.slane %v15731_v8, 4 }
 0xe49   : > { %19772 = vmatprep.subr.bf16.mxu0 %v22377_v59 }
 0xe4a   : > { %v15737_v51 = vor.u32 %v15736_v25, %v15733_v54 }
 0xe4c   : > { %19773 = vmatpush3.bf16.msra.mxu0 %v22378_v22 }
 0xe4d   : > { %19786 = vmatprep.subr.bf16.mxu0 %v22379_v48 }
 0xe4f   : > { %15593 = vmatmul.mubr.bf16.vlgmr.msra.gmra.mrb[72].mxu0 %v15299_v41  ;;  %v22398_v41 = vld [vmem:[%s28865_s9 + $0x388] sm:$0xff]  }
 0xe50   : > { %15600 = vmatprep.mubr.bf16.mxu0 %v15310_v7  ;;  %19787 = vmatpush3.bf16.msra.mxu0 %v22380_v55  ;;  %v15721_v55 = vrot.slane %v15719_v62, 4  ;;  %v22399_v7 = vld [vmem:[%s28865_s9 + $0x3d0] sm:$0xff]  }
 0xe51   : > { %19788 = vmatprep.subr.bf16.mxu0 %v22381_v4  ;;  %v15724_v4 = vrot.slane %v15722_v10, 5 }
 0xe53   : > { %v15725_v63 = vor.u32 %v15724_v4, %v15721_v55 }
 0xe54   : > { %19789 = vmatpush3.bf16.msra.mxu0 %v22382_v38  ;;  %v15738_v38 = vsel %vm1775_vm2, %v28328_v20, %v15737_v51  ;;  %v22404_v20 = vld [vmem:[%s28865_s9 + $0x3a0] sm:$0xff]  }
 0xe55   : > { %19790 = vmatprep.subr.bf16.mxu0 %v22383_v35  ;;  %v15729_v35 = vsel %vm1775_vm2, %v15725_v63, %v28457_v23 }
 0xe57   : > { %15601 = vmatmul.mubr.bf16.gmra.mrb[76].mxu0 %v15308_v1  ;;  %v15616_v1 = vld [vmem:[#allocation2 + $0x58] sm:$0x1f] }
 0xe58   : > { %19791 = vmatpush3.bf16.msra.mxu0 %v22384_v50  ;;  %15998 = vmatprep.mubr.bf16.mxu0 %v15705_v61  ;;  %v22405_v50 = vld [vmem:[%s28865_s9 + $0x3e8] sm:$0xff]   ;;  %v22407_v61 = vld [vmem:[%s28865_s9 + $0x3f0] sm:$0xff]  }
 0xe59   : > { %19792 = vmatprep.subr.bf16.mxu0 %v22385_v57  ;;  %v22406_v57 = vld [vmem:[%s28865_s9 + $0x3a8] sm:$0xff]  }
 0xe5c   : > { %19793 = vmatpush3.bf16.msra.mxu0 %v22386_v49  ;;  %v15707_v49 = vshrl.u32 %v28704_v19, 16 }
 0xe5d   : > { %19794 = vmatprep.subr.bf16.mxu0 %v22387_v31  ;;  %v15710_v31 = vshll.u32 %v28704_v19, 16  ;;  %v22410_v19 = vld [vmem:[%s28865_s9 + $0x3b8] sm:$0xff]  }
 0xe60   : > { %19795 = vmatpush3.bf16.msra.mxu0 %v22388_v32  ;;  %v15758_v32 = vshrl.u32 %v15616_v1, 16 }
 0xe61   : > { %19796 = vmatprep.subr.bf16.mxu0 %v22389_v5  ;;  %v15761_v5 = vshll.u32 %v15616_v1, 16 }
 0xe62   : > { %v19634_v36 = vpop.f32.mrb[32].mxu0  ;;  %v15760_v18 = vrot.slane %v15758_v32, 4 }
 0xe63   : > { %v19635_v60 = vpop.f32.mrb[33].mxu0  ;;  %v15763_v15 = vrot.slane %v15761_v5, 5 }
 0xe64   : > { %v28759_v56 = vadd.f32 %v19635_v60, %v19634_v36  ;;  %19797 = vmatpush3.bf16.msra.mxu0 %v22390_v17  ;;  %v19637_v37 = vpop.f32.mrb[34].mxu0  ;;  %v22408_v17 = vld [vmem:[%s28865_s9 + $0x3b0] sm:$0xff]   ;;  %v15712_v36 = vrot.slane %v15710_v31, 5 }
 0xe65   : > { %v19638_v58 = vpop.f32.mrb[35].mxu0  ;;  %19798 = vmatprep.subr.bf16.mxu0 %v22391_v40  ;;  %v15709_v40 = vrot.slane %v15707_v49, 4  ;;  %v15615_v60 = vld [vmem:[#allocation2 + $0x50] sm:$0x1f] }
 0xe66   : > { %v28767_v21 = vadd.f32 %v19638_v58, %v19637_v37  ;;  %v15749_v44 = vshrl.u32 %v15615_v60, 16  ;;  %v15752_v37 = vshll.u32 %v15615_v60, 16 }
 0xe67   : > { %v15713_v53 = vor.u32 %v15712_v36, %v15709_v40 }
 0xe68   : > { %19799 = vmatpush3.bf16.msra.mxu0 %v22392_v12  ;;  %v15764_v12 = vor.u32 %v15763_v15, %v15760_v18  ;;  %v15754_v30 = vrot.slane %v15752_v37, 5 }
 0xe69   : > { %19800 = vmatprep.subr.bf16.mxu0 %v22393_v2  ;;  %v15717_v58 = vsel %vm1775_vm2, %v15713_v53, %v28462_v28  ;;  %v15751_v2 = vrot.slane %v15749_v44, 4 }
 0xe6a   : > { %v19640_v42 = vpop.f32.mrb[36].mxu0  ;;  %v15765_v46 = vsel %vm1775_vm2, %v28457_v23, %v15764_v12 }
 0xe6b   : > { %v19641_v34 = vpop.f32.mrb[37].mxu0  ;;  %v15755_v16 = vor.u32 %v15754_v30, %v15751_v2 }
 0xe6c   : > { %v28777_v59 = vadd.f32 %v19641_v34, %v19640_v42  ;;  %19801 = vmatpush3.bf16.msra.mxu0 %v22394_v14  ;;  %v19643_v22 = vpop.f32.mrb[38].mxu0 }
 0xe6d   : > { %v19644_v48 = vpop.f32.mrb[39].mxu0  ;;  %19814 = vmatprep.subr.bf16.mxu0 %v22395_v0  ;;  %v15756_v29 = vsel %vm1775_vm2, %v28462_v28, %v15755_v16 }
 0xe6e   : > { %v28785_v52 = vadd.f32 %v19644_v48, %v19643_v22 }
 0xe6f   : > { %15999 = vmatmul.mubr.bf16.vlgmr.msra.gmra.mrb[80].mxu0 %v15693_v3 }
 0xe70   : > { %16006 = vmatprep.mubr.bf16.mxu0 %v15747_v47  ;;  %19815 = vmatpush3.bf16.msra.mxu0 %v22396_v6 }
 0xe71   : > { %19816 = vmatprep.subr.bf16.mxu0 %v22397_v9 }
 0xe74   : > { %19817 = vmatpush3.bf16.msra.mxu0 %v22398_v41 }
 0xe75   : > { %19818 = vmatprep.subr.bf16.mxu0 %v22399_v7 }
 0xe77   : > { %16007 = vmatmul.mubr.bf16.gmra.mrb[84].mxu0 %v15738_v38 }
 0xe78   : > { %19819 = vmatpush3.bf16.msra.mxu0 %v22400_v43  ;;  %16047 = vmatprep.mubr.bf16.mxu0 %v15729_v35 }
 0xe79   : > { %19820 = vmatprep.subr.bf16.mxu0 %v22401_v45 }
 0xe7c   : > { %19821 = vmatpush3.bf16.msra.mxu0 %v22402_v24 }
 0xe7d   : > { %19822 = vmatprep.subr.bf16.mxu0 %v22403_v13 }
 0xe80   : > { %19823 = vmatpush3.bf16.msra.mxu0 %v22404_v20 }
 0xe81   : > { %19824 = vmatprep.subr.bf16.mxu0 %v22405_v50 }
 0xe84   : > { %19825 = vmatpush3.bf16.msra.mxu0 %v22406_v57 }
 0xe85   : > { %19826 = vmatprep.subr.bf16.mxu0 %v22407_v61 }
 0xe88   : > { %19827 = vmatpush3.bf16.msra.mxu0 %v22408_v17 }
 0xe89   : > { %19828 = vmatprep.subr.bf16.mxu0 %v22409_v33 }
 0xe8c   : > { %19829 = vmatpush3.bf16.msra.mxu0 %v22410_v19 }
 0xe8f   : > { %16048 = vmatmul.mubr.bf16.vlgmr.msra.gmra.mrb[88].mxu0 %v15717_v58 }
 0xe90   : > { %16055 = vmatprep.mubr.bf16.mxu0 %v15765_v46 }
 0xe97   : > { %16056 = vmatmul.mubr.bf16.gmra.mrb[92].mxu0 %v15756_v29 }
 0xea2   : > { %v19662_v26 = vpop.f32.mrb[40].mxu0 }
 0xea3   : > { %v19663_v14 = vpop.f32.mrb[41].mxu0 }
 0xea4   : > { %v19664_v0 = vadd.f32 %v19663_v14, %v19662_v26  ;;  %v19665_v42 = vpop.f32.mrb[42].mxu0 }
 0xea5   : > { %v19666_v27 = vpop.f32.mrb[43].mxu0 }
 0xea6   : > { %v14902_v8 = vadd.f32 %v19664_v0, %v28759_v56  ;;  %v19667_v39 = vadd.f32 %v19666_v27, %v19665_v42 }
 0xea8   : > { %v14905_v34 = vadd.f32 %v19667_v39, %v28767_v21 }
 0xeaa   : > { %v19668_v11 = vpop.f32.mrb[44].mxu0 }
 0xeab   : > { %v19669_v62 = vpop.f32.mrb[45].mxu0 }
 0xeac   : > { %v19670_v10 = vadd.f32 %v19669_v62, %v19668_v11  ;;  %v19671_v23 = vpop.f32.mrb[46].mxu0 }
 0xead   : > { %v19672_v22 = vpop.f32.mrb[47].mxu0 }
 0xeae   : > { %v14910_v6 = vadd.f32 %v19670_v10, %v28777_v59  ;;  %v19673_v48 = vadd.f32 %v19672_v22, %v19671_v23 }
 0xeb0   : > { %v14913_v28 = vadd.f32 %v19673_v48, %v28785_v52 }
 0xec2   : > { %v19690_v9 = vpop.f32.mrb[48].mxu0 }
 0xec3   : > { %v19691_v3 = vpop.f32.mrb[49].mxu0 }
 0xec4   : > { %v19692_v54 = vadd.f32 %v19691_v3, %v19690_v9  ;;  %v19693_v25 = vpop.f32.mrb[50].mxu0 }
 0xec5   : > { %v19694_v47 = vpop.f32.mrb[51].mxu0 }
 0xec6   : > { %v15143_v55 = vadd.f32 %v19692_v54, %v14902_v8  ;;  %v19695_v56 = vadd.f32 %v19694_v47, %v19693_v25 }
 0xec8   : > { %v15146_v4 = vadd.f32 %v19695_v56, %v14905_v34 }
 0xeca   : > { %v19696_v41 = vpop.f32.mrb[52].mxu0 }
 0xecb   : > { %v19697_v21 = vpop.f32.mrb[53].mxu0 }
 0xecc   : > { %v19698_v7 = vadd.f32 %v19697_v21, %v19696_v41  ;;  %v19699_v51 = vpop.f32.mrb[54].mxu0 }
 0xecd   : > { %v19700_v63 = vpop.f32.mrb[55].mxu0 }
 0xece   : > { %v15151_v43 = vadd.f32 %v19698_v7, %v14910_v6  ;;  %v19701_v45 = vadd.f32 %v19700_v63, %v19699_v51 }
 0xed0   : > { %v15154_v38 = vadd.f32 %v19701_v45, %v14913_v28 }
 0xee2   : > { %v19718_v59 = vpop.f32.mrb[56].mxu0 }
 0xee3   : > { %v19719_v35 = vpop.f32.mrb[57].mxu0 }
 0xee4   : > { %v19720_v24 = vadd.f32 %v19719_v35, %v19718_v59  ;;  %v19721_v52 = vpop.f32.mrb[58].mxu0 }
 0xee5   : > { %v19722_v13 = vpop.f32.mrb[59].mxu0 }
 0xee6   : > { %v15192_v20 = vadd.f32 %v19720_v24, %v15143_v55  ;;  %v19723_v50 = vadd.f32 %v19722_v13, %v19721_v52  ;;  %v19358_v52 = vld [vmem:[%s28866_s10] ss:$0 sm:$0xff] }
 0xee8   : > { %v15195_v57 = vadd.f32 %v19723_v50, %v15146_v4 }
 0xeea   : > { %v19724_v1 = vpop.f32.mrb[60].mxu0 }
 0xeeb   : > { %v19725_v61 = vpop.f32.mrb[61].mxu0 }
 0xeec   : > { %v19726_v49 = vadd.f32 %v19725_v61, %v19724_v1  ;;  %v19727_v31 = vpop.f32.mrb[62].mxu0 }
 0xeed   : > { %v19728_v32 = vpop.f32.mrb[63].mxu0 }
 0xeee   : > { %v15200_v5 = vadd.f32 %v19726_v49, %v15151_v43  ;;  %v19729_v17 = vadd.f32 %v19728_v32, %v19727_v31 }
 0xef0   : > { %v15203_v33 = vadd.f32 %v19729_v17, %v15154_v38 }
 0xf02   : > { %v19746_v40 = vpop.f32.mrb[64].mxu0 }
 0xf03   : > { %v19747_v36 = vpop.f32.mrb[65].mxu0 }
 0xf04   : > { %v19748_v18 = vadd.f32 %v19747_v36, %v19746_v40  ;;  %v19749_v15 = vpop.f32.mrb[66].mxu0 }
 0xf05   : > { %v19750_v60 = vpop.f32.mrb[67].mxu0 }
 0xf06   : > { %v19751_v19 = vadd.f32 %v19750_v60, %v19749_v15 }
 0xf0a   : > { %v19752_v53 = vpop.f32.mrb[68].mxu0 }
 0xf0b   : > { %v19753_v44 = vpop.f32.mrb[69].mxu0 }
 0xf0c   : > { %v19754_v37 = vadd.f32 %v19753_v44, %v19752_v53  ;;  %v19755_v12 = vpop.f32.mrb[70].mxu0 }
 0xf0d   : > { %v19756_v58 = vpop.f32.mrb[71].mxu0 }
 0xf0e   : > { %v19757_v2 = vadd.f32 %v19756_v58, %v19755_v12 }
 0xf22   : > { %v19774_v30 = vpop.f32.mrb[72].mxu0 }
 0xf23   : > { %v19775_v46 = vpop.f32.mrb[73].mxu0 }
 0xf24   : > { %v19776_v16 = vadd.f32 %v19775_v46, %v19774_v30  ;;  %v19777_v29 = vpop.f32.mrb[74].mxu0 }
 0xf25   : > { %v19778_v26 = vpop.f32.mrb[75].mxu0 }
 0xf26   : > { %v15595_v14 = vadd.f32 %v19776_v16, %v19748_v18  ;;  %v19779_v0 = vadd.f32 %v19778_v26, %v19777_v29 }
 0xf28   : > { %v15609_v42 = vadd.f32 %v15595_v14, %v15192_v20  ;;  %v15598_v27 = vadd.f32 %v19779_v0, %v19751_v19 }
 0xf2a   : > { %v15610_v8 = vadd.f32 %v15598_v27, %v15195_v57  ;;  %v19780_v39 = vpop.f32.mrb[76].mxu0 }
 0xf2b   : > { %v19781_v34 = vpop.f32.mrb[77].mxu0 }
 0xf2c   : > { %v19782_v11 = vadd.f32 %v19781_v34, %v19780_v39  ;;  %v19783_v62 = vpop.f32.mrb[78].mxu0 }
 0xf2d   : > { %v19784_v10 = vpop.f32.mrb[79].mxu0 }
 0xf2e   : > { %v15603_v23 = vadd.f32 %v19782_v11, %v19754_v37  ;;  %v19785_v22 = vadd.f32 %v19784_v10, %v19783_v62 }
 0xf30   : > { %v15611_v6 = vadd.f32 %v15603_v23, %v15200_v5  ;;  %v15606_v48 = vadd.f32 %v19785_v22, %v19757_v2 }
 0xf32   : > { %v15612_v28 = vadd.f32 %v15606_v48, %v15203_v33 }
 0xf42   : > { %v19802_v9 = vpop.f32.mrb[80].mxu0 }
 0xf43   : > { %v19803_v3 = vpop.f32.mrb[81].mxu0 }
 0xf44   : > { %v19804_v54 = vadd.f32 %v19803_v3, %v19802_v9  ;;  %v19805_v25 = vpop.f32.mrb[82].mxu0 }
 0xf45   : > { %v19806_v47 = vpop.f32.mrb[83].mxu0 }
 0xf46   : > { %v19807_v55 = vadd.f32 %v19806_v47, %v19805_v25 }
 0xf4a   : > { %v19808_v56 = vpop.f32.mrb[84].mxu0 }
 0xf4b   : > { %v19809_v4 = vpop.f32.mrb[85].mxu0 }
 0xf4c   : > { %v19810_v41 = vadd.f32 %v19809_v4, %v19808_v56  ;;  %v19811_v21 = vpop.f32.mrb[86].mxu0 }
 0xf4d   : > { %v19812_v7 = vpop.f32.mrb[87].mxu0 }
 0xf4e   : > { %v19813_v51 = vadd.f32 %v19812_v7, %v19811_v21 }
 0xf62   : > { %v19830_v63 = vpop.f32.mrb[88].mxu0 }
 0xf63   : > { %v19831_v43 = vpop.f32.mrb[89].mxu0 }
 0xf64   : > { %v19832_v45 = vadd.f32 %v19831_v43, %v19830_v63  ;;  %v19833_v38 = vpop.f32.mrb[90].mxu0 }
 0xf65   : > { %v19834_v59 = vpop.f32.mrb[91].mxu0 }
 0xf66   : > { %v16050_v35 = vadd.f32 %v19832_v45, %v19804_v54  ;;  %v19835_v24 = vadd.f32 %v19834_v59, %v19833_v38 }
 0xf68   : > { %v16064_v13 = vadd.f32 %v16050_v35, %v15609_v42  ;;  %v16053_v20 = vadd.f32 %v19835_v24, %v19807_v55 }
 0xf6a   : > { %v16075_v50 = vadd.f32 %v19358_v52, %v16064_v13  ;;  %v16065_v57 = vadd.f32 %v16053_v20, %v15610_v8  ;;  %v19836_v1 = vpop.f32.mrb[92].mxu0 }
 0xf6b   : > { %v19837_v61 = vpop.f32.mrb[93].mxu0 }
 0xf6c   : > { %v19359_v49 = vmul.f32 -1.442695, %v16075_v50  ;;  %v16076_v31 = vadd.f32 %v19358_v52, %v16065_v57  ;;  %v19838_v32 = vadd.f32 %v19837_v61, %v19836_v1  ;;  %v19839_v5 = vpop.f32.mrb[94].mxu0 }
 0xf6d   : > { %v19840_v17 = vpop.f32.mrb[95].mxu0 }
 0xf6e   : > { %22411 = vpow2.f32 %v19359_v49  ;;  %v19360_v33 = vmul.f32 -1.442695, %v16076_v31  ;;  %v16058_v40 = vadd.f32 %v19838_v32, %v19810_v41  ;;  %v19841_v36 = vadd.f32 %v19840_v17, %v19839_v5 }
 0xf70   : > { %22413 = vpow2.f32 %v19360_v33  ;;  %v16066_v18 = vadd.f32 %v16058_v40, %v15611_v6  ;;  %v16061_v15 = vadd.f32 %v19841_v36, %v19813_v51 }
 0xf72   : > { %v16077_v60 = vadd.f32 %v19358_v52, %v16066_v18  ;;  %v16067_v19 = vadd.f32 %v16061_v15, %v15612_v28 }
 0xf74   : > { %v19361_v53 = vmul.f32 -1.442695, %v16077_v60  ;;  %v16078_v44 = vadd.f32 %v19358_v52, %v16067_v19 }
 0xf76   : > { %22415 = vpow2.f32 %v19361_v53  ;;  %v19362_v37 = vmul.f32 -1.442695, %v16078_v44 }
 0xf78   : > { %v22412_v12 = vpop.eup %22411  ;;  %22417 = vpow2.f32 %v19362_v37 }
 0xf79   : > { %v16091_v58 = vadd.f32 1.0, %v22412_v12 }
 0xf7a   : > { %v22414_v2 = vpop.eup %22413 }
 0xf7b   : > { %22419 = vrcp.f32 %v16091_v58  ;;  %v16092_v30 = vadd.f32 1.0, %v22414_v2 }
 0xf7d   : > { %22421 = vrcp.f32 %v16092_v30 }
 0xf80   : > { %v22416_v46 = vpop.eup %22415 }
 0xf81   : > { %v16093_v16 = vadd.f32 1.0, %v22416_v46 }
 0xf82   : > { %v22418_v29 = vpop.eup %22417 }
 0xf83   : > { %22423 = vrcp.f32 %v16093_v16  ;;  %v16094_v26 = vadd.f32 1.0, %v22418_v29 }
 0xf85   : > { %v22420_v14 = vpop.eup %22419  ;;  %22425 = vrcp.f32 %v16094_v26 }
 0xf86   : > { %16103 = vst [vmem:[%s391_s26] sm:$0xf] %v22420_v14 }
 0xf87   : > { %v22422_v0 = vpop.eup %22421 }
 0xf88   : > { %16104 = vst [vmem:[%s391_s26 + $0x4] sm:$0xf] %v22422_v0 }
 0xf8d   : > { %v22424_v42 = vpop.eup %22423 }
 0xf8e   : > { %16105 = vst [vmem:[%s391_s26 + $0x8] sm:$0xf] %v22424_v42 }
 0xf8f   : > { %v22426_v27 = vpop.eup %22425 }
 0xf90   : > { %16106 = vst [vmem:[%s391_s26 + $0xc] sm:$0xf] %v22426_v27 }
 0xf91 PF: > { %s21_s17 = sadd.s32 1, %s22495_s17  }
 0xf92   : > { %p18_p4 = scmp.ge.s32.totalorder %s21_s17, 4  }
 0xf94   :  { %20 = sbr.rel (!%p18_p4) target bundleno = 1 (0x1), region = 129 }

</bundles_post_ra>
